<compile_context>
chip_gen: v5e
topology: v5e:2x2
jax: 0.10.0
libtpu: 0.0.40
codegen_flags: <defaults>
</compile_context>

<pallas_src>
import functools

import jax
import jax.numpy as jnp
from jax.experimental import pallas as pl
from jax.experimental.pallas import tpu as pltpu


# ----------------------------- fused conv kernel ----------------------------

def _fused_conv_kernel(*refs, has_gn, has_res, apply_relu, eps):
    """One grid step == one batch sample.

    refs (in order):
      patches (1, K, HW) bf16, weights (Cout, K) bf16, bias (Cout, 1) f32,
      [A (Cout, Cout) f32, gamma (Cout, 1) f32, beta (Cout, 1) f32,]
      [residual (1, Cout, HW) f32,]  out (1, Cout, HW) f32.
    """
    x_ref, w_ref, b_ref = refs[0], refs[1], refs[2]
    idx = 3
    if has_gn:
        a_ref, g_ref, be_ref = refs[idx], refs[idx + 1], refs[idx + 2]
        idx += 3
    if has_res:
        res_ref = refs[idx]
        idx += 1
    o_ref = refs[idx]

    # MXU: bf16 operands, f32 accumulation.  y is (Cout, HW): channels on
    # sublanes, spatial on lanes -> stored directly into the (N, C, H*W) slab.
    y = jnp.dot(w_ref[...], x_ref[0], preferred_element_type=jnp.float32)
    y = y + b_ref[...]                                       # bias broadcast over lanes

    if has_gn:
        # GroupNorm over (C//G, H*W) per sample.  First reduce over lanes
        # (XLU), then mix channels of a group with the tiny matrix A where
        # A[c, c'] = 1/(cg*HW) when c, c' share a group, else 0.  No sublane
        # reshape, and only O(C*HW + C^2) work.
        s1 = jnp.sum(y, axis=1, keepdims=True)               # (Cout, 1)
        s2 = jnp.sum(y * y, axis=1, keepdims=True)           # (Cout, 1)
        stats = jnp.concatenate([s1, s2], axis=1)            # (Cout, 2)
        gstats = jnp.dot(a_ref[...], stats, preferred_element_type=jnp.float32)
        mean = gstats[:, 0:1]                                 # per-channel group mean
        var = jnp.maximum(gstats[:, 1:2] - mean * mean, 0.0)  # biased var, clamp >= 0
        y = (y - mean) * jax.lax.rsqrt(var + eps)
        y = y * g_ref[...] + be_ref[...]

    if apply_relu:
        y = jnp.maximum(y, 0.0)
    if has_res:                                              # relu(skip + y)
        y = jnp.maximum(y + res_ref[0], 0.0)

    o_ref[0] = y.astype(o_ref.dtype)


# ------------------------------- conv wrapper --------------------------------

def _im2col(x, kh, kw, stride, padding):
    """(N,Cin,H,W) -> (N, Cin*Kh*Kw, Ho*Wo) bf16 patches in consumer layout."""
    n, cin, h, w = x.shape
    ho = (h + 2 * padding - kh) // stride + 1
    wo = (w + 2 * padding - kw) // stride + 1
    x = x.astype(jnp.bfloat16)
    if kh == 1 and kw == 1 and stride == 1 and padding == 0:
        return x.reshape(n, cin, h * w), ho, wo
    xp = jnp.pad(x, ((0, 0), (0, 0), (padding, padding), (padding, padding)))
    slabs = [xp[:, :, i:i + stride * ho:stride, j:j + stride * wo:stride]
             for i in range(kh) for j in range(kw)]
    # (N, Cin, Kh*Kw, Ho, Wo) -> (N, Cin*Kh*Kw, Ho*Wo): contiguous merges only,
    # no transpose of the spatial (lane) axes.
    patches = jnp.stack(slabs, axis=2).reshape(n, cin * kh * kw, ho * wo)
    # TODO(synk): at full CCMR resolution, replace host-side im2col (Kh*Kw x
    # HBM traffic) with an in-kernel loop over the taps on a resident tile.
    return patches, ho, wo


def _group_avg_matrix(cout, num_groups, hw):
    cg = cout // num_groups
    ch = jnp.arange(cout)
    same = (ch[:, None] // cg) == (ch[None, :] // cg)
    return same.astype(jnp.float32) / float(cg * hw)


def fused_conv(x, w, b, *, stride=1, padding=0, gn=None, num_groups=None,
               apply_relu=False, residual=None, eps=1e-5):
    """Fused Conv2d(+bias)(+GroupNorm)(+ReLU)(+residual add+ReLU) on NCHW."""
    n, cin, _, _ = x.shape
    cout, _, kh, kw = w.shape
    patches, ho, wo = _im2col(x, kh, kw, stride, padding)
    hw = ho * wo
    k = cin * kh * kw

    has_gn = gn is not None
    has_res = residual is not None

    args = [patches,
            w.reshape(cout, k).astype(jnp.bfloat16),
            b.reshape(cout, 1).astype(jnp.float32)]
    in_specs = [
        pl.BlockSpec((1, k, hw), lambda i: (i, 0, 0)),        # per-sample patches
        pl.BlockSpec((cout, k), lambda i: (0, 0)),            # resident weights
        pl.BlockSpec((cout, 1), lambda i: (0, 0)),            # resident bias
    ]
    if has_gn:
        args += [_group_avg_matrix(cout, num_groups, hw),
                 gn["gamma"].reshape(cout, 1).astype(jnp.float32),
                 gn["beta"].reshape(cout, 1).astype(jnp.float32)]
        in_specs += [pl.BlockSpec((cout, cout), lambda i: (0, 0)),
                     pl.BlockSpec((cout, 1), lambda i: (0, 0)),
                     pl.BlockSpec((cout, 1), lambda i: (0, 0))]
    if has_res:
        args.append(residual.reshape(n, cout, hw).astype(jnp.float32))
        in_specs.append(pl.BlockSpec((1, cout, hw), lambda i: (i, 0, 0)))

    kernel = functools.partial(_fused_conv_kernel, has_gn=has_gn,
                               has_res=has_res, apply_relu=apply_relu, eps=eps)
    out = pl.pallas_call(
        kernel,
        out_shape=jax.ShapeDtypeStruct((n, cout, hw), jnp.float32),
        grid=(n,),
        in_specs=in_specs,
        out_specs=pl.BlockSpec((1, cout, hw), lambda i: (i, 0, 0)),
        compiler_params=pltpu.CompilerParams(
            dimension_semantics=("parallel",)),   # batch steps shard across TCs
    )(*args)
    # TODO(synk): for full-resolution inputs on v7x, tile the H*W axis and use
    # a two-pass GroupNorm; this per-sample slab assumes it fits VMEM.
    return out.reshape(n, cout, ho, wo)


# -------------------------------- parameters ---------------------------------

def _conv_params(key, cout, cin, kh, kw):
    fan_out = cout * kh * kw                  # kaiming_normal_, mode='fan_out', relu
    std = (2.0 / fan_out) ** 0.5
    w = jax.random.normal(key, (cout, cin, kh, kw), jnp.float32) * std
    return {"w": w, "b": jnp.zeros((cout,), jnp.float32)}


def _gn_params(c):
    return {"gamma": jnp.ones((c,), jnp.float32), "beta": jnp.zeros((c,), jnp.float32)}


def _res_block_params(key, in_planes, planes, stride):
    k1, k2, k3 = jax.random.split(key, 3)
    p = {
        "conv1": _conv_params(k1, planes, in_planes, 3, 3),
        "conv2": _conv_params(k2, planes, planes, 3, 3),
        "gn1": _gn_params(planes),
        "gn2": _gn_params(planes),
        "stride": stride,
        "planes": planes,
    }
    if stride != 1:
        p["down_conv"] = _conv_params(k3, planes, in_planes, 1, 1)
        p["gn3"] = _gn_params(planes)
    return p


def _layer_params(key, in_dim, dim, stride):
    k1, k2 = jax.random.split(key)
    return [_res_block_params(k1, in_dim, dim, stride),
            _res_block_params(k2, dim, dim, 1)]


def make_params(key, output_dim=32, channels=(16, 16, 16, 16, 16)):
    ks = jax.random.split(key, 10)
    return {
        "conv1": _conv_params(ks[0], channels[0], 3, 7, 7),
        "norm1": _gn_params(channels[0]),
        "layer1": _layer_params(ks[1], channels[0], channels[1], 1),
        "layer2": _layer_params(ks[2], channels[1], channels[2], 2),
        "layer3": _layer_params(ks[3], channels[2], channels[3], 2),
        "layer4": _layer_params(ks[4], channels[3], channels[4], 2),
        "conv2": _conv_params(ks[5], output_dim, channels[4], 1, 1),
        "up_layer2": _layer_params(ks[6], output_dim + channels[3], channels[3], 1),
        "after_up2": _conv_params(ks[7], output_dim, channels[3], 1, 1),
        "up_layer1": _layer_params(ks[8], output_dim + channels[2], channels[2], 1),
        "after_up1": _conv_params(ks[9], output_dim, channels[2], 1, 1),
    }


# --------------------------------- forward -----------------------------------

def _res_block_forward(p, x):
    g = p["planes"] // 8
    y = fused_conv(x, p["conv1"]["w"], p["conv1"]["b"], stride=p["stride"], padding=1,
                   gn=p["gn1"], num_groups=g, apply_relu=True)
    if p["stride"] != 1:
        skip = fused_conv(x, p["down_conv"]["w"], p["down_conv"]["b"],
                          stride=p["stride"], padding=0,
                          gn=p["gn3"], num_groups=g, apply_relu=False)
    else:
        skip = x
    if skip.shape[1] != p["planes"]:
        # Channel mismatch (stride==1, in_planes != planes): the PyTorch forward
        # returns y = relu(gn2(conv2(y))) without the residual add.
        return fused_conv(y, p["conv2"]["w"], p["conv2"]["b"], stride=1, padding=1,
                          gn=p["gn2"], num_groups=g, apply_relu=True)
    return fused_conv(y, p["conv2"]["w"], p["conv2"]["b"], stride=1, padding=1,
                      gn=p["gn2"], num_groups=g, apply_relu=True, residual=skip)


def _layer_forward(layer, x):
    for blk in layer:
        x = _res_block_forward(blk, x)
    return x


def context_encoder_ccmr(params, x):
    x = fused_conv(x, params["conv1"]["w"], params["conv1"]["b"], stride=2, padding=3,
                   gn=params["norm1"], num_groups=8, apply_relu=True)
    x = _layer_forward(params["layer1"], x)                     # enc_out1 (unused downstream)
    enc_out2 = x = _layer_forward(params["layer2"], x)
    enc_out3 = x = _layer_forward(params["layer3"], x)
    x = _layer_forward(params["layer4"], x)
    enc_out4 = x = fused_conv(x, params["conv2"]["w"], params["conv2"]["b"])
    # TODO(synk): TF.resize (bilinear, half-pixel / align_corners=False) kept as JAX glue.
    x = jax.image.resize(x, x.shape[:2] + enc_out3.shape[-2:], method="bilinear")
    x = jnp.concatenate((x, enc_out3), axis=1)
    x = _layer_forward(params["up_layer2"], x)
    up2_out = x = fused_conv(x, params["after_up2"]["w"], params["after_up2"]["b"])
    x = jax.image.resize(x, x.shape[:2] + enc_out2.shape[-2:], method="bilinear")
    x = jnp.concatenate((x, enc_out2), axis=1)
    x = _layer_forward(params["up_layer1"], x)
    up1_out = x = fused_conv(x, params["after_up1"]["w"], params["after_up1"]["b"])
    return [enc_out4, up2_out, up1_out]


# ----------------------------------- main ------------------------------------

if __name__ == "__main__":
    key = jax.random.PRNGKey(0)
    pkey, xkey = jax.random.split(key)
    # Small config consistent with the module: channels divisible by 8 (GroupNorm),
    # spatial divisible by 16 (four stride-2 stages).
    params = make_params(pkey, output_dim=32, channels=(16, 16, 16, 16, 16))
    x = jax.random.normal(xkey, (2, 3, 32, 32), jnp.float32)

    forward = jax.jit(lambda inp: context_encoder_ccmr(params, inp))
    enc_out4, up2_out, up1_out = jax.block_until_ready(forward(x))

    assert enc_out4.shape == (2, 32, 2, 2)
    assert up2_out.shape == (2, 32, 4, 4)
    assert up1_out.shape == (2, 32, 8, 8)
    assert all(bool(jnp.isfinite(o).all()) for o in (enc_out4, up2_out, up1_out))
    print("KERNEL_OK")
</pallas_src>

<mosaic_0001>
module attributes {stable_mosaic.version = 11 : i64} {
  func.func @_fused_conv_kernel(%arg0: i32, %arg1: memref<1x147x256xbf16, #tpu.memory_space<vmem>>, %arg2: memref<16x147xbf16, #tpu.memory_space<vmem>>, %arg3: memref<16x1xf32, #tpu.memory_space<vmem>>, %arg4: memref<16x16xf32, #tpu.memory_space<vmem>>, %arg5: memref<16x1xf32, #tpu.memory_space<vmem>>, %arg6: memref<16x1xf32, #tpu.memory_space<vmem>>, %arg7: memref<1x16x256xf32, #tpu.memory_space<vmem>>) attributes {dimension_semantics = [#tpu.dimension_semantics<parallel>], iteration_bounds = array<i64: 2>, scalar_prefetch = 0 : i64, scratch_operands = 0 : i64, tpu.core_type = #tpu.core_type<tc>, window_params = [{transform_indices = @transform_0, window_bounds = array<i64: 1, 147, 256>}, {pipeline_mode = #tpu.pipeline_mode<synchronous>, transform_indices = @transform_1, window_bounds = array<i64: 16, 147>}, {pipeline_mode = #tpu.pipeline_mode<synchronous>, transform_indices = @transform_2, window_bounds = array<i64: 16, 1>}, {pipeline_mode = #tpu.pipeline_mode<synchronous>, transform_indices = @transform_3, window_bounds = array<i64: 16, 16>}, {pipeline_mode = #tpu.pipeline_mode<synchronous>, transform_indices = @transform_4, window_bounds = array<i64: 16, 1>}, {pipeline_mode = #tpu.pipeline_mode<synchronous>, transform_indices = @transform_5, window_bounds = array<i64: 16, 1>}, {transform_indices = @transform_6, window_bounds = array<i64: 1, 16, 256>}]} {
    %c0 = arith.constant 0 : index
    %c0_0 = arith.constant 0 : index
    %0 = vector.load %arg2[%c0, %c0_0] : memref<16x147xbf16, #tpu.memory_space<vmem>>, vector<16x147xbf16>
    %c0_1 = arith.constant 0 : index
    %c0_2 = arith.constant 0 : index
    %c0_3 = arith.constant 0 : index
    %1 = vector.load %arg1[%c0_1, %c0_2, %c0_3] : memref<1x147x256xbf16, #tpu.memory_space<vmem>>, vector<1x147x256xbf16>
    %2 = vector.shape_cast %1 : vector<1x147x256xbf16> to vector<147x256xbf16>
    %cst = arith.constant dense<0.000000e+00> : vector<16x256xf32>
    %3 = tpu.matmul %0, %2, %cst {dimension_numbers = #tpu.dot_dimension_numbers<[1], [0], [0], [1], [0, 0, 1, 1], [], []>} : vector<16x147xbf16>, vector<147x256xbf16>, vector<16x256xf32> -> vector<16x256xf32>
    %c0_4 = arith.constant 0 : index
    %c0_5 = arith.constant 0 : index
    %4 = vector.load %arg3[%c0_4, %c0_5] : memref<16x1xf32, #tpu.memory_space<vmem>>, vector<16x1xf32>
    %5 = vector.broadcast %4 : vector<16x1xf32> to vector<16x256xf32>
    %6 = arith.addf %3, %5 : vector<16x256xf32>
    %cst_6 = arith.constant dense<0.000000e+00> : vector<16xf32>
    %7 = vector.multi_reduction <add>, %6, %cst_6 [1] : vector<16x256xf32> to vector<16xf32>
    %8 = vector.shape_cast %7 : vector<16xf32> to vector<16x1xf32>
    %9 = arith.mulf %6, %6 : vector<16x256xf32>
    %cst_7 = arith.constant dense<0.000000e+00> : vector<16xf32>
    %10 = vector.multi_reduction <add>, %9, %cst_7 [1] : vector<16x256xf32> to vector<16xf32>
    %11 = vector.shape_cast %10 : vector<16xf32> to vector<16x1xf32>
    %12 = tpu.concatenate %8, %11 in 1 : vector<16x1xf32>, vector<16x1xf32> -> vector<16x2xf32>
    %c0_8 = arith.constant 0 : index
    %c0_9 = arith.constant 0 : index
    %13 = vector.load %arg4[%c0_8, %c0_9] : memref<16x16xf32, #tpu.memory_space<vmem>>, vector<16x16xf32>
    %cst_10 = arith.constant dense<0.000000e+00> : vector<16x2xf32>
    %14 = tpu.matmul %13, %12, %cst_10 {dimension_numbers = #tpu.dot_dimension_numbers<[1], [0], [0], [1], [0, 0, 1, 1], [], []>} : vector<16x16xf32>, vector<16x2xf32>, vector<16x2xf32> -> vector<16x2xf32>
    %15 = vector.extract_strided_slice %14 {offsets = [0, 0], sizes = [16, 1], strides = [1, 1]} : vector<16x2xf32> to vector<16x1xf32>
    %16 = vector.extract_strided_slice %14 {offsets = [0, 1], sizes = [16, 1], strides = [1, 1]} : vector<16x2xf32> to vector<16x1xf32>
    %17 = arith.mulf %15, %15 : vector<16x1xf32>
    %18 = arith.subf %16, %17 : vector<16x1xf32>
    %cst_11 = arith.constant 0.000000e+00 : f32
    %19 = vector.broadcast %cst_11 : f32 to vector<16x1xf32>
    %20 = arith.maximumf %18, %19 : vector<16x1xf32>
    %21 = vector.broadcast %15 : vector<16x1xf32> to vector<16x256xf32>
    %22 = arith.subf %6, %21 : vector<16x256xf32>
    %cst_12 = arith.constant 9.99999974E-6 : f32
    %23 = vector.broadcast %cst_12 : f32 to vector<16x1xf32>
    %24 = arith.addf %20, %23 : vector<16x1xf32>
    %25 = math.rsqrt %24 : vector<16x1xf32>
    %26 = vector.broadcast %25 : vector<16x1xf32> to vector<16x256xf32>
    %27 = arith.mulf %22, %26 : vector<16x256xf32>
    %c0_13 = arith.constant 0 : index
    %c0_14 = arith.constant 0 : index
    %28 = vector.load %arg5[%c0_13, %c0_14] : memref<16x1xf32, #tpu.memory_space<vmem>>, vector<16x1xf32>
    %29 = vector.broadcast %28 : vector<16x1xf32> to vector<16x256xf32>
    %30 = arith.mulf %27, %29 : vector<16x256xf32>
    %c0_15 = arith.constant 0 : index
    %c0_16 = arith.constant 0 : index
    %31 = vector.load %arg6[%c0_15, %c0_16] : memref<16x1xf32, #tpu.memory_space<vmem>>, vector<16x1xf32>
    %32 = vector.broadcast %31 : vector<16x1xf32> to vector<16x256xf32>
    %33 = arith.addf %30, %32 : vector<16x256xf32>
    %cst_17 = arith.constant 0.000000e+00 : f32
    %34 = vector.broadcast %cst_17 : f32 to vector<16x256xf32>
    %35 = arith.maximumf %33, %34 : vector<16x256xf32>
    %c0_18 = arith.constant 0 : index
    %c0_19 = arith.constant 0 : index
    %c0_20 = arith.constant 0 : index
    %36 = vector.load %arg7[%c0_18, %c0_19, %c0_20] : memref<1x16x256xf32, #tpu.memory_space<vmem>>, vector<1x16x256xf32>
    %37 = vector.shape_cast %36 : vector<1x16x256xf32> to vector<16x256xf32>
    %38 = vector.shape_cast %35 : vector<16x256xf32> to vector<1x16x256xf32>
    tpu.vector_store %arg7[%c0_18, %c0_19, %c0_20], %38 {strides = array<i32>} : memref<1x16x256xf32, #tpu.memory_space<vmem>>, vector<1x16x256xf32>,
    return
  }
  func.func @transform_0(%arg0: i32) -> (i32, i32, i32) {
    %c0_i32 = arith.constant 0 : i32
    %c0_i32_0 = arith.constant 0 : i32
    %c0_i32_1 = arith.constant 0 : i32
    return %arg0, %c0_i32, %c0_i32_0 : i32, i32, i32
  }
  func.func @transform_1(%arg0: i32) -> (i32, i32) {
    %c0_i32 = arith.constant 0 : i32
    %c0_i32_0 = arith.constant 0 : i32
    %c0_i32_1 = arith.constant 0 : i32
    return %c0_i32, %c0_i32_0 : i32, i32
  }
  func.func @transform_2(%arg0: i32) -> (i32, i32) {
    %c0_i32 = arith.constant 0 : i32
    %c0_i32_0 = arith.constant 0 : i32
    %c0_i32_1 = arith.constant 0 : i32
    return %c0_i32, %c0_i32_0 : i32, i32
  }
  func.func @transform_3(%arg0: i32) -> (i32, i32) {
    %c0_i32 = arith.constant 0 : i32
    %c0_i32_0 = arith.constant 0 : i32
    %c0_i32_1 = arith.constant 0 : i32
    return %c0_i32, %c0_i32_0 : i32, i32
  }
  func.func @transform_4(%arg0: i32) -> (i32, i32) {
    %c0_i32 = arith.constant 0 : i32
    %c0_i32_0 = arith.constant 0 : i32
    %c0_i32_1 = arith.constant 0 : i32
    return %c0_i32, %c0_i32_0 : i32, i32
  }
  func.func @transform_5(%arg0: i32) -> (i32, i32) {
    %c0_i32 = arith.constant 0 : i32
    %c0_i32_0 = arith.constant 0 : i32
    %c0_i32_1 = arith.constant 0 : i32
    return %c0_i32, %c0_i32_0 : i32, i32
  }
  func.func @transform_6(%arg0: i32) -> (i32, i32, i32) {
    %c0_i32 = arith.constant 0 : i32
    %c0_i32_0 = arith.constant 0 : i32
    %c0_i32_1 = arith.constant 0 : i32
    return %arg0, %c0_i32, %c0_i32_0 : i32, i32, i32
  }
}

module attributes {stable_mosaic.version = 11 : i64} {
  func.func @_fused_conv_kernel(%arg0: i32, %arg1: memref<1x144x256xbf16, #tpu.memory_space<vmem>>, %arg2: memref<16x144xbf16, #tpu.memory_space<vmem>>, %arg3: memref<16x1xf32, #tpu.memory_space<vmem>>, %arg4: memref<16x16xf32, #tpu.memory_space<vmem>>, %arg5: memref<16x1xf32, #tpu.memory_space<vmem>>, %arg6: memref<16x1xf32, #tpu.memory_space<vmem>>, %arg7: memref<1x16x256xf32, #tpu.memory_space<vmem>>) attributes {dimension_semantics = [#tpu.dimension_semantics<parallel>], iteration_bounds = array<i64: 2>, scalar_prefetch = 0 : i64, scratch_operands = 0 : i64, tpu.core_type = #tpu.core_type<tc>, window_params = [{transform_indices = @transform_0, window_bounds = array<i64: 1, 144, 256>}, {pipeline_mode = #tpu.pipeline_mode<synchronous>, transform_indices = @transform_1, window_bounds = array<i64: 16, 144>}, {pipeline_mode = #tpu.pipeline_mode<synchronous>, transform_indices = @transform_2, window_bounds = array<i64: 16, 1>}, {pipeline_mode = #tpu.pipeline_mode<synchronous>, transform_indices = @transform_3, window_bounds = array<i64: 16, 16>}, {pipeline_mode = #tpu.pipeline_mode<synchronous>, transform_indices = @transform_4, window_bounds = array<i64: 16, 1>}, {pipeline_mode = #tpu.pipeline_mode<synchronous>, transform_indices = @transform_5, window_bounds = array<i64: 16, 1>}, {transform_indices = @transform_6, window_bounds = array<i64: 1, 16, 256>}]} {
    %c0 = arith.constant 0 : index
    %c0_0 = arith.constant 0 : index
    %0 = vector.load %arg2[%c0, %c0_0] : memref<16x144xbf16, #tpu.memory_space<vmem>>, vector<16x144xbf16>
    %c0_1 = arith.constant 0 : index
    %c0_2 = arith.constant 0 : index
    %c0_3 = arith.constant 0 : index
    %1 = vector.load %arg1[%c0_1, %c0_2, %c0_3] : memref<1x144x256xbf16, #tpu.memory_space<vmem>>, vector<1x144x256xbf16>
    %2 = vector.shape_cast %1 : vector<1x144x256xbf16> to vector<144x256xbf16>
    %cst = arith.constant dense<0.000000e+00> : vector<16x256xf32>
    %3 = tpu.matmul %0, %2, %cst {dimension_numbers = #tpu.dot_dimension_numbers<[1], [0], [0], [1], [0, 0, 1, 1], [], []>} : vector<16x144xbf16>, vector<144x256xbf16>, vector<16x256xf32> -> vector<16x256xf32>
    %c0_4 = arith.constant 0 : index
    %c0_5 = arith.constant 0 : index
    %4 = vector.load %arg3[%c0_4, %c0_5] : memref<16x1xf32, #tpu.memory_space<vmem>>, vector<16x1xf32>
    %5 = vector.broadcast %4 : vector<16x1xf32> to vector<16x256xf32>
    %6 = arith.addf %3, %5 : vector<16x256xf32>
    %cst_6 = arith.constant dense<0.000000e+00> : vector<16xf32>
    %7 = vector.multi_reduction <add>, %6, %cst_6 [1] : vector<16x256xf32> to vector<16xf32>
    %8 = vector.shape_cast %7 : vector<16xf32> to vector<16x1xf32>
    %9 = arith.mulf %6, %6 : vector<16x256xf32>
    %cst_7 = arith.constant dense<0.000000e+00> : vector<16xf32>
    %10 = vector.multi_reduction <add>, %9, %cst_7 [1] : vector<16x256xf32> to vector<16xf32>
    %11 = vector.shape_cast %10 : vector<16xf32> to vector<16x1xf32>
    %12 = tpu.concatenate %8, %11 in 1 : vector<16x1xf32>, vector<16x1xf32> -> vector<16x2xf32>
    %c0_8 = arith.constant 0 : index
    %c0_9 = arith.constant 0 : index
    %13 = vector.load %arg4[%c0_8, %c0_9] : memref<16x16xf32, #tpu.memory_space<vmem>>, vector<16x16xf32>
    %cst_10 = arith.constant dense<0.000000e+00> : vector<16x2xf32>
    %14 = tpu.matmul %13, %12, %cst_10 {dimension_numbers = #tpu.dot_dimension_numbers<[1], [0], [0], [1], [0, 0, 1, 1], [], []>} : vector<16x16xf32>, vector<16x2xf32>, vector<16x2xf32> -> vector<16x2xf32>
    %15 = vector.extract_strided_slice %14 {offsets = [0, 0], sizes = [16, 1], strides = [1, 1]} : vector<16x2xf32> to vector<16x1xf32>
    %16 = vector.extract_strided_slice %14 {offsets = [0, 1], sizes = [16, 1], strides = [1, 1]} : vector<16x2xf32> to vector<16x1xf32>
    %17 = arith.mulf %15, %15 : vector<16x1xf32>
    %18 = arith.subf %16, %17 : vector<16x1xf32>
    %cst_11 = arith.constant 0.000000e+00 : f32
    %19 = vector.broadcast %cst_11 : f32 to vector<16x1xf32>
    %20 = arith.maximumf %18, %19 : vector<16x1xf32>
    %21 = vector.broadcast %15 : vector<16x1xf32> to vector<16x256xf32>
    %22 = arith.subf %6, %21 : vector<16x256xf32>
    %cst_12 = arith.constant 9.99999974E-6 : f32
    %23 = vector.broadcast %cst_12 : f32 to vector<16x1xf32>
    %24 = arith.addf %20, %23 : vector<16x1xf32>
    %25 = math.rsqrt %24 : vector<16x1xf32>
    %26 = vector.broadcast %25 : vector<16x1xf32> to vector<16x256xf32>
    %27 = arith.mulf %22, %26 : vector<16x256xf32>
    %c0_13 = arith.constant 0 : index
    %c0_14 = arith.constant 0 : index
    %28 = vector.load %arg5[%c0_13, %c0_14] : memref<16x1xf32, #tpu.memory_space<vmem>>, vector<16x1xf32>
    %29 = vector.broadcast %28 : vector<16x1xf32> to vector<16x256xf32>
    %30 = arith.mulf %27, %29 : vector<16x256xf32>
    %c0_15 = arith.constant 0 : index
    %c0_16 = arith.constant 0 : index
    %31 = vector.load %arg6[%c0_15, %c0_16] : memref<16x1xf32, #tpu.memory_space<vmem>>, vector<16x1xf32>
    %32 = vector.broadcast %31 : vector<16x1xf32> to vector<16x256xf32>
    %33 = arith.addf %30, %32 : vector<16x256xf32>
    %cst_17 = arith.constant 0.000000e+00 : f32
    %34 = vector.broadcast %cst_17 : f32 to vector<16x256xf32>
    %35 = arith.maximumf %33, %34 : vector<16x256xf32>
    %c0_18 = arith.constant 0 : index
    %c0_19 = arith.constant 0 : index
    %c0_20 = arith.constant 0 : index
    %36 = vector.load %arg7[%c0_18, %c0_19, %c0_20] : memref<1x16x256xf32, #tpu.memory_space<vmem>>, vector<1x16x256xf32>
    %37 = vector.shape_cast %36 : vector<1x16x256xf32> to vector<16x256xf32>
    %38 = vector.shape_cast %35 : vector<16x256xf32> to vector<1x16x256xf32>
    tpu.vector_store %arg7[%c0_18, %c0_19, %c0_20], %38 {strides = array<i32>} : memref<1x16x256xf32, #tpu.memory_space<vmem>>, vector<1x16x256xf32>,
    return
  }
  func.func @transform_0(%arg0: i32) -> (i32, i32, i32) {
    %c0_i32 = arith.constant 0 : i32
    %c0_i32_0 = arith.constant 0 : i32
    %c0_i32_1 = arith.constant 0 : i32
    return %arg0, %c0_i32, %c0_i32_0 : i32, i32, i32
  }
  func.func @transform_1(%arg0: i32) -> (i32, i32) {
    %c0_i32 = arith.constant 0 : i32
    %c0_i32_0 = arith.constant 0 : i32
    %c0_i32_1 = arith.constant 0 : i32
    return %c0_i32, %c0_i32_0 : i32, i32
  }
  func.func @transform_2(%arg0: i32) -> (i32, i32) {
    %c0_i32 = arith.constant 0 : i32
    %c0_i32_0 = arith.constant 0 : i32
    %c0_i32_1 = arith.constant 0 : i32
    return %c0_i32, %c0_i32_0 : i32, i32
  }
  func.func @transform_3(%arg0: i32) -> (i32, i32) {
    %c0_i32 = arith.constant 0 : i32
    %c0_i32_0 = arith.constant 0 : i32
    %c0_i32_1 = arith.constant 0 : i32
    return %c0_i32, %c0_i32_0 : i32, i32
  }
  func.func @transform_4(%arg0: i32) -> (i32, i32) {
    %c0_i32 = arith.constant 0 : i32
    %c0_i32_0 = arith.constant 0 : i32
    %c0_i32_1 = arith.constant 0 : i32
    return %c0_i32, %c0_i32_0 : i32, i32
  }
  func.func @transform_5(%arg0: i32) -> (i32, i32) {
    %c0_i32 = arith.constant 0 : i32
    %c0_i32_0 = arith.constant 0 : i32
    %c0_i32_1 = arith.constant 0 : i32
    return %c0_i32, %c0_i32_0 : i32, i32
  }
  func.func @transform_6(%arg0: i32) -> (i32, i32, i32) {
    %c0_i32 = arith.constant 0 : i32
    %c0_i32_0 = arith.constant 0 : i32
    %c0_i32_1 = arith.constant 0 : i32
    return %arg0, %c0_i32, %c0_i32_0 : i32, i32, i32
  }
}

module attributes {stable_mosaic.version = 11 : i64} {
  func.func @_fused_conv_kernel(%arg0: i32, %arg1: memref<1x144x256xbf16, #tpu.memory_space<vmem>>, %arg2: memref<16x144xbf16, #tpu.memory_space<vmem>>, %arg3: memref<16x1xf32, #tpu.memory_space<vmem>>, %arg4: memref<16x16xf32, #tpu.memory_space<vmem>>, %arg5: memref<16x1xf32, #tpu.memory_space<vmem>>, %arg6: memref<16x1xf32, #tpu.memory_space<vmem>>, %arg7: memref<1x16x256xf32, #tpu.memory_space<vmem>>, %arg8: memref<1x16x256xf32, #tpu.memory_space<vmem>>) attributes {dimension_semantics = [#tpu.dimension_semantics<parallel>], iteration_bounds = array<i64: 2>, scalar_prefetch = 0 : i64, scratch_operands = 0 : i64, tpu.core_type = #tpu.core_type<tc>, window_params = [{transform_indices = @transform_0, window_bounds = array<i64: 1, 144, 256>}, {pipeline_mode = #tpu.pipeline_mode<synchronous>, transform_indices = @transform_1, window_bounds = array<i64: 16, 144>}, {pipeline_mode = #tpu.pipeline_mode<synchronous>, transform_indices = @transform_2, window_bounds = array<i64: 16, 1>}, {pipeline_mode = #tpu.pipeline_mode<synchronous>, transform_indices = @transform_3, window_bounds = array<i64: 16, 16>}, {pipeline_mode = #tpu.pipeline_mode<synchronous>, transform_indices = @transform_4, window_bounds = array<i64: 16, 1>}, {pipeline_mode = #tpu.pipeline_mode<synchronous>, transform_indices = @transform_5, window_bounds = array<i64: 16, 1>}, {transform_indices = @transform_6, window_bounds = array<i64: 1, 16, 256>}, {transform_indices = @transform_7, window_bounds = array<i64: 1, 16, 256>}]} {
    %c0 = arith.constant 0 : index
    %c0_0 = arith.constant 0 : index
    %0 = vector.load %arg2[%c0, %c0_0] : memref<16x144xbf16, #tpu.memory_space<vmem>>, vector<16x144xbf16>
    %c0_1 = arith.constant 0 : index
    %c0_2 = arith.constant 0 : index
    %c0_3 = arith.constant 0 : index
    %1 = vector.load %arg1[%c0_1, %c0_2, %c0_3] : memref<1x144x256xbf16, #tpu.memory_space<vmem>>, vector<1x144x256xbf16>
    %2 = vector.shape_cast %1 : vector<1x144x256xbf16> to vector<144x256xbf16>
    %cst = arith.constant dense<0.000000e+00> : vector<16x256xf32>
    %3 = tpu.matmul %0, %2, %cst {dimension_numbers = #tpu.dot_dimension_numbers<[1], [0], [0], [1], [0, 0, 1, 1], [], []>} : vector<16x144xbf16>, vector<144x256xbf16>, vector<16x256xf32> -> vector<16x256xf32>
    %c0_4 = arith.constant 0 : index
    %c0_5 = arith.constant 0 : index
    %4 = vector.load %arg3[%c0_4, %c0_5] : memref<16x1xf32, #tpu.memory_space<vmem>>, vector<16x1xf32>
    %5 = vector.broadcast %4 : vector<16x1xf32> to vector<16x256xf32>
    %6 = arith.addf %3, %5 : vector<16x256xf32>
    %cst_6 = arith.constant dense<0.000000e+00> : vector<16xf32>
    %7 = vector.multi_reduction <add>, %6, %cst_6 [1] : vector<16x256xf32> to vector<16xf32>
    %8 = vector.shape_cast %7 : vector<16xf32> to vector<16x1xf32>
    %9 = arith.mulf %6, %6 : vector<16x256xf32>
    %cst_7 = arith.constant dense<0.000000e+00> : vector<16xf32>
    %10 = vector.multi_reduction <add>, %9, %cst_7 [1] : vector<16x256xf32> to vector<16xf32>
    %11 = vector.shape_cast %10 : vector<16xf32> to vector<16x1xf32>
    %12 = tpu.concatenate %8, %11 in 1 : vector<16x1xf32>, vector<16x1xf32> -> vector<16x2xf32>
    %c0_8 = arith.constant 0 : index
    %c0_9 = arith.constant 0 : index
    %13 = vector.load %arg4[%c0_8, %c0_9] : memref<16x16xf32, #tpu.memory_space<vmem>>, vector<16x16xf32>
    %cst_10 = arith.constant dense<0.000000e+00> : vector<16x2xf32>
    %14 = tpu.matmul %13, %12, %cst_10 {dimension_numbers = #tpu.dot_dimension_numbers<[1], [0], [0], [1], [0, 0, 1, 1], [], []>} : vector<16x16xf32>, vector<16x2xf32>, vector<16x2xf32> -> vector<16x2xf32>
    %15 = vector.extract_strided_slice %14 {offsets = [0, 0], sizes = [16, 1], strides = [1, 1]} : vector<16x2xf32> to vector<16x1xf32>
    %16 = vector.extract_strided_slice %14 {offsets = [0, 1], sizes = [16, 1], strides = [1, 1]} : vector<16x2xf32> to vector<16x1xf32>
    %17 = arith.mulf %15, %15 : vector<16x1xf32>
    %18 = arith.subf %16, %17 : vector<16x1xf32>
    %cst_11 = arith.constant 0.000000e+00 : f32
    %19 = vector.broadcast %cst_11 : f32 to vector<16x1xf32>
    %20 = arith.maximumf %18, %19 : vector<16x1xf32>
    %21 = vector.broadcast %15 : vector<16x1xf32> to vector<16x256xf32>
    %22 = arith.subf %6, %21 : vector<16x256xf32>
    %cst_12 = arith.constant 9.99999974E-6 : f32
    %23 = vector.broadcast %cst_12 : f32 to vector<16x1xf32>
    %24 = arith.addf %20, %23 : vector<16x1xf32>
    %25 = math.rsqrt %24 : vector<16x1xf32>
    %26 = vector.broadcast %25 : vector<16x1xf32> to vector<16x256xf32>
    %27 = arith.mulf %22, %26 : vector<16x256xf32>
    %c0_13 = arith.constant 0 : index
    %c0_14 = arith.constant 0 : index
    %28 = vector.load %arg5[%c0_13, %c0_14] : memref<16x1xf32, #tpu.memory_space<vmem>>, vector<16x1xf32>
    %29 = vector.broadcast %28 : vector<16x1xf32> to vector<16x256xf32>
    %30 = arith.mulf %27, %29 : vector<16x256xf32>
    %c0_15 = arith.constant 0 : index
    %c0_16 = arith.constant 0 : index
    %31 = vector.load %arg6[%c0_15, %c0_16] : memref<16x1xf32, #tpu.memory_space<vmem>>, vector<16x1xf32>
    %32 = vector.broadcast %31 : vector<16x1xf32> to vector<16x256xf32>
    %33 = arith.addf %30, %32 : vector<16x256xf32>
    %cst_17 = arith.constant 0.000000e+00 : f32
    %34 = vector.broadcast %cst_17 : f32 to vector<16x256xf32>
    %35 = arith.maximumf %33, %34 : vector<16x256xf32>
    %c0_18 = arith.constant 0 : index
    %c0_19 = arith.constant 0 : index
    %c0_20 = arith.constant 0 : index
    %36 = vector.load %arg7[%c0_18, %c0_19, %c0_20] : memref<1x16x256xf32, #tpu.memory_space<vmem>>, vector<1x16x256xf32>
    %37 = vector.shape_cast %36 : vector<1x16x256xf32> to vector<16x256xf32>
    %38 = arith.addf %35, %37 : vector<16x256xf32>
    %cst_21 = arith.constant 0.000000e+00 : f32
    %39 = vector.broadcast %cst_21 : f32 to vector<16x256xf32>
    %40 = arith.maximumf %38, %39 : vector<16x256xf32>
    %c0_22 = arith.constant 0 : index
    %c0_23 = arith.constant 0 : index
    %c0_24 = arith.constant 0 : index
    %41 = vector.load %arg8[%c0_22, %c0_23, %c0_24] : memref<1x16x256xf32, #tpu.memory_space<vmem>>, vector<1x16x256xf32>
    %42 = vector.shape_cast %41 : vector<1x16x256xf32> to vector<16x256xf32>
    %43 = vector.shape_cast %40 : vector<16x256xf32> to vector<1x16x256xf32>
    tpu.vector_store %arg8[%c0_22, %c0_23, %c0_24], %43 {strides = array<i32>} : memref<1x16x256xf32, #tpu.memory_space<vmem>>, vector<1x16x256xf32>,
    return
  }
  func.func @transform_0(%arg0: i32) -> (i32, i32, i32) {
    %c0_i32 = arith.constant 0 : i32
    %c0_i32_0 = arith.constant 0 : i32
    %c0_i32_1 = arith.constant 0 : i32
    return %arg0, %c0_i32, %c0_i32_0 : i32, i32, i32
  }
  func.func @transform_1(%arg0: i32) -> (i32, i32) {
    %c0_i32 = arith.constant 0 : i32
    %c0_i32_0 = arith.constant 0 : i32
    %c0_i32_1 = arith.constant 0 : i32
    return %c0_i32, %c0_i32_0 : i32, i32
  }
  func.func @transform_2(%arg0: i32) -> (i32, i32) {
    %c0_i32 = arith.constant 0 : i32
    %c0_i32_0 = arith.constant 0 : i32
    %c0_i32_1 = arith.constant 0 : i32
    return %c0_i32, %c0_i32_0 : i32, i32
  }
  func.func @transform_3(%arg0: i32) -> (i32, i32) {
    %c0_i32 = arith.constant 0 : i32
    %c0_i32_0 = arith.constant 0 : i32
    %c0_i32_1 = arith.constant 0 : i32
    return %c0_i32, %c0_i32_0 : i32, i32
  }
  func.func @transform_4(%arg0: i32) -> (i32, i32) {
    %c0_i32 = arith.constant 0 : i32
    %c0_i32_0 = arith.constant 0 : i32
    %c0_i32_1 = arith.constant 0 : i32
    return %c0_i32, %c0_i32_0 : i32, i32
  }
  func.func @transform_5(%arg0: i32) -> (i32, i32) {
    %c0_i32 = arith.constant 0 : i32
    %c0_i32_0 = arith.constant 0 : i32
    %c0_i32_1 = arith.constant 0 : i32
    return %c0_i32, %c0_i32_0 : i32, i32
  }
  func.func @transform_6(%arg0: i32) -> (i32, i32, i32) {
    %c0_i32 = arith.constant 0 : i32
    %c0_i32_0 = arith.constant 0 : i32
    %c0_i32_1 = arith.constant 0 : i32
    return %arg0, %c0_i32, %c0_i32_0 : i32, i32, i32
  }
  func.func @transform_7(%arg0: i32) -> (i32, i32, i32) {
    %c0_i32 = arith.constant 0 : i32
    %c0_i32_0 = arith.constant 0 : i32
    %c0_i32_1 = arith.constant 0 : i32
    return %arg0, %c0_i32, %c0_i32_0 : i32, i32, i32
  }
}

module attributes {stable_mosaic.version = 11 : i64} {
  func.func @_fused_conv_kernel(%arg0: i32, %arg1: memref<1x144x64xbf16, #tpu.memory_space<vmem>>, %arg2: memref<16x144xbf16, #tpu.memory_space<vmem>>, %arg3: memref<16x1xf32, #tpu.memory_space<vmem>>, %arg4: memref<16x16xf32, #tpu.memory_space<vmem>>, %arg5: memref<16x1xf32, #tpu.memory_space<vmem>>, %arg6: memref<16x1xf32, #tpu.memory_space<vmem>>, %arg7: memref<1x16x64xf32, #tpu.memory_space<vmem>>) attributes {dimension_semantics = [#tpu.dimension_semantics<parallel>], iteration_bounds = array<i64: 2>, scalar_prefetch = 0 : i64, scratch_operands = 0 : i64, tpu.core_type = #tpu.core_type<tc>, window_params = [{transform_indices = @transform_0, window_bounds = array<i64: 1, 144, 64>}, {pipeline_mode = #tpu.pipeline_mode<synchronous>, transform_indices = @transform_1, window_bounds = array<i64: 16, 144>}, {pipeline_mode = #tpu.pipeline_mode<synchronous>, transform_indices = @transform_2, window_bounds = array<i64: 16, 1>}, {pipeline_mode = #tpu.pipeline_mode<synchronous>, transform_indices = @transform_3, window_bounds = array<i64: 16, 16>}, {pipeline_mode = #tpu.pipeline_mode<synchronous>, transform_indices = @transform_4, window_bounds = array<i64: 16, 1>}, {pipeline_mode = #tpu.pipeline_mode<synchronous>, transform_indices = @transform_5, window_bounds = array<i64: 16, 1>}, {transform_indices = @transform_6, window_bounds = array<i64: 1, 16, 64>}]} {
    %c0 = arith.constant 0 : index
    %c0_0 = arith.constant 0 : index
    %0 = vector.load %arg2[%c0, %c0_0] : memref<16x144xbf16, #tpu.memory_space<vmem>>, vector<16x144xbf16>
    %c0_1 = arith.constant 0 : index
    %c0_2 = arith.constant 0 : index
    %c0_3 = arith.constant 0 : index
    %1 = vector.load %arg1[%c0_1, %c0_2, %c0_3] : memref<1x144x64xbf16, #tpu.memory_space<vmem>>, vector<1x144x64xbf16>
    %2 = vector.shape_cast %1 : vector<1x144x64xbf16> to vector<144x64xbf16>
    %cst = arith.constant dense<0.000000e+00> : vector<16x64xf32>
    %3 = tpu.matmul %0, %2, %cst {dimension_numbers = #tpu.dot_dimension_numbers<[1], [0], [0], [1], [0, 0, 1, 1], [], []>} : vector<16x144xbf16>, vector<144x64xbf16>, vector<16x64xf32> -> vector<16x64xf32>
    %c0_4 = arith.constant 0 : index
    %c0_5 = arith.constant 0 : index
    %4 = vector.load %arg3[%c0_4, %c0_5] : memref<16x1xf32, #tpu.memory_space<vmem>>, vector<16x1xf32>
    %5 = vector.broadcast %4 : vector<16x1xf32> to vector<16x64xf32>
    %6 = arith.addf %3, %5 : vector<16x64xf32>
    %cst_6 = arith.constant dense<0.000000e+00> : vector<16xf32>
    %7 = vector.multi_reduction <add>, %6, %cst_6 [1] : vector<16x64xf32> to vector<16xf32>
    %8 = vector.shape_cast %7 : vector<16xf32> to vector<16x1xf32>
    %9 = arith.mulf %6, %6 : vector<16x64xf32>
    %cst_7 = arith.constant dense<0.000000e+00> : vector<16xf32>
    %10 = vector.multi_reduction <add>, %9, %cst_7 [1] : vector<16x64xf32> to vector<16xf32>
    %11 = vector.shape_cast %10 : vector<16xf32> to vector<16x1xf32>
    %12 = tpu.concatenate %8, %11 in 1 : vector<16x1xf32>, vector<16x1xf32> -> vector<16x2xf32>
    %c0_8 = arith.constant 0 : index
    %c0_9 = arith.constant 0 : index
    %13 = vector.load %arg4[%c0_8, %c0_9] : memref<16x16xf32, #tpu.memory_space<vmem>>, vector<16x16xf32>
    %cst_10 = arith.constant dense<0.000000e+00> : vector<16x2xf32>
    %14 = tpu.matmul %13, %12, %cst_10 {dimension_numbers = #tpu.dot_dimension_numbers<[1], [0], [0], [1], [0, 0, 1, 1], [], []>} : vector<16x16xf32>, vector<16x2xf32>, vector<16x2xf32> -> vector<16x2xf32>
    %15 = vector.extract_strided_slice %14 {offsets = [0, 0], sizes = [16, 1], strides = [1, 1]} : vector<16x2xf32> to vector<16x1xf32>
    %16 = vector.extract_strided_slice %14 {offsets = [0, 1], sizes = [16, 1], strides = [1, 1]} : vector<16x2xf32> to vector<16x1xf32>
    %17 = arith.mulf %15, %15 : vector<16x1xf32>
    %18 = arith.subf %16, %17 : vector<16x1xf32>
    %cst_11 = arith.constant 0.000000e+00 : f32
    %19 = vector.broadcast %cst_11 : f32 to vector<16x1xf32>
    %20 = arith.maximumf %18, %19 : vector<16x1xf32>
    %21 = vector.broadcast %15 : vector<16x1xf32> to vector<16x64xf32>
    %22 = arith.subf %6, %21 : vector<16x64xf32>
    %cst_12 = arith.constant 9.99999974E-6 : f32
    %23 = vector.broadcast %cst_12 : f32 to vector<16x1xf32>
    %24 = arith.addf %20, %23 : vector<16x1xf32>
    %25 = math.rsqrt %24 : vector<16x1xf32>
    %26 = vector.broadcast %25 : vector<16x1xf32> to vector<16x64xf32>
    %27 = arith.mulf %22, %26 : vector<16x64xf32>
    %c0_13 = arith.constant 0 : index
    %c0_14 = arith.constant 0 : index
    %28 = vector.load %arg5[%c0_13, %c0_14] : memref<16x1xf32, #tpu.memory_space<vmem>>, vector<16x1xf32>
    %29 = vector.broadcast %28 : vector<16x1xf32> to vector<16x64xf32>
    %30 = arith.mulf %27, %29 : vector<16x64xf32>
    %c0_15 = arith.constant 0 : index
    %c0_16 = arith.constant 0 : index
    %31 = vector.load %arg6[%c0_15, %c0_16] : memref<16x1xf32, #tpu.memory_space<vmem>>, vector<16x1xf32>
    %32 = vector.broadcast %31 : vector<16x1xf32> to vector<16x64xf32>
    %33 = arith.addf %30, %32 : vector<16x64xf32>
    %cst_17 = arith.constant 0.000000e+00 : f32
    %34 = vector.broadcast %cst_17 : f32 to vector<16x64xf32>
    %35 = arith.maximumf %33, %34 : vector<16x64xf32>
    %c0_18 = arith.constant 0 : index
    %c0_19 = arith.constant 0 : index
    %c0_20 = arith.constant 0 : index
    %36 = vector.load %arg7[%c0_18, %c0_19, %c0_20] : memref<1x16x64xf32, #tpu.memory_space<vmem>>, vector<1x16x64xf32>
    %37 = vector.shape_cast %36 : vector<1x16x64xf32> to vector<16x64xf32>
    %38 = vector.shape_cast %35 : vector<16x64xf32> to vector<1x16x64xf32>
    tpu.vector_store %arg7[%c0_18, %c0_19, %c0_20], %38 {strides = array<i32>} : memref<1x16x64xf32, #tpu.memory_space<vmem>>, vector<1x16x64xf32>,
    return
  }
  func.func @transform_0(%arg0: i32) -> (i32, i32, i32) {
    %c0_i32 = arith.constant 0 : i32
    %c0_i32_0 = arith.constant 0 : i32
    %c0_i32_1 = arith.constant 0 : i32
    return %arg0, %c0_i32, %c0_i32_0 : i32, i32, i32
  }
  func.func @transform_1(%arg0: i32) -> (i32, i32) {
    %c0_i32 = arith.constant 0 : i32
    %c0_i32_0 = arith.constant 0 : i32
    %c0_i32_1 = arith.constant 0 : i32
    return %c0_i32, %c0_i32_0 : i32, i32
  }
  func.func @transform_2(%arg0: i32) -> (i32, i32) {
    %c0_i32 = arith.constant 0 : i32
    %c0_i32_0 = arith.constant 0 : i32
    %c0_i32_1 = arith.constant 0 : i32
    return %c0_i32, %c0_i32_0 : i32, i32
  }
  func.func @transform_3(%arg0: i32) -> (i32, i32) {
    %c0_i32 = arith.constant 0 : i32
    %c0_i32_0 = arith.constant 0 : i32
    %c0_i32_1 = arith.constant 0 : i32
    return %c0_i32, %c0_i32_0 : i32, i32
  }
  func.func @transform_4(%arg0: i32) -> (i32, i32) {
    %c0_i32 = arith.constant 0 : i32
    %c0_i32_0 = arith.constant 0 : i32
    %c0_i32_1 = arith.constant 0 : i32
    return %c0_i32, %c0_i32_0 : i32, i32
  }
  func.func @transform_5(%arg0: i32) -> (i32, i32) {
    %c0_i32 = arith.constant 0 : i32
    %c0_i32_0 = arith.constant 0 : i32
    %c0_i32_1 = arith.constant 0 : i32
    return %c0_i32, %c0_i32_0 : i32, i32
  }
  func.func @transform_6(%arg0: i32) -> (i32, i32, i32) {
    %c0_i32 = arith.constant 0 : i32
    %c0_i32_0 = arith.constant 0 : i32
    %c0_i32_1 = arith.constant 0 : i32
    return %arg0, %c0_i32, %c0_i32_0 : i32, i32, i32
  }
}

module attributes {stable_mosaic.version = 11 : i64} {
  func.func @_fused_conv_kernel(%arg0: i32, %arg1: memref<1x16x64xbf16, #tpu.memory_space<vmem>>, %arg2: memref<16x16xbf16, #tpu.memory_space<vmem>>, %arg3: memref<16x1xf32, #tpu.memory_space<vmem>>, %arg4: memref<16x16xf32, #tpu.memory_space<vmem>>, %arg5: memref<16x1xf32, #tpu.memory_space<vmem>>, %arg6: memref<16x1xf32, #tpu.memory_space<vmem>>, %arg7: memref<1x16x64xf32, #tpu.memory_space<vmem>>) attributes {dimension_semantics = [#tpu.dimension_semantics<parallel>], iteration_bounds = array<i64: 2>, scalar_prefetch = 0 : i64, scratch_operands = 0 : i64, tpu.core_type = #tpu.core_type<tc>, window_params = [{transform_indices = @transform_0, window_bounds = array<i64: 1, 16, 64>}, {pipeline_mode = #tpu.pipeline_mode<synchronous>, transform_indices = @transform_1, window_bounds = array<i64: 16, 16>}, {pipeline_mode = #tpu.pipeline_mode<synchronous>, transform_indices = @transform_2, window_bounds = array<i64: 16, 1>}, {pipeline_mode = #tpu.pipeline_mode<synchronous>, transform_indices = @transform_3, window_bounds = array<i64: 16, 16>}, {pipeline_mode = #tpu.pipeline_mode<synchronous>, transform_indices = @transform_4, window_bounds = array<i64: 16, 1>}, {pipeline_mode = #tpu.pipeline_mode<synchronous>, transform_indices = @transform_5, window_bounds = array<i64: 16, 1>}, {transform_indices = @transform_6, window_bounds = array<i64: 1, 16, 64>}]} {
    %c0 = arith.constant 0 : index
    %c0_0 = arith.constant 0 : index
    %0 = vector.load %arg2[%c0, %c0_0] : memref<16x16xbf16, #tpu.memory_space<vmem>>, vector<16x16xbf16>
    %c0_1 = arith.constant 0 : index
    %c0_2 = arith.constant 0 : index
    %c0_3 = arith.constant 0 : index
    %1 = vector.load %arg1[%c0_1, %c0_2, %c0_3] : memref<1x16x64xbf16, #tpu.memory_space<vmem>>, vector<1x16x64xbf16>
    %2 = vector.shape_cast %1 : vector<1x16x64xbf16> to vector<16x64xbf16>
    %cst = arith.constant dense<0.000000e+00> : vector<16x64xf32>
    %3 = tpu.matmul %0, %2, %cst {dimension_numbers = #tpu.dot_dimension_numbers<[1], [0], [0], [1], [0, 0, 1, 1], [], []>} : vector<16x16xbf16>, vector<16x64xbf16>, vector<16x64xf32> -> vector<16x64xf32>
    %c0_4 = arith.constant 0 : index
    %c0_5 = arith.constant 0 : index
    %4 = vector.load %arg3[%c0_4, %c0_5] : memref<16x1xf32, #tpu.memory_space<vmem>>, vector<16x1xf32>
    %5 = vector.broadcast %4 : vector<16x1xf32> to vector<16x64xf32>
    %6 = arith.addf %3, %5 : vector<16x64xf32>
    %cst_6 = arith.constant dense<0.000000e+00> : vector<16xf32>
    %7 = vector.multi_reduction <add>, %6, %cst_6 [1] : vector<16x64xf32> to vector<16xf32>
    %8 = vector.shape_cast %7 : vector<16xf32> to vector<16x1xf32>
    %9 = arith.mulf %6, %6 : vector<16x64xf32>
    %cst_7 = arith.constant dense<0.000000e+00> : vector<16xf32>
    %10 = vector.multi_reduction <add>, %9, %cst_7 [1] : vector<16x64xf32> to vector<16xf32>
    %11 = vector.shape_cast %10 : vector<16xf32> to vector<16x1xf32>
    %12 = tpu.concatenate %8, %11 in 1 : vector<16x1xf32>, vector<16x1xf32> -> vector<16x2xf32>
    %c0_8 = arith.constant 0 : index
    %c0_9 = arith.constant 0 : index
    %13 = vector.load %arg4[%c0_8, %c0_9] : memref<16x16xf32, #tpu.memory_space<vmem>>, vector<16x16xf32>
    %cst_10 = arith.constant dense<0.000000e+00> : vector<16x2xf32>
    %14 = tpu.matmul %13, %12, %cst_10 {dimension_numbers = #tpu.dot_dimension_numbers<[1], [0], [0], [1], [0, 0, 1, 1], [], []>} : vector<16x16xf32>, vector<16x2xf32>, vector<16x2xf32> -> vector<16x2xf32>
    %15 = vector.extract_strided_slice %14 {offsets = [0, 0], sizes = [16, 1], strides = [1, 1]} : vector<16x2xf32> to vector<16x1xf32>
    %16 = vector.extract_strided_slice %14 {offsets = [0, 1], sizes = [16, 1], strides = [1, 1]} : vector<16x2xf32> to vector<16x1xf32>
    %17 = arith.mulf %15, %15 : vector<16x1xf32>
    %18 = arith.subf %16, %17 : vector<16x1xf32>
    %cst_11 = arith.constant 0.000000e+00 : f32
    %19 = vector.broadcast %cst_11 : f32 to vector<16x1xf32>
    %20 = arith.maximumf %18, %19 : vector<16x1xf32>
    %21 = vector.broadcast %15 : vector<16x1xf32> to vector<16x64xf32>
    %22 = arith.subf %6, %21 : vector<16x64xf32>
    %cst_12 = arith.constant 9.99999974E-6 : f32
    %23 = vector.broadcast %cst_12 : f32 to vector<16x1xf32>
    %24 = arith.addf %20, %23 : vector<16x1xf32>
    %25 = math.rsqrt %24 : vector<16x1xf32>
    %26 = vector.broadcast %25 : vector<16x1xf32> to vector<16x64xf32>
    %27 = arith.mulf %22, %26 : vector<16x64xf32>
    %c0_13 = arith.constant 0 : index
    %c0_14 = arith.constant 0 : index
    %28 = vector.load %arg5[%c0_13, %c0_14] : memref<16x1xf32, #tpu.memory_space<vmem>>, vector<16x1xf32>
    %29 = vector.broadcast %28 : vector<16x1xf32> to vector<16x64xf32>
    %30 = arith.mulf %27, %29 : vector<16x64xf32>
    %c0_15 = arith.constant 0 : index
    %c0_16 = arith.constant 0 : index
    %31 = vector.load %arg6[%c0_15, %c0_16] : memref<16x1xf32, #tpu.memory_space<vmem>>, vector<16x1xf32>
    %32 = vector.broadcast %31 : vector<16x1xf32> to vector<16x64xf32>
    %33 = arith.addf %30, %32 : vector<16x64xf32>
    %c0_17 = arith.constant 0 : index
    %c0_18 = arith.constant 0 : index
    %c0_19 = arith.constant 0 : index
    %34 = vector.load %arg7[%c0_17, %c0_18, %c0_19] : memref<1x16x64xf32, #tpu.memory_space<vmem>>, vector<1x16x64xf32>
    %35 = vector.shape_cast %34 : vector<1x16x64xf32> to vector<16x64xf32>
    %36 = vector.shape_cast %33 : vector<16x64xf32> to vector<1x16x64xf32>
    tpu.vector_store %arg7[%c0_17, %c0_18, %c0_19], %36 {strides = array<i32>} : memref<1x16x64xf32, #tpu.memory_space<vmem>>, vector<1x16x64xf32>,
    return
  }
  func.func @transform_0(%arg0: i32) -> (i32, i32, i32) {
    %c0_i32 = arith.constant 0 : i32
    %c0_i32_0 = arith.constant 0 : i32
    %c0_i32_1 = arith.constant 0 : i32
    return %arg0, %c0_i32, %c0_i32_0 : i32, i32, i32
  }
  func.func @transform_1(%arg0: i32) -> (i32, i32) {
    %c0_i32 = arith.constant 0 : i32
    %c0_i32_0 = arith.constant 0 : i32
    %c0_i32_1 = arith.constant 0 : i32
    return %c0_i32, %c0_i32_0 : i32, i32
  }
  func.func @transform_2(%arg0: i32) -> (i32, i32) {
    %c0_i32 = arith.constant 0 : i32
    %c0_i32_0 = arith.constant 0 : i32
    %c0_i32_1 = arith.constant 0 : i32
    return %c0_i32, %c0_i32_0 : i32, i32
  }
  func.func @transform_3(%arg0: i32) -> (i32, i32) {
    %c0_i32 = arith.constant 0 : i32
    %c0_i32_0 = arith.constant 0 : i32
    %c0_i32_1 = arith.constant 0 : i32
    return %c0_i32, %c0_i32_0 : i32, i32
  }
  func.func @transform_4(%arg0: i32) -> (i32, i32) {
    %c0_i32 = arith.constant 0 : i32
    %c0_i32_0 = arith.constant 0 : i32
    %c0_i32_1 = arith.constant 0 : i32
    return %c0_i32, %c0_i32_0 : i32, i32
  }
  func.func @transform_5(%arg0: i32) -> (i32, i32) {
    %c0_i32 = arith.constant 0 : i32
    %c0_i32_0 = arith.constant 0 : i32
    %c0_i32_1 = arith.constant 0 : i32
    return %c0_i32, %c0_i32_0 : i32, i32
  }
  func.func @transform_6(%arg0: i32) -> (i32, i32, i32) {
    %c0_i32 = arith.constant 0 : i32
    %c0_i32_0 = arith.constant 0 : i32
    %c0_i32_1 = arith.constant 0 : i32
    return %arg0, %c0_i32, %c0_i32_0 : i32, i32, i32
  }
}

module attributes {stable_mosaic.version = 11 : i64} {
  func.func @_fused_conv_kernel(%arg0: i32, %arg1: memref<1x144x64xbf16, #tpu.memory_space<vmem>>, %arg2: memref<16x144xbf16, #tpu.memory_space<vmem>>, %arg3: memref<16x1xf32, #tpu.memory_space<vmem>>, %arg4: memref<16x16xf32, #tpu.memory_space<vmem>>, %arg5: memref<16x1xf32, #tpu.memory_space<vmem>>, %arg6: memref<16x1xf32, #tpu.memory_space<vmem>>, %arg7: memref<1x16x64xf32, #tpu.memory_space<vmem>>, %arg8: memref<1x16x64xf32, #tpu.memory_space<vmem>>) attributes {dimension_semantics = [#tpu.dimension_semantics<parallel>], iteration_bounds = array<i64: 2>, scalar_prefetch = 0 : i64, scratch_operands = 0 : i64, tpu.core_type = #tpu.core_type<tc>, window_params = [{transform_indices = @transform_0, window_bounds = array<i64: 1, 144, 64>}, {pipeline_mode = #tpu.pipeline_mode<synchronous>, transform_indices = @transform_1, window_bounds = array<i64: 16, 144>}, {pipeline_mode = #tpu.pipeline_mode<synchronous>, transform_indices = @transform_2, window_bounds = array<i64: 16, 1>}, {pipeline_mode = #tpu.pipeline_mode<synchronous>, transform_indices = @transform_3, window_bounds = array<i64: 16, 16>}, {pipeline_mode = #tpu.pipeline_mode<synchronous>, transform_indices = @transform_4, window_bounds = array<i64: 16, 1>}, {pipeline_mode = #tpu.pipeline_mode<synchronous>, transform_indices = @transform_5, window_bounds = array<i64: 16, 1>}, {transform_indices = @transform_6, window_bounds = array<i64: 1, 16, 64>}, {transform_indices = @transform_7, window_bounds = array<i64: 1, 16, 64>}]} {
    %c0 = arith.constant 0 : index
    %c0_0 = arith.constant 0 : index
    %0 = vector.load %arg2[%c0, %c0_0] : memref<16x144xbf16, #tpu.memory_space<vmem>>, vector<16x144xbf16>
    %c0_1 = arith.constant 0 : index
    %c0_2 = arith.constant 0 : index
    %c0_3 = arith.constant 0 : index
    %1 = vector.load %arg1[%c0_1, %c0_2, %c0_3] : memref<1x144x64xbf16, #tpu.memory_space<vmem>>, vector<1x144x64xbf16>
    %2 = vector.shape_cast %1 : vector<1x144x64xbf16> to vector<144x64xbf16>
    %cst = arith.constant dense<0.000000e+00> : vector<16x64xf32>
    %3 = tpu.matmul %0, %2, %cst {dimension_numbers = #tpu.dot_dimension_numbers<[1], [0], [0], [1], [0, 0, 1, 1], [], []>} : vector<16x144xbf16>, vector<144x64xbf16>, vector<16x64xf32> -> vector<16x64xf32>
    %c0_4 = arith.constant 0 : index
    %c0_5 = arith.constant 0 : index
    %4 = vector.load %arg3[%c0_4, %c0_5] : memref<16x1xf32, #tpu.memory_space<vmem>>, vector<16x1xf32>
    %5 = vector.broadcast %4 : vector<16x1xf32> to vector<16x64xf32>
    %6 = arith.addf %3, %5 : vector<16x64xf32>
    %cst_6 = arith.constant dense<0.000000e+00> : vector<16xf32>
    %7 = vector.multi_reduction <add>, %6, %cst_6 [1] : vector<16x64xf32> to vector<16xf32>
    %8 = vector.shape_cast %7 : vector<16xf32> to vector<16x1xf32>
    %9 = arith.mulf %6, %6 : vector<16x64xf32>
    %cst_7 = arith.constant dense<0.000000e+00> : vector<16xf32>
    %10 = vector.multi_reduction <add>, %9, %cst_7 [1] : vector<16x64xf32> to vector<16xf32>
    %11 = vector.shape_cast %10 : vector<16xf32> to vector<16x1xf32>
    %12 = tpu.concatenate %8, %11 in 1 : vector<16x1xf32>, vector<16x1xf32> -> vector<16x2xf32>
    %c0_8 = arith.constant 0 : index
    %c0_9 = arith.constant 0 : index
    %13 = vector.load %arg4[%c0_8, %c0_9] : memref<16x16xf32, #tpu.memory_space<vmem>>, vector<16x16xf32>
    %cst_10 = arith.constant dense<0.000000e+00> : vector<16x2xf32>
    %14 = tpu.matmul %13, %12, %cst_10 {dimension_numbers = #tpu.dot_dimension_numbers<[1], [0], [0], [1], [0, 0, 1, 1], [], []>} : vector<16x16xf32>, vector<16x2xf32>, vector<16x2xf32> -> vector<16x2xf32>
    %15 = vector.extract_strided_slice %14 {offsets = [0, 0], sizes = [16, 1], strides = [1, 1]} : vector<16x2xf32> to vector<16x1xf32>
    %16 = vector.extract_strided_slice %14 {offsets = [0, 1], sizes = [16, 1], strides = [1, 1]} : vector<16x2xf32> to vector<16x1xf32>
    %17 = arith.mulf %15, %15 : vector<16x1xf32>
    %18 = arith.subf %16, %17 : vector<16x1xf32>
    %cst_11 = arith.constant 0.000000e+00 : f32
    %19 = vector.broadcast %cst_11 : f32 to vector<16x1xf32>
    %20 = arith.maximumf %18, %19 : vector<16x1xf32>
    %21 = vector.broadcast %15 : vector<16x1xf32> to vector<16x64xf32>
    %22 = arith.subf %6, %21 : vector<16x64xf32>
    %cst_12 = arith.constant 9.99999974E-6 : f32
    %23 = vector.broadcast %cst_12 : f32 to vector<16x1xf32>
    %24 = arith.addf %20, %23 : vector<16x1xf32>
    %25 = math.rsqrt %24 : vector<16x1xf32>
    %26 = vector.broadcast %25 : vector<16x1xf32> to vector<16x64xf32>
    %27 = arith.mulf %22, %26 : vector<16x64xf32>
    %c0_13 = arith.constant 0 : index
    %c0_14 = arith.constant 0 : index
    %28 = vector.load %arg5[%c0_13, %c0_14] : memref<16x1xf32, #tpu.memory_space<vmem>>, vector<16x1xf32>
    %29 = vector.broadcast %28 : vector<16x1xf32> to vector<16x64xf32>
    %30 = arith.mulf %27, %29 : vector<16x64xf32>
    %c0_15 = arith.constant 0 : index
    %c0_16 = arith.constant 0 : index
    %31 = vector.load %arg6[%c0_15, %c0_16] : memref<16x1xf32, #tpu.memory_space<vmem>>, vector<16x1xf32>
    %32 = vector.broadcast %31 : vector<16x1xf32> to vector<16x64xf32>
    %33 = arith.addf %30, %32 : vector<16x64xf32>
    %cst_17 = arith.constant 0.000000e+00 : f32
    %34 = vector.broadcast %cst_17 : f32 to vector<16x64xf32>
    %35 = arith.maximumf %33, %34 : vector<16x64xf32>
    %c0_18 = arith.constant 0 : index
    %c0_19 = arith.constant 0 : index
    %c0_20 = arith.constant 0 : index
    %36 = vector.load %arg7[%c0_18, %c0_19, %c0_20] : memref<1x16x64xf32, #tpu.memory_space<vmem>>, vector<1x16x64xf32>
    %37 = vector.shape_cast %36 : vector<1x16x64xf32> to vector<16x64xf32>
    %38 = arith.addf %35, %37 : vector<16x64xf32>
    %cst_21 = arith.constant 0.000000e+00 : f32
    %39 = vector.broadcast %cst_21 : f32 to vector<16x64xf32>
    %40 = arith.maximumf %38, %39 : vector<16x64xf32>
    %c0_22 = arith.constant 0 : index
    %c0_23 = arith.constant 0 : index
    %c0_24 = arith.constant 0 : index
    %41 = vector.load %arg8[%c0_22, %c0_23, %c0_24] : memref<1x16x64xf32, #tpu.memory_space<vmem>>, vector<1x16x64xf32>
    %42 = vector.shape_cast %41 : vector<1x16x64xf32> to vector<16x64xf32>
    %43 = vector.shape_cast %40 : vector<16x64xf32> to vector<1x16x64xf32>
    tpu.vector_store %arg8[%c0_22, %c0_23, %c0_24], %43 {strides = array<i32>} : memref<1x16x64xf32, #tpu.memory_space<vmem>>, vector<1x16x64xf32>,
    return
  }
  func.func @transform_0(%arg0: i32) -> (i32, i32, i32) {
    %c0_i32 = arith.constant 0 : i32
    %c0_i32_0 = arith.constant 0 : i32
    %c0_i32_1 = arith.constant 0 : i32
    return %arg0, %c0_i32, %c0_i32_0 : i32, i32, i32
  }
  func.func @transform_1(%arg0: i32) -> (i32, i32) {
    %c0_i32 = arith.constant 0 : i32
    %c0_i32_0 = arith.constant 0 : i32
    %c0_i32_1 = arith.constant 0 : i32
    return %c0_i32, %c0_i32_0 : i32, i32
  }
  func.func @transform_2(%arg0: i32) -> (i32, i32) {
    %c0_i32 = arith.constant 0 : i32
    %c0_i32_0 = arith.constant 0 : i32
    %c0_i32_1 = arith.constant 0 : i32
    return %c0_i32, %c0_i32_0 : i32, i32
  }
  func.func @transform_3(%arg0: i32) -> (i32, i32) {
    %c0_i32 = arith.constant 0 : i32
    %c0_i32_0 = arith.constant 0 : i32
    %c0_i32_1 = arith.constant 0 : i32
    return %c0_i32, %c0_i32_0 : i32, i32
  }
  func.func @transform_4(%arg0: i32) -> (i32, i32) {
    %c0_i32 = arith.constant 0 : i32
    %c0_i32_0 = arith.constant 0 : i32
    %c0_i32_1 = arith.constant 0 : i32
    return %c0_i32, %c0_i32_0 : i32, i32
  }
  func.func @transform_5(%arg0: i32) -> (i32, i32) {
    %c0_i32 = arith.constant 0 : i32
    %c0_i32_0 = arith.constant 0 : i32
    %c0_i32_1 = arith.constant 0 : i32
    return %c0_i32, %c0_i32_0 : i32, i32
  }
  func.func @transform_6(%arg0: i32) -> (i32, i32, i32) {
    %c0_i32 = arith.constant 0 : i32
    %c0_i32_0 = arith.constant 0 : i32
    %c0_i32_1 = arith.constant 0 : i32
    return %arg0, %c0_i32, %c0_i32_0 : i32, i32, i32
  }
  func.func @transform_7(%arg0: i32) -> (i32, i32, i32) {
    %c0_i32 = arith.constant 0 : i32
    %c0_i32_0 = arith.constant 0 : i32
    %c0_i32_1 = arith.constant 0 : i32
    return %arg0, %c0_i32, %c0_i32_0 : i32, i32, i32
  }
}

module attributes {stable_mosaic.version = 11 : i64} {
  func.func @_fused_conv_kernel(%arg0: i32, %arg1: memref<1x144x16xbf16, #tpu.memory_space<vmem>>, %arg2: memref<16x144xbf16, #tpu.memory_space<vmem>>, %arg3: memref<16x1xf32, #tpu.memory_space<vmem>>, %arg4: memref<16x16xf32, #tpu.memory_space<vmem>>, %arg5: memref<16x1xf32, #tpu.memory_space<vmem>>, %arg6: memref<16x1xf32, #tpu.memory_space<vmem>>, %arg7: memref<1x16x16xf32, #tpu.memory_space<vmem>>) attributes {dimension_semantics = [#tpu.dimension_semantics<parallel>], iteration_bounds = array<i64: 2>, scalar_prefetch = 0 : i64, scratch_operands = 0 : i64, tpu.core_type = #tpu.core_type<tc>, window_params = [{transform_indices = @transform_0, window_bounds = array<i64: 1, 144, 16>}, {pipeline_mode = #tpu.pipeline_mode<synchronous>, transform_indices = @transform_1, window_bounds = array<i64: 16, 144>}, {pipeline_mode = #tpu.pipeline_mode<synchronous>, transform_indices = @transform_2, window_bounds = array<i64: 16, 1>}, {pipeline_mode = #tpu.pipeline_mode<synchronous>, transform_indices = @transform_3, window_bounds = array<i64: 16, 16>}, {pipeline_mode = #tpu.pipeline_mode<synchronous>, transform_indices = @transform_4, window_bounds = array<i64: 16, 1>}, {pipeline_mode = #tpu.pipeline_mode<synchronous>, transform_indices = @transform_5, window_bounds = array<i64: 16, 1>}, {transform_indices = @transform_6, window_bounds = array<i64: 1, 16, 16>}]} {
    %c0 = arith.constant 0 : index
    %c0_0 = arith.constant 0 : index
    %0 = vector.load %arg2[%c0, %c0_0] : memref<16x144xbf16, #tpu.memory_space<vmem>>, vector<16x144xbf16>
    %c0_1 = arith.constant 0 : index
    %c0_2 = arith.constant 0 : index
    %c0_3 = arith.constant 0 : index
    %1 = vector.load %arg1[%c0_1, %c0_2, %c0_3] : memref<1x144x16xbf16, #tpu.memory_space<vmem>>, vector<1x144x16xbf16>
    %2 = vector.shape_cast %1 : vector<1x144x16xbf16> to vector<144x16xbf16>
    %cst = arith.constant dense<0.000000e+00> : vector<16x16xf32>
    %3 = tpu.matmul %0, %2, %cst {dimension_numbers = #tpu.dot_dimension_numbers<[1], [0], [0], [1], [0, 0, 1, 1], [], []>} : vector<16x144xbf16>, vector<144x16xbf16>, vector<16x16xf32> -> vector<16x16xf32>
    %c0_4 = arith.constant 0 : index
    %c0_5 = arith.constant 0 : index
    %4 = vector.load %arg3[%c0_4, %c0_5] : memref<16x1xf32, #tpu.memory_space<vmem>>, vector<16x1xf32>
    %5 = vector.broadcast %4 : vector<16x1xf32> to vector<16x16xf32>
    %6 = arith.addf %3, %5 : vector<16x16xf32>
    %cst_6 = arith.constant dense<0.000000e+00> : vector<16xf32>
    %7 = vector.multi_reduction <add>, %6, %cst_6 [1] : vector<16x16xf32> to vector<16xf32>
    %8 = vector.shape_cast %7 : vector<16xf32> to vector<16x1xf32>
    %9 = arith.mulf %6, %6 : vector<16x16xf32>
    %cst_7 = arith.constant dense<0.000000e+00> : vector<16xf32>
    %10 = vector.multi_reduction <add>, %9, %cst_7 [1] : vector<16x16xf32> to vector<16xf32>
    %11 = vector.shape_cast %10 : vector<16xf32> to vector<16x1xf32>
    %12 = tpu.concatenate %8, %11 in 1 : vector<16x1xf32>, vector<16x1xf32> -> vector<16x2xf32>
    %c0_8 = arith.constant 0 : index
    %c0_9 = arith.constant 0 : index
    %13 = vector.load %arg4[%c0_8, %c0_9] : memref<16x16xf32, #tpu.memory_space<vmem>>, vector<16x16xf32>
    %cst_10 = arith.constant dense<0.000000e+00> : vector<16x2xf32>
    %14 = tpu.matmul %13, %12, %cst_10 {dimension_numbers = #tpu.dot_dimension_numbers<[1], [0], [0], [1], [0, 0, 1, 1], [], []>} : vector<16x16xf32>, vector<16x2xf32>, vector<16x2xf32> -> vector<16x2xf32>
    %15 = vector.extract_strided_slice %14 {offsets = [0, 0], sizes = [16, 1], strides = [1, 1]} : vector<16x2xf32> to vector<16x1xf32>
    %16 = vector.extract_strided_slice %14 {offsets = [0, 1], sizes = [16, 1], strides = [1, 1]} : vector<16x2xf32> to vector<16x1xf32>
    %17 = arith.mulf %15, %15 : vector<16x1xf32>
    %18 = arith.subf %16, %17 : vector<16x1xf32>
    %cst_11 = arith.constant 0.000000e+00 : f32
    %19 = vector.broadcast %cst_11 : f32 to vector<16x1xf32>
    %20 = arith.maximumf %18, %19 : vector<16x1xf32>
    %21 = vector.broadcast %15 : vector<16x1xf32> to vector<16x16xf32>
    %22 = arith.subf %6, %21 : vector<16x16xf32>
    %cst_12 = arith.constant 9.99999974E-6 : f32
    %23 = vector.broadcast %cst_12 : f32 to vector<16x1xf32>
    %24 = arith.addf %20, %23 : vector<16x1xf32>
    %25 = math.rsqrt %24 : vector<16x1xf32>
    %26 = vector.broadcast %25 : vector<16x1xf32> to vector<16x16xf32>
    %27 = arith.mulf %22, %26 : vector<16x16xf32>
    %c0_13 = arith.constant 0 : index
    %c0_14 = arith.constant 0 : index
    %28 = vector.load %arg5[%c0_13, %c0_14] : memref<16x1xf32, #tpu.memory_space<vmem>>, vector<16x1xf32>
    %29 = vector.broadcast %28 : vector<16x1xf32> to vector<16x16xf32>
    %30 = arith.mulf %27, %29 : vector<16x16xf32>
    %c0_15 = arith.constant 0 : index
    %c0_16 = arith.constant 0 : index
    %31 = vector.load %arg6[%c0_15, %c0_16] : memref<16x1xf32, #tpu.memory_space<vmem>>, vector<16x1xf32>
    %32 = vector.broadcast %31 : vector<16x1xf32> to vector<16x16xf32>
    %33 = arith.addf %30, %32 : vector<16x16xf32>
    %cst_17 = arith.constant 0.000000e+00 : f32
    %34 = vector.broadcast %cst_17 : f32 to vector<16x16xf32>
    %35 = arith.maximumf %33, %34 : vector<16x16xf32>
    %c0_18 = arith.constant 0 : index
    %c0_19 = arith.constant 0 : index
    %c0_20 = arith.constant 0 : index
    %36 = vector.load %arg7[%c0_18, %c0_19, %c0_20] : memref<1x16x16xf32, #tpu.memory_space<vmem>>, vector<1x16x16xf32>
    %37 = vector.shape_cast %36 : vector<1x16x16xf32> to vector<16x16xf32>
    %38 = vector.shape_cast %35 : vector<16x16xf32> to vector<1x16x16xf32>
    tpu.vector_store %arg7[%c0_18, %c0_19, %c0_20], %38 {strides = array<i32>} : memref<1x16x16xf32, #tpu.memory_space<vmem>>, vector<1x16x16xf32>,
    return
  }
  func.func @transform_0(%arg0: i32) -> (i32, i32, i32) {
    %c0_i32 = arith.constant 0 : i32
    %c0_i32_0 = arith.constant 0 : i32
    %c0_i32_1 = arith.constant 0 : i32
    return %arg0, %c0_i32, %c0_i32_0 : i32, i32, i32
  }
  func.func @transform_1(%arg0: i32) -> (i32, i32) {
    %c0_i32 = arith.constant 0 : i32
    %c0_i32_0 = arith.constant 0 : i32
    %c0_i32_1 = arith.constant 0 : i32
    return %c0_i32, %c0_i32_0 : i32, i32
  }
  func.func @transform_2(%arg0: i32) -> (i32, i32) {
    %c0_i32 = arith.constant 0 : i32
    %c0_i32_0 = arith.constant 0 : i32
    %c0_i32_1 = arith.constant 0 : i32
    return %c0_i32, %c0_i32_0 : i32, i32
  }
  func.func @transform_3(%arg0: i32) -> (i32, i32) {
    %c0_i32 = arith.constant 0 : i32
    %c0_i32_0 = arith.constant 0 : i32
    %c0_i32_1 = arith.constant 0 : i32
    return %c0_i32, %c0_i32_0 : i32, i32
  }
  func.func @transform_4(%arg0: i32) -> (i32, i32) {
    %c0_i32 = arith.constant 0 : i32
    %c0_i32_0 = arith.constant 0 : i32
    %c0_i32_1 = arith.constant 0 : i32
    return %c0_i32, %c0_i32_0 : i32, i32
  }
  func.func @transform_5(%arg0: i32) -> (i32, i32) {
    %c0_i32 = arith.constant 0 : i32
    %c0_i32_0 = arith.constant 0 : i32
    %c0_i32_1 = arith.constant 0 : i32
    return %c0_i32, %c0_i32_0 : i32, i32
  }
  func.func @transform_6(%arg0: i32) -> (i32, i32, i32) {
    %c0_i32 = arith.constant 0 : i32
    %c0_i32_0 = arith.constant 0 : i32
    %c0_i32_1 = arith.constant 0 : i32
    return %arg0, %c0_i32, %c0_i32_0 : i32, i32, i32
  }
}

module attributes {stable_mosaic.version = 11 : i64} {
  func.func @_fused_conv_kernel(%arg0: i32, %arg1: memref<1x144x16xbf16, #tpu.memory_space<vmem>>, %arg2: memref<16x144xbf16, #tpu.memory_space<vmem>>, %arg3: memref<16x1xf32, #tpu.memory_space<vmem>>, %arg4: memref<16x16xf32, #tpu.memory_space<vmem>>, %arg5: memref<16x1xf32, #tpu.memory_space<vmem>>, %arg6: memref<16x1xf32, #tpu.memory_space<vmem>>, %arg7: memref<1x16x16xf32, #tpu.memory_space<vmem>>, %arg8: memref<1x16x16xf32, #tpu.memory_space<vmem>>) attributes {dimension_semantics = [#tpu.dimension_semantics<parallel>], iteration_bounds = array<i64: 2>, scalar_prefetch = 0 : i64, scratch_operands = 0 : i64, tpu.core_type = #tpu.core_type<tc>, window_params = [{transform_indices = @transform_0, window_bounds = array<i64: 1, 144, 16>}, {pipeline_mode = #tpu.pipeline_mode<synchronous>, transform_indices = @transform_1, window_bounds = array<i64: 16, 144>}, {pipeline_mode = #tpu.pipeline_mode<synchronous>, transform_indices = @transform_2, window_bounds = array<i64: 16, 1>}, {pipeline_mode = #tpu.pipeline_mode<synchronous>, transform_indices = @transform_3, window_bounds = array<i64: 16, 16>}, {pipeline_mode = #tpu.pipeline_mode<synchronous>, transform_indices = @transform_4, window_bounds = array<i64: 16, 1>}, {pipeline_mode = #tpu.pipeline_mode<synchronous>, transform_indices = @transform_5, window_bounds = array<i64: 16, 1>}, {transform_indices = @transform_6, window_bounds = array<i64: 1, 16, 16>}, {transform_indices = @transform_7, window_bounds = array<i64: 1, 16, 16>}]} {
    %c0 = arith.constant 0 : index
    %c0_0 = arith.constant 0 : index
    %0 = vector.load %arg2[%c0, %c0_0] : memref<16x144xbf16, #tpu.memory_space<vmem>>, vector<16x144xbf16>
    %c0_1 = arith.constant 0 : index
    %c0_2 = arith.constant 0 : index
    %c0_3 = arith.constant 0 : index
    %1 = vector.load %arg1[%c0_1, %c0_2, %c0_3] : memref<1x144x16xbf16, #tpu.memory_space<vmem>>, vector<1x144x16xbf16>
    %2 = vector.shape_cast %1 : vector<1x144x16xbf16> to vector<144x16xbf16>
    %cst = arith.constant dense<0.000000e+00> : vector<16x16xf32>
    %3 = tpu.matmul %0, %2, %cst {dimension_numbers = #tpu.dot_dimension_numbers<[1], [0], [0], [1], [0, 0, 1, 1], [], []>} : vector<16x144xbf16>, vector<144x16xbf16>, vector<16x16xf32> -> vector<16x16xf32>
    %c0_4 = arith.constant 0 : index
    %c0_5 = arith.constant 0 : index
    %4 = vector.load %arg3[%c0_4, %c0_5] : memref<16x1xf32, #tpu.memory_space<vmem>>, vector<16x1xf32>
    %5 = vector.broadcast %4 : vector<16x1xf32> to vector<16x16xf32>
    %6 = arith.addf %3, %5 : vector<16x16xf32>
    %cst_6 = arith.constant dense<0.000000e+00> : vector<16xf32>
    %7 = vector.multi_reduction <add>, %6, %cst_6 [1] : vector<16x16xf32> to vector<16xf32>
    %8 = vector.shape_cast %7 : vector<16xf32> to vector<16x1xf32>
    %9 = arith.mulf %6, %6 : vector<16x16xf32>
    %cst_7 = arith.constant dense<0.000000e+00> : vector<16xf32>
    %10 = vector.multi_reduction <add>, %9, %cst_7 [1] : vector<16x16xf32> to vector<16xf32>
    %11 = vector.shape_cast %10 : vector<16xf32> to vector<16x1xf32>
    %12 = tpu.concatenate %8, %11 in 1 : vector<16x1xf32>, vector<16x1xf32> -> vector<16x2xf32>
    %c0_8 = arith.constant 0 : index
    %c0_9 = arith.constant 0 : index
    %13 = vector.load %arg4[%c0_8, %c0_9] : memref<16x16xf32, #tpu.memory_space<vmem>>, vector<16x16xf32>
    %cst_10 = arith.constant dense<0.000000e+00> : vector<16x2xf32>
    %14 = tpu.matmul %13, %12, %cst_10 {dimension_numbers = #tpu.dot_dimension_numbers<[1], [0], [0], [1], [0, 0, 1, 1], [], []>} : vector<16x16xf32>, vector<16x2xf32>, vector<16x2xf32> -> vector<16x2xf32>
    %15 = vector.extract_strided_slice %14 {offsets = [0, 0], sizes = [16, 1], strides = [1, 1]} : vector<16x2xf32> to vector<16x1xf32>
    %16 = vector.extract_strided_slice %14 {offsets = [0, 1], sizes = [16, 1], strides = [1, 1]} : vector<16x2xf32> to vector<16x1xf32>
    %17 = arith.mulf %15, %15 : vector<16x1xf32>
    %18 = arith.subf %16, %17 : vector<16x1xf32>
    %cst_11 = arith.constant 0.000000e+00 : f32
    %19 = vector.broadcast %cst_11 : f32 to vector<16x1xf32>
    %20 = arith.maximumf %18, %19 : vector<16x1xf32>
    %21 = vector.broadcast %15 : vector<16x1xf32> to vector<16x16xf32>
    %22 = arith.subf %6, %21 : vector<16x16xf32>
    %cst_12 = arith.constant 9.99999974E-6 : f32
    %23 = vector.broadcast %cst_12 : f32 to vector<16x1xf32>
    %24 = arith.addf %20, %23 : vector<16x1xf32>
    %25 = math.rsqrt %24 : vector<16x1xf32>
    %26 = vector.broadcast %25 : vector<16x1xf32> to vector<16x16xf32>
    %27 = arith.mulf %22, %26 : vector<16x16xf32>
    %c0_13 = arith.constant 0 : index
    %c0_14 = arith.constant 0 : index
    %28 = vector.load %arg5[%c0_13, %c0_14] : memref<16x1xf32, #tpu.memory_space<vmem>>, vector<16x1xf32>
    %29 = vector.broadcast %28 : vector<16x1xf32> to vector<16x16xf32>
    %30 = arith.mulf %27, %29 : vector<16x16xf32>
    %c0_15 = arith.constant 0 : index
    %c0_16 = arith.constant 0 : index
    %31 = vector.load %arg6[%c0_15, %c0_16] : memref<16x1xf32, #tpu.memory_space<vmem>>, vector<16x1xf32>
    %32 = vector.broadcast %31 : vector<16x1xf32> to vector<16x16xf32>
    %33 = arith.addf %30, %32 : vector<16x16xf32>
    %cst_17 = arith.constant 0.000000e+00 : f32
    %34 = vector.broadcast %cst_17 : f32 to vector<16x16xf32>
    %35 = arith.maximumf %33, %34 : vector<16x16xf32>
    %c0_18 = arith.constant 0 : index
    %c0_19 = arith.constant 0 : index
    %c0_20 = arith.constant 0 : index
    %36 = vector.load %arg7[%c0_18, %c0_19, %c0_20] : memref<1x16x16xf32, #tpu.memory_space<vmem>>, vector<1x16x16xf32>
    %37 = vector.shape_cast %36 : vector<1x16x16xf32> to vector<16x16xf32>
    %38 = arith.addf %35, %37 : vector<16x16xf32>
    %cst_21 = arith.constant 0.000000e+00 : f32
    %39 = vector.broadcast %cst_21 : f32 to vector<16x16xf32>
    %40 = arith.maximumf %38, %39 : vector<16x16xf32>
    %c0_22 = arith.constant 0 : index
    %c0_23 = arith.constant 0 : index
    %c0_24 = arith.constant 0 : index
    %41 = vector.load %arg8[%c0_22, %c0_23, %c0_24] : memref<1x16x16xf32, #tpu.memory_space<vmem>>, vector<1x16x16xf32>
    %42 = vector.shape_cast %41 : vector<1x16x16xf32> to vector<16x16xf32>
    %43 = vector.shape_cast %40 : vector<16x16xf32> to vector<1x16x16xf32>
    tpu.vector_store %arg8[%c0_22, %c0_23, %c0_24], %43 {strides = array<i32>} : memref<1x16x16xf32, #tpu.memory_space<vmem>>, vector<1x16x16xf32>,
    return
  }
  func.func @transform_0(%arg0: i32) -> (i32, i32, i32) {
    %c0_i32 = arith.constant 0 : i32
    %c0_i32_0 = arith.constant 0 : i32
    %c0_i32_1 = arith.constant 0 : i32
    return %arg0, %c0_i32, %c0_i32_0 : i32, i32, i32
  }
  func.func @transform_1(%arg0: i32) -> (i32, i32) {
    %c0_i32 = arith.constant 0 : i32
    %c0_i32_0 = arith.constant 0 : i32
    %c0_i32_1 = arith.constant 0 : i32
    return %c0_i32, %c0_i32_0 : i32, i32
  }
  func.func @transform_2(%arg0: i32) -> (i32, i32) {
    %c0_i32 = arith.constant 0 : i32
    %c0_i32_0 = arith.constant 0 : i32
    %c0_i32_1 = arith.constant 0 : i32
    return %c0_i32, %c0_i32_0 : i32, i32
  }
  func.func @transform_3(%arg0: i32) -> (i32, i32) {
    %c0_i32 = arith.constant 0 : i32
    %c0_i32_0 = arith.constant 0 : i32
    %c0_i32_1 = arith.constant 0 : i32
    return %c0_i32, %c0_i32_0 : i32, i32
  }
  func.func @transform_4(%arg0: i32) -> (i32, i32) {
    %c0_i32 = arith.constant 0 : i32
    %c0_i32_0 = arith.constant 0 : i32
    %c0_i32_1 = arith.constant 0 : i32
    return %c0_i32, %c0_i32_0 : i32, i32
  }
  func.func @transform_5(%arg0: i32) -> (i32, i32) {
    %c0_i32 = arith.constant 0 : i32
    %c0_i32_0 = arith.constant 0 : i32
    %c0_i32_1 = arith.constant 0 : i32
    return %c0_i32, %c0_i32_0 : i32, i32
  }
  func.func @transform_6(%arg0: i32) -> (i32, i32, i32) {
    %c0_i32 = arith.constant 0 : i32
    %c0_i32_0 = arith.constant 0 : i32
    %c0_i32_1 = arith.constant 0 : i32
    return %arg0, %c0_i32, %c0_i32_0 : i32, i32, i32
  }
  func.func @transform_7(%arg0: i32) -> (i32, i32, i32) {
    %c0_i32 = arith.constant 0 : i32
    %c0_i32_0 = arith.constant 0 : i32
    %c0_i32_1 = arith.constant 0 : i32
    return %arg0, %c0_i32, %c0_i32_0 : i32, i32, i32
  }
}

module attributes {stable_mosaic.version = 11 : i64} {
  func.func @_fused_conv_kernel(%arg0: i32, %arg1: memref<1x16x16xbf16, #tpu.memory_space<vmem>>, %arg2: memref<16x16xbf16, #tpu.memory_space<vmem>>, %arg3: memref<16x1xf32, #tpu.memory_space<vmem>>, %arg4: memref<16x16xf32, #tpu.memory_space<vmem>>, %arg5: memref<16x1xf32, #tpu.memory_space<vmem>>, %arg6: memref<16x1xf32, #tpu.memory_space<vmem>>, %arg7: memref<1x16x16xf32, #tpu.memory_space<vmem>>) attributes {dimension_semantics = [#tpu.dimension_semantics<parallel>], iteration_bounds = array<i64: 2>, scalar_prefetch = 0 : i64, scratch_operands = 0 : i64, tpu.core_type = #tpu.core_type<tc>, window_params = [{transform_indices = @transform_0, window_bounds = array<i64: 1, 16, 16>}, {pipeline_mode = #tpu.pipeline_mode<synchronous>, transform_indices = @transform_1, window_bounds = array<i64: 16, 16>}, {pipeline_mode = #tpu.pipeline_mode<synchronous>, transform_indices = @transform_2, window_bounds = array<i64: 16, 1>}, {pipeline_mode = #tpu.pipeline_mode<synchronous>, transform_indices = @transform_3, window_bounds = array<i64: 16, 16>}, {pipeline_mode = #tpu.pipeline_mode<synchronous>, transform_indices = @transform_4, window_bounds = array<i64: 16, 1>}, {pipeline_mode = #tpu.pipeline_mode<synchronous>, transform_indices = @transform_5, window_bounds = array<i64: 16, 1>}, {transform_indices = @transform_6, window_bounds = array<i64: 1, 16, 16>}]} {
    %c0 = arith.constant 0 : index
    %c0_0 = arith.constant 0 : index
    %0 = vector.load %arg2[%c0, %c0_0] : memref<16x16xbf16, #tpu.memory_space<vmem>>, vector<16x16xbf16>
    %c0_1 = arith.constant 0 : index
    %c0_2 = arith.constant 0 : index
    %c0_3 = arith.constant 0 : index
    %1 = vector.load %arg1[%c0_1, %c0_2, %c0_3] : memref<1x16x16xbf16, #tpu.memory_space<vmem>>, vector<1x16x16xbf16>
    %2 = vector.shape_cast %1 : vector<1x16x16xbf16> to vector<16x16xbf16>
    %cst = arith.constant dense<0.000000e+00> : vector<16x16xf32>
    %3 = tpu.matmul %0, %2, %cst {dimension_numbers = #tpu.dot_dimension_numbers<[1], [0], [0], [1], [0, 0, 1, 1], [], []>} : vector<16x16xbf16>, vector<16x16xbf16>, vector<16x16xf32> -> vector<16x16xf32>
    %c0_4 = arith.constant 0 : index
    %c0_5 = arith.constant 0 : index
    %4 = vector.load %arg3[%c0_4, %c0_5] : memref<16x1xf32, #tpu.memory_space<vmem>>, vector<16x1xf32>
    %5 = vector.broadcast %4 : vector<16x1xf32> to vector<16x16xf32>
    %6 = arith.addf %3, %5 : vector<16x16xf32>
    %cst_6 = arith.constant dense<0.000000e+00> : vector<16xf32>
    %7 = vector.multi_reduction <add>, %6, %cst_6 [1] : vector<16x16xf32> to vector<16xf32>
    %8 = vector.shape_cast %7 : vector<16xf32> to vector<16x1xf32>
    %9 = arith.mulf %6, %6 : vector<16x16xf32>
    %cst_7 = arith.constant dense<0.000000e+00> : vector<16xf32>
    %10 = vector.multi_reduction <add>, %9, %cst_7 [1] : vector<16x16xf32> to vector<16xf32>
    %11 = vector.shape_cast %10 : vector<16xf32> to vector<16x1xf32>
    %12 = tpu.concatenate %8, %11 in 1 : vector<16x1xf32>, vector<16x1xf32> -> vector<16x2xf32>
    %c0_8 = arith.constant 0 : index
    %c0_9 = arith.constant 0 : index
    %13 = vector.load %arg4[%c0_8, %c0_9] : memref<16x16xf32, #tpu.memory_space<vmem>>, vector<16x16xf32>
    %cst_10 = arith.constant dense<0.000000e+00> : vector<16x2xf32>
    %14 = tpu.matmul %13, %12, %cst_10 {dimension_numbers = #tpu.dot_dimension_numbers<[1], [0], [0], [1], [0, 0, 1, 1], [], []>} : vector<16x16xf32>, vector<16x2xf32>, vector<16x2xf32> -> vector<16x2xf32>
    %15 = vector.extract_strided_slice %14 {offsets = [0, 0], sizes = [16, 1], strides = [1, 1]} : vector<16x2xf32> to vector<16x1xf32>
    %16 = vector.extract_strided_slice %14 {offsets = [0, 1], sizes = [16, 1], strides = [1, 1]} : vector<16x2xf32> to vector<16x1xf32>
    %17 = arith.mulf %15, %15 : vector<16x1xf32>
    %18 = arith.subf %16, %17 : vector<16x1xf32>
    %cst_11 = arith.constant 0.000000e+00 : f32
    %19 = vector.broadcast %cst_11 : f32 to vector<16x1xf32>
    %20 = arith.maximumf %18, %19 : vector<16x1xf32>
    %21 = vector.broadcast %15 : vector<16x1xf32> to vector<16x16xf32>
    %22 = arith.subf %6, %21 : vector<16x16xf32>
    %cst_12 = arith.constant 9.99999974E-6 : f32
    %23 = vector.broadcast %cst_12 : f32 to vector<16x1xf32>
    %24 = arith.addf %20, %23 : vector<16x1xf32>
    %25 = math.rsqrt %24 : vector<16x1xf32>
    %26 = vector.broadcast %25 : vector<16x1xf32> to vector<16x16xf32>
    %27 = arith.mulf %22, %26 : vector<16x16xf32>
    %c0_13 = arith.constant 0 : index
    %c0_14 = arith.constant 0 : index
    %28 = vector.load %arg5[%c0_13, %c0_14] : memref<16x1xf32, #tpu.memory_space<vmem>>, vector<16x1xf32>
    %29 = vector.broadcast %28 : vector<16x1xf32> to vector<16x16xf32>
    %30 = arith.mulf %27, %29 : vector<16x16xf32>
    %c0_15 = arith.constant 0 : index
    %c0_16 = arith.constant 0 : index
    %31 = vector.load %arg6[%c0_15, %c0_16] : memref<16x1xf32, #tpu.memory_space<vmem>>, vector<16x1xf32>
    %32 = vector.broadcast %31 : vector<16x1xf32> to vector<16x16xf32>
    %33 = arith.addf %30, %32 : vector<16x16xf32>
    %c0_17 = arith.constant 0 : index
    %c0_18 = arith.constant 0 : index
    %c0_19 = arith.constant 0 : index
    %34 = vector.load %arg7[%c0_17, %c0_18, %c0_19] : memref<1x16x16xf32, #tpu.memory_space<vmem>>, vector<1x16x16xf32>
    %35 = vector.shape_cast %34 : vector<1x16x16xf32> to vector<16x16xf32>
    %36 = vector.shape_cast %33 : vector<16x16xf32> to vector<1x16x16xf32>
    tpu.vector_store %arg7[%c0_17, %c0_18, %c0_19], %36 {strides = array<i32>} : memref<1x16x16xf32, #tpu.memory_space<vmem>>, vector<1x16x16xf32>,
    return
  }
  func.func @transform_0(%arg0: i32) -> (i32, i32, i32) {
    %c0_i32 = arith.constant 0 : i32
    %c0_i32_0 = arith.constant 0 : i32
    %c0_i32_1 = arith.constant 0 : i32
    return %arg0, %c0_i32, %c0_i32_0 : i32, i32, i32
  }
  func.func @transform_1(%arg0: i32) -> (i32, i32) {
    %c0_i32 = arith.constant 0 : i32
    %c0_i32_0 = arith.constant 0 : i32
    %c0_i32_1 = arith.constant 0 : i32
    return %c0_i32, %c0_i32_0 : i32, i32
  }
  func.func @transform_2(%arg0: i32) -> (i32, i32) {
    %c0_i32 = arith.constant 0 : i32
    %c0_i32_0 = arith.constant 0 : i32
    %c0_i32_1 = arith.constant 0 : i32
    return %c0_i32, %c0_i32_0 : i32, i32
  }
  func.func @transform_3(%arg0: i32) -> (i32, i32) {
    %c0_i32 = arith.constant 0 : i32
    %c0_i32_0 = arith.constant 0 : i32
    %c0_i32_1 = arith.constant 0 : i32
    return %c0_i32, %c0_i32_0 : i32, i32
  }
  func.func @transform_4(%arg0: i32) -> (i32, i32) {
    %c0_i32 = arith.constant 0 : i32
    %c0_i32_0 = arith.constant 0 : i32
    %c0_i32_1 = arith.constant 0 : i32
    return %c0_i32, %c0_i32_0 : i32, i32
  }
  func.func @transform_5(%arg0: i32) -> (i32, i32) {
    %c0_i32 = arith.constant 0 : i32
    %c0_i32_0 = arith.constant 0 : i32
    %c0_i32_1 = arith.constant 0 : i32
    return %c0_i32, %c0_i32_0 : i32, i32
  }
  func.func @transform_6(%arg0: i32) -> (i32, i32, i32) {
    %c0_i32 = arith.constant 0 : i32
    %c0_i32_0 = arith.constant 0 : i32
    %c0_i32_1 = arith.constant 0 : i32
    return %arg0, %c0_i32, %c0_i32_0 : i32, i32, i32
  }
}

module attributes {stable_mosaic.version = 11 : i64} {
  func.func @_fused_conv_kernel(%arg0: i32, %arg1: memref<1x144x4xbf16, #tpu.memory_space<vmem>>, %arg2: memref<16x144xbf16, #tpu.memory_space<vmem>>, %arg3: memref<16x1xf32, #tpu.memory_space<vmem>>, %arg4: memref<16x16xf32, #tpu.memory_space<vmem>>, %arg5: memref<16x1xf32, #tpu.memory_space<vmem>>, %arg6: memref<16x1xf32, #tpu.memory_space<vmem>>, %arg7: memref<1x16x4xf32, #tpu.memory_space<vmem>>) attributes {dimension_semantics = [#tpu.dimension_semantics<parallel>], iteration_bounds = array<i64: 2>, scalar_prefetch = 0 : i64, scratch_operands = 0 : i64, tpu.core_type = #tpu.core_type<tc>, window_params = [{transform_indices = @transform_0, window_bounds = array<i64: 1, 144, 4>}, {pipeline_mode = #tpu.pipeline_mode<synchronous>, transform_indices = @transform_1, window_bounds = array<i64: 16, 144>}, {pipeline_mode = #tpu.pipeline_mode<synchronous>, transform_indices = @transform_2, window_bounds = array<i64: 16, 1>}, {pipeline_mode = #tpu.pipeline_mode<synchronous>, transform_indices = @transform_3, window_bounds = array<i64: 16, 16>}, {pipeline_mode = #tpu.pipeline_mode<synchronous>, transform_indices = @transform_4, window_bounds = array<i64: 16, 1>}, {pipeline_mode = #tpu.pipeline_mode<synchronous>, transform_indices = @transform_5, window_bounds = array<i64: 16, 1>}, {transform_indices = @transform_6, window_bounds = array<i64: 1, 16, 4>}]} {
    %c0 = arith.constant 0 : index
    %c0_0 = arith.constant 0 : index
    %0 = vector.load %arg2[%c0, %c0_0] : memref<16x144xbf16, #tpu.memory_space<vmem>>, vector<16x144xbf16>
    %c0_1 = arith.constant 0 : index
    %c0_2 = arith.constant 0 : index
    %c0_3 = arith.constant 0 : index
    %1 = vector.load %arg1[%c0_1, %c0_2, %c0_3] : memref<1x144x4xbf16, #tpu.memory_space<vmem>>, vector<1x144x4xbf16>
    %2 = vector.shape_cast %1 : vector<1x144x4xbf16> to vector<144x4xbf16>
    %cst = arith.constant dense<0.000000e+00> : vector<16x4xf32>
    %3 = tpu.matmul %0, %2, %cst {dimension_numbers = #tpu.dot_dimension_numbers<[1], [0], [0], [1], [0, 0, 1, 1], [], []>} : vector<16x144xbf16>, vector<144x4xbf16>, vector<16x4xf32> -> vector<16x4xf32>
    %c0_4 = arith.constant 0 : index
    %c0_5 = arith.constant 0 : index
    %4 = vector.load %arg3[%c0_4, %c0_5] : memref<16x1xf32, #tpu.memory_space<vmem>>, vector<16x1xf32>
    %5 = vector.broadcast %4 : vector<16x1xf32> to vector<16x4xf32>
    %6 = arith.addf %3, %5 : vector<16x4xf32>
    %cst_6 = arith.constant dense<0.000000e+00> : vector<16xf32>
    %7 = vector.multi_reduction <add>, %6, %cst_6 [1] : vector<16x4xf32> to vector<16xf32>
    %8 = vector.shape_cast %7 : vector<16xf32> to vector<16x1xf32>
    %9 = arith.mulf %6, %6 : vector<16x4xf32>
    %cst_7 = arith.constant dense<0.000000e+00> : vector<16xf32>
    %10 = vector.multi_reduction <add>, %9, %cst_7 [1] : vector<16x4xf32> to vector<16xf32>
    %11 = vector.shape_cast %10 : vector<16xf32> to vector<16x1xf32>
    %12 = tpu.concatenate %8, %11 in 1 : vector<16x1xf32>, vector<16x1xf32> -> vector<16x2xf32>
    %c0_8 = arith.constant 0 : index
    %c0_9 = arith.constant 0 : index
    %13 = vector.load %arg4[%c0_8, %c0_9] : memref<16x16xf32, #tpu.memory_space<vmem>>, vector<16x16xf32>
    %cst_10 = arith.constant dense<0.000000e+00> : vector<16x2xf32>
    %14 = tpu.matmul %13, %12, %cst_10 {dimension_numbers = #tpu.dot_dimension_numbers<[1], [0], [0], [1], [0, 0, 1, 1], [], []>} : vector<16x16xf32>, vector<16x2xf32>, vector<16x2xf32> -> vector<16x2xf32>
    %15 = vector.extract_strided_slice %14 {offsets = [0, 0], sizes = [16, 1], strides = [1, 1]} : vector<16x2xf32> to vector<16x1xf32>
    %16 = vector.extract_strided_slice %14 {offsets = [0, 1], sizes = [16, 1], strides = [1, 1]} : vector<16x2xf32> to vector<16x1xf32>
    %17 = arith.mulf %15, %15 : vector<16x1xf32>
    %18 = arith.subf %16, %17 : vector<16x1xf32>
    %cst_11 = arith.constant 0.000000e+00 : f32
    %19 = vector.broadcast %cst_11 : f32 to vector<16x1xf32>
    %20 = arith.maximumf %18, %19 : vector<16x1xf32>
    %21 = vector.broadcast %15 : vector<16x1xf32> to vector<16x4xf32>
    %22 = arith.subf %6, %21 : vector<16x4xf32>
    %cst_12 = arith.constant 9.99999974E-6 : f32
    %23 = vector.broadcast %cst_12 : f32 to vector<16x1xf32>
    %24 = arith.addf %20, %23 : vector<16x1xf32>
    %25 = math.rsqrt %24 : vector<16x1xf32>
    %26 = vector.broadcast %25 : vector<16x1xf32> to vector<16x4xf32>
    %27 = arith.mulf %22, %26 : vector<16x4xf32>
    %c0_13 = arith.constant 0 : index
    %c0_14 = arith.constant 0 : index
    %28 = vector.load %arg5[%c0_13, %c0_14] : memref<16x1xf32, #tpu.memory_space<vmem>>, vector<16x1xf32>
    %29 = vector.broadcast %28 : vector<16x1xf32> to vector<16x4xf32>
    %30 = arith.mulf %27, %29 : vector<16x4xf32>
    %c0_15 = arith.constant 0 : index
    %c0_16 = arith.constant 0 : index
    %31 = vector.load %arg6[%c0_15, %c0_16] : memref<16x1xf32, #tpu.memory_space<vmem>>, vector<16x1xf32>
    %32 = vector.broadcast %31 : vector<16x1xf32> to vector<16x4xf32>
    %33 = arith.addf %30, %32 : vector<16x4xf32>
    %cst_17 = arith.constant 0.000000e+00 : f32
    %34 = vector.broadcast %cst_17 : f32 to vector<16x4xf32>
    %35 = arith.maximumf %33, %34 : vector<16x4xf32>
    %c0_18 = arith.constant 0 : index
    %c0_19 = arith.constant 0 : index
    %c0_20 = arith.constant 0 : index
    %36 = vector.load %arg7[%c0_18, %c0_19, %c0_20] : memref<1x16x4xf32, #tpu.memory_space<vmem>>, vector<1x16x4xf32>
    %37 = vector.shape_cast %36 : vector<1x16x4xf32> to vector<16x4xf32>
    %38 = vector.shape_cast %35 : vector<16x4xf32> to vector<1x16x4xf32>
    tpu.vector_store %arg7[%c0_18, %c0_19, %c0_20], %38 {strides = array<i32>} : memref<1x16x4xf32, #tpu.memory_space<vmem>>, vector<1x16x4xf32>,
    return
  }
  func.func @transform_0(%arg0: i32) -> (i32, i32, i32) {
    %c0_i32 = arith.constant 0 : i32
    %c0_i32_0 = arith.constant 0 : i32
    %c0_i32_1 = arith.constant 0 : i32
    return %arg0, %c0_i32, %c0_i32_0 : i32, i32, i32
  }
  func.func @transform_1(%arg0: i32) -> (i32, i32) {
    %c0_i32 = arith.constant 0 : i32
    %c0_i32_0 = arith.constant 0 : i32
    %c0_i32_1 = arith.constant 0 : i32
    return %c0_i32, %c0_i32_0 : i32, i32
  }
  func.func @transform_2(%arg0: i32) -> (i32, i32) {
    %c0_i32 = arith.constant 0 : i32
    %c0_i32_0 = arith.constant 0 : i32
    %c0_i32_1 = arith.constant 0 : i32
    return %c0_i32, %c0_i32_0 : i32, i32
  }
  func.func @transform_3(%arg0: i32) -> (i32, i32) {
    %c0_i32 = arith.constant 0 : i32
    %c0_i32_0 = arith.constant 0 : i32
    %c0_i32_1 = arith.constant 0 : i32
    return %c0_i32, %c0_i32_0 : i32, i32
  }
  func.func @transform_4(%arg0: i32) -> (i32, i32) {
    %c0_i32 = arith.constant 0 : i32
    %c0_i32_0 = arith.constant 0 : i32
    %c0_i32_1 = arith.constant 0 : i32
    return %c0_i32, %c0_i32_0 : i32, i32
  }
  func.func @transform_5(%arg0: i32) -> (i32, i32) {
    %c0_i32 = arith.constant 0 : i32
    %c0_i32_0 = arith.constant 0 : i32
    %c0_i32_1 = arith.constant 0 : i32
    return %c0_i32, %c0_i32_0 : i32, i32
  }
  func.func @transform_6(%arg0: i32) -> (i32, i32, i32) {
    %c0_i32 = arith.constant 0 : i32
    %c0_i32_0 = arith.constant 0 : i32
    %c0_i32_1 = arith.constant 0 : i32
    return %arg0, %c0_i32, %c0_i32_0 : i32, i32, i32
  }
}

module attributes {stable_mosaic.version = 11 : i64} {
  func.func @_fused_conv_kernel(%arg0: i32, %arg1: memref<1x16x4xbf16, #tpu.memory_space<vmem>>, %arg2: memref<16x16xbf16, #tpu.memory_space<vmem>>, %arg3: memref<16x1xf32, #tpu.memory_space<vmem>>, %arg4: memref<16x16xf32, #tpu.memory_space<vmem>>, %arg5: memref<16x1xf32, #tpu.memory_space<vmem>>, %arg6: memref<16x1xf32, #tpu.memory_space<vmem>>, %arg7: memref<1x16x4xf32, #tpu.memory_space<vmem>>) attributes {dimension_semantics = [#tpu.dimension_semantics<parallel>], iteration_bounds = array<i64: 2>, scalar_prefetch = 0 : i64, scratch_operands = 0 : i64, tpu.core_type = #tpu.core_type<tc>, window_params = [{transform_indices = @transform_0, window_bounds = array<i64: 1, 16, 4>}, {pipeline_mode = #tpu.pipeline_mode<synchronous>, transform_indices = @transform_1, window_bounds = array<i64: 16, 16>}, {pipeline_mode = #tpu.pipeline_mode<synchronous>, transform_indices = @transform_2, window_bounds = array<i64: 16, 1>}, {pipeline_mode = #tpu.pipeline_mode<synchronous>, transform_indices = @transform_3, window_bounds = array<i64: 16, 16>}, {pipeline_mode = #tpu.pipeline_mode<synchronous>, transform_indices = @transform_4, window_bounds = array<i64: 16, 1>}, {pipeline_mode = #tpu.pipeline_mode<synchronous>, transform_indices = @transform_5, window_bounds = array<i64: 16, 1>}, {transform_indices = @transform_6, window_bounds = array<i64: 1, 16, 4>}]} {
    %c0 = arith.constant 0 : index
    %c0_0 = arith.constant 0 : index
    %0 = vector.load %arg2[%c0, %c0_0] : memref<16x16xbf16, #tpu.memory_space<vmem>>, vector<16x16xbf16>
    %c0_1 = arith.constant 0 : index
    %c0_2 = arith.constant 0 : index
    %c0_3 = arith.constant 0 : index
    %1 = vector.load %arg1[%c0_1, %c0_2, %c0_3] : memref<1x16x4xbf16, #tpu.memory_space<vmem>>, vector<1x16x4xbf16>
    %2 = vector.shape_cast %1 : vector<1x16x4xbf16> to vector<16x4xbf16>
    %cst = arith.constant dense<0.000000e+00> : vector<16x4xf32>
    %3 = tpu.matmul %0, %2, %cst {dimension_numbers = #tpu.dot_dimension_numbers<[1], [0], [0], [1], [0, 0, 1, 1], [], []>} : vector<16x16xbf16>, vector<16x4xbf16>, vector<16x4xf32> -> vector<16x4xf32>
    %c0_4 = arith.constant 0 : index
    %c0_5 = arith.constant 0 : index
    %4 = vector.load %arg3[%c0_4, %c0_5] : memref<16x1xf32, #tpu.memory_space<vmem>>, vector<16x1xf32>
    %5 = vector.broadcast %4 : vector<16x1xf32> to vector<16x4xf32>
    %6 = arith.addf %3, %5 : vector<16x4xf32>
    %cst_6 = arith.constant dense<0.000000e+00> : vector<16xf32>
    %7 = vector.multi_reduction <add>, %6, %cst_6 [1] : vector<16x4xf32> to vector<16xf32>
    %8 = vector.shape_cast %7 : vector<16xf32> to vector<16x1xf32>
    %9 = arith.mulf %6, %6 : vector<16x4xf32>
    %cst_7 = arith.constant dense<0.000000e+00> : vector<16xf32>
    %10 = vector.multi_reduction <add>, %9, %cst_7 [1] : vector<16x4xf32> to vector<16xf32>
    %11 = vector.shape_cast %10 : vector<16xf32> to vector<16x1xf32>
    %12 = tpu.concatenate %8, %11 in 1 : vector<16x1xf32>, vector<16x1xf32> -> vector<16x2xf32>
    %c0_8 = arith.constant 0 : index
    %c0_9 = arith.constant 0 : index
    %13 = vector.load %arg4[%c0_8, %c0_9] : memref<16x16xf32, #tpu.memory_space<vmem>>, vector<16x16xf32>
    %cst_10 = arith.constant dense<0.000000e+00> : vector<16x2xf32>
    %14 = tpu.matmul %13, %12, %cst_10 {dimension_numbers = #tpu.dot_dimension_numbers<[1], [0], [0], [1], [0, 0, 1, 1], [], []>} : vector<16x16xf32>, vector<16x2xf32>, vector<16x2xf32> -> vector<16x2xf32>
    %15 = vector.extract_strided_slice %14 {offsets = [0, 0], sizes = [16, 1], strides = [1, 1]} : vector<16x2xf32> to vector<16x1xf32>
    %16 = vector.extract_strided_slice %14 {offsets = [0, 1], sizes = [16, 1], strides = [1, 1]} : vector<16x2xf32> to vector<16x1xf32>
    %17 = arith.mulf %15, %15 : vector<16x1xf32>
    %18 = arith.subf %16, %17 : vector<16x1xf32>
    %cst_11 = arith.constant 0.000000e+00 : f32
    %19 = vector.broadcast %cst_11 : f32 to vector<16x1xf32>
    %20 = arith.maximumf %18, %19 : vector<16x1xf32>
    %21 = vector.broadcast %15 : vector<16x1xf32> to vector<16x4xf32>
    %22 = arith.subf %6, %21 : vector<16x4xf32>
    %cst_12 = arith.constant 9.99999974E-6 : f32
    %23 = vector.broadcast %cst_12 : f32 to vector<16x1xf32>
    %24 = arith.addf %20, %23 : vector<16x1xf32>
    %25 = math.rsqrt %24 : vector<16x1xf32>
    %26 = vector.broadcast %25 : vector<16x1xf32> to vector<16x4xf32>
    %27 = arith.mulf %22, %26 : vector<16x4xf32>
    %c0_13 = arith.constant 0 : index
    %c0_14 = arith.constant 0 : index
    %28 = vector.load %arg5[%c0_13, %c0_14] : memref<16x1xf32, #tpu.memory_space<vmem>>, vector<16x1xf32>
    %29 = vector.broadcast %28 : vector<16x1xf32> to vector<16x4xf32>
    %30 = arith.mulf %27, %29 : vector<16x4xf32>
    %c0_15 = arith.constant 0 : index
    %c0_16 = arith.constant 0 : index
    %31 = vector.load %arg6[%c0_15, %c0_16] : memref<16x1xf32, #tpu.memory_space<vmem>>, vector<16x1xf32>
    %32 = vector.broadcast %31 : vector<16x1xf32> to vector<16x4xf32>
    %33 = arith.addf %30, %32 : vector<16x4xf32>
    %c0_17 = arith.constant 0 : index
    %c0_18 = arith.constant 0 : index
    %c0_19 = arith.constant 0 : index
    %34 = vector.load %arg7[%c0_17, %c0_18, %c0_19] : memref<1x16x4xf32, #tpu.memory_space<vmem>>, vector<1x16x4xf32>
    %35 = vector.shape_cast %34 : vector<1x16x4xf32> to vector<16x4xf32>
    %36 = vector.shape_cast %33 : vector<16x4xf32> to vector<1x16x4xf32>
    tpu.vector_store %arg7[%c0_17, %c0_18, %c0_19], %36 {strides = array<i32>} : memref<1x16x4xf32, #tpu.memory_space<vmem>>, vector<1x16x4xf32>,
    return
  }
  func.func @transform_0(%arg0: i32) -> (i32, i32, i32) {
    %c0_i32 = arith.constant 0 : i32
    %c0_i32_0 = arith.constant 0 : i32
    %c0_i32_1 = arith.constant 0 : i32
    return %arg0, %c0_i32, %c0_i32_0 : i32, i32, i32
  }
  func.func @transform_1(%arg0: i32) -> (i32, i32) {
    %c0_i32 = arith.constant 0 : i32
    %c0_i32_0 = arith.constant 0 : i32
    %c0_i32_1 = arith.constant 0 : i32
    return %c0_i32, %c0_i32_0 : i32, i32
  }
  func.func @transform_2(%arg0: i32) -> (i32, i32) {
    %c0_i32 = arith.constant 0 : i32
    %c0_i32_0 = arith.constant 0 : i32
    %c0_i32_1 = arith.constant 0 : i32
    return %c0_i32, %c0_i32_0 : i32, i32
  }
  func.func @transform_3(%arg0: i32) -> (i32, i32) {
    %c0_i32 = arith.constant 0 : i32
    %c0_i32_0 = arith.constant 0 : i32
    %c0_i32_1 = arith.constant 0 : i32
    return %c0_i32, %c0_i32_0 : i32, i32
  }
  func.func @transform_4(%arg0: i32) -> (i32, i32) {
    %c0_i32 = arith.constant 0 : i32
    %c0_i32_0 = arith.constant 0 : i32
    %c0_i32_1 = arith.constant 0 : i32
    return %c0_i32, %c0_i32_0 : i32, i32
  }
  func.func @transform_5(%arg0: i32) -> (i32, i32) {
    %c0_i32 = arith.constant 0 : i32
    %c0_i32_0 = arith.constant 0 : i32
    %c0_i32_1 = arith.constant 0 : i32
    return %c0_i32, %c0_i32_0 : i32, i32
  }
  func.func @transform_6(%arg0: i32) -> (i32, i32, i32) {
    %c0_i32 = arith.constant 0 : i32
    %c0_i32_0 = arith.constant 0 : i32
    %c0_i32_1 = arith.constant 0 : i32
    return %arg0, %c0_i32, %c0_i32_0 : i32, i32, i32
  }
}

module attributes {stable_mosaic.version = 11 : i64} {
  func.func @_fused_conv_kernel(%arg0: i32, %arg1: memref<1x144x4xbf16, #tpu.memory_space<vmem>>, %arg2: memref<16x144xbf16, #tpu.memory_space<vmem>>, %arg3: memref<16x1xf32, #tpu.memory_space<vmem>>, %arg4: memref<16x16xf32, #tpu.memory_space<vmem>>, %arg5: memref<16x1xf32, #tpu.memory_space<vmem>>, %arg6: memref<16x1xf32, #tpu.memory_space<vmem>>, %arg7: memref<1x16x4xf32, #tpu.memory_space<vmem>>, %arg8: memref<1x16x4xf32, #tpu.memory_space<vmem>>) attributes {dimension_semantics = [#tpu.dimension_semantics<parallel>], iteration_bounds = array<i64: 2>, scalar_prefetch = 0 : i64, scratch_operands = 0 : i64, tpu.core_type = #tpu.core_type<tc>, window_params = [{transform_indices = @transform_0, window_bounds = array<i64: 1, 144, 4>}, {pipeline_mode = #tpu.pipeline_mode<synchronous>, transform_indices = @transform_1, window_bounds = array<i64: 16, 144>}, {pipeline_mode = #tpu.pipeline_mode<synchronous>, transform_indices = @transform_2, window_bounds = array<i64: 16, 1>}, {pipeline_mode = #tpu.pipeline_mode<synchronous>, transform_indices = @transform_3, window_bounds = array<i64: 16, 16>}, {pipeline_mode = #tpu.pipeline_mode<synchronous>, transform_indices = @transform_4, window_bounds = array<i64: 16, 1>}, {pipeline_mode = #tpu.pipeline_mode<synchronous>, transform_indices = @transform_5, window_bounds = array<i64: 16, 1>}, {transform_indices = @transform_6, window_bounds = array<i64: 1, 16, 4>}, {transform_indices = @transform_7, window_bounds = array<i64: 1, 16, 4>}]} {
    %c0 = arith.constant 0 : index
    %c0_0 = arith.constant 0 : index
    %0 = vector.load %arg2[%c0, %c0_0] : memref<16x144xbf16, #tpu.memory_space<vmem>>, vector<16x144xbf16>
    %c0_1 = arith.constant 0 : index
    %c0_2 = arith.constant 0 : index
    %c0_3 = arith.constant 0 : index
    %1 = vector.load %arg1[%c0_1, %c0_2, %c0_3] : memref<1x144x4xbf16, #tpu.memory_space<vmem>>, vector<1x144x4xbf16>
    %2 = vector.shape_cast %1 : vector<1x144x4xbf16> to vector<144x4xbf16>
    %cst = arith.constant dense<0.000000e+00> : vector<16x4xf32>
    %3 = tpu.matmul %0, %2, %cst {dimension_numbers = #tpu.dot_dimension_numbers<[1], [0], [0], [1], [0, 0, 1, 1], [], []>} : vector<16x144xbf16>, vector<144x4xbf16>, vector<16x4xf32> -> vector<16x4xf32>
    %c0_4 = arith.constant 0 : index
    %c0_5 = arith.constant 0 : index
    %4 = vector.load %arg3[%c0_4, %c0_5] : memref<16x1xf32, #tpu.memory_space<vmem>>, vector<16x1xf32>
    %5 = vector.broadcast %4 : vector<16x1xf32> to vector<16x4xf32>
    %6 = arith.addf %3, %5 : vector<16x4xf32>
    %cst_6 = arith.constant dense<0.000000e+00> : vector<16xf32>
    %7 = vector.multi_reduction <add>, %6, %cst_6 [1] : vector<16x4xf32> to vector<16xf32>
    %8 = vector.shape_cast %7 : vector<16xf32> to vector<16x1xf32>
    %9 = arith.mulf %6, %6 : vector<16x4xf32>
    %cst_7 = arith.constant dense<0.000000e+00> : vector<16xf32>
    %10 = vector.multi_reduction <add>, %9, %cst_7 [1] : vector<16x4xf32> to vector<16xf32>
    %11 = vector.shape_cast %10 : vector<16xf32> to vector<16x1xf32>
    %12 = tpu.concatenate %8, %11 in 1 : vector<16x1xf32>, vector<16x1xf32> -> vector<16x2xf32>
    %c0_8 = arith.constant 0 : index
    %c0_9 = arith.constant 0 : index
    %13 = vector.load %arg4[%c0_8, %c0_9] : memref<16x16xf32, #tpu.memory_space<vmem>>, vector<16x16xf32>
    %cst_10 = arith.constant dense<0.000000e+00> : vector<16x2xf32>
    %14 = tpu.matmul %13, %12, %cst_10 {dimension_numbers = #tpu.dot_dimension_numbers<[1], [0], [0], [1], [0, 0, 1, 1], [], []>} : vector<16x16xf32>, vector<16x2xf32>, vector<16x2xf32> -> vector<16x2xf32>
    %15 = vector.extract_strided_slice %14 {offsets = [0, 0], sizes = [16, 1], strides = [1, 1]} : vector<16x2xf32> to vector<16x1xf32>
    %16 = vector.extract_strided_slice %14 {offsets = [0, 1], sizes = [16, 1], strides = [1, 1]} : vector<16x2xf32> to vector<16x1xf32>
    %17 = arith.mulf %15, %15 : vector<16x1xf32>
    %18 = arith.subf %16, %17 : vector<16x1xf32>
    %cst_11 = arith.constant 0.000000e+00 : f32
    %19 = vector.broadcast %cst_11 : f32 to vector<16x1xf32>
    %20 = arith.maximumf %18, %19 : vector<16x1xf32>
    %21 = vector.broadcast %15 : vector<16x1xf32> to vector<16x4xf32>
    %22 = arith.subf %6, %21 : vector<16x4xf32>
    %cst_12 = arith.constant 9.99999974E-6 : f32
    %23 = vector.broadcast %cst_12 : f32 to vector<16x1xf32>
    %24 = arith.addf %20, %23 : vector<16x1xf32>
    %25 = math.rsqrt %24 : vector<16x1xf32>
    %26 = vector.broadcast %25 : vector<16x1xf32> to vector<16x4xf32>
    %27 = arith.mulf %22, %26 : vector<16x4xf32>
    %c0_13 = arith.constant 0 : index
    %c0_14 = arith.constant 0 : index
    %28 = vector.load %arg5[%c0_13, %c0_14] : memref<16x1xf32, #tpu.memory_space<vmem>>, vector<16x1xf32>
    %29 = vector.broadcast %28 : vector<16x1xf32> to vector<16x4xf32>
    %30 = arith.mulf %27, %29 : vector<16x4xf32>
    %c0_15 = arith.constant 0 : index
    %c0_16 = arith.constant 0 : index
    %31 = vector.load %arg6[%c0_15, %c0_16] : memref<16x1xf32, #tpu.memory_space<vmem>>, vector<16x1xf32>
    %32 = vector.broadcast %31 : vector<16x1xf32> to vector<16x4xf32>
    %33 = arith.addf %30, %32 : vector<16x4xf32>
    %cst_17 = arith.constant 0.000000e+00 : f32
    %34 = vector.broadcast %cst_17 : f32 to vector<16x4xf32>
    %35 = arith.maximumf %33, %34 : vector<16x4xf32>
    %c0_18 = arith.constant 0 : index
    %c0_19 = arith.constant 0 : index
    %c0_20 = arith.constant 0 : index
    %36 = vector.load %arg7[%c0_18, %c0_19, %c0_20] : memref<1x16x4xf32, #tpu.memory_space<vmem>>, vector<1x16x4xf32>
    %37 = vector.shape_cast %36 : vector<1x16x4xf32> to vector<16x4xf32>
    %38 = arith.addf %35, %37 : vector<16x4xf32>
    %cst_21 = arith.constant 0.000000e+00 : f32
    %39 = vector.broadcast %cst_21 : f32 to vector<16x4xf32>
    %40 = arith.maximumf %38, %39 : vector<16x4xf32>
    %c0_22 = arith.constant 0 : index
    %c0_23 = arith.constant 0 : index
    %c0_24 = arith.constant 0 : index
    %41 = vector.load %arg8[%c0_22, %c0_23, %c0_24] : memref<1x16x4xf32, #tpu.memory_space<vmem>>, vector<1x16x4xf32>
    %42 = vector.shape_cast %41 : vector<1x16x4xf32> to vector<16x4xf32>
    %43 = vector.shape_cast %40 : vector<16x4xf32> to vector<1x16x4xf32>
    tpu.vector_store %arg8[%c0_22, %c0_23, %c0_24], %43 {strides = array<i32>} : memref<1x16x4xf32, #tpu.memory_space<vmem>>, vector<1x16x4xf32>,
    return
  }
  func.func @transform_0(%arg0: i32) -> (i32, i32, i32) {
    %c0_i32 = arith.constant 0 : i32
    %c0_i32_0 = arith.constant 0 : i32
    %c0_i32_1 = arith.constant 0 : i32
    return %arg0, %c0_i32, %c0_i32_0 : i32, i32, i32
  }
  func.func @transform_1(%arg0: i32) -> (i32, i32) {
    %c0_i32 = arith.constant 0 : i32
    %c0_i32_0 = arith.constant 0 : i32
    %c0_i32_1 = arith.constant 0 : i32
    return %c0_i32, %c0_i32_0 : i32, i32
  }
  func.func @transform_2(%arg0: i32) -> (i32, i32) {
    %c0_i32 = arith.constant 0 : i32
    %c0_i32_0 = arith.constant 0 : i32
    %c0_i32_1 = arith.constant 0 : i32
    return %c0_i32, %c0_i32_0 : i32, i32
  }
  func.func @transform_3(%arg0: i32) -> (i32, i32) {
    %c0_i32 = arith.constant 0 : i32
    %c0_i32_0 = arith.constant 0 : i32
    %c0_i32_1 = arith.constant 0 : i32
    return %c0_i32, %c0_i32_0 : i32, i32
  }
  func.func @transform_4(%arg0: i32) -> (i32, i32) {
    %c0_i32 = arith.constant 0 : i32
    %c0_i32_0 = arith.constant 0 : i32
    %c0_i32_1 = arith.constant 0 : i32
    return %c0_i32, %c0_i32_0 : i32, i32
  }
  func.func @transform_5(%arg0: i32) -> (i32, i32) {
    %c0_i32 = arith.constant 0 : i32
    %c0_i32_0 = arith.constant 0 : i32
    %c0_i32_1 = arith.constant 0 : i32
    return %c0_i32, %c0_i32_0 : i32, i32
  }
  func.func @transform_6(%arg0: i32) -> (i32, i32, i32) {
    %c0_i32 = arith.constant 0 : i32
    %c0_i32_0 = arith.constant 0 : i32
    %c0_i32_1 = arith.constant 0 : i32
    return %arg0, %c0_i32, %c0_i32_0 : i32, i32, i32
  }
  func.func @transform_7(%arg0: i32) -> (i32, i32, i32) {
    %c0_i32 = arith.constant 0 : i32
    %c0_i32_0 = arith.constant 0 : i32
    %c0_i32_1 = arith.constant 0 : i32
    return %arg0, %c0_i32, %c0_i32_0 : i32, i32, i32
  }
}

module attributes {stable_mosaic.version = 11 : i64} {
  func.func @_fused_conv_kernel(%arg0: i32, %arg1: memref<1x16x4xbf16, #tpu.memory_space<vmem>>, %arg2: memref<32x16xbf16, #tpu.memory_space<vmem>>, %arg3: memref<32x1xf32, #tpu.memory_space<vmem>>, %arg4: memref<1x32x4xf32, #tpu.memory_space<vmem>>) attributes {dimension_semantics = [#tpu.dimension_semantics<parallel>], iteration_bounds = array<i64: 2>, scalar_prefetch = 0 : i64, scratch_operands = 0 : i64, tpu.core_type = #tpu.core_type<tc>, window_params = [{transform_indices = @transform_0, window_bounds = array<i64: 1, 16, 4>}, {pipeline_mode = #tpu.pipeline_mode<synchronous>, transform_indices = @transform_1, window_bounds = array<i64: 32, 16>}, {pipeline_mode = #tpu.pipeline_mode<synchronous>, transform_indices = @transform_2, window_bounds = array<i64: 32, 1>}, {transform_indices = @transform_3, window_bounds = array<i64: 1, 32, 4>}]} {
    %c0 = arith.constant 0 : index
    %c0_0 = arith.constant 0 : index
    %0 = vector.load %arg2[%c0, %c0_0] : memref<32x16xbf16, #tpu.memory_space<vmem>>, vector<32x16xbf16>
    %c0_1 = arith.constant 0 : index
    %c0_2 = arith.constant 0 : index
    %c0_3 = arith.constant 0 : index
    %1 = vector.load %arg1[%c0_1, %c0_2, %c0_3] : memref<1x16x4xbf16, #tpu.memory_space<vmem>>, vector<1x16x4xbf16>
    %2 = vector.shape_cast %1 : vector<1x16x4xbf16> to vector<16x4xbf16>
    %cst = arith.constant dense<0.000000e+00> : vector<32x4xf32>
    %3 = tpu.matmul %0, %2, %cst {dimension_numbers = #tpu.dot_dimension_numbers<[1], [0], [0], [1], [0, 0, 1, 1], [], []>} : vector<32x16xbf16>, vector<16x4xbf16>, vector<32x4xf32> -> vector<32x4xf32>
    %c0_4 = arith.constant 0 : index
    %c0_5 = arith.constant 0 : index
    %4 = vector.load %arg3[%c0_4, %c0_5] : memref<32x1xf32, #tpu.memory_space<vmem>>, vector<32x1xf32>
    %5 = vector.broadcast %4 : vector<32x1xf32> to vector<32x4xf32>
    %6 = arith.addf %3, %5 : vector<32x4xf32>
    %c0_6 = arith.constant 0 : index
    %c0_7 = arith.constant 0 : index
    %c0_8 = arith.constant 0 : index
    %7 = vector.load %arg4[%c0_6, %c0_7, %c0_8] : memref<1x32x4xf32, #tpu.memory_space<vmem>>, vector<1x32x4xf32>
    %8 = vector.shape_cast %7 : vector<1x32x4xf32> to vector<32x4xf32>
    %9 = vector.shape_cast %6 : vector<32x4xf32> to vector<1x32x4xf32>
    tpu.vector_store %arg4[%c0_6, %c0_7, %c0_8], %9 {strides = array<i32>} : memref<1x32x4xf32, #tpu.memory_space<vmem>>, vector<1x32x4xf32>,
    return
  }
  func.func @transform_0(%arg0: i32) -> (i32, i32, i32) {
    %c0_i32 = arith.constant 0 : i32
    %c0_i32_0 = arith.constant 0 : i32
    %c0_i32_1 = arith.constant 0 : i32
    return %arg0, %c0_i32, %c0_i32_0 : i32, i32, i32
  }
  func.func @transform_1(%arg0: i32) -> (i32, i32) {
    %c0_i32 = arith.constant 0 : i32
    %c0_i32_0 = arith.constant 0 : i32
    %c0_i32_1 = arith.constant 0 : i32
    return %c0_i32, %c0_i32_0 : i32, i32
  }
  func.func @transform_2(%arg0: i32) -> (i32, i32) {
    %c0_i32 = arith.constant 0 : i32
    %c0_i32_0 = arith.constant 0 : i32
    %c0_i32_1 = arith.constant 0 : i32
    return %c0_i32, %c0_i32_0 : i32, i32
  }
  func.func @transform_3(%arg0: i32) -> (i32, i32, i32) {
    %c0_i32 = arith.constant 0 : i32
    %c0_i32_0 = arith.constant 0 : i32
    %c0_i32_1 = arith.constant 0 : i32
    return %arg0, %c0_i32, %c0_i32_0 : i32, i32, i32
  }
}

module attributes {stable_mosaic.version = 11 : i64} {
  func.func @_fused_conv_kernel(%arg0: i32, %arg1: memref<1x432x16xbf16, #tpu.memory_space<vmem>>, %arg2: memref<16x432xbf16, #tpu.memory_space<vmem>>, %arg3: memref<16x1xf32, #tpu.memory_space<vmem>>, %arg4: memref<16x16xf32, #tpu.memory_space<vmem>>, %arg5: memref<16x1xf32, #tpu.memory_space<vmem>>, %arg6: memref<16x1xf32, #tpu.memory_space<vmem>>, %arg7: memref<1x16x16xf32, #tpu.memory_space<vmem>>) attributes {dimension_semantics = [#tpu.dimension_semantics<parallel>], iteration_bounds = array<i64: 2>, scalar_prefetch = 0 : i64, scratch_operands = 0 : i64, tpu.core_type = #tpu.core_type<tc>, window_params = [{transform_indices = @transform_0, window_bounds = array<i64: 1, 432, 16>}, {pipeline_mode = #tpu.pipeline_mode<synchronous>, transform_indices = @transform_1, window_bounds = array<i64: 16, 432>}, {pipeline_mode = #tpu.pipeline_mode<synchronous>, transform_indices = @transform_2, window_bounds = array<i64: 16, 1>}, {pipeline_mode = #tpu.pipeline_mode<synchronous>, transform_indices = @transform_3, window_bounds = array<i64: 16, 16>}, {pipeline_mode = #tpu.pipeline_mode<synchronous>, transform_indices = @transform_4, window_bounds = array<i64: 16, 1>}, {pipeline_mode = #tpu.pipeline_mode<synchronous>, transform_indices = @transform_5, window_bounds = array<i64: 16, 1>}, {transform_indices = @transform_6, window_bounds = array<i64: 1, 16, 16>}]} {
    %c0 = arith.constant 0 : index
    %c0_0 = arith.constant 0 : index
    %0 = vector.load %arg2[%c0, %c0_0] : memref<16x432xbf16, #tpu.memory_space<vmem>>, vector<16x432xbf16>
    %c0_1 = arith.constant 0 : index
    %c0_2 = arith.constant 0 : index
    %c0_3 = arith.constant 0 : index
    %1 = vector.load %arg1[%c0_1, %c0_2, %c0_3] : memref<1x432x16xbf16, #tpu.memory_space<vmem>>, vector<1x432x16xbf16>
    %2 = vector.shape_cast %1 : vector<1x432x16xbf16> to vector<432x16xbf16>
    %cst = arith.constant dense<0.000000e+00> : vector<16x16xf32>
    %3 = tpu.matmul %0, %2, %cst {dimension_numbers = #tpu.dot_dimension_numbers<[1], [0], [0], [1], [0, 0, 1, 1], [], []>} : vector<16x432xbf16>, vector<432x16xbf16>, vector<16x16xf32> -> vector<16x16xf32>
    %c0_4 = arith.constant 0 : index
    %c0_5 = arith.constant 0 : index
    %4 = vector.load %arg3[%c0_4, %c0_5] : memref<16x1xf32, #tpu.memory_space<vmem>>, vector<16x1xf32>
    %5 = vector.broadcast %4 : vector<16x1xf32> to vector<16x16xf32>
    %6 = arith.addf %3, %5 : vector<16x16xf32>
    %cst_6 = arith.constant dense<0.000000e+00> : vector<16xf32>
    %7 = vector.multi_reduction <add>, %6, %cst_6 [1] : vector<16x16xf32> to vector<16xf32>
    %8 = vector.shape_cast %7 : vector<16xf32> to vector<16x1xf32>
    %9 = arith.mulf %6, %6 : vector<16x16xf32>
    %cst_7 = arith.constant dense<0.000000e+00> : vector<16xf32>
    %10 = vector.multi_reduction <add>, %9, %cst_7 [1] : vector<16x16xf32> to vector<16xf32>
    %11 = vector.shape_cast %10 : vector<16xf32> to vector<16x1xf32>
    %12 = tpu.concatenate %8, %11 in 1 : vector<16x1xf32>, vector<16x1xf32> -> vector<16x2xf32>
    %c0_8 = arith.constant 0 : index
    %c0_9 = arith.constant 0 : index
    %13 = vector.load %arg4[%c0_8, %c0_9] : memref<16x16xf32, #tpu.memory_space<vmem>>, vector<16x16xf32>
    %cst_10 = arith.constant dense<0.000000e+00> : vector<16x2xf32>
    %14 = tpu.matmul %13, %12, %cst_10 {dimension_numbers = #tpu.dot_dimension_numbers<[1], [0], [0], [1], [0, 0, 1, 1], [], []>} : vector<16x16xf32>, vector<16x2xf32>, vector<16x2xf32> -> vector<16x2xf32>
    %15 = vector.extract_strided_slice %14 {offsets = [0, 0], sizes = [16, 1], strides = [1, 1]} : vector<16x2xf32> to vector<16x1xf32>
    %16 = vector.extract_strided_slice %14 {offsets = [0, 1], sizes = [16, 1], strides = [1, 1]} : vector<16x2xf32> to vector<16x1xf32>
    %17 = arith.mulf %15, %15 : vector<16x1xf32>
    %18 = arith.subf %16, %17 : vector<16x1xf32>
    %cst_11 = arith.constant 0.000000e+00 : f32
    %19 = vector.broadcast %cst_11 : f32 to vector<16x1xf32>
    %20 = arith.maximumf %18, %19 : vector<16x1xf32>
    %21 = vector.broadcast %15 : vector<16x1xf32> to vector<16x16xf32>
    %22 = arith.subf %6, %21 : vector<16x16xf32>
    %cst_12 = arith.constant 9.99999974E-6 : f32
    %23 = vector.broadcast %cst_12 : f32 to vector<16x1xf32>
    %24 = arith.addf %20, %23 : vector<16x1xf32>
    %25 = math.rsqrt %24 : vector<16x1xf32>
    %26 = vector.broadcast %25 : vector<16x1xf32> to vector<16x16xf32>
    %27 = arith.mulf %22, %26 : vector<16x16xf32>
    %c0_13 = arith.constant 0 : index
    %c0_14 = arith.constant 0 : index
    %28 = vector.load %arg5[%c0_13, %c0_14] : memref<16x1xf32, #tpu.memory_space<vmem>>, vector<16x1xf32>
    %29 = vector.broadcast %28 : vector<16x1xf32> to vector<16x16xf32>
    %30 = arith.mulf %27, %29 : vector<16x16xf32>
    %c0_15 = arith.constant 0 : index
    %c0_16 = arith.constant 0 : index
    %31 = vector.load %arg6[%c0_15, %c0_16] : memref<16x1xf32, #tpu.memory_space<vmem>>, vector<16x1xf32>
    %32 = vector.broadcast %31 : vector<16x1xf32> to vector<16x16xf32>
    %33 = arith.addf %30, %32 : vector<16x16xf32>
    %cst_17 = arith.constant 0.000000e+00 : f32
    %34 = vector.broadcast %cst_17 : f32 to vector<16x16xf32>
    %35 = arith.maximumf %33, %34 : vector<16x16xf32>
    %c0_18 = arith.constant 0 : index
    %c0_19 = arith.constant 0 : index
    %c0_20 = arith.constant 0 : index
    %36 = vector.load %arg7[%c0_18, %c0_19, %c0_20] : memref<1x16x16xf32, #tpu.memory_space<vmem>>, vector<1x16x16xf32>
    %37 = vector.shape_cast %36 : vector<1x16x16xf32> to vector<16x16xf32>
    %38 = vector.shape_cast %35 : vector<16x16xf32> to vector<1x16x16xf32>
    tpu.vector_store %arg7[%c0_18, %c0_19, %c0_20], %38 {strides = array<i32>} : memref<1x16x16xf32, #tpu.memory_space<vmem>>, vector<1x16x16xf32>,
    return
  }
  func.func @transform_0(%arg0: i32) -> (i32, i32, i32) {
    %c0_i32 = arith.constant 0 : i32
    %c0_i32_0 = arith.constant 0 : i32
    %c0_i32_1 = arith.constant 0 : i32
    return %arg0, %c0_i32, %c0_i32_0 : i32, i32, i32
  }
  func.func @transform_1(%arg0: i32) -> (i32, i32) {
    %c0_i32 = arith.constant 0 : i32
    %c0_i32_0 = arith.constant 0 : i32
    %c0_i32_1 = arith.constant 0 : i32
    return %c0_i32, %c0_i32_0 : i32, i32
  }
  func.func @transform_2(%arg0: i32) -> (i32, i32) {
    %c0_i32 = arith.constant 0 : i32
    %c0_i32_0 = arith.constant 0 : i32
    %c0_i32_1 = arith.constant 0 : i32
    return %c0_i32, %c0_i32_0 : i32, i32
  }
  func.func @transform_3(%arg0: i32) -> (i32, i32) {
    %c0_i32 = arith.constant 0 : i32
    %c0_i32_0 = arith.constant 0 : i32
    %c0_i32_1 = arith.constant 0 : i32
    return %c0_i32, %c0_i32_0 : i32, i32
  }
  func.func @transform_4(%arg0: i32) -> (i32, i32) {
    %c0_i32 = arith.constant 0 : i32
    %c0_i32_0 = arith.constant 0 : i32
    %c0_i32_1 = arith.constant 0 : i32
    return %c0_i32, %c0_i32_0 : i32, i32
  }
  func.func @transform_5(%arg0: i32) -> (i32, i32) {
    %c0_i32 = arith.constant 0 : i32
    %c0_i32_0 = arith.constant 0 : i32
    %c0_i32_1 = arith.constant 0 : i32
    return %c0_i32, %c0_i32_0 : i32, i32
  }
  func.func @transform_6(%arg0: i32) -> (i32, i32, i32) {
    %c0_i32 = arith.constant 0 : i32
    %c0_i32_0 = arith.constant 0 : i32
    %c0_i32_1 = arith.constant 0 : i32
    return %arg0, %c0_i32, %c0_i32_0 : i32, i32, i32
  }
}

module attributes {stable_mosaic.version = 11 : i64} {
  func.func @_fused_conv_kernel(%arg0: i32, %arg1: memref<1x16x16xbf16, #tpu.memory_space<vmem>>, %arg2: memref<32x16xbf16, #tpu.memory_space<vmem>>, %arg3: memref<32x1xf32, #tpu.memory_space<vmem>>, %arg4: memref<1x32x16xf32, #tpu.memory_space<vmem>>) attributes {dimension_semantics = [#tpu.dimension_semantics<parallel>], iteration_bounds = array<i64: 2>, scalar_prefetch = 0 : i64, scratch_operands = 0 : i64, tpu.core_type = #tpu.core_type<tc>, window_params = [{transform_indices = @transform_0, window_bounds = array<i64: 1, 16, 16>}, {pipeline_mode = #tpu.pipeline_mode<synchronous>, transform_indices = @transform_1, window_bounds = array<i64: 32, 16>}, {pipeline_mode = #tpu.pipeline_mode<synchronous>, transform_indices = @transform_2, window_bounds = array<i64: 32, 1>}, {transform_indices = @transform_3, window_bounds = array<i64: 1, 32, 16>}]} {
    %c0 = arith.constant 0 : index
    %c0_0 = arith.constant 0 : index
    %0 = vector.load %arg2[%c0, %c0_0] : memref<32x16xbf16, #tpu.memory_space<vmem>>, vector<32x16xbf16>
    %c0_1 = arith.constant 0 : index
    %c0_2 = arith.constant 0 : index
    %c0_3 = arith.constant 0 : index
    %1 = vector.load %arg1[%c0_1, %c0_2, %c0_3] : memref<1x16x16xbf16, #tpu.memory_space<vmem>>, vector<1x16x16xbf16>
    %2 = vector.shape_cast %1 : vector<1x16x16xbf16> to vector<16x16xbf16>
    %cst = arith.constant dense<0.000000e+00> : vector<32x16xf32>
    %3 = tpu.matmul %0, %2, %cst {dimension_numbers = #tpu.dot_dimension_numbers<[1], [0], [0], [1], [0, 0, 1, 1], [], []>} : vector<32x16xbf16>, vector<16x16xbf16>, vector<32x16xf32> -> vector<32x16xf32>
    %c0_4 = arith.constant 0 : index
    %c0_5 = arith.constant 0 : index
    %4 = vector.load %arg3[%c0_4, %c0_5] : memref<32x1xf32, #tpu.memory_space<vmem>>, vector<32x1xf32>
    %5 = vector.broadcast %4 : vector<32x1xf32> to vector<32x16xf32>
    %6 = arith.addf %3, %5 : vector<32x16xf32>
    %c0_6 = arith.constant 0 : index
    %c0_7 = arith.constant 0 : index
    %c0_8 = arith.constant 0 : index
    %7 = vector.load %arg4[%c0_6, %c0_7, %c0_8] : memref<1x32x16xf32, #tpu.memory_space<vmem>>, vector<1x32x16xf32>
    %8 = vector.shape_cast %7 : vector<1x32x16xf32> to vector<32x16xf32>
    %9 = vector.shape_cast %6 : vector<32x16xf32> to vector<1x32x16xf32>
    tpu.vector_store %arg4[%c0_6, %c0_7, %c0_8], %9 {strides = array<i32>} : memref<1x32x16xf32, #tpu.memory_space<vmem>>, vector<1x32x16xf32>,
    return
  }
  func.func @transform_0(%arg0: i32) -> (i32, i32, i32) {
    %c0_i32 = arith.constant 0 : i32
    %c0_i32_0 = arith.constant 0 : i32
    %c0_i32_1 = arith.constant 0 : i32
    return %arg0, %c0_i32, %c0_i32_0 : i32, i32, i32
  }
  func.func @transform_1(%arg0: i32) -> (i32, i32) {
    %c0_i32 = arith.constant 0 : i32
    %c0_i32_0 = arith.constant 0 : i32
    %c0_i32_1 = arith.constant 0 : i32
    return %c0_i32, %c0_i32_0 : i32, i32
  }
  func.func @transform_2(%arg0: i32) -> (i32, i32) {
    %c0_i32 = arith.constant 0 : i32
    %c0_i32_0 = arith.constant 0 : i32
    %c0_i32_1 = arith.constant 0 : i32
    return %c0_i32, %c0_i32_0 : i32, i32
  }
  func.func @transform_3(%arg0: i32) -> (i32, i32, i32) {
    %c0_i32 = arith.constant 0 : i32
    %c0_i32_0 = arith.constant 0 : i32
    %c0_i32_1 = arith.constant 0 : i32
    return %arg0, %c0_i32, %c0_i32_0 : i32, i32, i32
  }
}

module attributes {stable_mosaic.version = 11 : i64} {
  func.func @_fused_conv_kernel(%arg0: i32, %arg1: memref<1x432x64xbf16, #tpu.memory_space<vmem>>, %arg2: memref<16x432xbf16, #tpu.memory_space<vmem>>, %arg3: memref<16x1xf32, #tpu.memory_space<vmem>>, %arg4: memref<16x16xf32, #tpu.memory_space<vmem>>, %arg5: memref<16x1xf32, #tpu.memory_space<vmem>>, %arg6: memref<16x1xf32, #tpu.memory_space<vmem>>, %arg7: memref<1x16x64xf32, #tpu.memory_space<vmem>>) attributes {dimension_semantics = [#tpu.dimension_semantics<parallel>], iteration_bounds = array<i64: 2>, scalar_prefetch = 0 : i64, scratch_operands = 0 : i64, tpu.core_type = #tpu.core_type<tc>, window_params = [{transform_indices = @transform_0, window_bounds = array<i64: 1, 432, 64>}, {pipeline_mode = #tpu.pipeline_mode<synchronous>, transform_indices = @transform_1, window_bounds = array<i64: 16, 432>}, {pipeline_mode = #tpu.pipeline_mode<synchronous>, transform_indices = @transform_2, window_bounds = array<i64: 16, 1>}, {pipeline_mode = #tpu.pipeline_mode<synchronous>, transform_indices = @transform_3, window_bounds = array<i64: 16, 16>}, {pipeline_mode = #tpu.pipeline_mode<synchronous>, transform_indices = @transform_4, window_bounds = array<i64: 16, 1>}, {pipeline_mode = #tpu.pipeline_mode<synchronous>, transform_indices = @transform_5, window_bounds = array<i64: 16, 1>}, {transform_indices = @transform_6, window_bounds = array<i64: 1, 16, 64>}]} {
    %c0 = arith.constant 0 : index
    %c0_0 = arith.constant 0 : index
    %0 = vector.load %arg2[%c0, %c0_0] : memref<16x432xbf16, #tpu.memory_space<vmem>>, vector<16x432xbf16>
    %c0_1 = arith.constant 0 : index
    %c0_2 = arith.constant 0 : index
    %c0_3 = arith.constant 0 : index
    %1 = vector.load %arg1[%c0_1, %c0_2, %c0_3] : memref<1x432x64xbf16, #tpu.memory_space<vmem>>, vector<1x432x64xbf16>
    %2 = vector.shape_cast %1 : vector<1x432x64xbf16> to vector<432x64xbf16>
    %cst = arith.constant dense<0.000000e+00> : vector<16x64xf32>
    %3 = tpu.matmul %0, %2, %cst {dimension_numbers = #tpu.dot_dimension_numbers<[1], [0], [0], [1], [0, 0, 1, 1], [], []>} : vector<16x432xbf16>, vector<432x64xbf16>, vector<16x64xf32> -> vector<16x64xf32>
    %c0_4 = arith.constant 0 : index
    %c0_5 = arith.constant 0 : index
    %4 = vector.load %arg3[%c0_4, %c0_5] : memref<16x1xf32, #tpu.memory_space<vmem>>, vector<16x1xf32>
    %5 = vector.broadcast %4 : vector<16x1xf32> to vector<16x64xf32>
    %6 = arith.addf %3, %5 : vector<16x64xf32>
    %cst_6 = arith.constant dense<0.000000e+00> : vector<16xf32>
    %7 = vector.multi_reduction <add>, %6, %cst_6 [1] : vector<16x64xf32> to vector<16xf32>
    %8 = vector.shape_cast %7 : vector<16xf32> to vector<16x1xf32>
    %9 = arith.mulf %6, %6 : vector<16x64xf32>
    %cst_7 = arith.constant dense<0.000000e+00> : vector<16xf32>
    %10 = vector.multi_reduction <add>, %9, %cst_7 [1] : vector<16x64xf32> to vector<16xf32>
    %11 = vector.shape_cast %10 : vector<16xf32> to vector<16x1xf32>
    %12 = tpu.concatenate %8, %11 in 1 : vector<16x1xf32>, vector<16x1xf32> -> vector<16x2xf32>
    %c0_8 = arith.constant 0 : index
    %c0_9 = arith.constant 0 : index
    %13 = vector.load %arg4[%c0_8, %c0_9] : memref<16x16xf32, #tpu.memory_space<vmem>>, vector<16x16xf32>
    %cst_10 = arith.constant dense<0.000000e+00> : vector<16x2xf32>
    %14 = tpu.matmul %13, %12, %cst_10 {dimension_numbers = #tpu.dot_dimension_numbers<[1], [0], [0], [1], [0, 0, 1, 1], [], []>} : vector<16x16xf32>, vector<16x2xf32>, vector<16x2xf32> -> vector<16x2xf32>
    %15 = vector.extract_strided_slice %14 {offsets = [0, 0], sizes = [16, 1], strides = [1, 1]} : vector<16x2xf32> to vector<16x1xf32>
    %16 = vector.extract_strided_slice %14 {offsets = [0, 1], sizes = [16, 1], strides = [1, 1]} : vector<16x2xf32> to vector<16x1xf32>
    %17 = arith.mulf %15, %15 : vector<16x1xf32>
    %18 = arith.subf %16, %17 : vector<16x1xf32>
    %cst_11 = arith.constant 0.000000e+00 : f32
    %19 = vector.broadcast %cst_11 : f32 to vector<16x1xf32>
    %20 = arith.maximumf %18, %19 : vector<16x1xf32>
    %21 = vector.broadcast %15 : vector<16x1xf32> to vector<16x64xf32>
    %22 = arith.subf %6, %21 : vector<16x64xf32>
    %cst_12 = arith.constant 9.99999974E-6 : f32
    %23 = vector.broadcast %cst_12 : f32 to vector<16x1xf32>
    %24 = arith.addf %20, %23 : vector<16x1xf32>
    %25 = math.rsqrt %24 : vector<16x1xf32>
    %26 = vector.broadcast %25 : vector<16x1xf32> to vector<16x64xf32>
    %27 = arith.mulf %22, %26 : vector<16x64xf32>
    %c0_13 = arith.constant 0 : index
    %c0_14 = arith.constant 0 : index
    %28 = vector.load %arg5[%c0_13, %c0_14] : memref<16x1xf32, #tpu.memory_space<vmem>>, vector<16x1xf32>
    %29 = vector.broadcast %28 : vector<16x1xf32> to vector<16x64xf32>
    %30 = arith.mulf %27, %29 : vector<16x64xf32>
    %c0_15 = arith.constant 0 : index
    %c0_16 = arith.constant 0 : index
    %31 = vector.load %arg6[%c0_15, %c0_16] : memref<16x1xf32, #tpu.memory_space<vmem>>, vector<16x1xf32>
    %32 = vector.broadcast %31 : vector<16x1xf32> to vector<16x64xf32>
    %33 = arith.addf %30, %32 : vector<16x64xf32>
    %cst_17 = arith.constant 0.000000e+00 : f32
    %34 = vector.broadcast %cst_17 : f32 to vector<16x64xf32>
    %35 = arith.maximumf %33, %34 : vector<16x64xf32>
    %c0_18 = arith.constant 0 : index
    %c0_19 = arith.constant 0 : index
    %c0_20 = arith.constant 0 : index
    %36 = vector.load %arg7[%c0_18, %c0_19, %c0_20] : memref<1x16x64xf32, #tpu.memory_space<vmem>>, vector<1x16x64xf32>
    %37 = vector.shape_cast %36 : vector<1x16x64xf32> to vector<16x64xf32>
    %38 = vector.shape_cast %35 : vector<16x64xf32> to vector<1x16x64xf32>
    tpu.vector_store %arg7[%c0_18, %c0_19, %c0_20], %38 {strides = array<i32>} : memref<1x16x64xf32, #tpu.memory_space<vmem>>, vector<1x16x64xf32>,
    return
  }
  func.func @transform_0(%arg0: i32) -> (i32, i32, i32) {
    %c0_i32 = arith.constant 0 : i32
    %c0_i32_0 = arith.constant 0 : i32
    %c0_i32_1 = arith.constant 0 : i32
    return %arg0, %c0_i32, %c0_i32_0 : i32, i32, i32
  }
  func.func @transform_1(%arg0: i32) -> (i32, i32) {
    %c0_i32 = arith.constant 0 : i32
    %c0_i32_0 = arith.constant 0 : i32
    %c0_i32_1 = arith.constant 0 : i32
    return %c0_i32, %c0_i32_0 : i32, i32
  }
  func.func @transform_2(%arg0: i32) -> (i32, i32) {
    %c0_i32 = arith.constant 0 : i32
    %c0_i32_0 = arith.constant 0 : i32
    %c0_i32_1 = arith.constant 0 : i32
    return %c0_i32, %c0_i32_0 : i32, i32
  }
  func.func @transform_3(%arg0: i32) -> (i32, i32) {
    %c0_i32 = arith.constant 0 : i32
    %c0_i32_0 = arith.constant 0 : i32
    %c0_i32_1 = arith.constant 0 : i32
    return %c0_i32, %c0_i32_0 : i32, i32
  }
  func.func @transform_4(%arg0: i32) -> (i32, i32) {
    %c0_i32 = arith.constant 0 : i32
    %c0_i32_0 = arith.constant 0 : i32
    %c0_i32_1 = arith.constant 0 : i32
    return %c0_i32, %c0_i32_0 : i32, i32
  }
  func.func @transform_5(%arg0: i32) -> (i32, i32) {
    %c0_i32 = arith.constant 0 : i32
    %c0_i32_0 = arith.constant 0 : i32
    %c0_i32_1 = arith.constant 0 : i32
    return %c0_i32, %c0_i32_0 : i32, i32
  }
  func.func @transform_6(%arg0: i32) -> (i32, i32, i32) {
    %c0_i32 = arith.constant 0 : i32
    %c0_i32_0 = arith.constant 0 : i32
    %c0_i32_1 = arith.constant 0 : i32
    return %arg0, %c0_i32, %c0_i32_0 : i32, i32, i32
  }
}

module attributes {stable_mosaic.version = 11 : i64} {
  func.func @_fused_conv_kernel(%arg0: i32, %arg1: memref<1x16x64xbf16, #tpu.memory_space<vmem>>, %arg2: memref<32x16xbf16, #tpu.memory_space<vmem>>, %arg3: memref<32x1xf32, #tpu.memory_space<vmem>>, %arg4: memref<1x32x64xf32, #tpu.memory_space<vmem>>) attributes {dimension_semantics = [#tpu.dimension_semantics<parallel>], iteration_bounds = array<i64: 2>, scalar_prefetch = 0 : i64, scratch_operands = 0 : i64, tpu.core_type = #tpu.core_type<tc>, window_params = [{transform_indices = @transform_0, window_bounds = array<i64: 1, 16, 64>}, {pipeline_mode = #tpu.pipeline_mode<synchronous>, transform_indices = @transform_1, window_bounds = array<i64: 32, 16>}, {pipeline_mode = #tpu.pipeline_mode<synchronous>, transform_indices = @transform_2, window_bounds = array<i64: 32, 1>}, {transform_indices = @transform_3, window_bounds = array<i64: 1, 32, 64>}]} {
    %c0 = arith.constant 0 : index
    %c0_0 = arith.constant 0 : index
    %0 = vector.load %arg2[%c0, %c0_0] : memref<32x16xbf16, #tpu.memory_space<vmem>>, vector<32x16xbf16>
    %c0_1 = arith.constant 0 : index
    %c0_2 = arith.constant 0 : index
    %c0_3 = arith.constant 0 : index
    %1 = vector.load %arg1[%c0_1, %c0_2, %c0_3] : memref<1x16x64xbf16, #tpu.memory_space<vmem>>, vector<1x16x64xbf16>
    %2 = vector.shape_cast %1 : vector<1x16x64xbf16> to vector<16x64xbf16>
    %cst = arith.constant dense<0.000000e+00> : vector<32x64xf32>
    %3 = tpu.matmul %0, %2, %cst {dimension_numbers = #tpu.dot_dimension_numbers<[1], [0], [0], [1], [0, 0, 1, 1], [], []>} : vector<32x16xbf16>, vector<16x64xbf16>, vector<32x64xf32> -> vector<32x64xf32>
    %c0_4 = arith.constant 0 : index
    %c0_5 = arith.constant 0 : index
    %4 = vector.load %arg3[%c0_4, %c0_5] : memref<32x1xf32, #tpu.memory_space<vmem>>, vector<32x1xf32>
    %5 = vector.broadcast %4 : vector<32x1xf32> to vector<32x64xf32>
    %6 = arith.addf %3, %5 : vector<32x64xf32>
    %c0_6 = arith.constant 0 : index
    %c0_7 = arith.constant 0 : index
    %c0_8 = arith.constant 0 : index
    %7 = vector.load %arg4[%c0_6, %c0_7, %c0_8] : memref<1x32x64xf32, #tpu.memory_space<vmem>>, vector<1x32x64xf32>
    %8 = vector.shape_cast %7 : vector<1x32x64xf32> to vector<32x64xf32>
    %9 = vector.shape_cast %6 : vector<32x64xf32> to vector<1x32x64xf32>
    tpu.vector_store %arg4[%c0_6, %c0_7, %c0_8], %9 {strides = array<i32>} : memref<1x32x64xf32, #tpu.memory_space<vmem>>, vector<1x32x64xf32>,
    return
  }
  func.func @transform_0(%arg0: i32) -> (i32, i32, i32) {
    %c0_i32 = arith.constant 0 : i32
    %c0_i32_0 = arith.constant 0 : i32
    %c0_i32_1 = arith.constant 0 : i32
    return %arg0, %c0_i32, %c0_i32_0 : i32, i32, i32
  }
  func.func @transform_1(%arg0: i32) -> (i32, i32) {
    %c0_i32 = arith.constant 0 : i32
    %c0_i32_0 = arith.constant 0 : i32
    %c0_i32_1 = arith.constant 0 : i32
    return %c0_i32, %c0_i32_0 : i32, i32
  }
  func.func @transform_2(%arg0: i32) -> (i32, i32) {
    %c0_i32 = arith.constant 0 : i32
    %c0_i32_0 = arith.constant 0 : i32
    %c0_i32_1 = arith.constant 0 : i32
    return %c0_i32, %c0_i32_0 : i32, i32
  }
  func.func @transform_3(%arg0: i32) -> (i32, i32, i32) {
    %c0_i32 = arith.constant 0 : i32
    %c0_i32_0 = arith.constant 0 : i32
    %c0_i32_1 = arith.constant 0 : i32
    return %arg0, %c0_i32, %c0_i32_0 : i32, i32, i32
  }
}

</mosaic_0001>

<bundles_post_ra>
// kernel: _lambda_.31
= control target key start
LH: loop header
LB: loop body
LE: loop exit
PB: predicated region body
PF: predicated region fallthrough
CT: control target
= control target key end

     0   :  { %s856_s21 = smov 0   ;;  %s981_s0 = inlined_call_operand.vmem [shape: bf16[2,147,256], index: 0, kind: input, shape index: {}]   ;;  %s982_s1 = inlined_call_operand.vmem [shape: bf16[16,147], index: 1, kind: input, shape index: {}]   ;;  %s983_s2 = inlined_call_operand.vmem [shape: f32[16,1], index: 2, kind: input, shape index: {}, may-alias: {2,5}]   ;;  %s984_s3 = inlined_call_operand.vmem [shape: f32[16,16], index: 3, kind: input, shape index: {}]   ;;  %s985_s4 = inlined_call_operand.vmem [shape: f32[16,1], index: 4, kind: input, shape index: {}]   ;;  %s986_s5 = inlined_call_operand.vmem [shape: f32[16,1], index: 5, kind: input, shape index: {}, may-alias: {2,5}]   ;;  %s987_s6 = inlined_call_operand.vmem [shape: f32[2,16,256], index: 6, kind: output, shape index: {}]  }
   0x1 LB: > { %s670_s22 = sadd.s32 4294967295, %s815_s21   ;;  %p674_p0 = scmp.ge.s32.totalorder %s815_s21, 1  ;;  %s815_s21 = sphi %s856_s21, %s16_s21  }
   0x2   : > { %p212_p1 = scmp.lt.s32.totalorder %s815_s21, 3 }
   0x4   : > { %p213_p2 = pnand %p674_p0, %p212_p1 }
   0x5   : > { %p242_p3 = scmp.lt.s32.totalorder (!%p213_p2), %s670_s22, 1  ;;  %s819_s19 = smov (!%p213_p2), 1  }
   0x6   : > { %216 = sbr.rel (%p213_p2) target bundleno = 723 (0x2d3), region = 44 }
   0xb   : > { %s989_s22 = smov (!%p242_p3, %s670_s22), 1  ;;  %vm394_vm0 = vcmask 1040384   ;;  %vm395_vm1 = vcmask 1041408   ;;  %v817_v16 = vmov 65535   ;;  %v765_v35 = vld [vmem:[%s982_s1 + $0x4] sm:$0xf] }
   0xc   : > { %s785_s23 = smul.u32 152, %s989_s22  ;;  %v396_v17 = vsel %vm394_vm0, 4294967295, %v817_v16  ;;  %v682_v41 = vld [vmem:[%s982_s1 + $0x8] sm:$0xf0]  ;;  %v818_v47 = vmov 0   ;;  %vm390_vm2 = vcmask 154624  }
   0xd   : > { %v397_v25 = vsel %vm395_vm1, %v396_v17, 0  ;;  %v275_v46 = vld [vmem:[%s983_s2 + $0x8] sm:$0xff]  ;;  %798 = vset.pattern.permute.xlu0 %v818_v47  ;;  %799 = vset.pattern.permute.xlu2 %v818_v47  ;;  %v685_v52 = vor.u32 %v765_v35, %v682_v41  ;;  %v274_v59 = vld [vmem:[%s983_s2] sm:$0xff]  ;;  %vm476_vm3 = vcmask 7168   ;;  %vm481_vm4 = vcmask 130048   ;;  %s764_s30 = sshll.u32 %s989_s22, 5 }
   0xe   : > { %s870_s26 = scalar_lea.vmem %s981_s0, %s785_s23  ;;  %283 = vperm.xlu0 %798, %v275_v46   ;;  %800 = vset.pattern.permute.xlu1 %v818_v47  ;;  %s251_s9 = scalar_lea.vmem %s987_s6, %s764_s30 }
   0xf   : > { %v744_v0 = vld [vmem:[%s870_s26 + $0x70] sm:$0xf]  ;;  %v782_v1 = vld [vmem:[%s870_s26 + $0x74] sm:$0xf0]  ;;  %v781_v2 = vld [vmem:[%s870_s26 + $0x74] sm:$0xf] }
  0x10   : > { %v745_v3 = vor.u32 %v782_v1, %v744_v0  ;;  %v746_v4 = vld [vmem:[%s870_s26 + $0x78] sm:$0xf0]  ;;  %v736_v5 = vld [vmem:[%s870_s26 + $0x60] sm:$0xf]  ;;  %v780_v6 = vld [vmem:[%s870_s26 + $0x64] sm:$0xf0] }
  0x11   : > { %v749_v7 = vor.u32 %v781_v2, %v746_v4  ;;  %v779_v8 = vld [vmem:[%s870_s26 + $0x64] sm:$0xf]  ;;  %v738_v9 = vld [vmem:[%s870_s26 + $0x68] sm:$0xf0]  ;;  %v737_v10 = vor.u32 %v780_v6, %v736_v5  ;;  %v728_v12 = vld [vmem:[%s870_s26 + $0x50] sm:$0xf] }
  0x12   : > { %404 = vmatpush.bf16.msra.mxu0 %v745_v3  ;;  %v741_v11 = vor.u32 %v779_v8, %v738_v9  ;;  %v778_v13 = vld [vmem:[%s870_s26 + $0x54] sm:$0xf0]  ;;  %v777_v14 = vld [vmem:[%s870_s26 + $0x54] sm:$0xf]  ;;  %v730_v15 = vld [vmem:[%s870_s26 + $0x58] sm:$0xf0] }
  0x13   : > { %432 = vmatpush.bf16.msra.mxu2 %v749_v7  ;;  %v273_v18 = vld [vmem:[%s870_s26 + $0x90] sm:$0x33]  ;;  %v729_v19 = vor.u32 %v778_v13, %v728_v12  ;;  %v733_v22 = vor.u32 %v777_v14, %v730_v15  ;;  %v720_v23 = vld [vmem:[%s870_s26 + $0x40] sm:$0xf]  ;;  %v776_v24 = vld [vmem:[%s870_s26 + $0x44] sm:$0xf0] }
  0x14   : > { %v351_v20 = vunpack.c.h.b16 %v273_v18  ;;  %v350_v21 = vunpack.c.l.b16 %v273_v18  ;;  %v775_v26 = vld [vmem:[%s870_s26 + $0x44] sm:$0xf]  ;;  %v722_v27 = vld [vmem:[%s870_s26 + $0x48] sm:$0xf0]  ;;  %v721_v32 = vor.u32 %v776_v24, %v720_v23  ;;  %v752_v36 = vld [vmem:[%s870_s26 + $0x80] sm:$0xf] }
  0x15   : > { %v783_v30 = vld [vmem:[%s870_s26 + $0x84] sm:$0xf]  ;;  %v754_v31 = vld [vmem:[%s870_s26 + $0x88] sm:$0xf0]  ;;  %v784_v37 = vld [vmem:[%s870_s26 + $0x84] sm:$0xf0]  ;;  %v725_v38 = vor.u32 %v775_v26, %v722_v27 }
  0x16   : > { %405 = vmatpush.bf16.msra.mxu0 %v737_v10  ;;  %v371_v28 = vpack.c.b16 %v351_v20, %v351_v20  ;;  %v370_v29 = vpack.c.b16 %v350_v21, %v350_v21  ;;  %v712_v39 = vld [vmem:[%s870_s26 + $0x30] sm:$0xf]  ;;  %v774_v40 = vld [vmem:[%s870_s26 + $0x34] sm:$0xf0]  ;;  %v773_v42 = vld [vmem:[%s870_s26 + $0x34] sm:$0xf]  ;;  %v757_v44 = vor.u32 %v783_v30, %v754_v31  ;;  %v753_v45 = vor.u32 %v784_v37, %v752_v36 }
  0x17   : > { %433 = vmatpush.bf16.msra.mxu2 %v741_v11  ;;  %v714_v43 = vld [vmem:[%s870_s26 + $0x38] sm:$0xf0]  ;;  %v713_v48 = vor.u32 %v774_v40, %v712_v39  ;;  %v704_v50 = vld [vmem:[%s870_s26 + $0x20] sm:$0xf]  ;;  %v772_v51 = vld [vmem:[%s870_s26 + $0x24] sm:$0xf0]  ;;  %278 = vperm.xlu0 %798, %v274_v59  }
  0x18   : > { %v402_v33 = vand.u32 %v397_v25, %v371_v28  ;;  %v399_v34 = vand.u32 %v397_v25, %v370_v29  ;;  %v717_v49 = vor.u32 %v773_v42, %v714_v43  ;;  %v771_v53 = vld [vmem:[%s870_s26 + $0x24] sm:$0xf]  ;;  %v706_v54 = vld [vmem:[%s870_s26 + $0x28] sm:$0xf0]  ;;  %v705_v55 = vor.u32 %v772_v51, %v704_v50  ;;  %v696_v57 = vld [vmem:[%s870_s26 + $0x10] sm:$0xf] }
  0x19   : > { %v709_v56 = vor.u32 %v771_v53, %v706_v54  ;;  %v770_v58 = vld [vmem:[%s870_s26 + $0x14] sm:$0xf0]  ;;  %v769_v60 = vld [vmem:[%s870_s26 + $0x14] sm:$0xf]  ;;  %v698_v61 = vld [vmem:[%s870_s26 + $0x18] sm:$0xf0] }
  0x1a   : > { %406 = vmatpush.bf16.msra.mxu0 %v729_v19  ;;  %452 = vmatpush.bf16.msra.mxu3 %v402_v33  ;;  %v697_v62 = vor.u32 %v770_v58, %v696_v57  ;;  %v701_v63 = vor.u32 %v769_v60, %v698_v61  ;;  %v688_v0 = vld [vmem:[%s870_s26] sm:$0xf]  ;;  %v768_v1 = vld [vmem:[%s870_s26 + $0x4] sm:$0xf0]  ;;  %v767_v2 = vld [vmem:[%s870_s26 + $0x4] sm:$0xf] }
  0x1b   : > { %434 = vmatpush.bf16.msra.mxu2 %v733_v22  ;;  %424 = vmatpush.bf16.msra.mxu1 %v399_v34  ;;  %v690_v3 = vld [vmem:[%s870_s26 + $0x8] sm:$0xf0]  ;;  %v689_v4 = vor.u32 %v768_v1, %v688_v0  ;;  %v680_v5 = vld [vmem:[%s982_s1] sm:$0xf]  ;;  %v766_v6 = vld [vmem:[%s982_s1 + $0x4] sm:$0xf0] }
  0x1c   : > { %v693_v7 = vor.u32 %v767_v2, %v690_v3  ;;  %v681_v8 = vor.u32 %v766_v6, %v680_v5  ;;  %v479_v40 = vld [vmem:[%s984_s3] sm:$0xff]  ;;  %v480_v42 = vld [vmem:[%s984_s3 + $0x8] sm:$0xff] }
  0x1d   : > { %v592_v50 = vld [vmem:[%s986_s5 + $0x8] sm:$0xff] }
  0x1e   : > { %407 = vmatpush.bf16.msra.mxu0 %v721_v32  ;;  %453 = vmatpush.bf16.msra.mxu3 %v757_v44 }
  0x1f   : > { %435 = vmatpush.bf16.msra.mxu2 %v725_v38  ;;  %425 = vmatpush.bf16.msra.mxu1 %v753_v45 }
  0x21   : > { %759 = vmatmul.msk.bf16.vlgmr.msra.gmra.mxu3 %vm390_vm2, %v685_v52 }
  0x22   : > { %408 = vmatpush.bf16.msra.mxu0 %v713_v48  ;;  %758 = vmatmul.msk.bf16.vlgmr.msra.gmra.mxu1 %vm390_vm2, %v685_v52  ;;  %v575_v48 = vld [vmem:[%s985_s4] sm:$0xff] }
  0x23   : > { %436 = vmatpush.bf16.msra.mxu2 %v717_v49  ;;  %v820_v49 = vmov 1  }
  0x26   : > { %409 = vmatpush.bf16.msra.mxu0 %v705_v55 }
  0x27   : > { %437 = vmatpush.bf16.msra.mxu2 %v709_v56 }
  0x2a   : > { %410 = vmatpush.bf16.msra.mxu0 %v697_v62 }
  0x2b   : > { %438 = vmatpush.bf16.msra.mxu2 %v701_v63 }
  0x2e   : > { %411 = vmatpush.bf16.msra.mxu0 %v689_v4 }
  0x2f   : > { %439 = vmatpush.bf16.msra.mxu2 %v693_v7 }
  0x31   : > { %412 = vmatmul.bf16.vlgmr.msra.gmra.mxu0 %v681_v8 }
  0x32   : > { %440 = vmatmul.bf16.vlgmr.msra.gmra.mxu2 %v681_v8  ;;  %v576_v8 = vld [vmem:[%s985_s4 + $0x8] sm:$0xff] }
  0x80   : > { %v284_v9 = vpop.permute.xlu0 %283 }
  0x89   : > { %v279_v11 = vpop.permute.xlu0 %278 }
  0x9f   : > { %v427_v13 = vpop.f32.mrf.mxu1 }
  0xa4   : > { %v455_v14 = vpop.f32.mrf.mxu3 }
  0xa7   : > { %v429_v26 = vpop.f32.mrf.mxu1 }
  0xac   : > { %v457_v27 = vpop.f32.mrf.mxu3 }
  0xae   : > { %v413_v10 = vpop.f32.mrf.mxu0 }
  0xaf   : > { %v414_v12 = vadd.f32 %v413_v10, %v279_v11  ;;  %v591_v10 = vld [vmem:[%s986_s5] sm:$0xff] }
  0xb1   : > { %v930_v16 = vadd.f32 %v427_v13, %v414_v12 }
  0xb3   : > { %v466_v24 = vmul.f32 %v930_v16, %v930_v16 }
  0xb5   : > { %v441_v15 = vpop.f32.mrf.mxu2 }
  0xb6   : > { %v442_v17 = vadd.f32 %v441_v15, %v279_v11  ;;  %v415_v19 = vpop.f32.mrf.mxu0 }
  0xb7   : > { %v416_v21 = vadd.f32 %v415_v19, %v284_v9 }
  0xb8   : > { %v932_v18 = vadd.f32 %v455_v14, %v442_v17 }
  0xb9   : > { %v940_v28 = vadd.f32 %v429_v26, %v416_v21 }
  0xba   : > { %v460_v20 = vadd.f32 %v932_v18, %v930_v16  ;;  %v467_v25 = vmul.f32 %v932_v18, %v932_v18 }
  0xbb   : > { %v468_v33 = vmul.f32 %v940_v28, %v940_v28 }
  0xbc   : > { %461 = vadd.xlane.f32.xlu2 %v460_v20  ;;  %v470_v31 = vadd.f32 %v467_v25, %v466_v24 }
  0xbd   : > { %v443_v22 = vpop.f32.mrf.mxu2 }
  0xbe   : > { %v444_v23 = vadd.f32 %v443_v22, %v284_v9 }
  0xc0   : > { %v942_v29 = vadd.f32 %v457_v27, %v444_v23 }
  0xc2   : > { %v463_v30 = vadd.f32 %v942_v29, %v940_v28  ;;  %v469_v32 = vmul.f32 %v942_v29, %v942_v29 }
  0xc4   : > { %464 = vadd.xlane.f32.xlu1 %v463_v30  ;;  %471 = vadd.xlane.f32.xlu2 %v470_v31  ;;  %v473_v34 = vadd.f32 %v469_v32, %v468_v33 }
  0xcc   : > { %474 = vadd.xlane.f32.xlu1 %v473_v34 }
 0x12f   : > { %v462_v35 = vpop.xlane.xlu2 %461 }
 0x137   : > { %v465_v36 = vpop.xlane.xlu1 %464  ;;  %v472_v37 = vpop.xlane.xlu2 %471 }
 0x138   : > { %v477_v41 = vsel %vm476_vm3, %v462_v35, %v472_v37 }
 0x13f   : > { %v475_v38 = vpop.xlane.xlu1 %474 }
 0x140   : > { %v478_v39 = vsel %vm476_vm3, %v465_v36, %v475_v38 }
 0x141   : > { %502 = vmatpush.msrb.mxu1 %v478_v39 }
 0x143   : > { %503 = vmatpush.msrb.mxu1 %v477_v41 }
 0x144   : > { %760 = vmatmul.msk.f32.vlgmr.msrb.gmra.mxu1 %vm481_vm4, %v479_v40 }
 0x14c   : > { %761 = vmatmul.msk.f32.gmra.mxu1 %vm481_vm4, %v480_v42 }
 0x1c1   : > { %v505_v43 = vpop.f32.mrf.mxu1 }
 0x1c2   : > { %v511_v44 = vmul.f32 %v505_v43, %v505_v43  ;;  %527 = vperm.xlu2 %799, %v505_v43  }
 0x1c4   : > { %515 = vrot.lane.b32.xlu0 %v511_v44, %s819_s19 }
 0x1c9   : > { %v508_v45 = vpop.f32.mrf.mxu1 }
 0x1ca   : > { %v512_v46 = vmul.f32 %v508_v45, %v508_v45  ;;  %802 = vset.pattern.permute.xlu2 %v820_v49 }
 0x1cc   : > { %532 = vperm.xlu0 %798, %v508_v45   ;;  %517 = vrot.lane.b32.xlu1 %v512_v46, %s819_s19 }
 0x1d4   : > { %579 = vperm.xlu1 %800, %v575_v48   ;;  %801 = vset.pattern.permute.xlu0 %v820_v49 }
 0x1dc   : > { %600 = vperm.xlu1 %800, %v592_v50  }
 0x21c   : > { %v528_v11 = vpop.permute.xlu2 %527 }
 0x21d   : > { %v535_v14 = vsub.f32 %v930_v16, %v528_v11  ;;  %v536_v15 = vsub.f32 %v932_v18, %v528_v11 }
 0x236   : > { %v516_v51 = vpop.permute.xlu0 %515 }
 0x237   : > { %v521_v52 = vsub.f32 %v505_v43, %v516_v51 }
 0x239   : > { %v523_v53 = vmax.f32 %v521_v52, 0.0 }
 0x23b   : > { %v539_v54 = vadd.f32 1e-05, %v523_v53 }
 0x23d   : > { %805 = vrsqrt.f32 %v539_v54  ;;  %vm547_vm6 = vweird.f32 %v539_v54 }
 0x23e   : > { %v518_v55 = vpop.permute.xlu1 %517  ;;  %v533_v12 = vpop.permute.xlu0 %532 }
 0x23f   : > { %v522_v56 = vsub.f32 %v508_v45, %v518_v55  ;;  %v538_v27 = vsub.f32 %v942_v29, %v533_v12 }
 0x241   : > { %v524_v57 = vmax.f32 %v522_v56, 0.0 }
 0x243   : > { %v806_v58 = vpop.eup %805  ;;  %v540_v59 = vadd.f32 1e-05, %v524_v57 }
 0x244   : > { %v542_v60 = vmul.f32 %v806_v58, %v539_v54  ;;  %vm548_vm5 = vweird.f32 %v806_v58 }
 0x245   : > { %807 = vrsqrt.f32 %v540_v59  ;;  %vm549_vm7 = vmor %vm547_vm6, %vm548_vm5  ;;  %vm557_vm9 = vweird.f32 %v540_v59 }
 0x246   : > { %v543_v61 = vmul.f32 %v806_v58, %v542_v60  ;;  %v580_v21 = vpop.permute.xlu1 %579 }
 0x248   : > { %v544_v62 = vmul.f32 0.5, %v543_v61 }
 0x24a   : > { %v545_v63 = vsub.f32 1.5, %v544_v62 }
 0x24b   : > { %v808_v0 = vpop.eup %807 }
 0x24c   : > { %v552_v1 = vmul.f32 %v808_v0, %v540_v59  ;;  %v546_v2 = vmul.f32 %v806_v58, %v545_v63  ;;  %vm558_vm8 = vweird.f32 %v808_v0 }
 0x24d   : > { %vm559_vm10 = vmor %vm557_vm9, %vm558_vm8 }
 0x24e   : > { %v553_v3 = vmul.f32 %v808_v0, %v552_v1  ;;  %v550_v4 = vsel %vm549_vm7, %v806_v58, %v546_v2  ;;  %v601_v35 = vpop.permute.xlu1 %600 }
 0x24f   : > { %563 = vperm.xlu0 %801, %v550_v4  }
 0x250   : > { %v554_v5 = vmul.f32 0.5, %v553_v3 }
 0x252   : > { %v555_v6 = vsub.f32 1.5, %v554_v5 }
 0x254   : > { %v556_v7 = vmul.f32 %v808_v0, %v555_v6 }
 0x256   : > { %v560_v9 = vsel %vm559_vm10, %v808_v0, %v556_v7 }
 0x257   : > { %803 = vset.pattern.permute.xlu0 %v818_v47  ;;  %568 = vperm.xlu2 %802, %v560_v9  }
 0x258   : > { %584 = vperm.xlu0 %803, %v576_v8  }
 0x25f   : > { %804 = vset.pattern.permute.xlu2 %v818_v47  ;;  %v537_v47 = vsub.f32 %v940_v28, %v533_v12 }
 0x260   : > { %595 = vperm.xlu2 %804, %v591_v10  }
 0x2b1   : > { %v569_v13 = vpop.permute.xlu2 %568 }
 0x2b2   : > { %v573_v30 = vmul.f32 %v569_v13, %v537_v47  ;;  %v574_v31 = vmul.f32 %v569_v13, %v538_v27 }
 0x2ba   : > { %v596_v22 = vpop.permute.xlu2 %595 }
 0x2c1   : > { %v564_v17 = vpop.permute.xlu0 %563 }
 0x2c2   : > { %v571_v19 = vmul.f32 %v564_v17, %v535_v14  ;;  %v572_v20 = vmul.f32 %v564_v17, %v536_v15 }
 0x2c4   : > { %v587_v23 = vmul.f32 %v580_v21, %v571_v19  ;;  %v588_v24 = vmul.f32 %v580_v21, %v572_v20 }
 0x2c6   : > { %v603_v25 = vadd.f32 %v596_v22, %v587_v23  ;;  %v604_v26 = vadd.f32 %v596_v22, %v588_v24 }
 0x2c8   : > { %v607_v16 = vmax.f32 %v603_v25, 0.0  ;;  %v608_v18 = vmax.f32 %v604_v26, 0.0 }
 0x2ca   : > { %611 = vst [vmem:[%s251_s9] sm:$0xff] %v607_v16  ;;  %v585_v32 = vpop.permute.xlu0 %584 }
 0x2cb   : > { %612 = vst [vmem:[%s251_s9 + $0x8] sm:$0xff] %v608_v18  ;;  %v589_v33 = vmul.f32 %v585_v32, %v573_v30  ;;  %v590_v34 = vmul.f32 %v585_v32, %v574_v31 }
 0x2cd   : > { %v605_v36 = vadd.f32 %v601_v35, %v589_v33  ;;  %v606_v37 = vadd.f32 %v601_v35, %v590_v34 }
 0x2cf   : > { %v609_v38 = vmax.f32 %v605_v36, 0.0  ;;  %v610_v28 = vmax.f32 %v606_v37, 0.0 }
 0x2d1   : > { %613 = vst [vmem:[%s251_s9 + $0x10] sm:$0xff] %v609_v38 }
 0x2d2   : > { %614 = vst [vmem:[%s251_s9 + $0x18] sm:$0xff] %v610_v28 }
 0x2d3 PF: > { %s16_s21 = sadd.s32 1, %s815_s21  }
 0x2d4   : > { %p13_p4 = scmp.ge.s32.totalorder %s16_s21, 4  }
 0x2d6   :  { %15 = sbr.rel (!%p13_p4) target bundleno = 1 (0x1), region = 74 }

// kernel: _lambda_.32
= control target key start
LH: loop header
LB: loop body
LE: loop exit
PB: predicated region body
PF: predicated region fallthrough
CT: control target
= control target key end

     0   :  { %s837_s21 = smov 0   ;;  %s965_s0 = inlined_call_operand.vmem [shape: bf16[2,144,256], index: 0, kind: input, shape index: {}]   ;;  %s966_s1 = inlined_call_operand.vmem [shape: bf16[16,144], index: 1, kind: input, shape index: {}]   ;;  %s967_s2 = inlined_call_operand.vmem [shape: f32[16,1], index: 2, kind: input, shape index: {}, may-alias: {2,5}]   ;;  %s968_s3 = inlined_call_operand.vmem [shape: f32[16,16], index: 3, kind: input, shape index: {}]   ;;  %s969_s4 = inlined_call_operand.vmem [shape: f32[16,1], index: 4, kind: input, shape index: {}]   ;;  %s970_s5 = inlined_call_operand.vmem [shape: f32[16,1], index: 5, kind: input, shape index: {}, may-alias: {2,5}]   ;;  %s971_s6 = inlined_call_operand.vmem [shape: f32[2,16,256], index: 6, kind: output, shape index: {}]  }
   0x1 LB: > { %s653_s22 = sadd.s32 4294967295, %s797_s21   ;;  %p657_p0 = scmp.ge.s32.totalorder %s797_s21, 1  ;;  %s797_s21 = sphi %s837_s21, %s16_s21  }
   0x2   : > { %p212_p1 = scmp.lt.s32.totalorder %s797_s21, 3 }
   0x4   : > { %p213_p2 = pnand %p657_p0, %p212_p1 }
   0x5   : > { %p242_p3 = scmp.lt.s32.totalorder (!%p213_p2), %s653_s22, 1  ;;  %s800_s19 = smov (!%p213_p2), 1  }
   0x6   : > { %216 = sbr.rel (%p213_p2) target bundleno = 723 (0x2d3), region = 44 }
   0xb   : > { %s973_s22 = smov (!%p242_p3, %s653_s22), 1  ;;  %v748_v18 = vld [vmem:[%s966_s1 + $0x4] sm:$0xf]  ;;  %v665_v19 = vld [vmem:[%s966_s1 + $0x8] sm:$0xf0]  ;;  %vm384_vm0 = vcmask 130048  }
   0xc   : > { %s768_s23 = smul.u32 144, %s973_s22  ;;  %v668_v27 = vor.u32 %v748_v18, %v665_v19  ;;  %v274_v35 = vld [vmem:[%s967_s2 + $0x8] sm:$0xff]  ;;  %v799_v38 = vmov 0   ;;  %v273_v49 = vld [vmem:[%s967_s2] sm:$0xff]  ;;  %vm460_vm1 = vcmask 7168   ;;  %s747_s30 = sshll.u32 %s973_s22, 5 }
   0xd   : > { %780 = vset.pattern.permute.xlu0 %v799_v38  ;;  %781 = vset.pattern.permute.xlu2 %v799_v38  ;;  %v663_v59 = vld [vmem:[%s966_s1] sm:$0xf]  ;;  %v749_v60 = vld [vmem:[%s966_s1 + $0x4] sm:$0xf0]  ;;  %s251_s9 = scalar_lea.vmem %s971_s6, %s747_s30 }
   0xe   : > { %s851_s26 = scalar_lea.vmem %s965_s0, %s768_s23  ;;  %282 = vperm.xlu0 %780, %v274_v35   ;;  %782 = vset.pattern.permute.xlu1 %v799_v38  ;;  %v664_v62 = vor.u32 %v749_v60, %v663_v59 }
   0xf   : > { %v727_v0 = vld [vmem:[%s851_s26 + $0x70] sm:$0xf]  ;;  %v765_v1 = vld [vmem:[%s851_s26 + $0x74] sm:$0xf0]  ;;  %v764_v2 = vld [vmem:[%s851_s26 + $0x74] sm:$0xf] }
  0x10   : > { %v728_v3 = vor.u32 %v765_v1, %v727_v0  ;;  %v729_v4 = vld [vmem:[%s851_s26 + $0x78] sm:$0xf0]  ;;  %v719_v5 = vld [vmem:[%s851_s26 + $0x60] sm:$0xf]  ;;  %v763_v6 = vld [vmem:[%s851_s26 + $0x64] sm:$0xf0] }
  0x11   : > { %v732_v7 = vor.u32 %v764_v2, %v729_v4  ;;  %v762_v8 = vld [vmem:[%s851_s26 + $0x64] sm:$0xf]  ;;  %v721_v9 = vld [vmem:[%s851_s26 + $0x68] sm:$0xf0]  ;;  %v720_v10 = vor.u32 %v763_v6, %v719_v5  ;;  %v711_v12 = vld [vmem:[%s851_s26 + $0x50] sm:$0xf] }
  0x12   : > { %388 = vmatpush.bf16.msra.mxu0 %v728_v3  ;;  %v724_v11 = vor.u32 %v762_v8, %v721_v9  ;;  %v761_v13 = vld [vmem:[%s851_s26 + $0x54] sm:$0xf0]  ;;  %v760_v14 = vld [vmem:[%s851_s26 + $0x54] sm:$0xf]  ;;  %v713_v15 = vld [vmem:[%s851_s26 + $0x58] sm:$0xf0] }
  0x13   : > { %416 = vmatpush.bf16.msra.mxu2 %v732_v7  ;;  %v712_v16 = vor.u32 %v761_v13, %v711_v12  ;;  %v703_v17 = vld [vmem:[%s851_s26 + $0x40] sm:$0xf]  ;;  %v716_v20 = vor.u32 %v760_v14, %v713_v15  ;;  %v759_v21 = vld [vmem:[%s851_s26 + $0x44] sm:$0xf0]  ;;  %v766_v22 = vld [vmem:[%s851_s26 + $0x84] sm:$0xf] }
  0x14   : > { %v737_v23 = vld [vmem:[%s851_s26 + $0x88] sm:$0xf0]  ;;  %v758_v24 = vld [vmem:[%s851_s26 + $0x44] sm:$0xf]  ;;  %v735_v28 = vld [vmem:[%s851_s26 + $0x80] sm:$0xf]  ;;  %v704_v29 = vor.u32 %v759_v21, %v703_v17 }
  0x15   : > { %v705_v25 = vld [vmem:[%s851_s26 + $0x48] sm:$0xf0]  ;;  %v740_v26 = vor.u32 %v766_v22, %v737_v23  ;;  %v767_v30 = vld [vmem:[%s851_s26 + $0x84] sm:$0xf0]  ;;  %v695_v32 = vld [vmem:[%s851_s26 + $0x30] sm:$0xf] }
  0x16   : > { %389 = vmatpush.bf16.msra.mxu0 %v720_v10  ;;  %v708_v31 = vor.u32 %v758_v24, %v705_v25  ;;  %v757_v33 = vld [vmem:[%s851_s26 + $0x34] sm:$0xf0]  ;;  %v736_v34 = vor.u32 %v767_v30, %v735_v28  ;;  %v756_v36 = vld [vmem:[%s851_s26 + $0x34] sm:$0xf]  ;;  %v697_v37 = vld [vmem:[%s851_s26 + $0x38] sm:$0xf0]  ;;  %277 = vperm.xlu0 %780, %v273_v49  }
  0x17   : > { %417 = vmatpush.bf16.msra.mxu2 %v724_v11  ;;  %437 = vmatpush.bf16.msra.mxu3 %v740_v26  ;;  %v696_v39 = vor.u32 %v757_v33, %v695_v32  ;;  %v700_v40 = vor.u32 %v756_v36, %v697_v37  ;;  %v687_v41 = vld [vmem:[%s851_s26 + $0x20] sm:$0xf]  ;;  %v755_v42 = vld [vmem:[%s851_s26 + $0x24] sm:$0xf0]  ;;  %v754_v43 = vld [vmem:[%s851_s26 + $0x24] sm:$0xf] }
  0x18   : > { %409 = vmatpush.bf16.msra.mxu1 %v736_v34  ;;  %v689_v44 = vld [vmem:[%s851_s26 + $0x28] sm:$0xf0]  ;;  %v688_v45 = vor.u32 %v755_v42, %v687_v41  ;;  %v679_v47 = vld [vmem:[%s851_s26 + $0x10] sm:$0xf]  ;;  %v753_v48 = vld [vmem:[%s851_s26 + $0x14] sm:$0xf0] }
  0x19   : > { %v692_v46 = vor.u32 %v754_v43, %v689_v44  ;;  %v752_v50 = vld [vmem:[%s851_s26 + $0x14] sm:$0xf]  ;;  %v681_v51 = vld [vmem:[%s851_s26 + $0x18] sm:$0xf0]  ;;  %v680_v52 = vor.u32 %v753_v48, %v679_v47  ;;  %v671_v54 = vld [vmem:[%s851_s26] sm:$0xf] }
  0x1a   : > { %390 = vmatpush.bf16.msra.mxu0 %v712_v16  ;;  %742 = vmatmul.msk.bf16.vlgmr.msra.gmra.mxu3 %vm384_vm0, %v668_v27  ;;  %v684_v53 = vor.u32 %v752_v50, %v681_v51  ;;  %v751_v55 = vld [vmem:[%s851_s26 + $0x4] sm:$0xf0]  ;;  %v750_v56 = vld [vmem:[%s851_s26 + $0x4] sm:$0xf]  ;;  %v673_v57 = vld [vmem:[%s851_s26 + $0x8] sm:$0xf0] }
  0x1b   : > { %418 = vmatpush.bf16.msra.mxu2 %v716_v20  ;;  %741 = vmatmul.msk.bf16.vlgmr.msra.gmra.mxu1 %vm384_vm0, %v668_v27  ;;  %v672_v58 = vor.u32 %v751_v55, %v671_v54  ;;  %v676_v61 = vor.u32 %v750_v56, %v673_v57  ;;  %v463_v30 = vld [vmem:[%s968_s3] sm:$0xff]  ;;  %v464_v32 = vld [vmem:[%s968_s3 + $0x8] sm:$0xff] }
  0x1c   : > { %v558_v37 = vld [vmem:[%s969_s4] sm:$0xff] }
  0x1e   : > { %391 = vmatpush.bf16.msra.mxu0 %v704_v29 }
  0x1f   : > { %419 = vmatpush.bf16.msra.mxu2 %v708_v31 }
  0x22   : > { %392 = vmatpush.bf16.msra.mxu0 %v696_v39  ;;  %v801_v39 = vmov 1  }
  0x23   : > { %420 = vmatpush.bf16.msra.mxu2 %v700_v40  ;;  %v575_v40 = vld [vmem:[%s970_s5 + $0x8] sm:$0xff] }
  0x26   : > { %393 = vmatpush.bf16.msra.mxu0 %v688_v45 }
  0x27   : > { %421 = vmatpush.bf16.msra.mxu2 %v692_v46 }
  0x2a   : > { %394 = vmatpush.bf16.msra.mxu0 %v680_v52 }
  0x2b   : > { %422 = vmatpush.bf16.msra.mxu2 %v684_v53 }
  0x2e   : > { %395 = vmatpush.bf16.msra.mxu0 %v672_v58 }
  0x2f   : > { %423 = vmatpush.bf16.msra.mxu2 %v676_v61 }
  0x31   : > { %396 = vmatmul.bf16.vlgmr.msra.gmra.mxu0 %v664_v62 }
  0x32   : > { %424 = vmatmul.bf16.vlgmr.msra.gmra.mxu2 %v664_v62  ;;  %v559_v62 = vld [vmem:[%s969_s4 + $0x8] sm:$0xff] }
  0x80   : > { %v283_v63 = vpop.permute.xlu0 %282 }
  0x88   : > { %v278_v1 = vpop.permute.xlu0 %277 }
  0x98   : > { %v411_v3 = vpop.f32.mrf.mxu1 }
  0x9d   : > { %v439_v4 = vpop.f32.mrf.mxu3 }
  0xa0   : > { %v413_v16 = vpop.f32.mrf.mxu1 }
  0xa5   : > { %v441_v17 = vpop.f32.mrf.mxu3 }
  0xae   : > { %v397_v0 = vpop.f32.mrf.mxu0 }
  0xaf   : > { %v398_v2 = vadd.f32 %v397_v0, %v278_v1  ;;  %v574_v0 = vld [vmem:[%s970_s5] sm:$0xff] }
  0xb1   : > { %v912_v6 = vadd.f32 %v411_v3, %v398_v2 }
  0xb3   : > { %v450_v14 = vmul.f32 %v912_v6, %v912_v6 }
  0xb5   : > { %v425_v5 = vpop.f32.mrf.mxu2 }
  0xb6   : > { %v426_v7 = vadd.f32 %v425_v5, %v278_v1  ;;  %v399_v9 = vpop.f32.mrf.mxu0 }
  0xb7   : > { %v400_v11 = vadd.f32 %v399_v9, %v283_v63 }
  0xb8   : > { %v914_v8 = vadd.f32 %v439_v4, %v426_v7 }
  0xb9   : > { %v922_v18 = vadd.f32 %v413_v16, %v400_v11 }
  0xba   : > { %v444_v10 = vadd.f32 %v914_v8, %v912_v6  ;;  %v451_v15 = vmul.f32 %v914_v8, %v914_v8 }
  0xbb   : > { %v452_v23 = vmul.f32 %v922_v18, %v922_v18 }
  0xbc   : > { %445 = vadd.xlane.f32.xlu2 %v444_v10  ;;  %v454_v21 = vadd.f32 %v451_v15, %v450_v14 }
  0xbd   : > { %v427_v12 = vpop.f32.mrf.mxu2 }
  0xbe   : > { %v428_v13 = vadd.f32 %v427_v12, %v283_v63 }
  0xc0   : > { %v924_v19 = vadd.f32 %v441_v17, %v428_v13 }
  0xc2   : > { %v447_v20 = vadd.f32 %v924_v19, %v922_v18  ;;  %v453_v22 = vmul.f32 %v924_v19, %v924_v19 }
  0xc4   : > { %448 = vadd.xlane.f32.xlu1 %v447_v20  ;;  %455 = vadd.xlane.f32.xlu2 %v454_v21  ;;  %v457_v24 = vadd.f32 %v453_v22, %v452_v23 }
  0xcc   : > { %458 = vadd.xlane.f32.xlu1 %v457_v24 }
 0x12f   : > { %v446_v25 = vpop.xlane.xlu2 %445 }
 0x137   : > { %v449_v26 = vpop.xlane.xlu1 %448  ;;  %v456_v27 = vpop.xlane.xlu2 %455 }
 0x138   : > { %v461_v31 = vsel %vm460_vm1, %v446_v25, %v456_v27 }
 0x13f   : > { %v459_v28 = vpop.xlane.xlu1 %458 }
 0x140   : > { %v462_v29 = vsel %vm460_vm1, %v449_v26, %v459_v28 }
 0x141   : > { %485 = vmatpush.msrb.mxu1 %v462_v29 }
 0x143   : > { %486 = vmatpush.msrb.mxu1 %v461_v31 }
 0x144   : > { %743 = vmatmul.msk.f32.vlgmr.msrb.gmra.mxu1 %vm384_vm0, %v463_v30 }
 0x14c   : > { %744 = vmatmul.msk.f32.gmra.mxu1 %vm384_vm0, %v464_v32 }
 0x1c1   : > { %v488_v33 = vpop.f32.mrf.mxu1 }
 0x1c2   : > { %v494_v34 = vmul.f32 %v488_v33, %v488_v33  ;;  %510 = vperm.xlu2 %781, %v488_v33  }
 0x1c4   : > { %498 = vrot.lane.b32.xlu0 %v494_v34, %s800_s19 }
 0x1c9   : > { %v491_v35 = vpop.f32.mrf.mxu1 }
 0x1ca   : > { %v495_v36 = vmul.f32 %v491_v35, %v491_v35  ;;  %784 = vset.pattern.permute.xlu2 %v801_v39 }
 0x1cc   : > { %515 = vperm.xlu0 %780, %v491_v35   ;;  %500 = vrot.lane.b32.xlu1 %v495_v36, %s800_s19 }
 0x1d4   : > { %562 = vperm.xlu1 %782, %v558_v37   ;;  %783 = vset.pattern.permute.xlu0 %v801_v39 }
 0x1dc   : > { %583 = vperm.xlu1 %782, %v575_v40  }
 0x21c   : > { %v511_v1 = vpop.permute.xlu2 %510 }
 0x21d   : > { %v518_v4 = vsub.f32 %v912_v6, %v511_v1  ;;  %v519_v5 = vsub.f32 %v914_v8, %v511_v1 }
 0x236   : > { %v499_v41 = vpop.permute.xlu0 %498 }
 0x237   : > { %v504_v42 = vsub.f32 %v488_v33, %v499_v41 }
 0x239   : > { %v506_v43 = vmax.f32 %v504_v42, 0.0 }
 0x23b   : > { %v522_v44 = vadd.f32 1e-05, %v506_v43 }
 0x23d   : > { %787 = vrsqrt.f32 %v522_v44  ;;  %vm530_vm3 = vweird.f32 %v522_v44 }
 0x23e   : > { %v501_v45 = vpop.permute.xlu1 %500  ;;  %v516_v2 = vpop.permute.xlu0 %515 }
 0x23f   : > { %v505_v46 = vsub.f32 %v491_v35, %v501_v45  ;;  %v521_v17 = vsub.f32 %v924_v19, %v516_v2 }
 0x241   : > { %v507_v47 = vmax.f32 %v505_v46, 0.0 }
 0x243   : > { %v788_v48 = vpop.eup %787  ;;  %v523_v49 = vadd.f32 1e-05, %v507_v47 }
 0x244   : > { %v525_v50 = vmul.f32 %v788_v48, %v522_v44  ;;  %vm531_vm2 = vweird.f32 %v788_v48 }
 0x245   : > { %789 = vrsqrt.f32 %v523_v49  ;;  %vm532_vm4 = vmor %vm530_vm3, %vm531_vm2  ;;  %vm540_vm6 = vweird.f32 %v523_v49 }
 0x246   : > { %v526_v51 = vmul.f32 %v788_v48, %v525_v50  ;;  %v563_v11 = vpop.permute.xlu1 %562 }
 0x248   : > { %v527_v52 = vmul.f32 0.5, %v526_v51 }
 0x24a   : > { %v528_v53 = vsub.f32 1.5, %v527_v52 }
 0x24b   : > { %v790_v54 = vpop.eup %789 }
 0x24c   : > { %v535_v55 = vmul.f32 %v790_v54, %v523_v49  ;;  %v529_v56 = vmul.f32 %v788_v48, %v528_v53  ;;  %vm541_vm5 = vweird.f32 %v790_v54 }
 0x24d   : > { %vm542_vm7 = vmor %vm540_vm6, %vm541_vm5 }
 0x24e   : > { %v536_v57 = vmul.f32 %v790_v54, %v535_v55  ;;  %v533_v58 = vsel %vm532_vm4, %v788_v48, %v529_v56  ;;  %v584_v25 = vpop.permute.xlu1 %583 }
 0x24f   : > { %546 = vperm.xlu0 %783, %v533_v58  }
 0x250   : > { %v537_v59 = vmul.f32 0.5, %v536_v57 }
 0x252   : > { %v538_v60 = vsub.f32 1.5, %v537_v59 }
 0x254   : > { %v539_v61 = vmul.f32 %v790_v54, %v538_v60 }
 0x256   : > { %v543_v63 = vsel %vm542_vm7, %v790_v54, %v539_v61 }
 0x257   : > { %785 = vset.pattern.permute.xlu0 %v799_v38  ;;  %551 = vperm.xlu2 %784, %v543_v63  }
 0x258   : > { %567 = vperm.xlu0 %785, %v559_v62  }
 0x25f   : > { %786 = vset.pattern.permute.xlu2 %v799_v38  ;;  %v520_v38 = vsub.f32 %v922_v18, %v516_v2 }
 0x260   : > { %578 = vperm.xlu2 %786, %v574_v0  }
 0x2b1   : > { %v552_v3 = vpop.permute.xlu2 %551 }
 0x2b2   : > { %v556_v20 = vmul.f32 %v552_v3, %v520_v38  ;;  %v557_v21 = vmul.f32 %v552_v3, %v521_v17 }
 0x2ba   : > { %v579_v12 = vpop.permute.xlu2 %578 }
 0x2c1   : > { %v547_v7 = vpop.permute.xlu0 %546 }
 0x2c2   : > { %v554_v9 = vmul.f32 %v547_v7, %v518_v4  ;;  %v555_v10 = vmul.f32 %v547_v7, %v519_v5 }
 0x2c4   : > { %v570_v13 = vmul.f32 %v563_v11, %v554_v9  ;;  %v571_v14 = vmul.f32 %v563_v11, %v555_v10 }
 0x2c6   : > { %v586_v15 = vadd.f32 %v579_v12, %v570_v13  ;;  %v587_v16 = vadd.f32 %v579_v12, %v571_v14 }
 0x2c8   : > { %v590_v6 = vmax.f32 %v586_v15, 0.0  ;;  %v591_v8 = vmax.f32 %v587_v16, 0.0 }
 0x2ca   : > { %594 = vst [vmem:[%s251_s9] sm:$0xff] %v590_v6  ;;  %v568_v22 = vpop.permute.xlu0 %567 }
 0x2cb   : > { %595 = vst [vmem:[%s251_s9 + $0x8] sm:$0xff] %v591_v8  ;;  %v572_v23 = vmul.f32 %v568_v22, %v556_v20  ;;  %v573_v24 = vmul.f32 %v568_v22, %v557_v21 }
 0x2cd   : > { %v588_v26 = vadd.f32 %v584_v25, %v572_v23  ;;  %v589_v27 = vadd.f32 %v584_v25, %v573_v24 }
 0x2cf   : > { %v592_v28 = vmax.f32 %v588_v26, 0.0  ;;  %v593_v18 = vmax.f32 %v589_v27, 0.0 }
 0x2d1   : > { %596 = vst [vmem:[%s251_s9 + $0x10] sm:$0xff] %v592_v28 }
 0x2d2   : > { %597 = vst [vmem:[%s251_s9 + $0x18] sm:$0xff] %v593_v18 }
 0x2d3 PF: > { %s16_s21 = sadd.s32 1, %s797_s21  }
 0x2d4   : > { %p13_p4 = scmp.ge.s32.totalorder %s16_s21, 4  }
 0x2d6   :  { %15 = sbr.rel (!%p13_p4) target bundleno = 1 (0x1), region = 74 }

// kernel: _lambda_.33
= control target key start
LH: loop header
LB: loop body
LE: loop exit
PB: predicated region body
PF: predicated region fallthrough
CT: control target
= control target key end

     0   :  { %s916_s24 = smov 0   ;;  %s1047_s0 = inlined_call_operand.vmem [shape: bf16[2,144,256], index: 0, kind: input, shape index: {}]   ;;  %s1048_s1 = inlined_call_operand.vmem [shape: bf16[16,144], index: 1, kind: input, shape index: {}]   ;;  %s1049_s2 = inlined_call_operand.vmem [shape: f32[16,1], index: 2, kind: input, shape index: {}, may-alias: {2,5}]   ;;  %s1050_s3 = inlined_call_operand.vmem [shape: f32[16,16], index: 3, kind: input, shape index: {}]   ;;  %s1051_s4 = inlined_call_operand.vmem [shape: f32[16,1], index: 4, kind: input, shape index: {}]   ;;  %s1052_s5 = inlined_call_operand.vmem [shape: f32[16,1], index: 5, kind: input, shape index: {}, may-alias: {2,5}]   ;;  %s1053_s6 = inlined_call_operand.vmem [shape: f32[2,16,256], index: 6, kind: input, shape index: {}]   ;;  %s1054_s7 = inlined_call_operand.vmem [shape: f32[2,16,256], index: 7, kind: output, shape index: {}]  }
   0x1 LB: > { %s724_s25 = sadd.s32 4294967295, %s871_s24   ;;  %p728_p0 = scmp.ge.s32.totalorder %s871_s24, 1  ;;  %s871_s24 = sphi %s916_s24, %s17_s24  }
   0x2   : > { %p247_p1 = scmp.lt.s32.totalorder %s871_s24, 3 }
   0x4   : > { %p248_p2 = pnand %p728_p0, %p247_p1 }
   0x5   : > { %p284_p3 = scmp.lt.s32.totalorder (!%p248_p2), %s724_s25, 1  ;;  %s874_s23 = smov (!%p248_p2), 1  }
   0x6   : > { %251 = sbr.rel (%p248_p2) target bundleno = 727 (0x2d7), region = 48 }
   0xb   : > { %s1056_s25 = smov (!%p284_p3, %s724_s25), 1  ;;  %v822_v18 = vld [vmem:[%s1048_s1 + $0x4] sm:$0xf]  ;;  %v738_v19 = vld [vmem:[%s1048_s1 + $0x8] sm:$0xf0]  ;;  %vm431_vm0 = vcmask 130048  }
   0xc   : > { %s842_s26 = smul.u32 144, %s1056_s25  ;;  %v741_v27 = vor.u32 %v822_v18, %v738_v19  ;;  %v321_v35 = vld [vmem:[%s1049_s2 + $0x8] sm:$0xff]  ;;  %v873_v38 = vmov 0   ;;  %v320_v49 = vld [vmem:[%s1049_s2] sm:$0xff]  ;;  %vm507_vm1 = vcmask 7168   ;;  %s820_s11 = sshll.u32 %s1056_s25, 5 }
   0xd   : > { %854 = vset.pattern.permute.xlu0 %v873_v38  ;;  %855 = vset.pattern.permute.xlu2 %v873_v38  ;;  %v736_v59 = vld [vmem:[%s1048_s1] sm:$0xf]  ;;  %v823_v60 = vld [vmem:[%s1048_s1 + $0x4] sm:$0xf0]  ;;  %s293_s14 = scalar_lea.vmem %s1053_s6, %s820_s11  ;;  %s298_s16 = scalar_lea.vmem %s1054_s7, %s820_s11 }
   0xe   : > { %s930_s29 = scalar_lea.vmem %s1047_s0, %s842_s26  ;;  %329 = vperm.xlu0 %854, %v321_v35   ;;  %856 = vset.pattern.permute.xlu1 %v873_v38  ;;  %v737_v62 = vor.u32 %v823_v60, %v736_v59 }
   0xf   : > { %v800_v0 = vld [vmem:[%s930_s29 + $0x70] sm:$0xf]  ;;  %v839_v1 = vld [vmem:[%s930_s29 + $0x74] sm:$0xf0]  ;;  %v838_v2 = vld [vmem:[%s930_s29 + $0x74] sm:$0xf] }
  0x10   : > { %v801_v3 = vor.u32 %v839_v1, %v800_v0  ;;  %v802_v4 = vld [vmem:[%s930_s29 + $0x78] sm:$0xf0]  ;;  %v792_v5 = vld [vmem:[%s930_s29 + $0x60] sm:$0xf]  ;;  %v837_v6 = vld [vmem:[%s930_s29 + $0x64] sm:$0xf0] }
  0x11   : > { %v805_v7 = vor.u32 %v838_v2, %v802_v4  ;;  %v836_v8 = vld [vmem:[%s930_s29 + $0x64] sm:$0xf]  ;;  %v794_v9 = vld [vmem:[%s930_s29 + $0x68] sm:$0xf0]  ;;  %v793_v10 = vor.u32 %v837_v6, %v792_v5  ;;  %v784_v12 = vld [vmem:[%s930_s29 + $0x50] sm:$0xf] }
  0x12   : > { %435 = vmatpush.bf16.msra.mxu0 %v801_v3  ;;  %v797_v11 = vor.u32 %v836_v8, %v794_v9  ;;  %v835_v13 = vld [vmem:[%s930_s29 + $0x54] sm:$0xf0]  ;;  %v834_v14 = vld [vmem:[%s930_s29 + $0x54] sm:$0xf]  ;;  %v786_v15 = vld [vmem:[%s930_s29 + $0x58] sm:$0xf0] }
  0x13   : > { %463 = vmatpush.bf16.msra.mxu2 %v805_v7  ;;  %v785_v16 = vor.u32 %v835_v13, %v784_v12  ;;  %v776_v17 = vld [vmem:[%s930_s29 + $0x40] sm:$0xf]  ;;  %v789_v20 = vor.u32 %v834_v14, %v786_v15  ;;  %v833_v21 = vld [vmem:[%s930_s29 + $0x44] sm:$0xf0]  ;;  %v840_v22 = vld [vmem:[%s930_s29 + $0x84] sm:$0xf] }
  0x14   : > { %v810_v23 = vld [vmem:[%s930_s29 + $0x88] sm:$0xf0]  ;;  %v832_v24 = vld [vmem:[%s930_s29 + $0x44] sm:$0xf]  ;;  %v808_v28 = vld [vmem:[%s930_s29 + $0x80] sm:$0xf]  ;;  %v777_v29 = vor.u32 %v833_v21, %v776_v17 }
  0x15   : > { %v778_v25 = vld [vmem:[%s930_s29 + $0x48] sm:$0xf0]  ;;  %v813_v26 = vor.u32 %v840_v22, %v810_v23  ;;  %v841_v30 = vld [vmem:[%s930_s29 + $0x84] sm:$0xf0]  ;;  %v768_v32 = vld [vmem:[%s930_s29 + $0x30] sm:$0xf] }
  0x16   : > { %436 = vmatpush.bf16.msra.mxu0 %v793_v10  ;;  %v781_v31 = vor.u32 %v832_v24, %v778_v25  ;;  %v831_v33 = vld [vmem:[%s930_s29 + $0x34] sm:$0xf0]  ;;  %v809_v34 = vor.u32 %v841_v30, %v808_v28  ;;  %v830_v36 = vld [vmem:[%s930_s29 + $0x34] sm:$0xf]  ;;  %v770_v37 = vld [vmem:[%s930_s29 + $0x38] sm:$0xf0]  ;;  %324 = vperm.xlu0 %854, %v320_v49  }
  0x17   : > { %464 = vmatpush.bf16.msra.mxu2 %v797_v11  ;;  %484 = vmatpush.bf16.msra.mxu3 %v813_v26  ;;  %v769_v39 = vor.u32 %v831_v33, %v768_v32  ;;  %v773_v40 = vor.u32 %v830_v36, %v770_v37  ;;  %v760_v41 = vld [vmem:[%s930_s29 + $0x20] sm:$0xf]  ;;  %v829_v42 = vld [vmem:[%s930_s29 + $0x24] sm:$0xf0]  ;;  %v828_v43 = vld [vmem:[%s930_s29 + $0x24] sm:$0xf] }
  0x18   : > { %456 = vmatpush.bf16.msra.mxu1 %v809_v34  ;;  %v762_v44 = vld [vmem:[%s930_s29 + $0x28] sm:$0xf0]  ;;  %v761_v45 = vor.u32 %v829_v42, %v760_v41  ;;  %v752_v47 = vld [vmem:[%s930_s29 + $0x10] sm:$0xf]  ;;  %v827_v48 = vld [vmem:[%s930_s29 + $0x14] sm:$0xf0] }
  0x19   : > { %v765_v46 = vor.u32 %v828_v43, %v762_v44  ;;  %v826_v50 = vld [vmem:[%s930_s29 + $0x14] sm:$0xf]  ;;  %v754_v51 = vld [vmem:[%s930_s29 + $0x18] sm:$0xf0]  ;;  %v753_v52 = vor.u32 %v827_v48, %v752_v47  ;;  %v744_v54 = vld [vmem:[%s930_s29] sm:$0xf] }
  0x1a   : > { %437 = vmatpush.bf16.msra.mxu0 %v785_v16  ;;  %815 = vmatmul.msk.bf16.vlgmr.msra.gmra.mxu3 %vm431_vm0, %v741_v27  ;;  %v757_v53 = vor.u32 %v826_v50, %v754_v51  ;;  %v825_v55 = vld [vmem:[%s930_s29 + $0x4] sm:$0xf0]  ;;  %v824_v56 = vld [vmem:[%s930_s29 + $0x4] sm:$0xf]  ;;  %v746_v57 = vld [vmem:[%s930_s29 + $0x8] sm:$0xf0] }
  0x1b   : > { %465 = vmatpush.bf16.msra.mxu2 %v789_v20  ;;  %814 = vmatmul.msk.bf16.vlgmr.msra.gmra.mxu1 %vm431_vm0, %v741_v27  ;;  %v745_v58 = vor.u32 %v825_v55, %v744_v54  ;;  %v749_v61 = vor.u32 %v824_v56, %v746_v57  ;;  %v510_v30 = vld [vmem:[%s1050_s3] sm:$0xff]  ;;  %v511_v32 = vld [vmem:[%s1050_s3 + $0x8] sm:$0xff] }
  0x1c   : > { %v605_v37 = vld [vmem:[%s1051_s4] sm:$0xff] }
  0x1e   : > { %438 = vmatpush.bf16.msra.mxu0 %v777_v29 }
  0x1f   : > { %466 = vmatpush.bf16.msra.mxu2 %v781_v31 }
  0x22   : > { %439 = vmatpush.bf16.msra.mxu0 %v769_v39  ;;  %v875_v39 = vmov 1  }
  0x23   : > { %467 = vmatpush.bf16.msra.mxu2 %v773_v40  ;;  %v622_v40 = vld [vmem:[%s1052_s5 + $0x8] sm:$0xff] }
  0x26   : > { %440 = vmatpush.bf16.msra.mxu0 %v761_v45 }
  0x27   : > { %468 = vmatpush.bf16.msra.mxu2 %v765_v46 }
  0x2a   : > { %441 = vmatpush.bf16.msra.mxu0 %v753_v52 }
  0x2b   : > { %469 = vmatpush.bf16.msra.mxu2 %v757_v53 }
  0x2e   : > { %442 = vmatpush.bf16.msra.mxu0 %v745_v58 }
  0x2f   : > { %470 = vmatpush.bf16.msra.mxu2 %v749_v61 }
  0x31   : > { %443 = vmatmul.bf16.vlgmr.msra.gmra.mxu0 %v737_v62 }
  0x32   : > { %471 = vmatmul.bf16.vlgmr.msra.gmra.mxu2 %v737_v62  ;;  %v606_v62 = vld [vmem:[%s1051_s4 + $0x8] sm:$0xff] }
  0x80   : > { %v330_v63 = vpop.permute.xlu0 %329 }
  0x88   : > { %v325_v1 = vpop.permute.xlu0 %324 }
  0x98   : > { %v458_v3 = vpop.f32.mrf.mxu1 }
  0x9d   : > { %v486_v4 = vpop.f32.mrf.mxu3 }
  0xa0   : > { %v460_v16 = vpop.f32.mrf.mxu1 }
  0xa5   : > { %v488_v17 = vpop.f32.mrf.mxu3 }
  0xae   : > { %v444_v0 = vpop.f32.mrf.mxu0 }
  0xaf   : > { %v445_v2 = vadd.f32 %v444_v0, %v325_v1  ;;  %v621_v0 = vld [vmem:[%s1052_s5] sm:$0xff] }
  0xb1   : > { %v991_v6 = vadd.f32 %v458_v3, %v445_v2 }
  0xb3   : > { %v497_v14 = vmul.f32 %v991_v6, %v991_v6 }
  0xb5   : > { %v472_v5 = vpop.f32.mrf.mxu2 }
  0xb6   : > { %v473_v7 = vadd.f32 %v472_v5, %v325_v1  ;;  %v446_v9 = vpop.f32.mrf.mxu0 }
  0xb7   : > { %v447_v11 = vadd.f32 %v446_v9, %v330_v63 }
  0xb8   : > { %v993_v8 = vadd.f32 %v486_v4, %v473_v7 }
  0xb9   : > { %v1001_v18 = vadd.f32 %v460_v16, %v447_v11 }
  0xba   : > { %v491_v10 = vadd.f32 %v993_v8, %v991_v6  ;;  %v498_v15 = vmul.f32 %v993_v8, %v993_v8 }
  0xbb   : > { %v499_v23 = vmul.f32 %v1001_v18, %v1001_v18 }
  0xbc   : > { %492 = vadd.xlane.f32.xlu2 %v491_v10  ;;  %v501_v21 = vadd.f32 %v498_v15, %v497_v14 }
  0xbd   : > { %v474_v12 = vpop.f32.mrf.mxu2 }
  0xbe   : > { %v475_v13 = vadd.f32 %v474_v12, %v330_v63 }
  0xc0   : > { %v1003_v19 = vadd.f32 %v488_v17, %v475_v13  ;;  %v641_v17 = vld [vmem:[%s293_s14] sm:$0xff] }
  0xc2   : > { %v494_v20 = vadd.f32 %v1003_v19, %v1001_v18  ;;  %v500_v22 = vmul.f32 %v1003_v19, %v1003_v19 }
  0xc4   : > { %495 = vadd.xlane.f32.xlu1 %v494_v20  ;;  %502 = vadd.xlane.f32.xlu2 %v501_v21  ;;  %v504_v24 = vadd.f32 %v500_v22, %v499_v23 }
  0xcc   : > { %505 = vadd.xlane.f32.xlu1 %v504_v24 }
 0x12f   : > { %v493_v25 = vpop.xlane.xlu2 %492 }
 0x137   : > { %v496_v26 = vpop.xlane.xlu1 %495  ;;  %v503_v27 = vpop.xlane.xlu2 %502 }
 0x138   : > { %v508_v31 = vsel %vm507_vm1, %v493_v25, %v503_v27 }
 0x13f   : > { %v506_v28 = vpop.xlane.xlu1 %505 }
 0x140   : > { %v509_v29 = vsel %vm507_vm1, %v496_v26, %v506_v28 }
 0x141   : > { %532 = vmatpush.msrb.mxu1 %v509_v29 }
 0x143   : > { %533 = vmatpush.msrb.mxu1 %v508_v31 }
 0x144   : > { %816 = vmatmul.msk.f32.vlgmr.msrb.gmra.mxu1 %vm431_vm0, %v510_v30 }
 0x14c   : > { %817 = vmatmul.msk.f32.gmra.mxu1 %vm431_vm0, %v511_v32  ;;  %v643_v32 = vld [vmem:[%s293_s14 + $0x10] sm:$0xff] }
 0x1c1   : > { %v535_v33 = vpop.f32.mrf.mxu1 }
 0x1c2   : > { %v541_v34 = vmul.f32 %v535_v33, %v535_v33  ;;  %557 = vperm.xlu2 %855, %v535_v33  }
 0x1c4   : > { %545 = vrot.lane.b32.xlu0 %v541_v34, %s874_s23 }
 0x1c9   : > { %v538_v35 = vpop.f32.mrf.mxu1 }
 0x1ca   : > { %v542_v36 = vmul.f32 %v538_v35, %v538_v35  ;;  %858 = vset.pattern.permute.xlu2 %v875_v39 }
 0x1cc   : > { %562 = vperm.xlu0 %854, %v538_v35   ;;  %547 = vrot.lane.b32.xlu1 %v542_v36, %s874_s23 }
 0x1d4   : > { %609 = vperm.xlu1 %856, %v605_v37   ;;  %857 = vset.pattern.permute.xlu0 %v875_v39 }
 0x1dc   : > { %630 = vperm.xlu1 %856, %v622_v40  }
 0x21c   : > { %v558_v1 = vpop.permute.xlu2 %557 }
 0x21d   : > { %v565_v4 = vsub.f32 %v991_v6, %v558_v1  ;;  %v566_v5 = vsub.f32 %v993_v8, %v558_v1  ;;  %v642_v8 = vld [vmem:[%s293_s14 + $0x8] sm:$0xff] }
 0x236   : > { %v546_v41 = vpop.permute.xlu0 %545 }
 0x237   : > { %v551_v42 = vsub.f32 %v535_v33, %v546_v41  ;;  %v644_v33 = vld [vmem:[%s293_s14 + $0x18] sm:$0xff] }
 0x239   : > { %v553_v43 = vmax.f32 %v551_v42, 0.0 }
 0x23b   : > { %v569_v44 = vadd.f32 1e-05, %v553_v43 }
 0x23d   : > { %861 = vrsqrt.f32 %v569_v44  ;;  %vm577_vm3 = vweird.f32 %v569_v44 }
 0x23e   : > { %v548_v45 = vpop.permute.xlu1 %547  ;;  %v563_v2 = vpop.permute.xlu0 %562 }
 0x23f   : > { %v552_v46 = vsub.f32 %v538_v35, %v548_v45  ;;  %v567_v16 = vsub.f32 %v1001_v18, %v563_v2  ;;  %v568_v6 = vsub.f32 %v1003_v19, %v563_v2 }
 0x241   : > { %v554_v47 = vmax.f32 %v552_v46, 0.0 }
 0x243   : > { %v862_v48 = vpop.eup %861  ;;  %v570_v49 = vadd.f32 1e-05, %v554_v47 }
 0x244   : > { %v572_v50 = vmul.f32 %v862_v48, %v569_v44  ;;  %vm578_vm2 = vweird.f32 %v862_v48 }
 0x245   : > { %863 = vrsqrt.f32 %v570_v49  ;;  %vm579_vm4 = vmor %vm577_vm3, %vm578_vm2  ;;  %vm587_vm6 = vweird.f32 %v570_v49 }
 0x246   : > { %v573_v51 = vmul.f32 %v862_v48, %v572_v50  ;;  %v610_v11 = vpop.permute.xlu1 %609 }
 0x248   : > { %v574_v52 = vmul.f32 0.5, %v573_v51 }
 0x24a   : > { %v575_v53 = vsub.f32 1.5, %v574_v52 }
 0x24b   : > { %v864_v54 = vpop.eup %863 }
 0x24c   : > { %v582_v55 = vmul.f32 %v864_v54, %v570_v49  ;;  %v576_v56 = vmul.f32 %v862_v48, %v575_v53  ;;  %vm588_vm5 = vweird.f32 %v864_v54 }
 0x24d   : > { %vm589_vm7 = vmor %vm587_vm6, %vm588_vm5 }
 0x24e   : > { %v583_v57 = vmul.f32 %v864_v54, %v582_v55  ;;  %v580_v58 = vsel %vm579_vm4, %v862_v48, %v576_v56  ;;  %v631_v18 = vpop.permute.xlu1 %630 }
 0x24f   : > { %593 = vperm.xlu0 %857, %v580_v58  }
 0x250   : > { %v584_v59 = vmul.f32 0.5, %v583_v57 }
 0x252   : > { %v585_v60 = vsub.f32 1.5, %v584_v59 }
 0x254   : > { %v586_v61 = vmul.f32 %v864_v54, %v585_v60 }
 0x256   : > { %v590_v63 = vsel %vm589_vm7, %v864_v54, %v586_v61 }
 0x257   : > { %859 = vset.pattern.permute.xlu0 %v873_v38  ;;  %598 = vperm.xlu2 %858, %v590_v63  }
 0x258   : > { %614 = vperm.xlu0 %859, %v606_v62  }
 0x25f   : > { %860 = vset.pattern.permute.xlu2 %v873_v38 }
 0x260   : > { %625 = vperm.xlu2 %860, %v621_v0  }
 0x2b1   : > { %v599_v3 = vpop.permute.xlu2 %598 }
 0x2b2   : > { %v603_v22 = vmul.f32 %v599_v3, %v567_v16  ;;  %v604_v23 = vmul.f32 %v599_v3, %v568_v6 }
 0x2ba   : > { %v626_v12 = vpop.permute.xlu2 %625 }
 0x2c1   : > { %v594_v7 = vpop.permute.xlu0 %593 }
 0x2c2   : > { %v601_v9 = vmul.f32 %v594_v7, %v565_v4  ;;  %v602_v10 = vmul.f32 %v594_v7, %v566_v5 }
 0x2c4   : > { %v617_v13 = vmul.f32 %v610_v11, %v601_v9  ;;  %v618_v14 = vmul.f32 %v610_v11, %v602_v10 }
 0x2c6   : > { %v633_v38 = vadd.f32 %v626_v12, %v617_v13  ;;  %v634_v15 = vadd.f32 %v626_v12, %v618_v14 }
 0x2c8   : > { %v637_v20 = vmax.f32 %v633_v38, 0.0  ;;  %v638_v21 = vmax.f32 %v634_v15, 0.0 }
 0x2ca   : > { %v645_v24 = vadd.f32 %v641_v17, %v637_v20  ;;  %v646_v25 = vadd.f32 %v642_v8, %v638_v21  ;;  %v615_v26 = vpop.permute.xlu0 %614 }
 0x2cb   : > { %v619_v27 = vmul.f32 %v615_v26, %v603_v22  ;;  %v620_v28 = vmul.f32 %v615_v26, %v604_v23 }
 0x2cc   : > { %v649_v29 = vmax.f32 %v645_v24, 0.0  ;;  %v650_v30 = vmax.f32 %v646_v25, 0.0 }
 0x2cd   : > { %v635_v31 = vadd.f32 %v631_v18, %v619_v27  ;;  %v636_v19 = vadd.f32 %v631_v18, %v620_v28 }
 0x2ce   : > { %653 = vst [vmem:[%s298_s16] sm:$0xff] %v649_v29 }
 0x2cf   : > { %654 = vst [vmem:[%s298_s16 + $0x8] sm:$0xff] %v650_v30  ;;  %v639_v34 = vmax.f32 %v635_v31, 0.0  ;;  %v640_v35 = vmax.f32 %v636_v19, 0.0 }
 0x2d1   : > { %v647_v36 = vadd.f32 %v643_v32, %v639_v34  ;;  %v648_v37 = vadd.f32 %v644_v33, %v640_v35 }
 0x2d3   : > { %v651_v39 = vmax.f32 %v647_v36, 0.0  ;;  %v652_v40 = vmax.f32 %v648_v37, 0.0 }
 0x2d5   : > { %655 = vst [vmem:[%s298_s16 + $0x10] sm:$0xff] %v651_v39 }
 0x2d6   : > { %656 = vst [vmem:[%s298_s16 + $0x18] sm:$0xff] %v652_v40 }
 0x2d7 PF: > { %s17_s24 = sadd.s32 1, %s871_s24  }
 0x2d8   : > { %p14_p4 = scmp.ge.s32.totalorder %s17_s24, 4  }
 0x2da   :  { %16 = sbr.rel (!%p14_p4) target bundleno = 1 (0x1), region = 81 }

// kernel: _lambda_.36
= control target key start
LH: loop header
LB: loop body
LE: loop exit
PB: predicated region body
PF: predicated region fallthrough
CT: control target
= control target key end

     0   :  { %s714_s21 = smov 0   ;;  %s797_s0 = inlined_call_operand.vmem [shape: bf16[2,144,64], index: 0, kind: input, shape index: {}]   ;;  %s798_s1 = inlined_call_operand.vmem [shape: bf16[16,144], index: 1, kind: input, shape index: {}]   ;;  %s799_s2 = inlined_call_operand.vmem [shape: f32[16,1], index: 2, kind: input, shape index: {}, may-alias: {2,5}]   ;;  %s800_s3 = inlined_call_operand.vmem [shape: f32[16,16], index: 3, kind: input, shape index: {}]   ;;  %s801_s4 = inlined_call_operand.vmem [shape: f32[16,1], index: 4, kind: input, shape index: {}]   ;;  %s802_s5 = inlined_call_operand.vmem [shape: f32[16,1], index: 5, kind: input, shape index: {}, may-alias: {2,5}]   ;;  %s803_s6 = inlined_call_operand.vmem [shape: f32[2,16,64], index: 6, kind: output, shape index: {}]  }
   0x1 LB: > { %s576_s22 = sadd.s32 4294967295, %s674_s21   ;;  %p580_p0 = scmp.ge.s32.totalorder %s674_s21, 1  ;;  %s674_s21 = sphi %s714_s21, %s16_s21  }
   0x2   : > { %p212_p1 = scmp.lt.s32.totalorder %s674_s21, 3 }
   0x4   : > { %p213_p2 = pnand %p580_p0, %p212_p1 }
   0x5   : > { %p242_p3 = scmp.lt.s32.totalorder (!%p213_p2), %s576_s22, 1  ;;  %s677_s19 = smov (!%p213_p2), 1  }
   0x6   : > { %216 = sbr.rel (%p213_p2) target bundleno = 718 (0x2ce), region = 44 }
   0xb   : > { %s805_s22 = smov (!%p242_p3, %s576_s22), 1  ;;  %v634_v1 = vld [vmem:[%s798_s1 + $0x4] sm:$0xf]  ;;  %v588_v2 = vld [vmem:[%s798_s1 + $0x8] sm:$0xf0]  ;;  %v676_v5 = vmov 0  }
   0xc   : > { %s645_s23 = smul.u32 72, %s805_s22  ;;  %657 = vset.pattern.permute.xlu0 %v676_v5  ;;  %v591_v6 = vor.u32 %v634_v1, %v588_v2  ;;  %v274_v7 = vld [vmem:[%s799_s2 + $0x8] sm:$0xff]  ;;  %658 = vset.pattern.permute.xlu2 %v676_v5  ;;  %vm348_vm0 = vcmask 130048   ;;  %v273_v9 = vld [vmem:[%s799_s2] sm:$0xff]  ;;  %vm380_vm1 = vcmask 523264   ;;  %vm395_vm2 = vcmask 7168  }
   0xd   : > { %659 = vset.pattern.permute.xlu1 %v676_v5  ;;  %282 = vperm.xlu0 %657, %v274_v7   ;;  %v586_v15 = vld [vmem:[%s798_s1] sm:$0xf]  ;;  %v635_v16 = vld [vmem:[%s798_s1 + $0x4] sm:$0xf0]  ;;  %v678_v47 = vmov 1   ;;  %s633_s30 = sshll.u32 %s805_s22, 4 }
   0xe   : > { %s246_s26 = scalar_lea.vmem %s797_s0, %s645_s23  ;;  %v587_v17 = vor.u32 %v635_v16, %v586_v15  ;;  %v398_v39 = vld [vmem:[%s800_s3] sm:$0xff]  ;;  %v399_v41 = vld [vmem:[%s800_s3 + $0x8] sm:$0xff]  ;;  %s251_s9 = scalar_lea.vmem %s803_s6, %s633_s30 }
   0xf   : > { %v643_v0 = vld [vmem:[%s246_s26 + $0x38] sm:$0xff]  ;;  %v642_v3 = vld [vmem:[%s246_s26 + $0x30] sm:$0xff]  ;;  %v644_v4 = vld [vmem:[%s246_s26 + $0x40] sm:$0xff] }
  0x10   : > { %352 = vmatpush.bf16.msra.mxu0 %v643_v0  ;;  %373 = vmatpush.bf16.msra.mxu1 %v644_v4  ;;  %v641_v8 = vld [vmem:[%s246_s26 + $0x28] sm:$0xff]  ;;  %v640_v10 = vld [vmem:[%s246_s26 + $0x20] sm:$0xff]  ;;  %v639_v11 = vld [vmem:[%s246_s26 + $0x18] sm:$0xff] }
  0x11   : > { %v638_v12 = vld [vmem:[%s246_s26 + $0x10] sm:$0xff]  ;;  %v637_v13 = vld [vmem:[%s246_s26 + $0x8] sm:$0xff]  ;;  %v636_v14 = vld [vmem:[%s246_s26] sm:$0xff] }
  0x12   : > { %v489_v46 = vld [vmem:[%s801_s4] sm:$0xff]  ;;  %v504_v48 = vld [vmem:[%s802_s5 + $0x8] sm:$0xff] }
  0x13   : > { %628 = vmatmul.msk.bf16.vlgmr.msra.gmra.mxu1 %vm348_vm0, %v591_v6  ;;  %v490_v7 = vld [vmem:[%s801_s4 + $0x8] sm:$0xff] }
  0x14   : > { %353 = vmatpush.bf16.msra.mxu0 %v642_v3 }
  0x15   : > { %277 = vperm.xlu0 %657, %v273_v9   ;;  %v503_v9 = vld [vmem:[%s802_s5] sm:$0xff] }
  0x18   : > { %354 = vmatpush.bf16.msra.mxu0 %v641_v8 }
  0x1c   : > { %355 = vmatpush.bf16.msra.mxu0 %v640_v10 }
  0x20   : > { %356 = vmatpush.bf16.msra.mxu0 %v639_v11 }
  0x24   : > { %357 = vmatpush.bf16.msra.mxu0 %v638_v12 }
  0x28   : > { %358 = vmatpush.bf16.msra.mxu0 %v637_v13 }
  0x2c   : > { %359 = vmatpush.bf16.msra.mxu0 %v636_v14 }
  0x2f   : > { %360 = vmatmul.bf16.vlgmr.msra.gmra.mxu0 %v587_v17 }
  0x7f   : > { %v283_v18 = vpop.permute.xlu0 %282 }
  0x87   : > { %v278_v19 = vpop.permute.xlu0 %277 }
  0x90   : > { %v375_v20 = vpop.f32.mrf.mxu1 }
  0x98   : > { %v377_v28 = vpop.f32.mrf.mxu1 }
  0xac   : > { %v361_v21 = vpop.f32.mrf.mxu0 }
  0xad   : > { %v362_v22 = vadd.f32 %v361_v21, %v278_v19 }
  0xaf   : > { %v750_v23 = vadd.f32 %v375_v20, %v362_v22 }
  0xb1   : > { %v381_v24 = vsel %vm380_vm1, %v750_v23, 0.0  ;;  %v387_v27 = vmul.f32 %v750_v23, %v750_v23 }
  0xb2   : > { %382 = vadd.xlane.f32.xlu2 %v381_v24 }
  0xb3   : > { %v389_v31 = vsel %vm380_vm1, %v387_v27, 0.0 }
  0xb4   : > { %v363_v25 = vpop.f32.mrf.mxu0 }
  0xb5   : > { %v364_v26 = vadd.f32 %v363_v25, %v283_v18 }
  0xb7   : > { %v756_v29 = vadd.f32 %v377_v28, %v364_v26 }
  0xb9   : > { %v384_v30 = vsel %vm380_vm1, %v756_v29, 0.0  ;;  %v388_v32 = vmul.f32 %v756_v29, %v756_v29 }
  0xba   : > { %385 = vadd.xlane.f32.xlu1 %v384_v30  ;;  %390 = vadd.xlane.f32.xlu2 %v389_v31 }
  0xbb   : > { %v392_v33 = vsel %vm380_vm1, %v388_v32, 0.0 }
  0xc2   : > { %393 = vadd.xlane.f32.xlu1 %v392_v33 }
 0x125   : > { %v383_v34 = vpop.xlane.xlu2 %382 }
 0x12d   : > { %v386_v35 = vpop.xlane.xlu1 %385  ;;  %v391_v36 = vpop.xlane.xlu2 %390 }
 0x12e   : > { %v396_v40 = vsel %vm395_vm2, %v383_v34, %v391_v36 }
 0x135   : > { %v394_v37 = vpop.xlane.xlu1 %393 }
 0x136   : > { %v397_v38 = vsel %vm395_vm2, %v386_v35, %v394_v37 }
 0x137   : > { %420 = vmatpush.msra.mxu2 %v397_v38 }
 0x139   : > { %421 = vmatpush.msra.mxu2 %v396_v40 }
 0x13a   : > { %629 = vmatmul.msk.f32.vlgmr.msra.gmra.mxu2 %vm348_vm0, %v398_v39 }
 0x142   : > { %630 = vmatmul.msk.f32.gmra.mxu2 %vm348_vm0, %v399_v41 }
 0x1bd   : > { %v423_v42 = vpop.f32.mrf.mxu2 }
 0x1be   : > { %v429_v43 = vmul.f32 %v423_v42, %v423_v42  ;;  %445 = vperm.xlu2 %658, %v423_v42  }
 0x1c0   : > { %433 = vrot.lane.b32.xlu0 %v429_v43, %s677_s19 }
 0x1c5   : > { %v426_v44 = vpop.f32.mrf.mxu2 }
 0x1c6   : > { %v430_v45 = vmul.f32 %v426_v44, %v426_v44  ;;  %661 = vset.pattern.permute.xlu2 %v678_v47 }
 0x1c8   : > { %450 = vperm.xlu0 %657, %v426_v44   ;;  %435 = vrot.lane.b32.xlu1 %v430_v45, %s677_s19 }
 0x1d0   : > { %493 = vperm.xlu1 %659, %v489_v46   ;;  %660 = vset.pattern.permute.xlu0 %v678_v47 }
 0x1d8   : > { %512 = vperm.xlu1 %659, %v504_v48  }
 0x218   : > { %v446_v10 = vpop.permute.xlu2 %445 }
 0x219   : > { %v453_v13 = vsub.f32 %v750_v23, %v446_v10 }
 0x232   : > { %v434_v49 = vpop.permute.xlu0 %433 }
 0x233   : > { %v439_v50 = vsub.f32 %v423_v42, %v434_v49 }
 0x235   : > { %v441_v51 = vmax.f32 %v439_v50, 0.0 }
 0x237   : > { %v455_v52 = vadd.f32 1e-05, %v441_v51 }
 0x239   : > { %664 = vrsqrt.f32 %v455_v52  ;;  %vm463_vm4 = vweird.f32 %v455_v52 }
 0x23a   : > { %v436_v53 = vpop.permute.xlu1 %435  ;;  %v451_v11 = vpop.permute.xlu0 %450 }
 0x23b   : > { %v440_v54 = vsub.f32 %v426_v44, %v436_v53  ;;  %v454_v20 = vsub.f32 %v756_v29, %v451_v11 }
 0x23d   : > { %v442_v55 = vmax.f32 %v440_v54, 0.0 }
 0x23f   : > { %v665_v56 = vpop.eup %664  ;;  %v456_v57 = vadd.f32 1e-05, %v442_v55 }
 0x240   : > { %v458_v58 = vmul.f32 %v665_v56, %v455_v52  ;;  %vm464_vm3 = vweird.f32 %v665_v56 }
 0x241   : > { %666 = vrsqrt.f32 %v456_v57  ;;  %vm465_vm5 = vmor %vm463_vm4, %vm464_vm3  ;;  %vm473_vm7 = vweird.f32 %v456_v57 }
 0x242   : > { %v459_v59 = vmul.f32 %v665_v56, %v458_v58  ;;  %v494_v15 = vpop.permute.xlu1 %493 }
 0x244   : > { %v460_v60 = vmul.f32 0.5, %v459_v59 }
 0x246   : > { %v461_v61 = vsub.f32 1.5, %v460_v60 }
 0x247   : > { %v667_v62 = vpop.eup %666 }
 0x248   : > { %v468_v63 = vmul.f32 %v667_v62, %v456_v57  ;;  %v462_v0 = vmul.f32 %v665_v56, %v461_v61  ;;  %vm474_vm6 = vweird.f32 %v667_v62 }
 0x249   : > { %vm475_vm8 = vmor %vm473_vm7, %vm474_vm6 }
 0x24a   : > { %v469_v1 = vmul.f32 %v667_v62, %v468_v63  ;;  %v466_v2 = vsel %vm465_vm5, %v665_v56, %v462_v0  ;;  %v513_v23 = vpop.permute.xlu1 %512 }
 0x24b   : > { %479 = vperm.xlu0 %660, %v466_v2  }
 0x24c   : > { %v470_v3 = vmul.f32 0.5, %v469_v1 }
 0x24e   : > { %v471_v4 = vsub.f32 1.5, %v470_v3 }
 0x250   : > { %v472_v6 = vmul.f32 %v667_v62, %v471_v4 }
 0x252   : > { %v476_v8 = vsel %vm475_vm8, %v667_v62, %v472_v6 }
 0x253   : > { %662 = vset.pattern.permute.xlu0 %v676_v5  ;;  %484 = vperm.xlu2 %661, %v476_v8  }
 0x254   : > { %498 = vperm.xlu0 %662, %v490_v7  }
 0x25b   : > { %663 = vset.pattern.permute.xlu2 %v676_v5 }
 0x25c   : > { %507 = vperm.xlu2 %663, %v503_v9  }
 0x2ad   : > { %v485_v12 = vpop.permute.xlu2 %484 }
 0x2ae   : > { %v488_v21 = vmul.f32 %v485_v12, %v454_v20 }
 0x2b6   : > { %v508_v17 = vpop.permute.xlu2 %507 }
 0x2bd   : > { %v480_v14 = vpop.permute.xlu0 %479 }
 0x2be   : > { %v487_v16 = vmul.f32 %v480_v14, %v453_v13 }
 0x2c0   : > { %v501_v18 = vmul.f32 %v494_v15, %v487_v16 }
 0x2c2   : > { %v515_v19 = vadd.f32 %v508_v17, %v501_v18 }
 0x2c4   : > { %v517_v5 = vmax.f32 %v515_v19, 0.0 }
 0x2c6   : > { %519 = vst.msk [vmem:[%s251_s9] sm:$0xff] %vm380_vm1, %v517_v5  ;;  %v499_v22 = vpop.permute.xlu0 %498 }
 0x2c7   : > { %v502_v24 = vmul.f32 %v499_v22, %v488_v21 }
 0x2c9   : > { %v516_v25 = vadd.f32 %v513_v23, %v502_v24 }
 0x2cb   : > { %v518_v26 = vmax.f32 %v516_v25, 0.0 }
 0x2cd   : > { %520 = vst.msk [vmem:[%s251_s9 + $0x8] sm:$0xff] %vm380_vm1, %v518_v26 }
 0x2ce PF: > { %s16_s21 = sadd.s32 1, %s674_s21  }
 0x2cf   : > { %p13_p4 = scmp.ge.s32.totalorder %s16_s21, 4  }
 0x2d1   :  { %15 = sbr.rel (!%p13_p4) target bundleno = 1 (0x1), region = 74 }

// kernel: _lambda_.37
= control target key start
LH: loop header
LB: loop body
LE: loop exit
PB: predicated region body
PF: predicated region fallthrough
CT: control target
= control target key end

     0   :  { %s586_s21 = smov 0   ;;  %s660_s0 = inlined_call_operand.vmem [shape: bf16[2,16,64], index: 0, kind: input, shape index: {}]   ;;  %s661_s1 = inlined_call_operand.vmem [shape: bf16[16,16], index: 1, kind: input, shape index: {}]   ;;  %s662_s2 = inlined_call_operand.vmem [shape: f32[16,1], index: 2, kind: input, shape index: {}, may-alias: {2,5}]   ;;  %s663_s3 = inlined_call_operand.vmem [shape: f32[16,16], index: 3, kind: input, shape index: {}]   ;;  %s664_s4 = inlined_call_operand.vmem [shape: f32[16,1], index: 4, kind: input, shape index: {}]   ;;  %s665_s5 = inlined_call_operand.vmem [shape: f32[16,1], index: 5, kind: input, shape index: {}, may-alias: {2,5}]   ;;  %s666_s6 = inlined_call_operand.vmem [shape: f32[2,16,64], index: 6, kind: output, shape index: {}]  }
   0x1 LB: > { %s492_s22 = sadd.s32 4294967295, %s546_s21   ;;  %p496_p0 = scmp.ge.s32.totalorder %s546_s21, 1  ;;  %s546_s21 = sphi %s586_s21, %s16_s21  }
   0x2   : > { %p212_p1 = scmp.lt.s32.totalorder %s546_s21, 3 }
   0x4   : > { %p213_p2 = pnand %p496_p0, %p212_p1 }
   0x5   : > { %p242_p3 = scmp.lt.s32.totalorder (!%p213_p2), %s492_s22, 1  ;;  %s549_s13 = smov (!%p213_p2), 1  }
   0x6   : > { %216 = sbr.rel (%p213_p2) target bundleno = 679 (0x2a7), region = 44 }
   0xb   : > { %v258_v0 = vld [vmem:[%s662_s2 + $0x8] sm:$0xff]  ;;  %v548_v1 = vmov 0   ;;  %s668_s22 = smov (!%p242_p3, %s492_s22), 1  ;;  %v516_v3 = vld [vmem:[%s661_s1] sm:$0xff]  ;;  %vm280_vm0 = vcmask 130048   ;;  %vm298_vm1 = vcmask 523264  }
   0xc   : > { %529 = vset.pattern.permute.xlu0 %v548_v1  ;;  %530 = vset.pattern.permute.xlu2 %v548_v1  ;;  %s514_s25 = sshll.u32 %s668_s22, 3  ;;  %v257_v4 = vld [vmem:[%s662_s2] sm:$0xff]  ;;  %vm313_vm2 = vcmask 7168   ;;  %v317_v24 = vld [vmem:[%s663_s3 + $0x8] sm:$0xff]  ;;  %v550_v30 = vmov 1   ;;  %s515_s24 = sshll.u32 %s668_s22, 4 }
   0xd   : > { %266 = vperm.xlu0 %529, %v258_v0   ;;  %531 = vset.pattern.permute.xlu1 %v548_v1  ;;  %s246_s28 = scalar_lea.vmem %s660_s0, %s514_s25  ;;  %v316_v22 = vld [vmem:[%s663_s3] sm:$0xff]  ;;  %v422_v31 = vld [vmem:[%s665_s5 + $0x8] sm:$0xff]  ;;  %s251_s27 = scalar_lea.vmem %s666_s6, %s515_s24 }
   0xe   : > { %v517_v2 = vld [vmem:[%s246_s28] sm:$0xff]  ;;  %v408_v53 = vld [vmem:[%s664_s4 + $0x8] sm:$0xff] }
   0xf   : > { %291 = vmatpush.bf16.msra.mxu0 %v517_v2  ;;  %v407_v29 = vld [vmem:[%s664_s4] sm:$0xff] }
  0x10   : > { %v421_v55 = vld [vmem:[%s665_s5] sm:$0xff] }
  0x12   : > { %509 = vmatmul.msk.bf16.vlgmr.msra.gmra.mxu0 %vm280_vm0, %v516_v3 }
  0x15   : > { %261 = vperm.xlu0 %529, %v257_v4  }
  0x7f   : > { %v267_v5 = vpop.permute.xlu0 %266 }
  0x87   : > { %v262_v6 = vpop.permute.xlu0 %261 }
  0x8f   : > { %v293_v7 = vpop.f32.mrf.mxu0 }
  0x90   : > { %v613_v8 = vadd.f32 %v293_v7, %v262_v6 }
  0x92   : > { %v299_v9 = vsel %vm298_vm1, %v613_v8, 0.0  ;;  %v305_v10 = vmul.f32 %v613_v8, %v613_v8 }
  0x93   : > { %300 = vadd.xlane.f32.xlu2 %v299_v9 }
  0x94   : > { %v307_v14 = vsel %vm298_vm1, %v305_v10, 0.0 }
  0x97   : > { %v295_v11 = vpop.f32.mrf.mxu0 }
  0x98   : > { %v619_v12 = vadd.f32 %v295_v11, %v267_v5 }
  0x9a   : > { %v302_v13 = vsel %vm298_vm1, %v619_v12, 0.0  ;;  %v306_v15 = vmul.f32 %v619_v12, %v619_v12 }
  0x9b   : > { %303 = vadd.xlane.f32.xlu1 %v302_v13  ;;  %308 = vadd.xlane.f32.xlu2 %v307_v14 }
  0x9c   : > { %v310_v16 = vsel %vm298_vm1, %v306_v15, 0.0 }
  0xa3   : > { %311 = vadd.xlane.f32.xlu1 %v310_v16 }
 0x106   : > { %v301_v17 = vpop.xlane.xlu2 %300 }
 0x10e   : > { %v304_v18 = vpop.xlane.xlu1 %303  ;;  %v309_v19 = vpop.xlane.xlu2 %308 }
 0x10f   : > { %v314_v23 = vsel %vm313_vm2, %v301_v17, %v309_v19 }
 0x116   : > { %v312_v20 = vpop.xlane.xlu1 %311 }
 0x117   : > { %v315_v21 = vsel %vm313_vm2, %v304_v18, %v312_v20 }
 0x118   : > { %338 = vmatpush.msra.mxu1 %v315_v21 }
 0x11a   : > { %339 = vmatpush.msra.mxu1 %v314_v23 }
 0x11b   : > { %510 = vmatmul.msk.f32.vlgmr.msra.gmra.mxu1 %vm280_vm0, %v316_v22 }
 0x123   : > { %511 = vmatmul.msk.f32.gmra.mxu1 %vm280_vm0, %v317_v24 }
 0x198   : > { %v341_v25 = vpop.f32.mrf.mxu1 }
 0x199   : > { %v347_v26 = vmul.f32 %v341_v25, %v341_v25  ;;  %363 = vperm.xlu2 %530, %v341_v25  }
 0x19b   : > { %351 = vrot.lane.b32.xlu0 %v347_v26, %s549_s13 }
 0x1a0   : > { %v344_v27 = vpop.f32.mrf.mxu1 }
 0x1a1   : > { %v348_v28 = vmul.f32 %v344_v27, %v344_v27  ;;  %533 = vset.pattern.permute.xlu2 %v550_v30 }
 0x1a3   : > { %368 = vperm.xlu0 %529, %v344_v27   ;;  %353 = vrot.lane.b32.xlu1 %v348_v28, %s549_s13 }
 0x1ab   : > { %411 = vperm.xlu1 %531, %v407_v29   ;;  %532 = vset.pattern.permute.xlu0 %v550_v30 }
 0x1b3   : > { %430 = vperm.xlu1 %531, %v422_v31  }
 0x1f3   : > { %v364_v56 = vpop.permute.xlu2 %363 }
 0x1f4   : > { %v371_v59 = vsub.f32 %v613_v8, %v364_v56 }
 0x20d   : > { %v352_v32 = vpop.permute.xlu0 %351 }
 0x20e   : > { %v357_v33 = vsub.f32 %v341_v25, %v352_v32 }
 0x210   : > { %v359_v34 = vmax.f32 %v357_v33, 0.0 }
 0x212   : > { %v373_v35 = vadd.f32 1e-05, %v359_v34 }
 0x214   : > { %536 = vrsqrt.f32 %v373_v35  ;;  %vm381_vm4 = vweird.f32 %v373_v35 }
 0x215   : > { %v354_v36 = vpop.permute.xlu1 %353  ;;  %v369_v57 = vpop.permute.xlu0 %368 }
 0x216   : > { %v358_v37 = vsub.f32 %v344_v27, %v354_v36  ;;  %v372_v3 = vsub.f32 %v619_v12, %v369_v57 }
 0x218   : > { %v360_v38 = vmax.f32 %v358_v37, 0.0 }
 0x21a   : > { %v537_v39 = vpop.eup %536  ;;  %v374_v40 = vadd.f32 1e-05, %v360_v38 }
 0x21b   : > { %v376_v41 = vmul.f32 %v537_v39, %v373_v35  ;;  %vm382_vm3 = vweird.f32 %v537_v39 }
 0x21c   : > { %538 = vrsqrt.f32 %v374_v40  ;;  %vm383_vm5 = vmor %vm381_vm4, %vm382_vm3  ;;  %vm391_vm7 = vweird.f32 %v374_v40 }
 0x21d   : > { %v377_v42 = vmul.f32 %v537_v39, %v376_v41  ;;  %v412_v61 = vpop.permute.xlu1 %411 }
 0x21f   : > { %v378_v43 = vmul.f32 0.5, %v377_v42 }
 0x221   : > { %v379_v44 = vsub.f32 1.5, %v378_v43 }
 0x222   : > { %v539_v45 = vpop.eup %538 }
 0x223   : > { %v386_v46 = vmul.f32 %v539_v45, %v374_v40  ;;  %v380_v47 = vmul.f32 %v537_v39, %v379_v44  ;;  %vm392_vm6 = vweird.f32 %v539_v45 }
 0x224   : > { %vm393_vm8 = vmor %vm391_vm7, %vm392_vm6 }
 0x225   : > { %v387_v48 = vmul.f32 %v539_v45, %v386_v46  ;;  %v384_v49 = vsel %vm383_vm5, %v537_v39, %v380_v47  ;;  %v431_v6 = vpop.permute.xlu1 %430 }
 0x226   : > { %397 = vperm.xlu0 %532, %v384_v49  }
 0x227   : > { %v388_v50 = vmul.f32 0.5, %v387_v48 }
 0x229   : > { %v389_v51 = vsub.f32 1.5, %v388_v50 }
 0x22b   : > { %v390_v52 = vmul.f32 %v539_v45, %v389_v51 }
 0x22d   : > { %v394_v54 = vsel %vm393_vm8, %v539_v45, %v390_v52 }
 0x22e   : > { %534 = vset.pattern.permute.xlu0 %v548_v1  ;;  %402 = vperm.xlu2 %533, %v394_v54  }
 0x22f   : > { %416 = vperm.xlu0 %534, %v408_v53  }
 0x236   : > { %535 = vset.pattern.permute.xlu2 %v548_v1 }
 0x237   : > { %425 = vperm.xlu2 %535, %v421_v55  }
 0x288   : > { %v403_v58 = vpop.permute.xlu2 %402 }
 0x289   : > { %v406_v1 = vmul.f32 %v403_v58, %v372_v3 }
 0x291   : > { %v426_v63 = vpop.permute.xlu2 %425 }
 0x298   : > { %v398_v60 = vpop.permute.xlu0 %397 }
 0x299   : > { %v405_v62 = vmul.f32 %v398_v60, %v371_v59 }
 0x29b   : > { %v419_v0 = vmul.f32 %v412_v61, %v405_v62 }
 0x29d   : > { %v433_v2 = vadd.f32 %v426_v63, %v419_v0 }
 0x29f   : > { %435 = vst.msk [vmem:[%s251_s27] sm:$0xff] %vm298_vm1, %v433_v2 }
 0x2a1   : > { %v417_v4 = vpop.permute.xlu0 %416 }
 0x2a2   : > { %v420_v5 = vmul.f32 %v417_v4, %v406_v1 }
 0x2a4   : > { %v434_v7 = vadd.f32 %v431_v6, %v420_v5 }
 0x2a6   : > { %436 = vst.msk [vmem:[%s251_s27 + $0x8] sm:$0xff] %vm298_vm1, %v434_v7 }
 0x2a7 PF: > { %s16_s21 = sadd.s32 1, %s546_s21  }
 0x2a8   : > { %p13_p4 = scmp.ge.s32.totalorder %s16_s21, 4  }
 0x2aa   :  { %15 = sbr.rel (!%p13_p4) target bundleno = 1 (0x1), region = 74 }

// kernel: _lambda_.38
= control target key start
LH: loop header
LB: loop body
LE: loop exit
PB: predicated region body
PF: predicated region fallthrough
CT: control target
= control target key end

     0   :  { %s787_s24 = smov 0   ;;  %s873_s0 = inlined_call_operand.vmem [shape: bf16[2,144,64], index: 0, kind: input, shape index: {}]   ;;  %s874_s1 = inlined_call_operand.vmem [shape: bf16[16,144], index: 1, kind: input, shape index: {}]   ;;  %s875_s2 = inlined_call_operand.vmem [shape: f32[16,1], index: 2, kind: input, shape index: {}, may-alias: {2,5}]   ;;  %s876_s3 = inlined_call_operand.vmem [shape: f32[16,16], index: 3, kind: input, shape index: {}]   ;;  %s877_s4 = inlined_call_operand.vmem [shape: f32[16,1], index: 4, kind: input, shape index: {}]   ;;  %s878_s5 = inlined_call_operand.vmem [shape: f32[16,1], index: 5, kind: input, shape index: {}, may-alias: {2,5}]   ;;  %s879_s6 = inlined_call_operand.vmem [shape: f32[2,16,64], index: 6, kind: input, shape index: {}]   ;;  %s880_s7 = inlined_call_operand.vmem [shape: f32[2,16,64], index: 7, kind: output, shape index: {}]  }
   0x1 LB: > { %s641_s25 = sadd.s32 4294967295, %s742_s24   ;;  %p645_p0 = scmp.ge.s32.totalorder %s742_s24, 1  ;;  %s742_s24 = sphi %s787_s24, %s17_s24  }
   0x2   : > { %p247_p1 = scmp.lt.s32.totalorder %s742_s24, 3 }
   0x4   : > { %p248_p2 = pnand %p645_p0, %p247_p1 }
   0x5   : > { %p284_p3 = scmp.lt.s32.totalorder (!%p248_p2), %s641_s25, 1  ;;  %s745_s23 = smov (!%p248_p2), 1  }
   0x6   : > { %251 = sbr.rel (%p248_p2) target bundleno = 722 (0x2d2), region = 48 }
   0xb   : > { %s882_s25 = smov (!%p284_p3, %s641_s25), 1  ;;  %v702_v1 = vld [vmem:[%s874_s1 + $0x4] sm:$0xf]  ;;  %v655_v2 = vld [vmem:[%s874_s1 + $0x8] sm:$0xf0]  ;;  %v744_v5 = vmov 0  }
   0xc   : > { %s713_s26 = smul.u32 72, %s882_s25  ;;  %725 = vset.pattern.permute.xlu0 %v744_v5  ;;  %v658_v6 = vor.u32 %v702_v1, %v655_v2  ;;  %v321_v7 = vld [vmem:[%s875_s2 + $0x8] sm:$0xff]  ;;  %726 = vset.pattern.permute.xlu2 %v744_v5  ;;  %vm395_vm0 = vcmask 130048   ;;  %v320_v9 = vld [vmem:[%s875_s2] sm:$0xff]  ;;  %vm427_vm1 = vcmask 523264   ;;  %vm442_vm2 = vcmask 7168  }
   0xd   : > { %727 = vset.pattern.permute.xlu1 %v744_v5  ;;  %329 = vperm.xlu0 %725, %v321_v7   ;;  %v653_v15 = vld [vmem:[%s874_s1] sm:$0xf]  ;;  %v703_v16 = vld [vmem:[%s874_s1 + $0x4] sm:$0xf0]  ;;  %v746_v47 = vmov 1   ;;  %s700_s11 = sshll.u32 %s882_s25, 4 }
   0xe   : > { %s288_s29 = scalar_lea.vmem %s873_s0, %s713_s26  ;;  %v654_v17 = vor.u32 %v703_v16, %v653_v15  ;;  %v445_v39 = vld [vmem:[%s876_s3] sm:$0xff]  ;;  %v446_v41 = vld [vmem:[%s876_s3 + $0x8] sm:$0xff]  ;;  %s293_s14 = scalar_lea.vmem %s879_s6, %s700_s11 }
   0xf   : > { %v711_v0 = vld [vmem:[%s288_s29 + $0x38] sm:$0xff]  ;;  %v710_v3 = vld [vmem:[%s288_s29 + $0x30] sm:$0xff]  ;;  %v712_v4 = vld [vmem:[%s288_s29 + $0x40] sm:$0xff]  ;;  %s298_s25 = scalar_lea.vmem %s880_s7, %s700_s11 }
  0x10   : > { %399 = vmatpush.bf16.msra.mxu0 %v711_v0  ;;  %420 = vmatpush.bf16.msra.mxu1 %v712_v4  ;;  %v709_v8 = vld [vmem:[%s288_s29 + $0x28] sm:$0xff]  ;;  %v708_v10 = vld [vmem:[%s288_s29 + $0x20] sm:$0xff]  ;;  %v707_v11 = vld [vmem:[%s288_s29 + $0x18] sm:$0xff] }
  0x11   : > { %v706_v12 = vld [vmem:[%s288_s29 + $0x10] sm:$0xff]  ;;  %v705_v13 = vld [vmem:[%s288_s29 + $0x8] sm:$0xff]  ;;  %v704_v14 = vld [vmem:[%s288_s29] sm:$0xff] }
  0x12   : > { %v536_v46 = vld [vmem:[%s877_s4] sm:$0xff]  ;;  %v551_v48 = vld [vmem:[%s878_s5 + $0x8] sm:$0xff] }
  0x13   : > { %695 = vmatmul.msk.bf16.vlgmr.msra.gmra.mxu1 %vm395_vm0, %v658_v6  ;;  %v537_v7 = vld [vmem:[%s877_s4 + $0x8] sm:$0xff] }
  0x14   : > { %400 = vmatpush.bf16.msra.mxu0 %v710_v3 }
  0x15   : > { %324 = vperm.xlu0 %725, %v320_v9   ;;  %v550_v9 = vld [vmem:[%s878_s5] sm:$0xff] }
  0x18   : > { %401 = vmatpush.bf16.msra.mxu0 %v709_v8 }
  0x1c   : > { %402 = vmatpush.bf16.msra.mxu0 %v708_v10 }
  0x20   : > { %403 = vmatpush.bf16.msra.mxu0 %v707_v11 }
  0x24   : > { %404 = vmatpush.bf16.msra.mxu0 %v706_v12 }
  0x28   : > { %405 = vmatpush.bf16.msra.mxu0 %v705_v13 }
  0x2c   : > { %406 = vmatpush.bf16.msra.mxu0 %v704_v14 }
  0x2f   : > { %407 = vmatmul.bf16.vlgmr.msra.gmra.mxu0 %v654_v17 }
  0x7f   : > { %v330_v18 = vpop.permute.xlu0 %329 }
  0x87   : > { %v325_v19 = vpop.permute.xlu0 %324 }
  0x90   : > { %v422_v20 = vpop.f32.mrf.mxu1 }
  0x98   : > { %v424_v28 = vpop.f32.mrf.mxu1 }
  0xac   : > { %v408_v21 = vpop.f32.mrf.mxu0 }
  0xad   : > { %v409_v22 = vadd.f32 %v408_v21, %v325_v19 }
  0xaf   : > { %v823_v23 = vadd.f32 %v422_v20, %v409_v22 }
  0xb1   : > { %v428_v24 = vsel %vm427_vm1, %v823_v23, 0.0  ;;  %v434_v27 = vmul.f32 %v823_v23, %v823_v23 }
  0xb2   : > { %429 = vadd.xlane.f32.xlu2 %v428_v24 }
  0xb3   : > { %v436_v31 = vsel %vm427_vm1, %v434_v27, 0.0 }
  0xb4   : > { %v410_v25 = vpop.f32.mrf.mxu0 }
  0xb5   : > { %v411_v26 = vadd.f32 %v410_v25, %v330_v18 }
  0xb7   : > { %v829_v29 = vadd.f32 %v424_v28, %v411_v26 }
  0xb9   : > { %v431_v30 = vsel %vm427_vm1, %v829_v29, 0.0  ;;  %v435_v32 = vmul.f32 %v829_v29, %v829_v29 }
  0xba   : > { %432 = vadd.xlane.f32.xlu1 %v431_v30  ;;  %437 = vadd.xlane.f32.xlu2 %v436_v31  ;;  %v567_v30 = vld [vmem:[%s293_s14 + $0x8] sm:$0xff] }
  0xbb   : > { %v439_v33 = vsel %vm427_vm1, %v435_v32, 0.0 }
  0xc2   : > { %440 = vadd.xlane.f32.xlu1 %v439_v33 }
 0x125   : > { %v430_v34 = vpop.xlane.xlu2 %429 }
 0x12d   : > { %v433_v35 = vpop.xlane.xlu1 %432  ;;  %v438_v36 = vpop.xlane.xlu2 %437 }
 0x12e   : > { %v443_v40 = vsel %vm442_vm2, %v430_v34, %v438_v36 }
 0x135   : > { %v441_v37 = vpop.xlane.xlu1 %440 }
 0x136   : > { %v444_v38 = vsel %vm442_vm2, %v433_v35, %v441_v37 }
 0x137   : > { %467 = vmatpush.msra.mxu2 %v444_v38 }
 0x139   : > { %468 = vmatpush.msra.mxu2 %v443_v40 }
 0x13a   : > { %696 = vmatmul.msk.f32.vlgmr.msra.gmra.mxu2 %vm395_vm0, %v445_v39 }
 0x142   : > { %697 = vmatmul.msk.f32.gmra.mxu2 %vm395_vm0, %v446_v41 }
 0x1bd   : > { %v470_v42 = vpop.f32.mrf.mxu2 }
 0x1be   : > { %v476_v43 = vmul.f32 %v470_v42, %v470_v42  ;;  %492 = vperm.xlu2 %726, %v470_v42  }
 0x1c0   : > { %480 = vrot.lane.b32.xlu0 %v476_v43, %s745_s23 }
 0x1c5   : > { %v473_v44 = vpop.f32.mrf.mxu2 }
 0x1c6   : > { %v477_v45 = vmul.f32 %v473_v44, %v473_v44  ;;  %729 = vset.pattern.permute.xlu2 %v746_v47 }
 0x1c8   : > { %497 = vperm.xlu0 %725, %v473_v44   ;;  %482 = vrot.lane.b32.xlu1 %v477_v45, %s745_s23 }
 0x1d0   : > { %540 = vperm.xlu1 %727, %v536_v46   ;;  %728 = vset.pattern.permute.xlu0 %v746_v47 }
 0x1d8   : > { %559 = vperm.xlu1 %727, %v551_v48  }
 0x218   : > { %v493_v10 = vpop.permute.xlu2 %492 }
 0x219   : > { %v500_v13 = vsub.f32 %v823_v23, %v493_v10 }
 0x232   : > { %v481_v49 = vpop.permute.xlu0 %480 }
 0x233   : > { %v486_v50 = vsub.f32 %v470_v42, %v481_v49 }
 0x235   : > { %v488_v51 = vmax.f32 %v486_v50, 0.0 }
 0x237   : > { %v502_v52 = vadd.f32 1e-05, %v488_v51 }
 0x239   : > { %732 = vrsqrt.f32 %v502_v52  ;;  %vm510_vm4 = vweird.f32 %v502_v52 }
 0x23a   : > { %v483_v53 = vpop.permute.xlu1 %482  ;;  %v498_v11 = vpop.permute.xlu0 %497 }
 0x23b   : > { %v487_v54 = vsub.f32 %v473_v44, %v483_v53  ;;  %v501_v20 = vsub.f32 %v829_v29, %v498_v11 }
 0x23d   : > { %v489_v55 = vmax.f32 %v487_v54, 0.0 }
 0x23f   : > { %v733_v56 = vpop.eup %732  ;;  %v503_v57 = vadd.f32 1e-05, %v489_v55 }
 0x240   : > { %v505_v58 = vmul.f32 %v733_v56, %v502_v52  ;;  %vm511_vm3 = vweird.f32 %v733_v56 }
 0x241   : > { %734 = vrsqrt.f32 %v503_v57  ;;  %vm512_vm5 = vmor %vm510_vm4, %vm511_vm3  ;;  %vm520_vm7 = vweird.f32 %v503_v57 }
 0x242   : > { %v506_v59 = vmul.f32 %v733_v56, %v505_v58  ;;  %v541_v15 = vpop.permute.xlu1 %540 }
 0x244   : > { %v507_v60 = vmul.f32 0.5, %v506_v59 }
 0x246   : > { %v508_v61 = vsub.f32 1.5, %v507_v60 }
 0x247   : > { %v735_v62 = vpop.eup %734 }
 0x248   : > { %v515_v63 = vmul.f32 %v735_v62, %v503_v57  ;;  %v509_v0 = vmul.f32 %v733_v56, %v508_v61  ;;  %vm521_vm6 = vweird.f32 %v735_v62 }
 0x249   : > { %vm522_vm8 = vmor %vm520_vm7, %vm521_vm6 }
 0x24a   : > { %v516_v1 = vmul.f32 %v735_v62, %v515_v63  ;;  %v513_v2 = vsel %vm512_vm5, %v733_v56, %v509_v0  ;;  %v560_v26 = vpop.permute.xlu1 %559 }
 0x24b   : > { %526 = vperm.xlu0 %728, %v513_v2  }
 0x24c   : > { %v517_v3 = vmul.f32 0.5, %v516_v1 }
 0x24e   : > { %v518_v4 = vsub.f32 1.5, %v517_v3 }
 0x250   : > { %v519_v6 = vmul.f32 %v735_v62, %v518_v4 }
 0x252   : > { %v523_v8 = vsel %vm522_vm8, %v735_v62, %v519_v6 }
 0x253   : > { %730 = vset.pattern.permute.xlu0 %v744_v5  ;;  %531 = vperm.xlu2 %729, %v523_v8  }
 0x254   : > { %545 = vperm.xlu0 %730, %v537_v7  }
 0x25b   : > { %731 = vset.pattern.permute.xlu2 %v744_v5  ;;  %v566_v5 = vld [vmem:[%s293_s14] sm:$0xff] }
 0x25c   : > { %554 = vperm.xlu2 %731, %v550_v9  }
 0x2ad   : > { %v532_v12 = vpop.permute.xlu2 %531 }
 0x2ae   : > { %v535_v22 = vmul.f32 %v532_v12, %v501_v20 }
 0x2b6   : > { %v555_v17 = vpop.permute.xlu2 %554 }
 0x2bd   : > { %v527_v14 = vpop.permute.xlu0 %526 }
 0x2be   : > { %v534_v16 = vmul.f32 %v527_v14, %v500_v13 }
 0x2c0   : > { %v548_v18 = vmul.f32 %v541_v15, %v534_v16 }
 0x2c2   : > { %v562_v19 = vadd.f32 %v555_v17, %v548_v18 }
 0x2c4   : > { %v564_v21 = vmax.f32 %v562_v19, 0.0 }
 0x2c6   : > { %v568_v24 = vadd.f32 %v566_v5, %v564_v21  ;;  %v546_v25 = vpop.permute.xlu0 %545 }
 0x2c7   : > { %v549_v23 = vmul.f32 %v546_v25, %v535_v22 }
 0x2c8   : > { %v570_v27 = vmax.f32 %v568_v24, 0.0 }
 0x2c9   : > { %v563_v28 = vadd.f32 %v560_v26, %v549_v23 }
 0x2ca   : > { %572 = vst.msk [vmem:[%s298_s25] sm:$0xff] %vm427_vm1, %v570_v27 }
 0x2cb   : > { %v565_v31 = vmax.f32 %v563_v28, 0.0 }
 0x2cd   : > { %v569_v32 = vadd.f32 %v567_v30, %v565_v31 }
 0x2cf   : > { %v571_v33 = vmax.f32 %v569_v32, 0.0 }
 0x2d1   : > { %573 = vst.msk [vmem:[%s298_s25 + $0x8] sm:$0xff] %vm427_vm1, %v571_v33 }
 0x2d2 PF: > { %s17_s24 = sadd.s32 1, %s742_s24  }
 0x2d3   : > { %p14_p4 = scmp.ge.s32.totalorder %s17_s24, 4  }
 0x2d5   :  { %16 = sbr.rel (!%p14_p4) target bundleno = 1 (0x1), region = 81 }

// kernel: _lambda_.41
= control target key start
LH: loop header
LB: loop body
LE: loop exit
PB: predicated region body
PF: predicated region fallthrough
CT: control target
= control target key end

     0   :  { %s713_s21 = smov 0   ;;  %s796_s0 = inlined_call_operand.vmem [shape: bf16[2,144,16], index: 0, kind: input, shape index: {}]   ;;  %s797_s1 = inlined_call_operand.vmem [shape: bf16[16,144], index: 1, kind: input, shape index: {}]   ;;  %s798_s2 = inlined_call_operand.vmem [shape: f32[16,1], index: 2, kind: input, shape index: {}, may-alias: {2,5}]   ;;  %s799_s3 = inlined_call_operand.vmem [shape: f32[16,16], index: 3, kind: input, shape index: {}]   ;;  %s800_s4 = inlined_call_operand.vmem [shape: f32[16,1], index: 4, kind: input, shape index: {}]   ;;  %s801_s5 = inlined_call_operand.vmem [shape: f32[16,1], index: 5, kind: input, shape index: {}, may-alias: {2,5}]   ;;  %s802_s6 = inlined_call_operand.vmem [shape: f32[2,16,16], index: 6, kind: output, shape index: {}]  }
   0x1 LB: > { %s575_s22 = sadd.s32 4294967295, %s673_s21   ;;  %p579_p0 = scmp.ge.s32.totalorder %s673_s21, 1  ;;  %s673_s21 = sphi %s713_s21, %s16_s21  }
   0x2   : > { %p212_p1 = scmp.lt.s32.totalorder %s673_s21, 3 }
   0x4   : > { %p213_p2 = pnand %p579_p0, %p212_p1 }
   0x5   : > { %p242_p3 = scmp.lt.s32.totalorder (!%p213_p2), %s575_s22, 1  ;;  %s676_s19 = smov (!%p213_p2), 1  }
   0x6   : > { %216 = sbr.rel (%p213_p2) target bundleno = 718 (0x2ce), region = 44 }
   0xb   : > { %s804_s22 = smov (!%p242_p3, %s575_s22), 1  ;;  %v633_v1 = vld [vmem:[%s797_s1 + $0x4] sm:$0xf]  ;;  %v587_v2 = vld [vmem:[%s797_s1 + $0x8] sm:$0xf0]  ;;  %v675_v5 = vmov 0  }
   0xc   : > { %s644_s23 = smul.u32 72, %s804_s22  ;;  %656 = vset.pattern.permute.xlu0 %v675_v5  ;;  %v590_v6 = vor.u32 %v633_v1, %v587_v2  ;;  %v274_v7 = vld [vmem:[%s798_s2 + $0x8] sm:$0xff]  ;;  %657 = vset.pattern.permute.xlu2 %v675_v5  ;;  %vm348_vm0 = vcmask 130048   ;;  %v273_v9 = vld [vmem:[%s798_s2] sm:$0xff]  ;;  %vm394_vm1 = vcmask 7168   ;;  %v677_v47 = vmov 1  }
   0xd   : > { %658 = vset.pattern.permute.xlu1 %v675_v5  ;;  %282 = vperm.xlu0 %656, %v274_v7   ;;  %v585_v15 = vld [vmem:[%s797_s1] sm:$0xf]  ;;  %v634_v16 = vld [vmem:[%s797_s1 + $0x4] sm:$0xf0]  ;;  %s632_s30 = sshll.u32 %s804_s22, 4 }
   0xe   : > { %s246_s26 = scalar_lea.vmem %s796_s0, %s644_s23  ;;  %v586_v17 = vor.u32 %v634_v16, %v585_v15  ;;  %v397_v39 = vld [vmem:[%s799_s3] sm:$0xff]  ;;  %v398_v41 = vld [vmem:[%s799_s3 + $0x8] sm:$0xff]  ;;  %s251_s9 = scalar_lea.vmem %s802_s6, %s632_s30 }
   0xf   : > { %v642_v0 = vld [vmem:[%s246_s26 + $0x38] sm:$0xff]  ;;  %v641_v3 = vld [vmem:[%s246_s26 + $0x30] sm:$0xff]  ;;  %v643_v4 = vld [vmem:[%s246_s26 + $0x40] sm:$0xff] }
  0x10   : > { %352 = vmatpush.bf16.msra.mxu0 %v642_v0  ;;  %373 = vmatpush.bf16.msra.mxu1 %v643_v4  ;;  %v640_v8 = vld [vmem:[%s246_s26 + $0x28] sm:$0xff]  ;;  %v639_v10 = vld [vmem:[%s246_s26 + $0x20] sm:$0xff]  ;;  %v638_v11 = vld [vmem:[%s246_s26 + $0x18] sm:$0xff] }
  0x11   : > { %v637_v12 = vld [vmem:[%s246_s26 + $0x10] sm:$0xff]  ;;  %v636_v13 = vld [vmem:[%s246_s26 + $0x8] sm:$0xff]  ;;  %v635_v14 = vld [vmem:[%s246_s26] sm:$0xff] }
  0x12   : > { %v488_v46 = vld [vmem:[%s800_s4] sm:$0xff]  ;;  %v503_v48 = vld [vmem:[%s801_s5 + $0x8] sm:$0xff] }
  0x13   : > { %627 = vmatmul.msk.bf16.vlgmr.msra.gmra.mxu1 %vm348_vm0, %v590_v6  ;;  %v489_v7 = vld [vmem:[%s800_s4 + $0x8] sm:$0xff] }
  0x14   : > { %353 = vmatpush.bf16.msra.mxu0 %v641_v3 }
  0x15   : > { %277 = vperm.xlu0 %656, %v273_v9   ;;  %v502_v9 = vld [vmem:[%s801_s5] sm:$0xff] }
  0x18   : > { %354 = vmatpush.bf16.msra.mxu0 %v640_v8 }
  0x1c   : > { %355 = vmatpush.bf16.msra.mxu0 %v639_v10 }
  0x20   : > { %356 = vmatpush.bf16.msra.mxu0 %v638_v11 }
  0x24   : > { %357 = vmatpush.bf16.msra.mxu0 %v637_v12 }
  0x28   : > { %358 = vmatpush.bf16.msra.mxu0 %v636_v13 }
  0x2c   : > { %359 = vmatpush.bf16.msra.mxu0 %v635_v14 }
  0x2f   : > { %360 = vmatmul.bf16.vlgmr.msra.gmra.mxu0 %v586_v17 }
  0x7f   : > { %v283_v18 = vpop.permute.xlu0 %282 }
  0x87   : > { %v278_v19 = vpop.permute.xlu0 %277 }
  0x90   : > { %v375_v20 = vpop.f32.mrf.mxu1 }
  0x98   : > { %v377_v28 = vpop.f32.mrf.mxu1 }
  0xac   : > { %v361_v21 = vpop.f32.mrf.mxu0 }
  0xad   : > { %v362_v22 = vadd.f32 %v361_v21, %v278_v19 }
  0xaf   : > { %v749_v23 = vadd.f32 %v375_v20, %v362_v22 }
  0xb1   : > { %v380_v24 = vsel %vm348_vm0, %v749_v23, 0.0  ;;  %v386_v27 = vmul.f32 %v749_v23, %v749_v23 }
  0xb2   : > { %381 = vadd.xlane.f32.xlu2 %v380_v24 }
  0xb3   : > { %v388_v31 = vsel %vm348_vm0, %v386_v27, 0.0 }
  0xb4   : > { %v363_v25 = vpop.f32.mrf.mxu0 }
  0xb5   : > { %v364_v26 = vadd.f32 %v363_v25, %v283_v18 }
  0xb7   : > { %v755_v29 = vadd.f32 %v377_v28, %v364_v26 }
  0xb9   : > { %v383_v30 = vsel %vm348_vm0, %v755_v29, 0.0  ;;  %v387_v32 = vmul.f32 %v755_v29, %v755_v29 }
  0xba   : > { %384 = vadd.xlane.f32.xlu1 %v383_v30  ;;  %389 = vadd.xlane.f32.xlu2 %v388_v31 }
  0xbb   : > { %v391_v33 = vsel %vm348_vm0, %v387_v32, 0.0 }
  0xc2   : > { %392 = vadd.xlane.f32.xlu1 %v391_v33 }
 0x125   : > { %v382_v34 = vpop.xlane.xlu2 %381 }
 0x12d   : > { %v385_v35 = vpop.xlane.xlu1 %384  ;;  %v390_v36 = vpop.xlane.xlu2 %389 }
 0x12e   : > { %v395_v40 = vsel %vm394_vm1, %v382_v34, %v390_v36 }
 0x135   : > { %v393_v37 = vpop.xlane.xlu1 %392 }
 0x136   : > { %v396_v38 = vsel %vm394_vm1, %v385_v35, %v393_v37 }
 0x137   : > { %419 = vmatpush.msra.mxu2 %v396_v38 }
 0x139   : > { %420 = vmatpush.msra.mxu2 %v395_v40 }
 0x13a   : > { %628 = vmatmul.msk.f32.vlgmr.msra.gmra.mxu2 %vm348_vm0, %v397_v39 }
 0x142   : > { %629 = vmatmul.msk.f32.gmra.mxu2 %vm348_vm0, %v398_v41 }
 0x1bd   : > { %v422_v42 = vpop.f32.mrf.mxu2 }
 0x1be   : > { %v428_v43 = vmul.f32 %v422_v42, %v422_v42  ;;  %444 = vperm.xlu2 %657, %v422_v42  }
 0x1c0   : > { %432 = vrot.lane.b32.xlu0 %v428_v43, %s676_s19 }
 0x1c5   : > { %v425_v44 = vpop.f32.mrf.mxu2 }
 0x1c6   : > { %v429_v45 = vmul.f32 %v425_v44, %v425_v44  ;;  %660 = vset.pattern.permute.xlu2 %v677_v47 }
 0x1c8   : > { %449 = vperm.xlu0 %656, %v425_v44   ;;  %434 = vrot.lane.b32.xlu1 %v429_v45, %s676_s19 }
 0x1d0   : > { %492 = vperm.xlu1 %658, %v488_v46   ;;  %659 = vset.pattern.permute.xlu0 %v677_v47 }
 0x1d8   : > { %511 = vperm.xlu1 %658, %v503_v48  }
 0x218   : > { %v445_v10 = vpop.permute.xlu2 %444 }
 0x219   : > { %v452_v13 = vsub.f32 %v749_v23, %v445_v10 }
 0x232   : > { %v433_v49 = vpop.permute.xlu0 %432 }
 0x233   : > { %v438_v50 = vsub.f32 %v422_v42, %v433_v49 }
 0x235   : > { %v440_v51 = vmax.f32 %v438_v50, 0.0 }
 0x237   : > { %v454_v52 = vadd.f32 1e-05, %v440_v51 }
 0x239   : > { %663 = vrsqrt.f32 %v454_v52  ;;  %vm462_vm3 = vweird.f32 %v454_v52 }
 0x23a   : > { %v435_v53 = vpop.permute.xlu1 %434  ;;  %v450_v11 = vpop.permute.xlu0 %449 }
 0x23b   : > { %v439_v54 = vsub.f32 %v425_v44, %v435_v53  ;;  %v453_v20 = vsub.f32 %v755_v29, %v450_v11 }
 0x23d   : > { %v441_v55 = vmax.f32 %v439_v54, 0.0 }
 0x23f   : > { %v664_v56 = vpop.eup %663  ;;  %v455_v57 = vadd.f32 1e-05, %v441_v55 }
 0x240   : > { %v457_v58 = vmul.f32 %v664_v56, %v454_v52  ;;  %vm463_vm2 = vweird.f32 %v664_v56 }
 0x241   : > { %665 = vrsqrt.f32 %v455_v57  ;;  %vm464_vm4 = vmor %vm462_vm3, %vm463_vm2  ;;  %vm472_vm6 = vweird.f32 %v455_v57 }
 0x242   : > { %v458_v59 = vmul.f32 %v664_v56, %v457_v58  ;;  %v493_v15 = vpop.permute.xlu1 %492 }
 0x244   : > { %v459_v60 = vmul.f32 0.5, %v458_v59 }
 0x246   : > { %v460_v61 = vsub.f32 1.5, %v459_v60 }
 0x247   : > { %v666_v62 = vpop.eup %665 }
 0x248   : > { %v467_v63 = vmul.f32 %v666_v62, %v455_v57  ;;  %v461_v0 = vmul.f32 %v664_v56, %v460_v61  ;;  %vm473_vm5 = vweird.f32 %v666_v62 }
 0x249   : > { %vm474_vm7 = vmor %vm472_vm6, %vm473_vm5 }
 0x24a   : > { %v468_v1 = vmul.f32 %v666_v62, %v467_v63  ;;  %v465_v2 = vsel %vm464_vm4, %v664_v56, %v461_v0  ;;  %v512_v23 = vpop.permute.xlu1 %511 }
 0x24b   : > { %478 = vperm.xlu0 %659, %v465_v2  }
 0x24c   : > { %v469_v3 = vmul.f32 0.5, %v468_v1 }
 0x24e   : > { %v470_v4 = vsub.f32 1.5, %v469_v3 }
 0x250   : > { %v471_v6 = vmul.f32 %v666_v62, %v470_v4 }
 0x252   : > { %v475_v8 = vsel %vm474_vm7, %v666_v62, %v471_v6 }
 0x253   : > { %661 = vset.pattern.permute.xlu0 %v675_v5  ;;  %483 = vperm.xlu2 %660, %v475_v8  }
 0x254   : > { %497 = vperm.xlu0 %661, %v489_v7  }
 0x25b   : > { %662 = vset.pattern.permute.xlu2 %v675_v5 }
 0x25c   : > { %506 = vperm.xlu2 %662, %v502_v9  }
 0x2ad   : > { %v484_v12 = vpop.permute.xlu2 %483 }
 0x2ae   : > { %v487_v21 = vmul.f32 %v484_v12, %v453_v20 }
 0x2b6   : > { %v507_v17 = vpop.permute.xlu2 %506 }
 0x2bd   : > { %v479_v14 = vpop.permute.xlu0 %478 }
 0x2be   : > { %v486_v16 = vmul.f32 %v479_v14, %v452_v13 }
 0x2c0   : > { %v500_v18 = vmul.f32 %v493_v15, %v486_v16 }
 0x2c2   : > { %v514_v19 = vadd.f32 %v507_v17, %v500_v18 }
 0x2c4   : > { %v516_v5 = vmax.f32 %v514_v19, 0.0 }
 0x2c6   : > { %518 = vst.msk [vmem:[%s251_s9] sm:$0xff] %vm348_vm0, %v516_v5  ;;  %v498_v22 = vpop.permute.xlu0 %497 }
 0x2c7   : > { %v501_v24 = vmul.f32 %v498_v22, %v487_v21 }
 0x2c9   : > { %v515_v25 = vadd.f32 %v512_v23, %v501_v24 }
 0x2cb   : > { %v517_v26 = vmax.f32 %v515_v25, 0.0 }
 0x2cd   : > { %519 = vst.msk [vmem:[%s251_s9 + $0x8] sm:$0xff] %vm348_vm0, %v517_v26 }
 0x2ce PF: > { %s16_s21 = sadd.s32 1, %s673_s21  }
 0x2cf   : > { %p13_p4 = scmp.ge.s32.totalorder %s16_s21, 4  }
 0x2d1   :  { %15 = sbr.rel (!%p13_p4) target bundleno = 1 (0x1), region = 74 }

// kernel: _lambda_.43
= control target key start
LH: loop header
LB: loop body
LE: loop exit
PB: predicated region body
PF: predicated region fallthrough
CT: control target
= control target key end

     0   :  { %s786_s24 = smov 0   ;;  %s872_s0 = inlined_call_operand.vmem [shape: bf16[2,144,16], index: 0, kind: input, shape index: {}]   ;;  %s873_s1 = inlined_call_operand.vmem [shape: bf16[16,144], index: 1, kind: input, shape index: {}]   ;;  %s874_s2 = inlined_call_operand.vmem [shape: f32[16,1], index: 2, kind: input, shape index: {}, may-alias: {2,5}]   ;;  %s875_s3 = inlined_call_operand.vmem [shape: f32[16,16], index: 3, kind: input, shape index: {}]   ;;  %s876_s4 = inlined_call_operand.vmem [shape: f32[16,1], index: 4, kind: input, shape index: {}]   ;;  %s877_s5 = inlined_call_operand.vmem [shape: f32[16,1], index: 5, kind: input, shape index: {}, may-alias: {2,5}]   ;;  %s878_s6 = inlined_call_operand.vmem [shape: f32[2,16,16], index: 6, kind: input, shape index: {}]   ;;  %s879_s7 = inlined_call_operand.vmem [shape: f32[2,16,16], index: 7, kind: output, shape index: {}]  }
   0x1 LB: > { %s640_s25 = sadd.s32 4294967295, %s741_s24   ;;  %p644_p0 = scmp.ge.s32.totalorder %s741_s24, 1  ;;  %s741_s24 = sphi %s786_s24, %s17_s24  }
   0x2   : > { %p247_p1 = scmp.lt.s32.totalorder %s741_s24, 3 }
   0x4   : > { %p248_p2 = pnand %p644_p0, %p247_p1 }
   0x5   : > { %p284_p3 = scmp.lt.s32.totalorder (!%p248_p2), %s640_s25, 1  ;;  %s744_s23 = smov (!%p248_p2), 1  }
   0x6   : > { %251 = sbr.rel (%p248_p2) target bundleno = 722 (0x2d2), region = 48 }
   0xb   : > { %s881_s25 = smov (!%p284_p3, %s640_s25), 1  ;;  %v701_v1 = vld [vmem:[%s873_s1 + $0x4] sm:$0xf]  ;;  %v654_v2 = vld [vmem:[%s873_s1 + $0x8] sm:$0xf0]  ;;  %v743_v5 = vmov 0  }
   0xc   : > { %s712_s26 = smul.u32 72, %s881_s25  ;;  %724 = vset.pattern.permute.xlu0 %v743_v5  ;;  %v657_v6 = vor.u32 %v701_v1, %v654_v2  ;;  %v321_v7 = vld [vmem:[%s874_s2 + $0x8] sm:$0xff]  ;;  %725 = vset.pattern.permute.xlu2 %v743_v5  ;;  %vm395_vm0 = vcmask 130048   ;;  %v320_v9 = vld [vmem:[%s874_s2] sm:$0xff]  ;;  %vm441_vm1 = vcmask 7168   ;;  %v745_v47 = vmov 1  }
   0xd   : > { %726 = vset.pattern.permute.xlu1 %v743_v5  ;;  %329 = vperm.xlu0 %724, %v321_v7   ;;  %v652_v15 = vld [vmem:[%s873_s1] sm:$0xf]  ;;  %v702_v16 = vld [vmem:[%s873_s1 + $0x4] sm:$0xf0]  ;;  %s699_s11 = sshll.u32 %s881_s25, 4 }
   0xe   : > { %s288_s29 = scalar_lea.vmem %s872_s0, %s712_s26  ;;  %v653_v17 = vor.u32 %v702_v16, %v652_v15  ;;  %v444_v39 = vld [vmem:[%s875_s3] sm:$0xff]  ;;  %v445_v41 = vld [vmem:[%s875_s3 + $0x8] sm:$0xff]  ;;  %s293_s14 = scalar_lea.vmem %s878_s6, %s699_s11 }
   0xf   : > { %v710_v0 = vld [vmem:[%s288_s29 + $0x38] sm:$0xff]  ;;  %v709_v3 = vld [vmem:[%s288_s29 + $0x30] sm:$0xff]  ;;  %v711_v4 = vld [vmem:[%s288_s29 + $0x40] sm:$0xff]  ;;  %s298_s25 = scalar_lea.vmem %s879_s7, %s699_s11 }
  0x10   : > { %399 = vmatpush.bf16.msra.mxu0 %v710_v0  ;;  %420 = vmatpush.bf16.msra.mxu1 %v711_v4  ;;  %v708_v8 = vld [vmem:[%s288_s29 + $0x28] sm:$0xff]  ;;  %v707_v10 = vld [vmem:[%s288_s29 + $0x20] sm:$0xff]  ;;  %v706_v11 = vld [vmem:[%s288_s29 + $0x18] sm:$0xff] }
  0x11   : > { %v705_v12 = vld [vmem:[%s288_s29 + $0x10] sm:$0xff]  ;;  %v704_v13 = vld [vmem:[%s288_s29 + $0x8] sm:$0xff]  ;;  %v703_v14 = vld [vmem:[%s288_s29] sm:$0xff] }
  0x12   : > { %v535_v46 = vld [vmem:[%s876_s4] sm:$0xff]  ;;  %v550_v48 = vld [vmem:[%s877_s5 + $0x8] sm:$0xff] }
  0x13   : > { %694 = vmatmul.msk.bf16.vlgmr.msra.gmra.mxu1 %vm395_vm0, %v657_v6  ;;  %v536_v7 = vld [vmem:[%s876_s4 + $0x8] sm:$0xff] }
  0x14   : > { %400 = vmatpush.bf16.msra.mxu0 %v709_v3 }
  0x15   : > { %324 = vperm.xlu0 %724, %v320_v9   ;;  %v549_v9 = vld [vmem:[%s877_s5] sm:$0xff] }
  0x18   : > { %401 = vmatpush.bf16.msra.mxu0 %v708_v8 }
  0x1c   : > { %402 = vmatpush.bf16.msra.mxu0 %v707_v10 }
  0x20   : > { %403 = vmatpush.bf16.msra.mxu0 %v706_v11 }
  0x24   : > { %404 = vmatpush.bf16.msra.mxu0 %v705_v12 }
  0x28   : > { %405 = vmatpush.bf16.msra.mxu0 %v704_v13 }
  0x2c   : > { %406 = vmatpush.bf16.msra.mxu0 %v703_v14 }
  0x2f   : > { %407 = vmatmul.bf16.vlgmr.msra.gmra.mxu0 %v653_v17 }
  0x7f   : > { %v330_v18 = vpop.permute.xlu0 %329 }
  0x87   : > { %v325_v19 = vpop.permute.xlu0 %324 }
  0x90   : > { %v422_v20 = vpop.f32.mrf.mxu1 }
  0x98   : > { %v424_v28 = vpop.f32.mrf.mxu1 }
  0xac   : > { %v408_v21 = vpop.f32.mrf.mxu0 }
  0xad   : > { %v409_v22 = vadd.f32 %v408_v21, %v325_v19 }
  0xaf   : > { %v822_v23 = vadd.f32 %v422_v20, %v409_v22 }
  0xb1   : > { %v427_v24 = vsel %vm395_vm0, %v822_v23, 0.0  ;;  %v433_v27 = vmul.f32 %v822_v23, %v822_v23 }
  0xb2   : > { %428 = vadd.xlane.f32.xlu2 %v427_v24 }
  0xb3   : > { %v435_v31 = vsel %vm395_vm0, %v433_v27, 0.0 }
  0xb4   : > { %v410_v25 = vpop.f32.mrf.mxu0 }
  0xb5   : > { %v411_v26 = vadd.f32 %v410_v25, %v330_v18 }
  0xb7   : > { %v828_v29 = vadd.f32 %v424_v28, %v411_v26 }
  0xb9   : > { %v430_v30 = vsel %vm395_vm0, %v828_v29, 0.0  ;;  %v434_v32 = vmul.f32 %v828_v29, %v828_v29 }
  0xba   : > { %431 = vadd.xlane.f32.xlu1 %v430_v30  ;;  %436 = vadd.xlane.f32.xlu2 %v435_v31  ;;  %v566_v30 = vld [vmem:[%s293_s14 + $0x8] sm:$0xff] }
  0xbb   : > { %v438_v33 = vsel %vm395_vm0, %v434_v32, 0.0 }
  0xc2   : > { %439 = vadd.xlane.f32.xlu1 %v438_v33 }
 0x125   : > { %v429_v34 = vpop.xlane.xlu2 %428 }
 0x12d   : > { %v432_v35 = vpop.xlane.xlu1 %431  ;;  %v437_v36 = vpop.xlane.xlu2 %436 }
 0x12e   : > { %v442_v40 = vsel %vm441_vm1, %v429_v34, %v437_v36 }
 0x135   : > { %v440_v37 = vpop.xlane.xlu1 %439 }
 0x136   : > { %v443_v38 = vsel %vm441_vm1, %v432_v35, %v440_v37 }
 0x137   : > { %466 = vmatpush.msra.mxu2 %v443_v38 }
 0x139   : > { %467 = vmatpush.msra.mxu2 %v442_v40 }
 0x13a   : > { %695 = vmatmul.msk.f32.vlgmr.msra.gmra.mxu2 %vm395_vm0, %v444_v39 }
 0x142   : > { %696 = vmatmul.msk.f32.gmra.mxu2 %vm395_vm0, %v445_v41 }
 0x1bd   : > { %v469_v42 = vpop.f32.mrf.mxu2 }
 0x1be   : > { %v475_v43 = vmul.f32 %v469_v42, %v469_v42  ;;  %491 = vperm.xlu2 %725, %v469_v42  }
 0x1c0   : > { %479 = vrot.lane.b32.xlu0 %v475_v43, %s744_s23 }
 0x1c5   : > { %v472_v44 = vpop.f32.mrf.mxu2 }
 0x1c6   : > { %v476_v45 = vmul.f32 %v472_v44, %v472_v44  ;;  %728 = vset.pattern.permute.xlu2 %v745_v47 }
 0x1c8   : > { %496 = vperm.xlu0 %724, %v472_v44   ;;  %481 = vrot.lane.b32.xlu1 %v476_v45, %s744_s23 }
 0x1d0   : > { %539 = vperm.xlu1 %726, %v535_v46   ;;  %727 = vset.pattern.permute.xlu0 %v745_v47 }
 0x1d8   : > { %558 = vperm.xlu1 %726, %v550_v48  }
 0x218   : > { %v492_v10 = vpop.permute.xlu2 %491 }
 0x219   : > { %v499_v13 = vsub.f32 %v822_v23, %v492_v10 }
 0x232   : > { %v480_v49 = vpop.permute.xlu0 %479 }
 0x233   : > { %v485_v50 = vsub.f32 %v469_v42, %v480_v49 }
 0x235   : > { %v487_v51 = vmax.f32 %v485_v50, 0.0 }
 0x237   : > { %v501_v52 = vadd.f32 1e-05, %v487_v51 }
 0x239   : > { %731 = vrsqrt.f32 %v501_v52  ;;  %vm509_vm3 = vweird.f32 %v501_v52 }
 0x23a   : > { %v482_v53 = vpop.permute.xlu1 %481  ;;  %v497_v11 = vpop.permute.xlu0 %496 }
 0x23b   : > { %v486_v54 = vsub.f32 %v472_v44, %v482_v53  ;;  %v500_v20 = vsub.f32 %v828_v29, %v497_v11 }
 0x23d   : > { %v488_v55 = vmax.f32 %v486_v54, 0.0 }
 0x23f   : > { %v732_v56 = vpop.eup %731  ;;  %v502_v57 = vadd.f32 1e-05, %v488_v55 }
 0x240   : > { %v504_v58 = vmul.f32 %v732_v56, %v501_v52  ;;  %vm510_vm2 = vweird.f32 %v732_v56 }
 0x241   : > { %733 = vrsqrt.f32 %v502_v57  ;;  %vm511_vm4 = vmor %vm509_vm3, %vm510_vm2  ;;  %vm519_vm6 = vweird.f32 %v502_v57 }
 0x242   : > { %v505_v59 = vmul.f32 %v732_v56, %v504_v58  ;;  %v540_v15 = vpop.permute.xlu1 %539 }
 0x244   : > { %v506_v60 = vmul.f32 0.5, %v505_v59 }
 0x246   : > { %v507_v61 = vsub.f32 1.5, %v506_v60 }
 0x247   : > { %v734_v62 = vpop.eup %733 }
 0x248   : > { %v514_v63 = vmul.f32 %v734_v62, %v502_v57  ;;  %v508_v0 = vmul.f32 %v732_v56, %v507_v61  ;;  %vm520_vm5 = vweird.f32 %v734_v62 }
 0x249   : > { %vm521_vm7 = vmor %vm519_vm6, %vm520_vm5 }
 0x24a   : > { %v515_v1 = vmul.f32 %v734_v62, %v514_v63  ;;  %v512_v2 = vsel %vm511_vm4, %v732_v56, %v508_v0  ;;  %v559_v26 = vpop.permute.xlu1 %558 }
 0x24b   : > { %525 = vperm.xlu0 %727, %v512_v2  }
 0x24c   : > { %v516_v3 = vmul.f32 0.5, %v515_v1 }
 0x24e   : > { %v517_v4 = vsub.f32 1.5, %v516_v3 }
 0x250   : > { %v518_v6 = vmul.f32 %v734_v62, %v517_v4 }
 0x252   : > { %v522_v8 = vsel %vm521_vm7, %v734_v62, %v518_v6 }
 0x253   : > { %729 = vset.pattern.permute.xlu0 %v743_v5  ;;  %530 = vperm.xlu2 %728, %v522_v8  }
 0x254   : > { %544 = vperm.xlu0 %729, %v536_v7  }
 0x25b   : > { %730 = vset.pattern.permute.xlu2 %v743_v5  ;;  %v565_v5 = vld [vmem:[%s293_s14] sm:$0xff] }
 0x25c   : > { %553 = vperm.xlu2 %730, %v549_v9  }
 0x2ad   : > { %v531_v12 = vpop.permute.xlu2 %530 }
 0x2ae   : > { %v534_v22 = vmul.f32 %v531_v12, %v500_v20 }
 0x2b6   : > { %v554_v17 = vpop.permute.xlu2 %553 }
 0x2bd   : > { %v526_v14 = vpop.permute.xlu0 %525 }
 0x2be   : > { %v533_v16 = vmul.f32 %v526_v14, %v499_v13 }
 0x2c0   : > { %v547_v18 = vmul.f32 %v540_v15, %v533_v16 }
 0x2c2   : > { %v561_v19 = vadd.f32 %v554_v17, %v547_v18 }
 0x2c4   : > { %v563_v21 = vmax.f32 %v561_v19, 0.0 }
 0x2c6   : > { %v567_v24 = vadd.f32 %v565_v5, %v563_v21  ;;  %v545_v25 = vpop.permute.xlu0 %544 }
 0x2c7   : > { %v548_v23 = vmul.f32 %v545_v25, %v534_v22 }
 0x2c8   : > { %v569_v27 = vmax.f32 %v567_v24, 0.0 }
 0x2c9   : > { %v562_v28 = vadd.f32 %v559_v26, %v548_v23 }
 0x2ca   : > { %571 = vst.msk [vmem:[%s298_s25] sm:$0xff] %vm395_vm0, %v569_v27 }
 0x2cb   : > { %v564_v31 = vmax.f32 %v562_v28, 0.0 }
 0x2cd   : > { %v568_v32 = vadd.f32 %v566_v30, %v564_v31 }
 0x2cf   : > { %v570_v33 = vmax.f32 %v568_v32, 0.0 }
 0x2d1   : > { %572 = vst.msk [vmem:[%s298_s25 + $0x8] sm:$0xff] %vm395_vm0, %v570_v33 }
 0x2d2 PF: > { %s17_s24 = sadd.s32 1, %s741_s24  }
 0x2d3   : > { %p14_p4 = scmp.ge.s32.totalorder %s17_s24, 4  }
 0x2d5   :  { %16 = sbr.rel (!%p14_p4) target bundleno = 1 (0x1), region = 81 }

// kernel: _lambda_.42
= control target key start
LH: loop header
LB: loop body
LE: loop exit
PB: predicated region body
PF: predicated region fallthrough
CT: control target
= control target key end

     0   :  { %s585_s21 = smov 0   ;;  %s659_s0 = inlined_call_operand.vmem [shape: bf16[2,16,16], index: 0, kind: input, shape index: {}]   ;;  %s660_s1 = inlined_call_operand.vmem [shape: bf16[16,16], index: 1, kind: input, shape index: {}]   ;;  %s661_s2 = inlined_call_operand.vmem [shape: f32[16,1], index: 2, kind: input, shape index: {}, may-alias: {2,5}]   ;;  %s662_s3 = inlined_call_operand.vmem [shape: f32[16,16], index: 3, kind: input, shape index: {}]   ;;  %s663_s4 = inlined_call_operand.vmem [shape: f32[16,1], index: 4, kind: input, shape index: {}]   ;;  %s664_s5 = inlined_call_operand.vmem [shape: f32[16,1], index: 5, kind: input, shape index: {}, may-alias: {2,5}]   ;;  %s665_s6 = inlined_call_operand.vmem [shape: f32[2,16,16], index: 6, kind: output, shape index: {}]  }
   0x1 LB: > { %s491_s22 = sadd.s32 4294967295, %s545_s21   ;;  %p495_p0 = scmp.ge.s32.totalorder %s545_s21, 1  ;;  %s545_s21 = sphi %s585_s21, %s16_s21  }
   0x2   : > { %p212_p1 = scmp.lt.s32.totalorder %s545_s21, 3 }
   0x4   : > { %p213_p2 = pnand %p495_p0, %p212_p1 }
   0x5   : > { %p242_p3 = scmp.lt.s32.totalorder (!%p213_p2), %s491_s22, 1  ;;  %s548_s13 = smov (!%p213_p2), 1  }
   0x6   : > { %216 = sbr.rel (%p213_p2) target bundleno = 679 (0x2a7), region = 44 }
   0xb   : > { %v258_v0 = vld [vmem:[%s661_s2 + $0x8] sm:$0xff]  ;;  %v547_v1 = vmov 0   ;;  %s667_s22 = smov (!%p242_p3, %s491_s22), 1  ;;  %v515_v3 = vld [vmem:[%s660_s1] sm:$0xff]  ;;  %vm280_vm0 = vcmask 130048   ;;  %vm312_vm1 = vcmask 7168  }
   0xc   : > { %528 = vset.pattern.permute.xlu0 %v547_v1  ;;  %529 = vset.pattern.permute.xlu2 %v547_v1  ;;  %s513_s25 = sshll.u32 %s667_s22, 3  ;;  %v257_v4 = vld [vmem:[%s661_s2] sm:$0xff]  ;;  %v316_v24 = vld [vmem:[%s662_s3 + $0x8] sm:$0xff]  ;;  %v549_v30 = vmov 1   ;;  %s514_s24 = sshll.u32 %s667_s22, 4 }
   0xd   : > { %266 = vperm.xlu0 %528, %v258_v0   ;;  %530 = vset.pattern.permute.xlu1 %v547_v1  ;;  %s246_s28 = scalar_lea.vmem %s659_s0, %s513_s25  ;;  %v315_v22 = vld [vmem:[%s662_s3] sm:$0xff]  ;;  %v421_v31 = vld [vmem:[%s664_s5 + $0x8] sm:$0xff]  ;;  %s251_s27 = scalar_lea.vmem %s665_s6, %s514_s24 }
   0xe   : > { %v516_v2 = vld [vmem:[%s246_s28] sm:$0xff]  ;;  %v407_v53 = vld [vmem:[%s663_s4 + $0x8] sm:$0xff] }
   0xf   : > { %291 = vmatpush.bf16.msra.mxu0 %v516_v2  ;;  %v406_v29 = vld [vmem:[%s663_s4] sm:$0xff] }
  0x10   : > { %v420_v55 = vld [vmem:[%s664_s5] sm:$0xff] }
  0x12   : > { %508 = vmatmul.msk.bf16.vlgmr.msra.gmra.mxu0 %vm280_vm0, %v515_v3 }
  0x15   : > { %261 = vperm.xlu0 %528, %v257_v4  }
  0x7f   : > { %v267_v5 = vpop.permute.xlu0 %266 }
  0x87   : > { %v262_v6 = vpop.permute.xlu0 %261 }
  0x8f   : > { %v293_v7 = vpop.f32.mrf.mxu0 }
  0x90   : > { %v612_v8 = vadd.f32 %v293_v7, %v262_v6 }
  0x92   : > { %v298_v9 = vsel %vm280_vm0, %v612_v8, 0.0  ;;  %v304_v10 = vmul.f32 %v612_v8, %v612_v8 }
  0x93   : > { %299 = vadd.xlane.f32.xlu2 %v298_v9 }
  0x94   : > { %v306_v14 = vsel %vm280_vm0, %v304_v10, 0.0 }
  0x97   : > { %v295_v11 = vpop.f32.mrf.mxu0 }
  0x98   : > { %v618_v12 = vadd.f32 %v295_v11, %v267_v5 }
  0x9a   : > { %v301_v13 = vsel %vm280_vm0, %v618_v12, 0.0  ;;  %v305_v15 = vmul.f32 %v618_v12, %v618_v12 }
  0x9b   : > { %302 = vadd.xlane.f32.xlu1 %v301_v13  ;;  %307 = vadd.xlane.f32.xlu2 %v306_v14 }
  0x9c   : > { %v309_v16 = vsel %vm280_vm0, %v305_v15, 0.0 }
  0xa3   : > { %310 = vadd.xlane.f32.xlu1 %v309_v16 }
 0x106   : > { %v300_v17 = vpop.xlane.xlu2 %299 }
 0x10e   : > { %v303_v18 = vpop.xlane.xlu1 %302  ;;  %v308_v19 = vpop.xlane.xlu2 %307 }
 0x10f   : > { %v313_v23 = vsel %vm312_vm1, %v300_v17, %v308_v19 }
 0x116   : > { %v311_v20 = vpop.xlane.xlu1 %310 }
 0x117   : > { %v314_v21 = vsel %vm312_vm1, %v303_v18, %v311_v20 }
 0x118   : > { %337 = vmatpush.msra.mxu1 %v314_v21 }
 0x11a   : > { %338 = vmatpush.msra.mxu1 %v313_v23 }
 0x11b   : > { %509 = vmatmul.msk.f32.vlgmr.msra.gmra.mxu1 %vm280_vm0, %v315_v22 }
 0x123   : > { %510 = vmatmul.msk.f32.gmra.mxu1 %vm280_vm0, %v316_v24 }
 0x198   : > { %v340_v25 = vpop.f32.mrf.mxu1 }
 0x199   : > { %v346_v26 = vmul.f32 %v340_v25, %v340_v25  ;;  %362 = vperm.xlu2 %529, %v340_v25  }
 0x19b   : > { %350 = vrot.lane.b32.xlu0 %v346_v26, %s548_s13 }
 0x1a0   : > { %v343_v27 = vpop.f32.mrf.mxu1 }
 0x1a1   : > { %v347_v28 = vmul.f32 %v343_v27, %v343_v27  ;;  %532 = vset.pattern.permute.xlu2 %v549_v30 }
 0x1a3   : > { %367 = vperm.xlu0 %528, %v343_v27   ;;  %352 = vrot.lane.b32.xlu1 %v347_v28, %s548_s13 }
 0x1ab   : > { %410 = vperm.xlu1 %530, %v406_v29   ;;  %531 = vset.pattern.permute.xlu0 %v549_v30 }
 0x1b3   : > { %429 = vperm.xlu1 %530, %v421_v31  }
 0x1f3   : > { %v363_v56 = vpop.permute.xlu2 %362 }
 0x1f4   : > { %v370_v59 = vsub.f32 %v612_v8, %v363_v56 }
 0x20d   : > { %v351_v32 = vpop.permute.xlu0 %350 }
 0x20e   : > { %v356_v33 = vsub.f32 %v340_v25, %v351_v32 }
 0x210   : > { %v358_v34 = vmax.f32 %v356_v33, 0.0 }
 0x212   : > { %v372_v35 = vadd.f32 1e-05, %v358_v34 }
 0x214   : > { %535 = vrsqrt.f32 %v372_v35  ;;  %vm380_vm3 = vweird.f32 %v372_v35 }
 0x215   : > { %v353_v36 = vpop.permute.xlu1 %352  ;;  %v368_v57 = vpop.permute.xlu0 %367 }
 0x216   : > { %v357_v37 = vsub.f32 %v343_v27, %v353_v36  ;;  %v371_v3 = vsub.f32 %v618_v12, %v368_v57 }
 0x218   : > { %v359_v38 = vmax.f32 %v357_v37, 0.0 }
 0x21a   : > { %v536_v39 = vpop.eup %535  ;;  %v373_v40 = vadd.f32 1e-05, %v359_v38 }
 0x21b   : > { %v375_v41 = vmul.f32 %v536_v39, %v372_v35  ;;  %vm381_vm2 = vweird.f32 %v536_v39 }
 0x21c   : > { %537 = vrsqrt.f32 %v373_v40  ;;  %vm382_vm4 = vmor %vm380_vm3, %vm381_vm2  ;;  %vm390_vm6 = vweird.f32 %v373_v40 }
 0x21d   : > { %v376_v42 = vmul.f32 %v536_v39, %v375_v41  ;;  %v411_v61 = vpop.permute.xlu1 %410 }
 0x21f   : > { %v377_v43 = vmul.f32 0.5, %v376_v42 }
 0x221   : > { %v378_v44 = vsub.f32 1.5, %v377_v43 }
 0x222   : > { %v538_v45 = vpop.eup %537 }
 0x223   : > { %v385_v46 = vmul.f32 %v538_v45, %v373_v40  ;;  %v379_v47 = vmul.f32 %v536_v39, %v378_v44  ;;  %vm391_vm5 = vweird.f32 %v538_v45 }
 0x224   : > { %vm392_vm7 = vmor %vm390_vm6, %vm391_vm5 }
 0x225   : > { %v386_v48 = vmul.f32 %v538_v45, %v385_v46  ;;  %v383_v49 = vsel %vm382_vm4, %v536_v39, %v379_v47  ;;  %v430_v6 = vpop.permute.xlu1 %429 }
 0x226   : > { %396 = vperm.xlu0 %531, %v383_v49  }
 0x227   : > { %v387_v50 = vmul.f32 0.5, %v386_v48 }
 0x229   : > { %v388_v51 = vsub.f32 1.5, %v387_v50 }
 0x22b   : > { %v389_v52 = vmul.f32 %v538_v45, %v388_v51 }
 0x22d   : > { %v393_v54 = vsel %vm392_vm7, %v538_v45, %v389_v52 }
 0x22e   : > { %533 = vset.pattern.permute.xlu0 %v547_v1  ;;  %401 = vperm.xlu2 %532, %v393_v54  }
 0x22f   : > { %415 = vperm.xlu0 %533, %v407_v53  }
 0x236   : > { %534 = vset.pattern.permute.xlu2 %v547_v1 }
 0x237   : > { %424 = vperm.xlu2 %534, %v420_v55  }
 0x288   : > { %v402_v58 = vpop.permute.xlu2 %401 }
 0x289   : > { %v405_v1 = vmul.f32 %v402_v58, %v371_v3 }
 0x291   : > { %v425_v63 = vpop.permute.xlu2 %424 }
 0x298   : > { %v397_v60 = vpop.permute.xlu0 %396 }
 0x299   : > { %v404_v62 = vmul.f32 %v397_v60, %v370_v59 }
 0x29b   : > { %v418_v0 = vmul.f32 %v411_v61, %v404_v62 }
 0x29d   : > { %v432_v2 = vadd.f32 %v425_v63, %v418_v0 }
 0x29f   : > { %434 = vst.msk [vmem:[%s251_s27] sm:$0xff] %vm280_vm0, %v432_v2 }
 0x2a1   : > { %v416_v4 = vpop.permute.xlu0 %415 }
 0x2a2   : > { %v419_v5 = vmul.f32 %v416_v4, %v405_v1 }
 0x2a4   : > { %v433_v7 = vadd.f32 %v430_v6, %v419_v5 }
 0x2a6   : > { %435 = vst.msk [vmem:[%s251_s27 + $0x8] sm:$0xff] %vm280_vm0, %v433_v7 }
 0x2a7 PF: > { %s16_s21 = sadd.s32 1, %s545_s21  }
 0x2a8   : > { %p13_p4 = scmp.ge.s32.totalorder %s16_s21, 4  }
 0x2aa   :  { %15 = sbr.rel (!%p13_p4) target bundleno = 1 (0x1), region = 74 }

// kernel: _lambda_.46
= control target key start
LH: loop header
LB: loop body
LE: loop exit
PB: predicated region body
PF: predicated region fallthrough
CT: control target
= control target key end

     0   :  { %s714_s21 = smov 0   ;;  %s797_s0 = inlined_call_operand.vmem [shape: bf16[2,144,4], index: 0, kind: input, shape index: {}]   ;;  %s798_s1 = inlined_call_operand.vmem [shape: bf16[16,144], index: 1, kind: input, shape index: {}]   ;;  %s799_s2 = inlined_call_operand.vmem [shape: f32[16,1], index: 2, kind: input, shape index: {}, may-alias: {2,5}]   ;;  %s800_s3 = inlined_call_operand.vmem [shape: f32[16,16], index: 3, kind: input, shape index: {}]   ;;  %s801_s4 = inlined_call_operand.vmem [shape: f32[16,1], index: 4, kind: input, shape index: {}]   ;;  %s802_s5 = inlined_call_operand.vmem [shape: f32[16,1], index: 5, kind: input, shape index: {}, may-alias: {2,5}]   ;;  %s803_s6 = inlined_call_operand.vmem [shape: f32[2,16,4], index: 6, kind: output, shape index: {}]  }
   0x1 LB: > { %s576_s22 = sadd.s32 4294967295, %s674_s21   ;;  %p580_p0 = scmp.ge.s32.totalorder %s674_s21, 1  ;;  %s674_s21 = sphi %s714_s21, %s16_s21  }
   0x2   : > { %p212_p1 = scmp.lt.s32.totalorder %s674_s21, 3 }
   0x4   : > { %p213_p2 = pnand %p580_p0, %p212_p1 }
   0x5   : > { %p242_p3 = scmp.lt.s32.totalorder (!%p213_p2), %s576_s22, 1  ;;  %s677_s19 = smov (!%p213_p2), 1  }
   0x6   : > { %216 = sbr.rel (%p213_p2) target bundleno = 718 (0x2ce), region = 44 }
   0xb   : > { %s805_s22 = smov (!%p242_p3, %s576_s22), 1  ;;  %v634_v1 = vld [vmem:[%s798_s1 + $0x4] sm:$0xf]  ;;  %v588_v2 = vld [vmem:[%s798_s1 + $0x8] sm:$0xf0]  ;;  %v676_v5 = vmov 0  }
   0xc   : > { %s645_s23 = smul.u32 72, %s805_s22  ;;  %657 = vset.pattern.permute.xlu0 %v676_v5  ;;  %v591_v6 = vor.u32 %v634_v1, %v588_v2  ;;  %v274_v7 = vld [vmem:[%s799_s2 + $0x8] sm:$0xff]  ;;  %658 = vset.pattern.permute.xlu2 %v676_v5  ;;  %vm348_vm0 = vcmask 130048   ;;  %v273_v9 = vld [vmem:[%s799_s2] sm:$0xff]  ;;  %vm380_vm1 = vcmask 31744   ;;  %vm395_vm2 = vcmask 7168  }
   0xd   : > { %659 = vset.pattern.permute.xlu1 %v676_v5  ;;  %282 = vperm.xlu0 %657, %v274_v7   ;;  %v586_v15 = vld [vmem:[%s798_s1] sm:$0xf]  ;;  %v635_v16 = vld [vmem:[%s798_s1 + $0x4] sm:$0xf0]  ;;  %v678_v47 = vmov 1   ;;  %s633_s30 = sshll.u32 %s805_s22, 4 }
   0xe   : > { %s246_s26 = scalar_lea.vmem %s797_s0, %s645_s23  ;;  %v587_v17 = vor.u32 %v635_v16, %v586_v15  ;;  %v398_v39 = vld [vmem:[%s800_s3] sm:$0xff]  ;;  %v399_v41 = vld [vmem:[%s800_s3 + $0x8] sm:$0xff]  ;;  %s251_s9 = scalar_lea.vmem %s803_s6, %s633_s30 }
   0xf   : > { %v643_v0 = vld [vmem:[%s246_s26 + $0x38] sm:$0xff]  ;;  %v642_v3 = vld [vmem:[%s246_s26 + $0x30] sm:$0xff]  ;;  %v644_v4 = vld [vmem:[%s246_s26 + $0x40] sm:$0xff] }
  0x10   : > { %352 = vmatpush.bf16.msra.mxu0 %v643_v0  ;;  %373 = vmatpush.bf16.msra.mxu1 %v644_v4  ;;  %v641_v8 = vld [vmem:[%s246_s26 + $0x28] sm:$0xff]  ;;  %v640_v10 = vld [vmem:[%s246_s26 + $0x20] sm:$0xff]  ;;  %v639_v11 = vld [vmem:[%s246_s26 + $0x18] sm:$0xff] }
  0x11   : > { %v638_v12 = vld [vmem:[%s246_s26 + $0x10] sm:$0xff]  ;;  %v637_v13 = vld [vmem:[%s246_s26 + $0x8] sm:$0xff]  ;;  %v636_v14 = vld [vmem:[%s246_s26] sm:$0xff] }
  0x12   : > { %v489_v46 = vld [vmem:[%s801_s4] sm:$0xff]  ;;  %v504_v48 = vld [vmem:[%s802_s5 + $0x8] sm:$0xff] }
  0x13   : > { %628 = vmatmul.msk.bf16.vlgmr.msra.gmra.mxu1 %vm348_vm0, %v591_v6  ;;  %v490_v7 = vld [vmem:[%s801_s4 + $0x8] sm:$0xff] }
  0x14   : > { %353 = vmatpush.bf16.msra.mxu0 %v642_v3 }
  0x15   : > { %277 = vperm.xlu0 %657, %v273_v9   ;;  %v503_v9 = vld [vmem:[%s802_s5] sm:$0xff] }
  0x18   : > { %354 = vmatpush.bf16.msra.mxu0 %v641_v8 }
  0x1c   : > { %355 = vmatpush.bf16.msra.mxu0 %v640_v10 }
  0x20   : > { %356 = vmatpush.bf16.msra.mxu0 %v639_v11 }
  0x24   : > { %357 = vmatpush.bf16.msra.mxu0 %v638_v12 }
  0x28   : > { %358 = vmatpush.bf16.msra.mxu0 %v637_v13 }
  0x2c   : > { %359 = vmatpush.bf16.msra.mxu0 %v636_v14 }
  0x2f   : > { %360 = vmatmul.bf16.vlgmr.msra.gmra.mxu0 %v587_v17 }
  0x7f   : > { %v283_v18 = vpop.permute.xlu0 %282 }
  0x87   : > { %v278_v19 = vpop.permute.xlu0 %277 }
  0x90   : > { %v375_v20 = vpop.f32.mrf.mxu1 }
  0x98   : > { %v377_v28 = vpop.f32.mrf.mxu1 }
  0xac   : > { %v361_v21 = vpop.f32.mrf.mxu0 }
  0xad   : > { %v362_v22 = vadd.f32 %v361_v21, %v278_v19 }
  0xaf   : > { %v750_v23 = vadd.f32 %v375_v20, %v362_v22 }
  0xb1   : > { %v381_v24 = vsel %vm380_vm1, %v750_v23, 0.0  ;;  %v387_v27 = vmul.f32 %v750_v23, %v750_v23 }
  0xb2   : > { %382 = vadd.xlane.f32.xlu2 %v381_v24 }
  0xb3   : > { %v389_v31 = vsel %vm380_vm1, %v387_v27, 0.0 }
  0xb4   : > { %v363_v25 = vpop.f32.mrf.mxu0 }
  0xb5   : > { %v364_v26 = vadd.f32 %v363_v25, %v283_v18 }
  0xb7   : > { %v756_v29 = vadd.f32 %v377_v28, %v364_v26 }
  0xb9   : > { %v384_v30 = vsel %vm380_vm1, %v756_v29, 0.0  ;;  %v388_v32 = vmul.f32 %v756_v29, %v756_v29 }
  0xba   : > { %385 = vadd.xlane.f32.xlu1 %v384_v30  ;;  %390 = vadd.xlane.f32.xlu2 %v389_v31 }
  0xbb   : > { %v392_v33 = vsel %vm380_vm1, %v388_v32, 0.0 }
  0xc2   : > { %393 = vadd.xlane.f32.xlu1 %v392_v33 }
 0x125   : > { %v383_v34 = vpop.xlane.xlu2 %382 }
 0x12d   : > { %v386_v35 = vpop.xlane.xlu1 %385  ;;  %v391_v36 = vpop.xlane.xlu2 %390 }
 0x12e   : > { %v396_v40 = vsel %vm395_vm2, %v383_v34, %v391_v36 }
 0x135   : > { %v394_v37 = vpop.xlane.xlu1 %393 }
 0x136   : > { %v397_v38 = vsel %vm395_vm2, %v386_v35, %v394_v37 }
 0x137   : > { %420 = vmatpush.msra.mxu2 %v397_v38 }
 0x139   : > { %421 = vmatpush.msra.mxu2 %v396_v40 }
 0x13a   : > { %629 = vmatmul.msk.f32.vlgmr.msra.gmra.mxu2 %vm348_vm0, %v398_v39 }
 0x142   : > { %630 = vmatmul.msk.f32.gmra.mxu2 %vm348_vm0, %v399_v41 }
 0x1bd   : > { %v423_v42 = vpop.f32.mrf.mxu2 }
 0x1be   : > { %v429_v43 = vmul.f32 %v423_v42, %v423_v42  ;;  %445 = vperm.xlu2 %658, %v423_v42  }
 0x1c0   : > { %433 = vrot.lane.b32.xlu0 %v429_v43, %s677_s19 }
 0x1c5   : > { %v426_v44 = vpop.f32.mrf.mxu2 }
 0x1c6   : > { %v430_v45 = vmul.f32 %v426_v44, %v426_v44  ;;  %661 = vset.pattern.permute.xlu2 %v678_v47 }
 0x1c8   : > { %450 = vperm.xlu0 %657, %v426_v44   ;;  %435 = vrot.lane.b32.xlu1 %v430_v45, %s677_s19 }
 0x1d0   : > { %493 = vperm.xlu1 %659, %v489_v46   ;;  %660 = vset.pattern.permute.xlu0 %v678_v47 }
 0x1d8   : > { %512 = vperm.xlu1 %659, %v504_v48  }
 0x218   : > { %v446_v10 = vpop.permute.xlu2 %445 }
 0x219   : > { %v453_v13 = vsub.f32 %v750_v23, %v446_v10 }
 0x232   : > { %v434_v49 = vpop.permute.xlu0 %433 }
 0x233   : > { %v439_v50 = vsub.f32 %v423_v42, %v434_v49 }
 0x235   : > { %v441_v51 = vmax.f32 %v439_v50, 0.0 }
 0x237   : > { %v455_v52 = vadd.f32 1e-05, %v441_v51 }
 0x239   : > { %664 = vrsqrt.f32 %v455_v52  ;;  %vm463_vm4 = vweird.f32 %v455_v52 }
 0x23a   : > { %v436_v53 = vpop.permute.xlu1 %435  ;;  %v451_v11 = vpop.permute.xlu0 %450 }
 0x23b   : > { %v440_v54 = vsub.f32 %v426_v44, %v436_v53  ;;  %v454_v20 = vsub.f32 %v756_v29, %v451_v11 }
 0x23d   : > { %v442_v55 = vmax.f32 %v440_v54, 0.0 }
 0x23f   : > { %v665_v56 = vpop.eup %664  ;;  %v456_v57 = vadd.f32 1e-05, %v442_v55 }
 0x240   : > { %v458_v58 = vmul.f32 %v665_v56, %v455_v52  ;;  %vm464_vm3 = vweird.f32 %v665_v56 }
 0x241   : > { %666 = vrsqrt.f32 %v456_v57  ;;  %vm465_vm5 = vmor %vm463_vm4, %vm464_vm3  ;;  %vm473_vm7 = vweird.f32 %v456_v57 }
 0x242   : > { %v459_v59 = vmul.f32 %v665_v56, %v458_v58  ;;  %v494_v15 = vpop.permute.xlu1 %493 }
 0x244   : > { %v460_v60 = vmul.f32 0.5, %v459_v59 }
 0x246   : > { %v461_v61 = vsub.f32 1.5, %v460_v60 }
 0x247   : > { %v667_v62 = vpop.eup %666 }
 0x248   : > { %v468_v63 = vmul.f32 %v667_v62, %v456_v57  ;;  %v462_v0 = vmul.f32 %v665_v56, %v461_v61  ;;  %vm474_vm6 = vweird.f32 %v667_v62 }
 0x249   : > { %vm475_vm8 = vmor %vm473_vm7, %vm474_vm6 }
 0x24a   : > { %v469_v1 = vmul.f32 %v667_v62, %v468_v63  ;;  %v466_v2 = vsel %vm465_vm5, %v665_v56, %v462_v0  ;;  %v513_v23 = vpop.permute.xlu1 %512 }
 0x24b   : > { %479 = vperm.xlu0 %660, %v466_v2  }
 0x24c   : > { %v470_v3 = vmul.f32 0.5, %v469_v1 }
 0x24e   : > { %v471_v4 = vsub.f32 1.5, %v470_v3 }
 0x250   : > { %v472_v6 = vmul.f32 %v667_v62, %v471_v4 }
 0x252   : > { %v476_v8 = vsel %vm475_vm8, %v667_v62, %v472_v6 }
 0x253   : > { %662 = vset.pattern.permute.xlu0 %v676_v5  ;;  %484 = vperm.xlu2 %661, %v476_v8  }
 0x254   : > { %498 = vperm.xlu0 %662, %v490_v7  }
 0x25b   : > { %663 = vset.pattern.permute.xlu2 %v676_v5 }
 0x25c   : > { %507 = vperm.xlu2 %663, %v503_v9  }
 0x2ad   : > { %v485_v12 = vpop.permute.xlu2 %484 }
 0x2ae   : > { %v488_v21 = vmul.f32 %v485_v12, %v454_v20 }
 0x2b6   : > { %v508_v17 = vpop.permute.xlu2 %507 }
 0x2bd   : > { %v480_v14 = vpop.permute.xlu0 %479 }
 0x2be   : > { %v487_v16 = vmul.f32 %v480_v14, %v453_v13 }
 0x2c0   : > { %v501_v18 = vmul.f32 %v494_v15, %v487_v16 }
 0x2c2   : > { %v515_v19 = vadd.f32 %v508_v17, %v501_v18 }
 0x2c4   : > { %v517_v5 = vmax.f32 %v515_v19, 0.0 }
 0x2c6   : > { %519 = vst.msk [vmem:[%s251_s9] sm:$0xff] %vm380_vm1, %v517_v5  ;;  %v499_v22 = vpop.permute.xlu0 %498 }
 0x2c7   : > { %v502_v24 = vmul.f32 %v499_v22, %v488_v21 }
 0x2c9   : > { %v516_v25 = vadd.f32 %v513_v23, %v502_v24 }
 0x2cb   : > { %v518_v26 = vmax.f32 %v516_v25, 0.0 }
 0x2cd   : > { %520 = vst.msk [vmem:[%s251_s9 + $0x8] sm:$0xff] %vm380_vm1, %v518_v26 }
 0x2ce PF: > { %s16_s21 = sadd.s32 1, %s674_s21  }
 0x2cf   : > { %p13_p4 = scmp.ge.s32.totalorder %s16_s21, 4  }
 0x2d1   :  { %15 = sbr.rel (!%p13_p4) target bundleno = 1 (0x1), region = 74 }

// kernel: _lambda_.47
= control target key start
LH: loop header
LB: loop body
LE: loop exit
PB: predicated region body
PF: predicated region fallthrough
CT: control target
= control target key end

     0   :  { %s586_s21 = smov 0   ;;  %s660_s0 = inlined_call_operand.vmem [shape: bf16[2,16,4], index: 0, kind: input, shape index: {}]   ;;  %s661_s1 = inlined_call_operand.vmem [shape: bf16[16,16], index: 1, kind: input, shape index: {}]   ;;  %s662_s2 = inlined_call_operand.vmem [shape: f32[16,1], index: 2, kind: input, shape index: {}, may-alias: {2,5}]   ;;  %s663_s3 = inlined_call_operand.vmem [shape: f32[16,16], index: 3, kind: input, shape index: {}]   ;;  %s664_s4 = inlined_call_operand.vmem [shape: f32[16,1], index: 4, kind: input, shape index: {}]   ;;  %s665_s5 = inlined_call_operand.vmem [shape: f32[16,1], index: 5, kind: input, shape index: {}, may-alias: {2,5}]   ;;  %s666_s6 = inlined_call_operand.vmem [shape: f32[2,16,4], index: 6, kind: output, shape index: {}]  }
   0x1 LB: > { %s492_s22 = sadd.s32 4294967295, %s546_s21   ;;  %p496_p0 = scmp.ge.s32.totalorder %s546_s21, 1  ;;  %s546_s21 = sphi %s586_s21, %s16_s21  }
   0x2   : > { %p212_p1 = scmp.lt.s32.totalorder %s546_s21, 3 }
   0x4   : > { %p213_p2 = pnand %p496_p0, %p212_p1 }
   0x5   : > { %p242_p3 = scmp.lt.s32.totalorder (!%p213_p2), %s492_s22, 1  ;;  %s549_s13 = smov (!%p213_p2), 1  }
   0x6   : > { %216 = sbr.rel (%p213_p2) target bundleno = 679 (0x2a7), region = 44 }
   0xb   : > { %v258_v0 = vld [vmem:[%s662_s2 + $0x8] sm:$0xff]  ;;  %v548_v1 = vmov 0   ;;  %s668_s22 = smov (!%p242_p3, %s492_s22), 1  ;;  %v516_v3 = vld [vmem:[%s661_s1] sm:$0xff]  ;;  %vm280_vm0 = vcmask 130048   ;;  %vm298_vm1 = vcmask 31744  }
   0xc   : > { %529 = vset.pattern.permute.xlu0 %v548_v1  ;;  %530 = vset.pattern.permute.xlu2 %v548_v1  ;;  %s514_s25 = sshll.u32 %s668_s22, 3  ;;  %v257_v4 = vld [vmem:[%s662_s2] sm:$0xff]  ;;  %vm313_vm2 = vcmask 7168   ;;  %v317_v24 = vld [vmem:[%s663_s3 + $0x8] sm:$0xff]  ;;  %v550_v30 = vmov 1   ;;  %s515_s24 = sshll.u32 %s668_s22, 4 }
   0xd   : > { %266 = vperm.xlu0 %529, %v258_v0   ;;  %531 = vset.pattern.permute.xlu1 %v548_v1  ;;  %s246_s28 = scalar_lea.vmem %s660_s0, %s514_s25  ;;  %v316_v22 = vld [vmem:[%s663_s3] sm:$0xff]  ;;  %v422_v31 = vld [vmem:[%s665_s5 + $0x8] sm:$0xff]  ;;  %s251_s27 = scalar_lea.vmem %s666_s6, %s515_s24 }
   0xe   : > { %v517_v2 = vld [vmem:[%s246_s28] sm:$0xff]  ;;  %v408_v53 = vld [vmem:[%s664_s4 + $0x8] sm:$0xff] }
   0xf   : > { %291 = vmatpush.bf16.msra.mxu0 %v517_v2  ;;  %v407_v29 = vld [vmem:[%s664_s4] sm:$0xff] }
  0x10   : > { %v421_v55 = vld [vmem:[%s665_s5] sm:$0xff] }
  0x12   : > { %509 = vmatmul.msk.bf16.vlgmr.msra.gmra.mxu0 %vm280_vm0, %v516_v3 }
  0x15   : > { %261 = vperm.xlu0 %529, %v257_v4  }
  0x7f   : > { %v267_v5 = vpop.permute.xlu0 %266 }
  0x87   : > { %v262_v6 = vpop.permute.xlu0 %261 }
  0x8f   : > { %v293_v7 = vpop.f32.mrf.mxu0 }
  0x90   : > { %v613_v8 = vadd.f32 %v293_v7, %v262_v6 }
  0x92   : > { %v299_v9 = vsel %vm298_vm1, %v613_v8, 0.0  ;;  %v305_v10 = vmul.f32 %v613_v8, %v613_v8 }
  0x93   : > { %300 = vadd.xlane.f32.xlu2 %v299_v9 }
  0x94   : > { %v307_v14 = vsel %vm298_vm1, %v305_v10, 0.0 }
  0x97   : > { %v295_v11 = vpop.f32.mrf.mxu0 }
  0x98   : > { %v619_v12 = vadd.f32 %v295_v11, %v267_v5 }
  0x9a   : > { %v302_v13 = vsel %vm298_vm1, %v619_v12, 0.0  ;;  %v306_v15 = vmul.f32 %v619_v12, %v619_v12 }
  0x9b   : > { %303 = vadd.xlane.f32.xlu1 %v302_v13  ;;  %308 = vadd.xlane.f32.xlu2 %v307_v14 }
  0x9c   : > { %v310_v16 = vsel %vm298_vm1, %v306_v15, 0.0 }
  0xa3   : > { %311 = vadd.xlane.f32.xlu1 %v310_v16 }
 0x106   : > { %v301_v17 = vpop.xlane.xlu2 %300 }
 0x10e   : > { %v304_v18 = vpop.xlane.xlu1 %303  ;;  %v309_v19 = vpop.xlane.xlu2 %308 }
 0x10f   : > { %v314_v23 = vsel %vm313_vm2, %v301_v17, %v309_v19 }
 0x116   : > { %v312_v20 = vpop.xlane.xlu1 %311 }
 0x117   : > { %v315_v21 = vsel %vm313_vm2, %v304_v18, %v312_v20 }
 0x118   : > { %338 = vmatpush.msra.mxu1 %v315_v21 }
 0x11a   : > { %339 = vmatpush.msra.mxu1 %v314_v23 }
 0x11b   : > { %510 = vmatmul.msk.f32.vlgmr.msra.gmra.mxu1 %vm280_vm0, %v316_v22 }
 0x123   : > { %511 = vmatmul.msk.f32.gmra.mxu1 %vm280_vm0, %v317_v24 }
 0x198   : > { %v341_v25 = vpop.f32.mrf.mxu1 }
 0x199   : > { %v347_v26 = vmul.f32 %v341_v25, %v341_v25  ;;  %363 = vperm.xlu2 %530, %v341_v25  }
 0x19b   : > { %351 = vrot.lane.b32.xlu0 %v347_v26, %s549_s13 }
 0x1a0   : > { %v344_v27 = vpop.f32.mrf.mxu1 }
 0x1a1   : > { %v348_v28 = vmul.f32 %v344_v27, %v344_v27  ;;  %533 = vset.pattern.permute.xlu2 %v550_v30 }
 0x1a3   : > { %368 = vperm.xlu0 %529, %v344_v27   ;;  %353 = vrot.lane.b32.xlu1 %v348_v28, %s549_s13 }
 0x1ab   : > { %411 = vperm.xlu1 %531, %v407_v29   ;;  %532 = vset.pattern.permute.xlu0 %v550_v30 }
 0x1b3   : > { %430 = vperm.xlu1 %531, %v422_v31  }
 0x1f3   : > { %v364_v56 = vpop.permute.xlu2 %363 }
 0x1f4   : > { %v371_v59 = vsub.f32 %v613_v8, %v364_v56 }
 0x20d   : > { %v352_v32 = vpop.permute.xlu0 %351 }
 0x20e   : > { %v357_v33 = vsub.f32 %v341_v25, %v352_v32 }
 0x210   : > { %v359_v34 = vmax.f32 %v357_v33, 0.0 }
 0x212   : > { %v373_v35 = vadd.f32 1e-05, %v359_v34 }
 0x214   : > { %536 = vrsqrt.f32 %v373_v35  ;;  %vm381_vm4 = vweird.f32 %v373_v35 }
 0x215   : > { %v354_v36 = vpop.permute.xlu1 %353  ;;  %v369_v57 = vpop.permute.xlu0 %368 }
 0x216   : > { %v358_v37 = vsub.f32 %v344_v27, %v354_v36  ;;  %v372_v3 = vsub.f32 %v619_v12, %v369_v57 }
 0x218   : > { %v360_v38 = vmax.f32 %v358_v37, 0.0 }
 0x21a   : > { %v537_v39 = vpop.eup %536  ;;  %v374_v40 = vadd.f32 1e-05, %v360_v38 }
 0x21b   : > { %v376_v41 = vmul.f32 %v537_v39, %v373_v35  ;;  %vm382_vm3 = vweird.f32 %v537_v39 }
 0x21c   : > { %538 = vrsqrt.f32 %v374_v40  ;;  %vm383_vm5 = vmor %vm381_vm4, %vm382_vm3  ;;  %vm391_vm7 = vweird.f32 %v374_v40 }
 0x21d   : > { %v377_v42 = vmul.f32 %v537_v39, %v376_v41  ;;  %v412_v61 = vpop.permute.xlu1 %411 }
 0x21f   : > { %v378_v43 = vmul.f32 0.5, %v377_v42 }
 0x221   : > { %v379_v44 = vsub.f32 1.5, %v378_v43 }
 0x222   : > { %v539_v45 = vpop.eup %538 }
 0x223   : > { %v386_v46 = vmul.f32 %v539_v45, %v374_v40  ;;  %v380_v47 = vmul.f32 %v537_v39, %v379_v44  ;;  %vm392_vm6 = vweird.f32 %v539_v45 }
 0x224   : > { %vm393_vm8 = vmor %vm391_vm7, %vm392_vm6 }
 0x225   : > { %v387_v48 = vmul.f32 %v539_v45, %v386_v46  ;;  %v384_v49 = vsel %vm383_vm5, %v537_v39, %v380_v47  ;;  %v431_v6 = vpop.permute.xlu1 %430 }
 0x226   : > { %397 = vperm.xlu0 %532, %v384_v49  }
 0x227   : > { %v388_v50 = vmul.f32 0.5, %v387_v48 }
 0x229   : > { %v389_v51 = vsub.f32 1.5, %v388_v50 }
 0x22b   : > { %v390_v52 = vmul.f32 %v539_v45, %v389_v51 }
 0x22d   : > { %v394_v54 = vsel %vm393_vm8, %v539_v45, %v390_v52 }
 0x22e   : > { %534 = vset.pattern.permute.xlu0 %v548_v1  ;;  %402 = vperm.xlu2 %533, %v394_v54  }
 0x22f   : > { %416 = vperm.xlu0 %534, %v408_v53  }
 0x236   : > { %535 = vset.pattern.permute.xlu2 %v548_v1 }
 0x237   : > { %425 = vperm.xlu2 %535, %v421_v55  }
 0x288   : > { %v403_v58 = vpop.permute.xlu2 %402 }
 0x289   : > { %v406_v1 = vmul.f32 %v403_v58, %v372_v3 }
 0x291   : > { %v426_v63 = vpop.permute.xlu2 %425 }
 0x298   : > { %v398_v60 = vpop.permute.xlu0 %397 }
 0x299   : > { %v405_v62 = vmul.f32 %v398_v60, %v371_v59 }
 0x29b   : > { %v419_v0 = vmul.f32 %v412_v61, %v405_v62 }
 0x29d   : > { %v433_v2 = vadd.f32 %v426_v63, %v419_v0 }
 0x29f   : > { %435 = vst.msk [vmem:[%s251_s27] sm:$0xff] %vm298_vm1, %v433_v2 }
 0x2a1   : > { %v417_v4 = vpop.permute.xlu0 %416 }
 0x2a2   : > { %v420_v5 = vmul.f32 %v417_v4, %v406_v1 }
 0x2a4   : > { %v434_v7 = vadd.f32 %v431_v6, %v420_v5 }
 0x2a6   : > { %436 = vst.msk [vmem:[%s251_s27 + $0x8] sm:$0xff] %vm298_vm1, %v434_v7 }
 0x2a7 PF: > { %s16_s21 = sadd.s32 1, %s546_s21  }
 0x2a8   : > { %p13_p4 = scmp.ge.s32.totalorder %s16_s21, 4  }
 0x2aa   :  { %15 = sbr.rel (!%p13_p4) target bundleno = 1 (0x1), region = 74 }

// kernel: _lambda_.51
= control target key start
LH: loop header
LB: loop body
LE: loop exit
PB: predicated region body
PF: predicated region fallthrough
CT: control target
= control target key end

     0   :  { %s375_s12 = smov 0   ;;  %s410_s0 = inlined_call_operand.vmem [shape: bf16[2,16,4], index: 0, kind: input, shape index: {}]   ;;  %s411_s1 = inlined_call_operand.vmem [shape: bf16[32,16], index: 1, kind: input, shape index: {}]   ;;  %s412_s2 = inlined_call_operand.vmem [shape: f32[32,1], index: 2, kind: input, shape index: {}]   ;;  %s413_s3 = inlined_call_operand.vmem [shape: f32[2,32,4], index: 3, kind: output, shape index: {}]  }
   0x1 LB: > { %s304_s13 = sadd.s32 4294967295, %s352_s12   ;;  %p308_p0 = scmp.ge.s32.totalorder %s352_s12, 1  ;;  %s352_s12 = sphi %s375_s12, %s13_s12  }
   0x2   : > { %p137_p1 = scmp.lt.s32.totalorder %s352_s12, 3 }
   0x4   : > { %p138_p2 = pnand %p308_p0, %p137_p1 }
   0x5   : > { %p161_p3 = scmp.lt.s32.totalorder (!%p138_p2), %s304_s13, 1 }
   0x6   : > { %141 = sbr.rel (%p138_p2) target bundleno = 156 (0x9c), region = 32 }
   0xb   : > { %v180_v0 = vld [vmem:[%s412_s2 + $0x10] sm:$0xff]  ;;  %v354_v1 = vmov 0   ;;  %v178_v2 = vld [vmem:[%s412_s2] sm:$0xff]  ;;  %s415_s13 = smov (!%p161_p3, %s304_s13), 1  ;;  %v332_v5 = vld [vmem:[%s411_s1 + $0x8] sm:$0xff]  ;;  %vm218_vm0 = vcmask 130048  }
   0xc   : > { %345 = vset.pattern.permute.xlu1 %v354_v1  ;;  %344 = vset.pattern.permute.xlu0 %v354_v1  ;;  %s329_s18 = sshll.u32 %s415_s13, 3  ;;  %v331_v4 = vld [vmem:[%s411_s1] sm:$0xff]  ;;  %v181_v6 = vld [vmem:[%s412_s2 + $0x18] sm:$0xff]  ;;  %v179_v7 = vld [vmem:[%s412_s2 + $0x8] sm:$0xff]  ;;  %s330_s30 = sshll.u32 %s415_s13, 5  ;;  %vm244_vm1 = vcmask 31744  }
   0xd   : > { %194 = vperm.xlu1 %345, %v180_v0   ;;  %184 = vperm.xlu0 %344, %v178_v2   ;;  %s165_s21 = scalar_lea.vmem %s410_s0, %s329_s18  ;;  %s170_s6 = scalar_lea.vmem %s413_s3, %s330_s30 }
   0xe   : > { %v333_v3 = vld [vmem:[%s165_s21] sm:$0xff] }
   0xf   : > { %232 = vmatpush.bf16.msra.mxu0 %v333_v3  ;;  %334 = vmatpush.bf16.msra.mxu1 %v333_v3 }
  0x12   : > { %325 = vmatmul.msk.bf16.vlgmr.msra.gmra.mxu0 %vm218_vm0, %v331_v4  ;;  %326 = vmatmul.msk.bf16.vlgmr.msra.gmra.mxu1 %vm218_vm0, %v332_v5 }
  0x15   : > { %199 = vperm.xlu1 %345, %v181_v6   ;;  %189 = vperm.xlu0 %344, %v179_v7  }
  0x7f   : > { %v195_v8 = vpop.permute.xlu1 %194  ;;  %v185_v9 = vpop.permute.xlu0 %184 }
  0x87   : > { %v200_v14 = vpop.permute.xlu1 %199  ;;  %v190_v15 = vpop.permute.xlu0 %189 }
  0x8f   : > { %v234_v10 = vpop.f32.mrf.mxu0  ;;  %v239_v11 = vpop.f32.mrf.mxu1 }
  0x90   : > { %v235_v12 = vadd.f32 %v234_v10, %v185_v9  ;;  %v240_v13 = vadd.f32 %v239_v11, %v195_v8 }
  0x92   : > { %245 = vst.msk [vmem:[%s170_s6] sm:$0xff] %vm244_vm1, %v235_v12 }
  0x93   : > { %247 = vst.msk [vmem:[%s170_s6 + $0x10] sm:$0xff] %vm244_vm1, %v240_v13 }
  0x97   : > { %v236_v16 = vpop.f32.mrf.mxu0  ;;  %v241_v17 = vpop.f32.mrf.mxu1 }
  0x98   : > { %v237_v18 = vadd.f32 %v236_v16, %v190_v15  ;;  %v242_v19 = vadd.f32 %v241_v17, %v200_v14 }
  0x9a   : > { %246 = vst.msk [vmem:[%s170_s6 + $0x8] sm:$0xff] %vm244_vm1, %v237_v18 }
  0x9b   : > { %248 = vst.msk [vmem:[%s170_s6 + $0x18] sm:$0xff] %vm244_vm1, %v242_v19 }
  0x9c PF: > { %s13_s12 = sadd.s32 1, %s352_s12  }
  0x9d   : > { %p10_p4 = scmp.ge.s32.totalorder %s13_s12, 4  }
  0x9f   :  { %12 = sbr.rel (!%p10_p4) target bundleno = 1 (0x1), region = 62 }

// kernel: _lambda_.48
= control target key start
LH: loop header
LB: loop body
LE: loop exit
PB: predicated region body
PF: predicated region fallthrough
CT: control target
= control target key end

     0   :  { %s787_s24 = smov 0   ;;  %s873_s0 = inlined_call_operand.vmem [shape: bf16[2,144,4], index: 0, kind: input, shape index: {}]   ;;  %s874_s1 = inlined_call_operand.vmem [shape: bf16[16,144], index: 1, kind: input, shape index: {}]   ;;  %s875_s2 = inlined_call_operand.vmem [shape: f32[16,1], index: 2, kind: input, shape index: {}, may-alias: {2,5}]   ;;  %s876_s3 = inlined_call_operand.vmem [shape: f32[16,16], index: 3, kind: input, shape index: {}]   ;;  %s877_s4 = inlined_call_operand.vmem [shape: f32[16,1], index: 4, kind: input, shape index: {}]   ;;  %s878_s5 = inlined_call_operand.vmem [shape: f32[16,1], index: 5, kind: input, shape index: {}, may-alias: {2,5}]   ;;  %s879_s6 = inlined_call_operand.vmem [shape: f32[2,16,4], index: 6, kind: input, shape index: {}]   ;;  %s880_s7 = inlined_call_operand.vmem [shape: f32[2,16,4], index: 7, kind: output, shape index: {}]  }
   0x1 LB: > { %s641_s25 = sadd.s32 4294967295, %s742_s24   ;;  %p645_p0 = scmp.ge.s32.totalorder %s742_s24, 1  ;;  %s742_s24 = sphi %s787_s24, %s17_s24  }
   0x2   : > { %p247_p1 = scmp.lt.s32.totalorder %s742_s24, 3 }
   0x4   : > { %p248_p2 = pnand %p645_p0, %p247_p1 }
   0x5   : > { %p284_p3 = scmp.lt.s32.totalorder (!%p248_p2), %s641_s25, 1  ;;  %s745_s23 = smov (!%p248_p2), 1  }
   0x6   : > { %251 = sbr.rel (%p248_p2) target bundleno = 722 (0x2d2), region = 48 }
   0xb   : > { %s882_s25 = smov (!%p284_p3, %s641_s25), 1  ;;  %v702_v1 = vld [vmem:[%s874_s1 + $0x4] sm:$0xf]  ;;  %v655_v2 = vld [vmem:[%s874_s1 + $0x8] sm:$0xf0]  ;;  %v744_v5 = vmov 0  }
   0xc   : > { %s713_s26 = smul.u32 72, %s882_s25  ;;  %725 = vset.pattern.permute.xlu0 %v744_v5  ;;  %v658_v6 = vor.u32 %v702_v1, %v655_v2  ;;  %v321_v7 = vld [vmem:[%s875_s2 + $0x8] sm:$0xff]  ;;  %726 = vset.pattern.permute.xlu2 %v744_v5  ;;  %vm395_vm0 = vcmask 130048   ;;  %v320_v9 = vld [vmem:[%s875_s2] sm:$0xff]  ;;  %vm427_vm1 = vcmask 31744   ;;  %vm442_vm2 = vcmask 7168  }
   0xd   : > { %727 = vset.pattern.permute.xlu1 %v744_v5  ;;  %329 = vperm.xlu0 %725, %v321_v7   ;;  %v653_v15 = vld [vmem:[%s874_s1] sm:$0xf]  ;;  %v703_v16 = vld [vmem:[%s874_s1 + $0x4] sm:$0xf0]  ;;  %v746_v47 = vmov 1   ;;  %s700_s11 = sshll.u32 %s882_s25, 4 }
   0xe   : > { %s288_s29 = scalar_lea.vmem %s873_s0, %s713_s26  ;;  %v654_v17 = vor.u32 %v703_v16, %v653_v15  ;;  %v445_v39 = vld [vmem:[%s876_s3] sm:$0xff]  ;;  %v446_v41 = vld [vmem:[%s876_s3 + $0x8] sm:$0xff]  ;;  %s293_s14 = scalar_lea.vmem %s879_s6, %s700_s11 }
   0xf   : > { %v711_v0 = vld [vmem:[%s288_s29 + $0x38] sm:$0xff]  ;;  %v710_v3 = vld [vmem:[%s288_s29 + $0x30] sm:$0xff]  ;;  %v712_v4 = vld [vmem:[%s288_s29 + $0x40] sm:$0xff]  ;;  %s298_s25 = scalar_lea.vmem %s880_s7, %s700_s11 }
  0x10   : > { %399 = vmatpush.bf16.msra.mxu0 %v711_v0  ;;  %420 = vmatpush.bf16.msra.mxu1 %v712_v4  ;;  %v709_v8 = vld [vmem:[%s288_s29 + $0x28] sm:$0xff]  ;;  %v708_v10 = vld [vmem:[%s288_s29 + $0x20] sm:$0xff]  ;;  %v707_v11 = vld [vmem:[%s288_s29 + $0x18] sm:$0xff] }
  0x11   : > { %v706_v12 = vld [vmem:[%s288_s29 + $0x10] sm:$0xff]  ;;  %v705_v13 = vld [vmem:[%s288_s29 + $0x8] sm:$0xff]  ;;  %v704_v14 = vld [vmem:[%s288_s29] sm:$0xff] }
  0x12   : > { %v536_v46 = vld [vmem:[%s877_s4] sm:$0xff]  ;;  %v551_v48 = vld [vmem:[%s878_s5 + $0x8] sm:$0xff] }
  0x13   : > { %695 = vmatmul.msk.bf16.vlgmr.msra.gmra.mxu1 %vm395_vm0, %v658_v6  ;;  %v537_v7 = vld [vmem:[%s877_s4 + $0x8] sm:$0xff] }
  0x14   : > { %400 = vmatpush.bf16.msra.mxu0 %v710_v3 }
  0x15   : > { %324 = vperm.xlu0 %725, %v320_v9   ;;  %v550_v9 = vld [vmem:[%s878_s5] sm:$0xff] }
  0x18   : > { %401 = vmatpush.bf16.msra.mxu0 %v709_v8 }
  0x1c   : > { %402 = vmatpush.bf16.msra.mxu0 %v708_v10 }
  0x20   : > { %403 = vmatpush.bf16.msra.mxu0 %v707_v11 }
  0x24   : > { %404 = vmatpush.bf16.msra.mxu0 %v706_v12 }
  0x28   : > { %405 = vmatpush.bf16.msra.mxu0 %v705_v13 }
  0x2c   : > { %406 = vmatpush.bf16.msra.mxu0 %v704_v14 }
  0x2f   : > { %407 = vmatmul.bf16.vlgmr.msra.gmra.mxu0 %v654_v17 }
  0x7f   : > { %v330_v18 = vpop.permute.xlu0 %329 }
  0x87   : > { %v325_v19 = vpop.permute.xlu0 %324 }
  0x90   : > { %v422_v20 = vpop.f32.mrf.mxu1 }
  0x98   : > { %v424_v28 = vpop.f32.mrf.mxu1 }
  0xac   : > { %v408_v21 = vpop.f32.mrf.mxu0 }
  0xad   : > { %v409_v22 = vadd.f32 %v408_v21, %v325_v19 }
  0xaf   : > { %v823_v23 = vadd.f32 %v422_v20, %v409_v22 }
  0xb1   : > { %v428_v24 = vsel %vm427_vm1, %v823_v23, 0.0  ;;  %v434_v27 = vmul.f32 %v823_v23, %v823_v23 }
  0xb2   : > { %429 = vadd.xlane.f32.xlu2 %v428_v24 }
  0xb3   : > { %v436_v31 = vsel %vm427_vm1, %v434_v27, 0.0 }
  0xb4   : > { %v410_v25 = vpop.f32.mrf.mxu0 }
  0xb5   : > { %v411_v26 = vadd.f32 %v410_v25, %v330_v18 }
  0xb7   : > { %v829_v29 = vadd.f32 %v424_v28, %v411_v26 }
  0xb9   : > { %v431_v30 = vsel %vm427_vm1, %v829_v29, 0.0  ;;  %v435_v32 = vmul.f32 %v829_v29, %v829_v29 }
  0xba   : > { %432 = vadd.xlane.f32.xlu1 %v431_v30  ;;  %437 = vadd.xlane.f32.xlu2 %v436_v31  ;;  %v567_v30 = vld [vmem:[%s293_s14 + $0x8] sm:$0xff] }
  0xbb   : > { %v439_v33 = vsel %vm427_vm1, %v435_v32, 0.0 }
  0xc2   : > { %440 = vadd.xlane.f32.xlu1 %v439_v33 }
 0x125   : > { %v430_v34 = vpop.xlane.xlu2 %429 }
 0x12d   : > { %v433_v35 = vpop.xlane.xlu1 %432  ;;  %v438_v36 = vpop.xlane.xlu2 %437 }
 0x12e   : > { %v443_v40 = vsel %vm442_vm2, %v430_v34, %v438_v36 }
 0x135   : > { %v441_v37 = vpop.xlane.xlu1 %440 }
 0x136   : > { %v444_v38 = vsel %vm442_vm2, %v433_v35, %v441_v37 }
 0x137   : > { %467 = vmatpush.msra.mxu2 %v444_v38 }
 0x139   : > { %468 = vmatpush.msra.mxu2 %v443_v40 }
 0x13a   : > { %696 = vmatmul.msk.f32.vlgmr.msra.gmra.mxu2 %vm395_vm0, %v445_v39 }
 0x142   : > { %697 = vmatmul.msk.f32.gmra.mxu2 %vm395_vm0, %v446_v41 }
 0x1bd   : > { %v470_v42 = vpop.f32.mrf.mxu2 }
 0x1be   : > { %v476_v43 = vmul.f32 %v470_v42, %v470_v42  ;;  %492 = vperm.xlu2 %726, %v470_v42  }
 0x1c0   : > { %480 = vrot.lane.b32.xlu0 %v476_v43, %s745_s23 }
 0x1c5   : > { %v473_v44 = vpop.f32.mrf.mxu2 }
 0x1c6   : > { %v477_v45 = vmul.f32 %v473_v44, %v473_v44  ;;  %729 = vset.pattern.permute.xlu2 %v746_v47 }
 0x1c8   : > { %497 = vperm.xlu0 %725, %v473_v44   ;;  %482 = vrot.lane.b32.xlu1 %v477_v45, %s745_s23 }
 0x1d0   : > { %540 = vperm.xlu1 %727, %v536_v46   ;;  %728 = vset.pattern.permute.xlu0 %v746_v47 }
 0x1d8   : > { %559 = vperm.xlu1 %727, %v551_v48  }
 0x218   : > { %v493_v10 = vpop.permute.xlu2 %492 }
 0x219   : > { %v500_v13 = vsub.f32 %v823_v23, %v493_v10 }
 0x232   : > { %v481_v49 = vpop.permute.xlu0 %480 }
 0x233   : > { %v486_v50 = vsub.f32 %v470_v42, %v481_v49 }
 0x235   : > { %v488_v51 = vmax.f32 %v486_v50, 0.0 }
 0x237   : > { %v502_v52 = vadd.f32 1e-05, %v488_v51 }
 0x239   : > { %732 = vrsqrt.f32 %v502_v52  ;;  %vm510_vm4 = vweird.f32 %v502_v52 }
 0x23a   : > { %v483_v53 = vpop.permute.xlu1 %482  ;;  %v498_v11 = vpop.permute.xlu0 %497 }
 0x23b   : > { %v487_v54 = vsub.f32 %v473_v44, %v483_v53  ;;  %v501_v20 = vsub.f32 %v829_v29, %v498_v11 }
 0x23d   : > { %v489_v55 = vmax.f32 %v487_v54, 0.0 }
 0x23f   : > { %v733_v56 = vpop.eup %732  ;;  %v503_v57 = vadd.f32 1e-05, %v489_v55 }
 0x240   : > { %v505_v58 = vmul.f32 %v733_v56, %v502_v52  ;;  %vm511_vm3 = vweird.f32 %v733_v56 }
 0x241   : > { %734 = vrsqrt.f32 %v503_v57  ;;  %vm512_vm5 = vmor %vm510_vm4, %vm511_vm3  ;;  %vm520_vm7 = vweird.f32 %v503_v57 }
 0x242   : > { %v506_v59 = vmul.f32 %v733_v56, %v505_v58  ;;  %v541_v15 = vpop.permute.xlu1 %540 }
 0x244   : > { %v507_v60 = vmul.f32 0.5, %v506_v59 }
 0x246   : > { %v508_v61 = vsub.f32 1.5, %v507_v60 }
 0x247   : > { %v735_v62 = vpop.eup %734 }
 0x248   : > { %v515_v63 = vmul.f32 %v735_v62, %v503_v57  ;;  %v509_v0 = vmul.f32 %v733_v56, %v508_v61  ;;  %vm521_vm6 = vweird.f32 %v735_v62 }
 0x249   : > { %vm522_vm8 = vmor %vm520_vm7, %vm521_vm6 }
 0x24a   : > { %v516_v1 = vmul.f32 %v735_v62, %v515_v63  ;;  %v513_v2 = vsel %vm512_vm5, %v733_v56, %v509_v0  ;;  %v560_v26 = vpop.permute.xlu1 %559 }
 0x24b   : > { %526 = vperm.xlu0 %728, %v513_v2  }
 0x24c   : > { %v517_v3 = vmul.f32 0.5, %v516_v1 }
 0x24e   : > { %v518_v4 = vsub.f32 1.5, %v517_v3 }
 0x250   : > { %v519_v6 = vmul.f32 %v735_v62, %v518_v4 }
 0x252   : > { %v523_v8 = vsel %vm522_vm8, %v735_v62, %v519_v6 }
 0x253   : > { %730 = vset.pattern.permute.xlu0 %v744_v5  ;;  %531 = vperm.xlu2 %729, %v523_v8  }
 0x254   : > { %545 = vperm.xlu0 %730, %v537_v7  }
 0x25b   : > { %731 = vset.pattern.permute.xlu2 %v744_v5  ;;  %v566_v5 = vld [vmem:[%s293_s14] sm:$0xff] }
 0x25c   : > { %554 = vperm.xlu2 %731, %v550_v9  }
 0x2ad   : > { %v532_v12 = vpop.permute.xlu2 %531 }
 0x2ae   : > { %v535_v22 = vmul.f32 %v532_v12, %v501_v20 }
 0x2b6   : > { %v555_v17 = vpop.permute.xlu2 %554 }
 0x2bd   : > { %v527_v14 = vpop.permute.xlu0 %526 }
 0x2be   : > { %v534_v16 = vmul.f32 %v527_v14, %v500_v13 }
 0x2c0   : > { %v548_v18 = vmul.f32 %v541_v15, %v534_v16 }
 0x2c2   : > { %v562_v19 = vadd.f32 %v555_v17, %v548_v18 }
 0x2c4   : > { %v564_v21 = vmax.f32 %v562_v19, 0.0 }
 0x2c6   : > { %v568_v24 = vadd.f32 %v566_v5, %v564_v21  ;;  %v546_v25 = vpop.permute.xlu0 %545 }
 0x2c7   : > { %v549_v23 = vmul.f32 %v546_v25, %v535_v22 }
 0x2c8   : > { %v570_v27 = vmax.f32 %v568_v24, 0.0 }
 0x2c9   : > { %v563_v28 = vadd.f32 %v560_v26, %v549_v23 }
 0x2ca   : > { %572 = vst.msk [vmem:[%s298_s25] sm:$0xff] %vm427_vm1, %v570_v27 }
 0x2cb   : > { %v565_v31 = vmax.f32 %v563_v28, 0.0 }
 0x2cd   : > { %v569_v32 = vadd.f32 %v567_v30, %v565_v31 }
 0x2cf   : > { %v571_v33 = vmax.f32 %v569_v32, 0.0 }
 0x2d1   : > { %573 = vst.msk [vmem:[%s298_s25 + $0x8] sm:$0xff] %vm427_vm1, %v571_v33 }
 0x2d2 PF: > { %s17_s24 = sadd.s32 1, %s742_s24  }
 0x2d3   : > { %p14_p4 = scmp.ge.s32.totalorder %s17_s24, 4  }
 0x2d5   :  { %16 = sbr.rel (!%p14_p4) target bundleno = 1 (0x1), region = 81 }

// kernel: _lambda_.56
= control target key start
LH: loop header
LB: loop body
LE: loop exit
PB: predicated region body
PF: predicated region fallthrough
CT: control target
= control target key end

     0   :  { %s374_s12 = smov 0   ;;  %s415_s0 = inlined_call_operand.vmem [shape: bf16[2,16,16], index: 0, kind: input, shape index: {}]   ;;  %s416_s1 = inlined_call_operand.vmem [shape: bf16[32,16], index: 1, kind: input, shape index: {}]   ;;  %s417_s2 = inlined_call_operand.vmem [shape: f32[32,1], index: 2, kind: input, shape index: {}]   ;;  %s418_s3 = inlined_call_operand.vmem [shape: f32[2,32,16], index: 3, kind: output, shape index: {}]  }
   0x1 LB: > { %s303_s13 = sadd.s32 4294967295, %s351_s12   ;;  %p307_p0 = scmp.ge.s32.totalorder %s351_s12, 1  ;;  %s351_s12 = sphi %s374_s12, %s13_s12  }
   0x2   : > { %p137_p1 = scmp.lt.s32.totalorder %s351_s12, 3 }
   0x4   : > { %p138_p2 = pnand %p307_p0, %p137_p1 }
   0x5   : > { %p161_p3 = scmp.lt.s32.totalorder (!%p138_p2), %s303_s13, 1 }
   0x6   : > { %141 = sbr.rel (%p138_p2) target bundleno = 156 (0x9c), region = 32 }
   0xb   : > { %v180_v0 = vld [vmem:[%s417_s2 + $0x10] sm:$0xff]  ;;  %v353_v1 = vmov 0   ;;  %v178_v2 = vld [vmem:[%s417_s2] sm:$0xff]  ;;  %s420_s13 = smov (!%p161_p3, %s303_s13), 1  ;;  %v331_v5 = vld [vmem:[%s416_s1 + $0x8] sm:$0xff]  ;;  %vm218_vm0 = vcmask 130048  }
   0xc   : > { %344 = vset.pattern.permute.xlu1 %v353_v1  ;;  %343 = vset.pattern.permute.xlu0 %v353_v1  ;;  %s328_s18 = sshll.u32 %s420_s13, 3  ;;  %v330_v4 = vld [vmem:[%s416_s1] sm:$0xff]  ;;  %v181_v6 = vld [vmem:[%s417_s2 + $0x18] sm:$0xff]  ;;  %v179_v7 = vld [vmem:[%s417_s2 + $0x8] sm:$0xff]  ;;  %s329_s30 = sshll.u32 %s420_s13, 5 }
   0xd   : > { %194 = vperm.xlu1 %344, %v180_v0   ;;  %184 = vperm.xlu0 %343, %v178_v2   ;;  %s165_s21 = scalar_lea.vmem %s415_s0, %s328_s18  ;;  %s170_s6 = scalar_lea.vmem %s418_s3, %s329_s30 }
   0xe   : > { %v332_v3 = vld [vmem:[%s165_s21] sm:$0xff] }
   0xf   : > { %232 = vmatpush.bf16.msra.mxu0 %v332_v3  ;;  %333 = vmatpush.bf16.msra.mxu1 %v332_v3 }
  0x12   : > { %324 = vmatmul.msk.bf16.vlgmr.msra.gmra.mxu0 %vm218_vm0, %v330_v4  ;;  %325 = vmatmul.msk.bf16.vlgmr.msra.gmra.mxu1 %vm218_vm0, %v331_v5 }
  0x15   : > { %199 = vperm.xlu1 %344, %v181_v6   ;;  %189 = vperm.xlu0 %343, %v179_v7  }
  0x7f   : > { %v195_v8 = vpop.permute.xlu1 %194  ;;  %v185_v9 = vpop.permute.xlu0 %184 }
  0x87   : > { %v200_v14 = vpop.permute.xlu1 %199  ;;  %v190_v15 = vpop.permute.xlu0 %189 }
  0x8f   : > { %v234_v10 = vpop.f32.mrf.mxu0  ;;  %v239_v11 = vpop.f32.mrf.mxu1 }
  0x90   : > { %v235_v12 = vadd.f32 %v234_v10, %v185_v9  ;;  %v240_v13 = vadd.f32 %v239_v11, %v195_v8 }
  0x92   : > { %244 = vst.msk [vmem:[%s170_s6] sm:$0xff] %vm218_vm0, %v235_v12 }
  0x93   : > { %246 = vst.msk [vmem:[%s170_s6 + $0x10] sm:$0xff] %vm218_vm0, %v240_v13 }
  0x97   : > { %v236_v16 = vpop.f32.mrf.mxu0  ;;  %v241_v17 = vpop.f32.mrf.mxu1 }
  0x98   : > { %v237_v18 = vadd.f32 %v236_v16, %v190_v15  ;;  %v242_v19 = vadd.f32 %v241_v17, %v200_v14 }
  0x9a   : > { %245 = vst.msk [vmem:[%s170_s6 + $0x8] sm:$0xff] %vm218_vm0, %v237_v18 }
  0x9b   : > { %247 = vst.msk [vmem:[%s170_s6 + $0x18] sm:$0xff] %vm218_vm0, %v242_v19 }
  0x9c PF: > { %s13_s12 = sadd.s32 1, %s351_s12  }
  0x9d   : > { %p10_p4 = scmp.ge.s32.totalorder %s13_s12, 4  }
  0x9f   :  { %12 = sbr.rel (!%p10_p4) target bundleno = 1 (0x1), region = 62 }

// kernel: _lambda_.52
= control target key start
LH: loop header
LB: loop body
LE: loop exit
PB: predicated region body
PF: predicated region fallthrough
CT: control target
= control target key end

     0   :  { %s998_s21 = smov 0   ;;  %s1121_s0 = inlined_call_operand.vmem [shape: bf16[2,432,16], index: 0, kind: input, shape index: {}]   ;;  %s1122_s1 = inlined_call_operand.vmem [shape: bf16[16,432], index: 1, kind: input, shape index: {}]   ;;  %s1123_s2 = inlined_call_operand.vmem [shape: f32[16,1], index: 2, kind: input, shape index: {}, may-alias: {2,5}]   ;;  %s1124_s3 = inlined_call_operand.vmem [shape: f32[16,16], index: 3, kind: input, shape index: {}]   ;;  %s1125_s4 = inlined_call_operand.vmem [shape: f32[16,1], index: 4, kind: input, shape index: {}]   ;;  %s1126_s5 = inlined_call_operand.vmem [shape: f32[16,1], index: 5, kind: input, shape index: {}, may-alias: {2,5}]   ;;  %s1127_s6 = inlined_call_operand.vmem [shape: f32[2,16,16], index: 6, kind: output, shape index: {}]  }
   0x1 LB: > { %s760_s22 = sadd.s32 4294967295, %s958_s21   ;;  %p764_p0 = scmp.ge.s32.totalorder %s958_s21, 1  ;;  %s958_s21 = sphi %s998_s21, %s16_s21  }
   0x2   : > { %p212_p1 = scmp.lt.s32.totalorder %s958_s21, 3 }
   0x4   : > { %p213_p2 = pnand %p764_p0, %p212_p1 }
   0x5   : > { %p242_p3 = scmp.lt.s32.totalorder (!%p213_p2), %s760_s22, 1  ;;  %s961_s29 = smov (!%p213_p2), 1  }
   0x6   : > { %216 = sbr.rel (%p213_p2) target bundleno = 726 (0x2d6), region = 44 }
   0xb   : > { %s1129_s22 = smov (!%p242_p3, %s760_s22), 1  ;;  %v960_v6 = vmov 0   ;;  %v312_v14 = vld [vmem:[%s1123_s2 + $0x8] sm:$0xff]  ;;  %v780_v18 = vld [vmem:[%s1122_s1 + $0x18] sm:$0xf0]  ;;  %vm504_vm0 = vcmask 392192  }
   0xc   : > { %s929_s23 = smul.u32 216, %s1129_s22  ;;  %941 = vset.pattern.permute.xlu0 %v960_v6  ;;  %942 = vset.pattern.permute.xlu2 %v960_v6  ;;  %v899_v17 = vld [vmem:[%s1122_s1 + $0xc] sm:$0xf]  ;;  %v311_v23 = vld [vmem:[%s1123_s2] sm:$0xff]  ;;  %v900_v31 = vld [vmem:[%s1122_s1 + $0xc] sm:$0xf0] }
   0xd   : > { %943 = vset.pattern.permute.xlu1 %v960_v6  ;;  %320 = vperm.xlu0 %941, %v312_v14   ;;  %v783_v22 = vor.u32 %v899_v17, %v780_v18  ;;  %v770_v30 = vld [vmem:[%s1122_s1] sm:$0xf]  ;;  %v898_v32 = vld [vmem:[%s1122_s1 + $0x4] sm:$0xf]  ;;  %v772_v35 = vld [vmem:[%s1122_s1 + $0x10] sm:$0xf0] }
   0xe   : > { %s1012_s26 = scalar_lea.vmem %s1121_s0, %s929_s23  ;;  %v778_v37 = vld [vmem:[%s1122_s1 + $0x8] sm:$0xf]  ;;  %v901_v38 = vld [vmem:[%s1122_s1 + $0x14] sm:$0xf0]  ;;  %v771_v39 = vor.u32 %v900_v31, %v770_v30  ;;  %v775_v40 = vor.u32 %v898_v32, %v772_v35  ;;  %vm564_vm1 = vcmask 130048   ;;  %vm579_vm2 = vcmask 7168  }
   0xf   : > { %v909_v0 = vld [vmem:[%s1012_s26 + $0x38] sm:$0xff]  ;;  %v908_v3 = vld [vmem:[%s1012_s26 + $0x30] sm:$0xff]  ;;  %v907_v8 = vld [vmem:[%s1012_s26 + $0x28] sm:$0xff]  ;;  %v779_v41 = vor.u32 %v901_v38, %v778_v37  ;;  %s897_s14 = sshll.u32 %s1129_s22, 4 }
  0x10   : > { %v917_v1 = vld [vmem:[%s1012_s26 + $0x78] sm:$0xff]  ;;  %508 = vmatpush.bf16.msra.mxu0 %v909_v0  ;;  %v916_v4 = vld [vmem:[%s1012_s26 + $0x70] sm:$0xff]  ;;  %v915_v9 = vld [vmem:[%s1012_s26 + $0x68] sm:$0xff]  ;;  %s251_s17 = scalar_lea.vmem %s1127_s6, %s897_s14 }
  0x11   : > { %v925_v2 = vld [vmem:[%s1012_s26 + $0xb8] sm:$0xff]  ;;  %522 = vmatpush.bf16.msra.mxu1 %v917_v1  ;;  %v924_v5 = vld [vmem:[%s1012_s26 + $0xb0] sm:$0xff]  ;;  %v923_v10 = vld [vmem:[%s1012_s26 + $0xa8] sm:$0xff] }
  0x12   : > { %536 = vmatpush.bf16.msra.mxu2 %v925_v2  ;;  %v928_v7 = vld [vmem:[%s1012_s26 + $0xd0] sm:$0xff]  ;;  %v927_v11 = vld [vmem:[%s1012_s26 + $0xc8] sm:$0xff]  ;;  %v906_v12 = vld [vmem:[%s1012_s26 + $0x20] sm:$0xff] }
  0x13   : > { %555 = vmatpush.bf16.msra.mxu3 %v928_v7  ;;  %v914_v13 = vld [vmem:[%s1012_s26 + $0x60] sm:$0xff]  ;;  %v905_v19 = vld [vmem:[%s1012_s26 + $0x18] sm:$0xff]  ;;  %v904_v24 = vld [vmem:[%s1012_s26 + $0x10] sm:$0xff] }
  0x14   : > { %509 = vmatpush.bf16.msra.mxu0 %v908_v3  ;;  %v922_v15 = vld [vmem:[%s1012_s26 + $0xa0] sm:$0xff]  ;;  %v913_v20 = vld [vmem:[%s1012_s26 + $0x58] sm:$0xff]  ;;  %v912_v25 = vld [vmem:[%s1012_s26 + $0x50] sm:$0xff] }
  0x15   : > { %523 = vmatpush.bf16.msra.mxu1 %v916_v4  ;;  %v926_v16 = vld [vmem:[%s1012_s26 + $0xc0] sm:$0xff]  ;;  %v921_v21 = vld [vmem:[%s1012_s26 + $0x98] sm:$0xff]  ;;  %v920_v26 = vld [vmem:[%s1012_s26 + $0x90] sm:$0xff]  ;;  %315 = vperm.xlu0 %941, %v311_v23  }
  0x16   : > { %537 = vmatpush.bf16.msra.mxu2 %v924_v5  ;;  %v903_v27 = vld [vmem:[%s1012_s26 + $0x8] sm:$0xff]  ;;  %v902_v33 = vld [vmem:[%s1012_s26] sm:$0xff] }
  0x17   : > { %556 = vmatpush.bf16.msra.mxu3 %v927_v11  ;;  %v911_v28 = vld [vmem:[%s1012_s26 + $0x48] sm:$0xff]  ;;  %v910_v34 = vld [vmem:[%s1012_s26 + $0x40] sm:$0xff] }
  0x18   : > { %510 = vmatpush.bf16.msra.mxu0 %v907_v8  ;;  %v919_v29 = vld [vmem:[%s1012_s26 + $0x88] sm:$0xff]  ;;  %v918_v36 = vld [vmem:[%s1012_s26 + $0x80] sm:$0xff] }
  0x19   : > { %524 = vmatpush.bf16.msra.mxu1 %v915_v9  ;;  %v582_v8 = vld [vmem:[%s1124_s3] sm:$0xff]  ;;  %v688_v17 = vld [vmem:[%s1126_s5 + $0x8] sm:$0xff] }
  0x1a   : > { %538 = vmatpush.bf16.msra.mxu2 %v923_v10  ;;  %v583_v10 = vld [vmem:[%s1124_s3 + $0x8] sm:$0xff] }
  0x1b   : > { %557 = vmatpush.bf16.msra.mxu3 %v926_v16  ;;  %v962_v16 = vmov 1  }
  0x1c   : > { %511 = vmatpush.bf16.msra.mxu0 %v906_v12 }
  0x1d   : > { %525 = vmatpush.bf16.msra.mxu1 %v914_v13 }
  0x1e   : > { %539 = vmatpush.bf16.msra.mxu2 %v922_v15  ;;  %892 = vmatmul.msk.bf16.vlgmr.msra.gmra.mxu3 %vm504_vm0, %v783_v22  ;;  %v673_v15 = vld [vmem:[%s1125_s4] sm:$0xff] }
  0x20   : > { %512 = vmatpush.bf16.msra.mxu0 %v905_v19 }
  0x21   : > { %526 = vmatpush.bf16.msra.mxu1 %v913_v20 }
  0x22   : > { %540 = vmatpush.bf16.msra.mxu2 %v921_v21 }
  0x24   : > { %513 = vmatpush.bf16.msra.mxu0 %v904_v24 }
  0x25   : > { %527 = vmatpush.bf16.msra.mxu1 %v912_v25 }
  0x26   : > { %541 = vmatpush.bf16.msra.mxu2 %v920_v26 }
  0x28   : > { %514 = vmatpush.bf16.msra.mxu0 %v903_v27 }
  0x29   : > { %528 = vmatpush.bf16.msra.mxu1 %v911_v28 }
  0x2a   : > { %542 = vmatpush.bf16.msra.mxu2 %v919_v29 }
  0x2c   : > { %515 = vmatpush.bf16.msra.mxu0 %v902_v33 }
  0x2d   : > { %529 = vmatpush.bf16.msra.mxu1 %v910_v34 }
  0x2e   : > { %543 = vmatpush.bf16.msra.mxu2 %v918_v36 }
  0x2f   : > { %516 = vmatmul.bf16.vlgmr.msra.gmra.mxu0 %v771_v39  ;;  %v674_v39 = vld [vmem:[%s1125_s4 + $0x8] sm:$0xff] }
  0x30   : > { %530 = vmatmul.bf16.vlgmr.msra.gmra.mxu1 %v775_v40 }
  0x31   : > { %544 = vmatmul.bf16.vlgmr.msra.gmra.mxu2 %v779_v41  ;;  %v687_v41 = vld [vmem:[%s1126_s5] sm:$0xff] }
  0x7f   : > { %v321_v42 = vpop.permute.xlu0 %320 }
  0x87   : > { %v316_v43 = vpop.permute.xlu0 %315 }
  0xa1   : > { %v559_v48 = vpop.f32.mrf.mxu3 }
  0xa9   : > { %v561_v60 = vpop.f32.mrf.mxu3 }
  0xac   : > { %v517_v44 = vpop.f32.mrf.mxu0 }
  0xad   : > { %v518_v45 = vadd.f32 %v517_v44, %v316_v43  ;;  %v531_v46 = vpop.f32.mrf.mxu1 }
  0xaf   : > { %v532_v47 = vadd.f32 %v531_v46, %v518_v45 }
  0xb4   : > { %v545_v49 = vpop.f32.mrf.mxu2  ;;  %v519_v51 = vpop.f32.mrf.mxu0 }
  0xb5   : > { %v546_v50 = vadd.f32 %v545_v49, %v532_v47  ;;  %v520_v53 = vadd.f32 %v519_v51, %v321_v42  ;;  %v533_v55 = vpop.f32.mrf.mxu1 }
  0xb7   : > { %v1074_v52 = vadd.f32 %v559_v48, %v546_v50  ;;  %v534_v56 = vadd.f32 %v533_v55, %v520_v53 }
  0xb9   : > { %v565_v54 = vsel %vm564_vm1, %v1074_v52, 0.0  ;;  %v571_v59 = vmul.f32 %v1074_v52, %v1074_v52 }
  0xba   : > { %566 = vadd.xlane.f32.xlu2 %v565_v54 }
  0xbb   : > { %v573_v63 = vsel %vm564_vm1, %v571_v59, 0.0 }
  0xbc   : > { %v547_v57 = vpop.f32.mrf.mxu2 }
  0xbd   : > { %v548_v58 = vadd.f32 %v547_v57, %v534_v56 }
  0xbf   : > { %v1080_v61 = vadd.f32 %v561_v60, %v548_v58 }
  0xc1   : > { %v568_v62 = vsel %vm564_vm1, %v1080_v61, 0.0  ;;  %v572_v0 = vmul.f32 %v1080_v61, %v1080_v61 }
  0xc2   : > { %569 = vadd.xlane.f32.xlu1 %v568_v62  ;;  %574 = vadd.xlane.f32.xlu2 %v573_v63 }
  0xc3   : > { %v576_v1 = vsel %vm564_vm1, %v572_v0, 0.0 }
  0xca   : > { %577 = vadd.xlane.f32.xlu1 %v576_v1 }
 0x12d   : > { %v567_v2 = vpop.xlane.xlu2 %566 }
 0x135   : > { %v570_v3 = vpop.xlane.xlu1 %569  ;;  %v575_v4 = vpop.xlane.xlu2 %574 }
 0x136   : > { %v580_v9 = vsel %vm579_vm2, %v567_v2, %v575_v4 }
 0x13d   : > { %v578_v5 = vpop.xlane.xlu1 %577 }
 0x13e   : > { %v581_v7 = vsel %vm579_vm2, %v570_v3, %v578_v5 }
 0x13f   : > { %604 = vmatpush.msrb.mxu3 %v581_v7 }
 0x141   : > { %605 = vmatpush.msrb.mxu3 %v580_v9 }
 0x142   : > { %893 = vmatmul.msk.f32.vlgmr.msrb.gmra.mxu3 %vm564_vm1, %v582_v8 }
 0x14a   : > { %894 = vmatmul.msk.f32.gmra.mxu3 %vm564_vm1, %v583_v10 }
 0x1c5   : > { %v607_v11 = vpop.f32.mrf.mxu3 }
 0x1c6   : > { %v613_v12 = vmul.f32 %v607_v11, %v607_v11  ;;  %629 = vperm.xlu2 %942, %v607_v11  }
 0x1c8   : > { %617 = vrot.lane.b32.xlu0 %v613_v12, %s961_s29 }
 0x1cd   : > { %v610_v13 = vpop.f32.mrf.mxu3 }
 0x1ce   : > { %v614_v14 = vmul.f32 %v610_v13, %v610_v13  ;;  %945 = vset.pattern.permute.xlu2 %v962_v16 }
 0x1d0   : > { %634 = vperm.xlu0 %941, %v610_v13   ;;  %619 = vrot.lane.b32.xlu1 %v614_v14, %s961_s29 }
 0x1d8   : > { %677 = vperm.xlu1 %943, %v673_v15   ;;  %944 = vset.pattern.permute.xlu0 %v962_v16 }
 0x1e0   : > { %696 = vperm.xlu1 %943, %v688_v17  }
 0x220   : > { %v630_v42 = vpop.permute.xlu2 %629 }
 0x221   : > { %v637_v45 = vsub.f32 %v1074_v52, %v630_v42 }
 0x23a   : > { %v618_v18 = vpop.permute.xlu0 %617 }
 0x23b   : > { %v623_v19 = vsub.f32 %v607_v11, %v618_v18 }
 0x23d   : > { %v625_v20 = vmax.f32 %v623_v19, 0.0 }
 0x23f   : > { %v639_v21 = vadd.f32 1e-05, %v625_v20 }
 0x241   : > { %948 = vrsqrt.f32 %v639_v21  ;;  %vm647_vm4 = vweird.f32 %v639_v21 }
 0x242   : > { %v620_v22 = vpop.permute.xlu1 %619  ;;  %v635_v43 = vpop.permute.xlu0 %634 }
 0x243   : > { %v624_v23 = vsub.f32 %v610_v13, %v620_v22  ;;  %v638_v53 = vsub.f32 %v1080_v61, %v635_v43 }
 0x245   : > { %v626_v24 = vmax.f32 %v624_v23, 0.0 }
 0x247   : > { %v949_v25 = vpop.eup %948  ;;  %v640_v26 = vadd.f32 1e-05, %v626_v24 }
 0x248   : > { %v642_v27 = vmul.f32 %v949_v25, %v639_v21  ;;  %vm648_vm3 = vweird.f32 %v949_v25 }
 0x249   : > { %950 = vrsqrt.f32 %v640_v26  ;;  %vm649_vm5 = vmor %vm647_vm4, %vm648_vm3  ;;  %vm657_vm7 = vweird.f32 %v640_v26 }
 0x24a   : > { %v643_v28 = vmul.f32 %v949_v25, %v642_v27  ;;  %v678_v48 = vpop.permute.xlu1 %677 }
 0x24c   : > { %v644_v29 = vmul.f32 0.5, %v643_v28 }
 0x24e   : > { %v645_v30 = vsub.f32 1.5, %v644_v29 }
 0x24f   : > { %v951_v31 = vpop.eup %950 }
 0x250   : > { %v652_v32 = vmul.f32 %v951_v31, %v640_v26  ;;  %v646_v33 = vmul.f32 %v949_v25, %v645_v30  ;;  %vm658_vm6 = vweird.f32 %v951_v31 }
 0x251   : > { %vm659_vm8 = vmor %vm657_vm7, %vm658_vm6 }
 0x252   : > { %v653_v34 = vmul.f32 %v951_v31, %v652_v32  ;;  %v650_v35 = vsel %vm649_vm5, %v949_v25, %v646_v33  ;;  %v697_v52 = vpop.permute.xlu1 %696 }
 0x253   : > { %663 = vperm.xlu0 %944, %v650_v35  }
 0x254   : > { %v654_v36 = vmul.f32 0.5, %v653_v34 }
 0x256   : > { %v655_v37 = vsub.f32 1.5, %v654_v36 }
 0x258   : > { %v656_v38 = vmul.f32 %v951_v31, %v655_v37 }
 0x25a   : > { %v660_v40 = vsel %vm659_vm8, %v951_v31, %v656_v38 }
 0x25b   : > { %946 = vset.pattern.permute.xlu0 %v960_v6  ;;  %668 = vperm.xlu2 %945, %v660_v40  }
 0x25c   : > { %682 = vperm.xlu0 %946, %v674_v39  }
 0x263   : > { %947 = vset.pattern.permute.xlu2 %v960_v6 }
 0x264   : > { %691 = vperm.xlu2 %947, %v687_v41  }
 0x2b5   : > { %v669_v44 = vpop.permute.xlu2 %668 }
 0x2b6   : > { %v672_v54 = vmul.f32 %v669_v44, %v638_v53 }
 0x2be   : > { %v692_v49 = vpop.permute.xlu2 %691 }
 0x2c5   : > { %v664_v46 = vpop.permute.xlu0 %663 }
 0x2c6   : > { %v671_v47 = vmul.f32 %v664_v46, %v637_v45 }
 0x2c8   : > { %v685_v50 = vmul.f32 %v678_v48, %v671_v47 }
 0x2ca   : > { %v699_v51 = vadd.f32 %v692_v49, %v685_v50 }
 0x2cc   : > { %v701_v6 = vmax.f32 %v699_v51, 0.0 }
 0x2ce   : > { %703 = vst.msk [vmem:[%s251_s17] sm:$0xff] %vm564_vm1, %v701_v6  ;;  %v683_v55 = vpop.permute.xlu0 %682 }
 0x2cf   : > { %v686_v56 = vmul.f32 %v683_v55, %v672_v54 }
 0x2d1   : > { %v700_v57 = vadd.f32 %v697_v52, %v686_v56 }
 0x2d3   : > { %v702_v58 = vmax.f32 %v700_v57, 0.0 }
 0x2d5   : > { %704 = vst.msk [vmem:[%s251_s17 + $0x8] sm:$0xff] %vm564_vm1, %v702_v58 }
 0x2d6 PF: > { %s16_s21 = sadd.s32 1, %s958_s21  }
 0x2d7   : > { %p13_p4 = scmp.ge.s32.totalorder %s16_s21, 4  }
 0x2d9   :  { %15 = sbr.rel (!%p13_p4) target bundleno = 1 (0x1), region = 74 }

// kernel: _lambda_.61
= control target key start
LH: loop header
LB: loop body
LE: loop exit
PB: predicated region body
PF: predicated region fallthrough
CT: control target
= control target key end

     0   :  { %s375_s12 = smov 0   ;;  %s410_s0 = inlined_call_operand.vmem [shape: bf16[2,16,64], index: 0, kind: input, shape index: {}]   ;;  %s411_s1 = inlined_call_operand.vmem [shape: bf16[32,16], index: 1, kind: input, shape index: {}]   ;;  %s412_s2 = inlined_call_operand.vmem [shape: f32[32,1], index: 2, kind: input, shape index: {}]   ;;  %s413_s3 = inlined_call_operand.vmem [shape: f32[2,32,64], index: 3, kind: output, shape index: {}]  }
   0x1 LB: > { %s304_s13 = sadd.s32 4294967295, %s352_s12   ;;  %p308_p0 = scmp.ge.s32.totalorder %s352_s12, 1  ;;  %s352_s12 = sphi %s375_s12, %s13_s12  }
   0x2   : > { %p137_p1 = scmp.lt.s32.totalorder %s352_s12, 3 }
   0x4   : > { %p138_p2 = pnand %p308_p0, %p137_p1 }
   0x5   : > { %p161_p3 = scmp.lt.s32.totalorder (!%p138_p2), %s304_s13, 1 }
   0x6   : > { %141 = sbr.rel (%p138_p2) target bundleno = 156 (0x9c), region = 32 }
   0xb   : > { %v180_v0 = vld [vmem:[%s412_s2 + $0x10] sm:$0xff]  ;;  %v354_v1 = vmov 0   ;;  %v178_v2 = vld [vmem:[%s412_s2] sm:$0xff]  ;;  %s415_s13 = smov (!%p161_p3, %s304_s13), 1  ;;  %v332_v5 = vld [vmem:[%s411_s1 + $0x8] sm:$0xff]  ;;  %vm218_vm0 = vcmask 130048  }
   0xc   : > { %345 = vset.pattern.permute.xlu1 %v354_v1  ;;  %344 = vset.pattern.permute.xlu0 %v354_v1  ;;  %s329_s18 = sshll.u32 %s415_s13, 3  ;;  %v331_v4 = vld [vmem:[%s411_s1] sm:$0xff]  ;;  %v181_v6 = vld [vmem:[%s412_s2 + $0x18] sm:$0xff]  ;;  %v179_v7 = vld [vmem:[%s412_s2 + $0x8] sm:$0xff]  ;;  %s330_s30 = sshll.u32 %s415_s13, 5  ;;  %vm244_vm1 = vcmask 523264  }
   0xd   : > { %194 = vperm.xlu1 %345, %v180_v0   ;;  %184 = vperm.xlu0 %344, %v178_v2   ;;  %s165_s21 = scalar_lea.vmem %s410_s0, %s329_s18  ;;  %s170_s6 = scalar_lea.vmem %s413_s3, %s330_s30 }
   0xe   : > { %v333_v3 = vld [vmem:[%s165_s21] sm:$0xff] }
   0xf   : > { %232 = vmatpush.bf16.msra.mxu0 %v333_v3  ;;  %334 = vmatpush.bf16.msra.mxu1 %v333_v3 }
  0x12   : > { %325 = vmatmul.msk.bf16.vlgmr.msra.gmra.mxu0 %vm218_vm0, %v331_v4  ;;  %326 = vmatmul.msk.bf16.vlgmr.msra.gmra.mxu1 %vm218_vm0, %v332_v5 }
  0x15   : > { %199 = vperm.xlu1 %345, %v181_v6   ;;  %189 = vperm.xlu0 %344, %v179_v7  }
  0x7f   : > { %v195_v8 = vpop.permute.xlu1 %194  ;;  %v185_v9 = vpop.permute.xlu0 %184 }
  0x87   : > { %v200_v14 = vpop.permute.xlu1 %199  ;;  %v190_v15 = vpop.permute.xlu0 %189 }
  0x8f   : > { %v234_v10 = vpop.f32.mrf.mxu0  ;;  %v239_v11 = vpop.f32.mrf.mxu1 }
  0x90   : > { %v235_v12 = vadd.f32 %v234_v10, %v185_v9  ;;  %v240_v13 = vadd.f32 %v239_v11, %v195_v8 }
  0x92   : > { %245 = vst.msk [vmem:[%s170_s6] sm:$0xff] %vm244_vm1, %v235_v12 }
  0x93   : > { %247 = vst.msk [vmem:[%s170_s6 + $0x10] sm:$0xff] %vm244_vm1, %v240_v13 }
  0x97   : > { %v236_v16 = vpop.f32.mrf.mxu0  ;;  %v241_v17 = vpop.f32.mrf.mxu1 }
  0x98   : > { %v237_v18 = vadd.f32 %v236_v16, %v190_v15  ;;  %v242_v19 = vadd.f32 %v241_v17, %v200_v14 }
  0x9a   : > { %246 = vst.msk [vmem:[%s170_s6 + $0x8] sm:$0xff] %vm244_vm1, %v237_v18 }
  0x9b   : > { %248 = vst.msk [vmem:[%s170_s6 + $0x18] sm:$0xff] %vm244_vm1, %v242_v19 }
  0x9c PF: > { %s13_s12 = sadd.s32 1, %s352_s12  }
  0x9d   : > { %p10_p4 = scmp.ge.s32.totalorder %s13_s12, 4  }
  0x9f   :  { %12 = sbr.rel (!%p10_p4) target bundleno = 1 (0x1), region = 62 }

// kernel: _lambda_.57
= control target key start
LH: loop header
LB: loop body
LE: loop exit
PB: predicated region body
PF: predicated region fallthrough
CT: control target
= control target key end

     0   :  { %s999_s21 = smov 0   ;;  %s1120_s0 = inlined_call_operand.vmem [shape: bf16[2,432,64], index: 0, kind: input, shape index: {}]   ;;  %s1121_s1 = inlined_call_operand.vmem [shape: bf16[16,432], index: 1, kind: input, shape index: {}]   ;;  %s1122_s2 = inlined_call_operand.vmem [shape: f32[16,1], index: 2, kind: input, shape index: {}, may-alias: {2,5}]   ;;  %s1123_s3 = inlined_call_operand.vmem [shape: f32[16,16], index: 3, kind: input, shape index: {}]   ;;  %s1124_s4 = inlined_call_operand.vmem [shape: f32[16,1], index: 4, kind: input, shape index: {}]   ;;  %s1125_s5 = inlined_call_operand.vmem [shape: f32[16,1], index: 5, kind: input, shape index: {}, may-alias: {2,5}]   ;;  %s1126_s6 = inlined_call_operand.vmem [shape: f32[2,16,64], index: 6, kind: output, shape index: {}]  }
   0x1 LB: > { %s761_s22 = sadd.s32 4294967295, %s959_s21   ;;  %p765_p0 = scmp.ge.s32.totalorder %s959_s21, 1  ;;  %s959_s21 = sphi %s999_s21, %s16_s21  }
   0x2   : > { %p212_p1 = scmp.lt.s32.totalorder %s959_s21, 3 }
   0x4   : > { %p213_p2 = pnand %p765_p0, %p212_p1 }
   0x5   : > { %p242_p3 = scmp.lt.s32.totalorder (!%p213_p2), %s761_s22, 1  ;;  %s962_s29 = smov (!%p213_p2), 1  }
   0x6   : > { %216 = sbr.rel (%p213_p2) target bundleno = 726 (0x2d6), region = 44 }
   0xb   : > { %s1128_s22 = smov (!%p242_p3, %s761_s22), 1  ;;  %v961_v6 = vmov 0   ;;  %v312_v14 = vld [vmem:[%s1122_s2 + $0x8] sm:$0xff]  ;;  %v781_v18 = vld [vmem:[%s1121_s1 + $0x18] sm:$0xf0]  ;;  %vm504_vm0 = vcmask 392192  }
   0xc   : > { %s930_s23 = smul.u32 216, %s1128_s22  ;;  %942 = vset.pattern.permute.xlu0 %v961_v6  ;;  %943 = vset.pattern.permute.xlu2 %v961_v6  ;;  %v900_v17 = vld [vmem:[%s1121_s1 + $0xc] sm:$0xf]  ;;  %v311_v23 = vld [vmem:[%s1122_s2] sm:$0xff]  ;;  %v901_v31 = vld [vmem:[%s1121_s1 + $0xc] sm:$0xf0] }
   0xd   : > { %944 = vset.pattern.permute.xlu1 %v961_v6  ;;  %320 = vperm.xlu0 %942, %v312_v14   ;;  %v784_v22 = vor.u32 %v900_v17, %v781_v18  ;;  %v771_v30 = vld [vmem:[%s1121_s1] sm:$0xf]  ;;  %v899_v32 = vld [vmem:[%s1121_s1 + $0x4] sm:$0xf]  ;;  %v773_v35 = vld [vmem:[%s1121_s1 + $0x10] sm:$0xf0] }
   0xe   : > { %s1013_s26 = scalar_lea.vmem %s1120_s0, %s930_s23  ;;  %v779_v37 = vld [vmem:[%s1121_s1 + $0x8] sm:$0xf]  ;;  %v902_v38 = vld [vmem:[%s1121_s1 + $0x14] sm:$0xf0]  ;;  %v772_v39 = vor.u32 %v901_v31, %v771_v30  ;;  %v776_v40 = vor.u32 %v899_v32, %v773_v35  ;;  %vm564_vm1 = vcmask 523264   ;;  %vm579_vm2 = vcmask 7168  }
   0xf   : > { %v910_v0 = vld [vmem:[%s1013_s26 + $0x38] sm:$0xff]  ;;  %v909_v3 = vld [vmem:[%s1013_s26 + $0x30] sm:$0xff]  ;;  %v908_v8 = vld [vmem:[%s1013_s26 + $0x28] sm:$0xff]  ;;  %v780_v41 = vor.u32 %v902_v38, %v779_v37  ;;  %vm584_vm3 = vcmask 130048   ;;  %s898_s14 = sshll.u32 %s1128_s22, 4 }
  0x10   : > { %v918_v1 = vld [vmem:[%s1013_s26 + $0x78] sm:$0xff]  ;;  %508 = vmatpush.bf16.msra.mxu0 %v910_v0  ;;  %v917_v4 = vld [vmem:[%s1013_s26 + $0x70] sm:$0xff]  ;;  %v916_v9 = vld [vmem:[%s1013_s26 + $0x68] sm:$0xff]  ;;  %s251_s17 = scalar_lea.vmem %s1126_s6, %s898_s14 }
  0x11   : > { %v926_v2 = vld [vmem:[%s1013_s26 + $0xb8] sm:$0xff]  ;;  %522 = vmatpush.bf16.msra.mxu1 %v918_v1  ;;  %v925_v5 = vld [vmem:[%s1013_s26 + $0xb0] sm:$0xff]  ;;  %v924_v10 = vld [vmem:[%s1013_s26 + $0xa8] sm:$0xff] }
  0x12   : > { %536 = vmatpush.bf16.msra.mxu2 %v926_v2  ;;  %v929_v7 = vld [vmem:[%s1013_s26 + $0xd0] sm:$0xff]  ;;  %v928_v11 = vld [vmem:[%s1013_s26 + $0xc8] sm:$0xff]  ;;  %v907_v12 = vld [vmem:[%s1013_s26 + $0x20] sm:$0xff] }
  0x13   : > { %555 = vmatpush.bf16.msra.mxu3 %v929_v7  ;;  %v915_v13 = vld [vmem:[%s1013_s26 + $0x60] sm:$0xff]  ;;  %v906_v19 = vld [vmem:[%s1013_s26 + $0x18] sm:$0xff]  ;;  %v905_v24 = vld [vmem:[%s1013_s26 + $0x10] sm:$0xff] }
  0x14   : > { %509 = vmatpush.bf16.msra.mxu0 %v909_v3  ;;  %v923_v15 = vld [vmem:[%s1013_s26 + $0xa0] sm:$0xff]  ;;  %v914_v20 = vld [vmem:[%s1013_s26 + $0x58] sm:$0xff]  ;;  %v913_v25 = vld [vmem:[%s1013_s26 + $0x50] sm:$0xff] }
  0x15   : > { %523 = vmatpush.bf16.msra.mxu1 %v917_v4  ;;  %v927_v16 = vld [vmem:[%s1013_s26 + $0xc0] sm:$0xff]  ;;  %v922_v21 = vld [vmem:[%s1013_s26 + $0x98] sm:$0xff]  ;;  %v921_v26 = vld [vmem:[%s1013_s26 + $0x90] sm:$0xff]  ;;  %315 = vperm.xlu0 %942, %v311_v23  }
  0x16   : > { %537 = vmatpush.bf16.msra.mxu2 %v925_v5  ;;  %v904_v27 = vld [vmem:[%s1013_s26 + $0x8] sm:$0xff]  ;;  %v903_v33 = vld [vmem:[%s1013_s26] sm:$0xff] }
  0x17   : > { %556 = vmatpush.bf16.msra.mxu3 %v928_v11  ;;  %v912_v28 = vld [vmem:[%s1013_s26 + $0x48] sm:$0xff]  ;;  %v911_v34 = vld [vmem:[%s1013_s26 + $0x40] sm:$0xff] }
  0x18   : > { %510 = vmatpush.bf16.msra.mxu0 %v908_v8  ;;  %v920_v29 = vld [vmem:[%s1013_s26 + $0x88] sm:$0xff]  ;;  %v919_v36 = vld [vmem:[%s1013_s26 + $0x80] sm:$0xff] }
  0x19   : > { %524 = vmatpush.bf16.msra.mxu1 %v916_v9  ;;  %v582_v8 = vld [vmem:[%s1123_s3] sm:$0xff]  ;;  %v689_v17 = vld [vmem:[%s1125_s5 + $0x8] sm:$0xff] }
  0x1a   : > { %538 = vmatpush.bf16.msra.mxu2 %v924_v10  ;;  %v583_v10 = vld [vmem:[%s1123_s3 + $0x8] sm:$0xff] }
  0x1b   : > { %557 = vmatpush.bf16.msra.mxu3 %v927_v16  ;;  %v963_v16 = vmov 1  }
  0x1c   : > { %511 = vmatpush.bf16.msra.mxu0 %v907_v12 }
  0x1d   : > { %525 = vmatpush.bf16.msra.mxu1 %v915_v13 }
  0x1e   : > { %539 = vmatpush.bf16.msra.mxu2 %v923_v15  ;;  %893 = vmatmul.msk.bf16.vlgmr.msra.gmra.mxu3 %vm504_vm0, %v784_v22  ;;  %v674_v15 = vld [vmem:[%s1124_s4] sm:$0xff] }
  0x20   : > { %512 = vmatpush.bf16.msra.mxu0 %v906_v19 }
  0x21   : > { %526 = vmatpush.bf16.msra.mxu1 %v914_v20 }
  0x22   : > { %540 = vmatpush.bf16.msra.mxu2 %v922_v21 }
  0x24   : > { %513 = vmatpush.bf16.msra.mxu0 %v905_v24 }
  0x25   : > { %527 = vmatpush.bf16.msra.mxu1 %v913_v25 }
  0x26   : > { %541 = vmatpush.bf16.msra.mxu2 %v921_v26 }
  0x28   : > { %514 = vmatpush.bf16.msra.mxu0 %v904_v27 }
  0x29   : > { %528 = vmatpush.bf16.msra.mxu1 %v912_v28 }
  0x2a   : > { %542 = vmatpush.bf16.msra.mxu2 %v920_v29 }
  0x2c   : > { %515 = vmatpush.bf16.msra.mxu0 %v903_v33 }
  0x2d   : > { %529 = vmatpush.bf16.msra.mxu1 %v911_v34 }
  0x2e   : > { %543 = vmatpush.bf16.msra.mxu2 %v919_v36 }
  0x2f   : > { %516 = vmatmul.bf16.vlgmr.msra.gmra.mxu0 %v772_v39  ;;  %v675_v39 = vld [vmem:[%s1124_s4 + $0x8] sm:$0xff] }
  0x30   : > { %530 = vmatmul.bf16.vlgmr.msra.gmra.mxu1 %v776_v40 }
  0x31   : > { %544 = vmatmul.bf16.vlgmr.msra.gmra.mxu2 %v780_v41  ;;  %v688_v41 = vld [vmem:[%s1125_s5] sm:$0xff] }
  0x7f   : > { %v321_v42 = vpop.permute.xlu0 %320 }
  0x87   : > { %v316_v43 = vpop.permute.xlu0 %315 }
  0xa1   : > { %v559_v48 = vpop.f32.mrf.mxu3 }
  0xa9   : > { %v561_v60 = vpop.f32.mrf.mxu3 }
  0xac   : > { %v517_v44 = vpop.f32.mrf.mxu0 }
  0xad   : > { %v518_v45 = vadd.f32 %v517_v44, %v316_v43  ;;  %v531_v46 = vpop.f32.mrf.mxu1 }
  0xaf   : > { %v532_v47 = vadd.f32 %v531_v46, %v518_v45 }
  0xb4   : > { %v545_v49 = vpop.f32.mrf.mxu2  ;;  %v519_v51 = vpop.f32.mrf.mxu0 }
  0xb5   : > { %v546_v50 = vadd.f32 %v545_v49, %v532_v47  ;;  %v520_v53 = vadd.f32 %v519_v51, %v321_v42  ;;  %v533_v55 = vpop.f32.mrf.mxu1 }
  0xb7   : > { %v1075_v52 = vadd.f32 %v559_v48, %v546_v50  ;;  %v534_v56 = vadd.f32 %v533_v55, %v520_v53 }
  0xb9   : > { %v565_v54 = vsel %vm564_vm1, %v1075_v52, 0.0  ;;  %v571_v59 = vmul.f32 %v1075_v52, %v1075_v52 }
  0xba   : > { %566 = vadd.xlane.f32.xlu2 %v565_v54 }
  0xbb   : > { %v573_v63 = vsel %vm564_vm1, %v571_v59, 0.0 }
  0xbc   : > { %v547_v57 = vpop.f32.mrf.mxu2 }
  0xbd   : > { %v548_v58 = vadd.f32 %v547_v57, %v534_v56 }
  0xbf   : > { %v1081_v61 = vadd.f32 %v561_v60, %v548_v58 }
  0xc1   : > { %v568_v62 = vsel %vm564_vm1, %v1081_v61, 0.0  ;;  %v572_v0 = vmul.f32 %v1081_v61, %v1081_v61 }
  0xc2   : > { %569 = vadd.xlane.f32.xlu1 %v568_v62  ;;  %574 = vadd.xlane.f32.xlu2 %v573_v63 }
  0xc3   : > { %v576_v1 = vsel %vm564_vm1, %v572_v0, 0.0 }
  0xca   : > { %577 = vadd.xlane.f32.xlu1 %v576_v1 }
 0x12d   : > { %v567_v2 = vpop.xlane.xlu2 %566 }
 0x135   : > { %v570_v3 = vpop.xlane.xlu1 %569  ;;  %v575_v4 = vpop.xlane.xlu2 %574 }
 0x136   : > { %v580_v9 = vsel %vm579_vm2, %v567_v2, %v575_v4 }
 0x13d   : > { %v578_v5 = vpop.xlane.xlu1 %577 }
 0x13e   : > { %v581_v7 = vsel %vm579_vm2, %v570_v3, %v578_v5 }
 0x13f   : > { %605 = vmatpush.msrb.mxu3 %v581_v7 }
 0x141   : > { %606 = vmatpush.msrb.mxu3 %v580_v9 }
 0x142   : > { %894 = vmatmul.msk.f32.vlgmr.msrb.gmra.mxu3 %vm584_vm3, %v582_v8 }
 0x14a   : > { %895 = vmatmul.msk.f32.gmra.mxu3 %vm584_vm3, %v583_v10 }
 0x1c5   : > { %v608_v11 = vpop.f32.mrf.mxu3 }
 0x1c6   : > { %v614_v12 = vmul.f32 %v608_v11, %v608_v11  ;;  %630 = vperm.xlu2 %943, %v608_v11  }
 0x1c8   : > { %618 = vrot.lane.b32.xlu0 %v614_v12, %s962_s29 }
 0x1cd   : > { %v611_v13 = vpop.f32.mrf.mxu3 }
 0x1ce   : > { %v615_v14 = vmul.f32 %v611_v13, %v611_v13  ;;  %946 = vset.pattern.permute.xlu2 %v963_v16 }
 0x1d0   : > { %635 = vperm.xlu0 %942, %v611_v13   ;;  %620 = vrot.lane.b32.xlu1 %v615_v14, %s962_s29 }
 0x1d8   : > { %678 = vperm.xlu1 %944, %v674_v15   ;;  %945 = vset.pattern.permute.xlu0 %v963_v16 }
 0x1e0   : > { %697 = vperm.xlu1 %944, %v689_v17  }
 0x220   : > { %v631_v42 = vpop.permute.xlu2 %630 }
 0x221   : > { %v638_v45 = vsub.f32 %v1075_v52, %v631_v42 }
 0x23a   : > { %v619_v18 = vpop.permute.xlu0 %618 }
 0x23b   : > { %v624_v19 = vsub.f32 %v608_v11, %v619_v18 }
 0x23d   : > { %v626_v20 = vmax.f32 %v624_v19, 0.0 }
 0x23f   : > { %v640_v21 = vadd.f32 1e-05, %v626_v20 }
 0x241   : > { %949 = vrsqrt.f32 %v640_v21  ;;  %vm648_vm5 = vweird.f32 %v640_v21 }
 0x242   : > { %v621_v22 = vpop.permute.xlu1 %620  ;;  %v636_v43 = vpop.permute.xlu0 %635 }
 0x243   : > { %v625_v23 = vsub.f32 %v611_v13, %v621_v22  ;;  %v639_v53 = vsub.f32 %v1081_v61, %v636_v43 }
 0x245   : > { %v627_v24 = vmax.f32 %v625_v23, 0.0 }
 0x247   : > { %v950_v25 = vpop.eup %949  ;;  %v641_v26 = vadd.f32 1e-05, %v627_v24 }
 0x248   : > { %v643_v27 = vmul.f32 %v950_v25, %v640_v21  ;;  %vm649_vm4 = vweird.f32 %v950_v25 }
 0x249   : > { %951 = vrsqrt.f32 %v641_v26  ;;  %vm650_vm6 = vmor %vm648_vm5, %vm649_vm4  ;;  %vm658_vm8 = vweird.f32 %v641_v26 }
 0x24a   : > { %v644_v28 = vmul.f32 %v950_v25, %v643_v27  ;;  %v679_v48 = vpop.permute.xlu1 %678 }
 0x24c   : > { %v645_v29 = vmul.f32 0.5, %v644_v28 }
 0x24e   : > { %v646_v30 = vsub.f32 1.5, %v645_v29 }
 0x24f   : > { %v952_v31 = vpop.eup %951 }
 0x250   : > { %v653_v32 = vmul.f32 %v952_v31, %v641_v26  ;;  %v647_v33 = vmul.f32 %v950_v25, %v646_v30  ;;  %vm659_vm7 = vweird.f32 %v952_v31 }
 0x251   : > { %vm660_vm9 = vmor %vm658_vm8, %vm659_vm7 }
 0x252   : > { %v654_v34 = vmul.f32 %v952_v31, %v653_v32  ;;  %v651_v35 = vsel %vm650_vm6, %v950_v25, %v647_v33  ;;  %v698_v52 = vpop.permute.xlu1 %697 }
 0x253   : > { %664 = vperm.xlu0 %945, %v651_v35  }
 0x254   : > { %v655_v36 = vmul.f32 0.5, %v654_v34 }
 0x256   : > { %v656_v37 = vsub.f32 1.5, %v655_v36 }
 0x258   : > { %v657_v38 = vmul.f32 %v952_v31, %v656_v37 }
 0x25a   : > { %v661_v40 = vsel %vm660_vm9, %v952_v31, %v657_v38 }
 0x25b   : > { %947 = vset.pattern.permute.xlu0 %v961_v6  ;;  %669 = vperm.xlu2 %946, %v661_v40  }
 0x25c   : > { %683 = vperm.xlu0 %947, %v675_v39  }
 0x263   : > { %948 = vset.pattern.permute.xlu2 %v961_v6 }
 0x264   : > { %692 = vperm.xlu2 %948, %v688_v41  }
 0x2b5   : > { %v670_v44 = vpop.permute.xlu2 %669 }
 0x2b6   : > { %v673_v54 = vmul.f32 %v670_v44, %v639_v53 }
 0x2be   : > { %v693_v49 = vpop.permute.xlu2 %692 }
 0x2c5   : > { %v665_v46 = vpop.permute.xlu0 %664 }
 0x2c6   : > { %v672_v47 = vmul.f32 %v665_v46, %v638_v45 }
 0x2c8   : > { %v686_v50 = vmul.f32 %v679_v48, %v672_v47 }
 0x2ca   : > { %v700_v51 = vadd.f32 %v693_v49, %v686_v50 }
 0x2cc   : > { %v702_v6 = vmax.f32 %v700_v51, 0.0 }
 0x2ce   : > { %704 = vst.msk [vmem:[%s251_s17] sm:$0xff] %vm564_vm1, %v702_v6  ;;  %v684_v55 = vpop.permute.xlu0 %683 }
 0x2cf   : > { %v687_v56 = vmul.f32 %v684_v55, %v673_v54 }
 0x2d1   : > { %v701_v57 = vadd.f32 %v698_v52, %v687_v56 }
 0x2d3   : > { %v703_v58 = vmax.f32 %v701_v57, 0.0 }
 0x2d5   : > { %705 = vst.msk [vmem:[%s251_s17 + $0x8] sm:$0xff] %vm564_vm1, %v703_v58 }
 0x2d6 PF: > { %s16_s21 = sadd.s32 1, %s959_s21  }
 0x2d7   : > { %p13_p4 = scmp.ge.s32.totalorder %s16_s21, 4  }
 0x2d9   :  { %15 = sbr.rel (!%p13_p4) target bundleno = 1 (0x1), region = 74 }

</bundles_post_ra>
